<compile_context>
chip_gen: v6e
topology: v6e:2x2x1
jax: 0.10.0
libtpu: 0.0.40
codegen_flags: <defaults>
</compile_context>

<pallas_src>
import jax
import jax.numpy as jnp
from jax.experimental import pallas as pl
from jax.experimental.pallas import tpu as pltpu


def _round_up(v, m):
    return (v + m - 1) // m * m


def _make_encoder_kernel(H, W, Cp, ley):
    HW = H * W

    def kernel(x_ref, w_ref, bias_ref, o_ref, halo_ref):
        # x_ref:    (1, H, W, Cp)     f32  channel-padded input (one batch elem)
        # w_ref:    (ley*9, Cp, Cp)   bf16 conv weights, BN scale folded in;
        #                              index = l*9 + kh*3 + kw, layout (cin, cout)
        # bias_ref: (ley, 1, Cp)      f32  folded bias (conv bias + BN shift)
        # o_ref:    (1, H, W, Cp)     f32
        # halo_ref: (H+2, W+2, Cp)    bf16 zero-border activation scratch

        zrow = jnp.zeros((W + 2, Cp), jnp.bfloat16)
        zcol = jnp.zeros((H, 1, Cp), jnp.bfloat16)

        # Zero ONLY the top/bottom border rows (every grid step: "parallel"
        # grid scratch is not guaranteed initialized per core otherwise).
        halo_ref[0, :, :] = zrow
        halo_ref[H + 1, :, :] = zrow

        # Block input -> bf16 halo interior.  Writing full-width rows
        # (zero | interior | zero) keeps the left/right border zero and uses
        # aligned, lane-dense stores instead of narrow column stores.
        xin = x_ref[0, :, :, :].astype(jnp.bfloat16)                 # (H, W, Cp)
        halo_ref[1:H + 1, :, :] = jnp.concatenate([zcol, xin, zcol], axis=1)

        for l in range(ley):                       # ley is static (2/3) -> unrolled
            # --- 3x3 conv as 9 accumulating MXU matmuls (no im2col) ---
            acc = None
            for kh in range(3):
                for kw in range(3):
                    tap = halo_ref[kh:kh + H, kw:kw + W, :].reshape(HW, Cp)
                    part = jnp.dot(tap, w_ref[l * 9 + kh * 3 + kw],
                                   preferred_element_type=jnp.float32)
                    acc = part if acc is None else acc + part

            # --- fused bias (conv bias + BN, scale folded into W) + ReLU ---
            y = jnp.maximum(acc + bias_ref[l], 0.0)                  # (HW, Cp) f32

            if l + 1 < ley:
                # Intermediate activation stays resident in VMEM (bf16).
                y3 = y.reshape(H, W, Cp).astype(jnp.bfloat16)
                halo_ref[1:H + 1, :, :] = jnp.concatenate([zcol, y3, zcol], axis=1)
            else:
                # Lane-dense (Cp = multiple of 128) output store.
                o_ref[0, :, :, :] = y.reshape(H, W, Cp).astype(o_ref.dtype)

    return kernel


def encoder_block_forward_nhwc(x_nhwc, params):
    """Fused [Conv3x3(pad1) -> BN(eval) -> ReLU] x ley.  x_nhwc: (N,H,W,Cin) f32."""
    eps = 1e-5
    ley = len(params)
    N, H, W, Cin = x_nhwc.shape
    chans = [Cin] + [p["w"].shape[-1] for p in params]
    Cp = _round_up(max(chans), 128)            # lane-dense channel tile

    # Channel-pad the block input once (layers are fused -> no per-layer pads).
    xp = jnp.pad(x_nhwc.astype(jnp.float32),
                 ((0, 0), (0, 0), (0, 0), (0, Cp - Cin)))

    w_list, b_list = [], []
    for p in params:
        cin_l, cout_l = p["w"].shape[2], p["w"].shape[3]
        inv_std = 1.0 / jnp.sqrt(p["var"] + eps)
        scale = p["gamma"] * inv_std                               # (Cout,)
        bias = (p["b"] - p["mean"]) * scale + p["beta"]            # conv bias folded
        # Fold BN scale into the weights in f32, then pad + cast to bf16.
        w_scaled = p["w"].astype(jnp.float32) * scale[None, None, None, :]
        w_pad = jnp.pad(w_scaled,
                        ((0, 0), (0, 0), (0, Cp - cin_l), (0, Cp - cout_l)))
        # (3,3,Cp,Cp) -> (9,Cp,Cp); index kh*3+kw matches the in-kernel taps.
        w_list.append(w_pad.reshape(9, Cp, Cp))
        b_list.append(jnp.pad(bias.astype(jnp.float32), (0, Cp - cout_l)))

    w_all = jnp.concatenate(w_list, axis=0).astype(jnp.bfloat16)   # (ley*9, Cp, Cp)
    bias_all = jnp.stack(b_list, axis=0).reshape(ley, 1, Cp)       # (ley, 1, Cp)

    kernel = _make_encoder_kernel(H, W, Cp, ley)
    out = pl.pallas_call(
        kernel,
        out_shape=jax.ShapeDtypeStruct((N, H, W, Cp), jnp.float32),
        grid_spec=pltpu.PrefetchScalarGridSpec(
            num_scalar_prefetch=0,
            grid=(N,),
            in_specs=[
                pl.BlockSpec((1, H, W, Cp), lambda n: (n, 0, 0, 0)),
                # Constant index maps -> weights/bias fetched once, stay resident.
                pl.BlockSpec((ley * 9, Cp, Cp), lambda n: (0, 0, 0)),
                pl.BlockSpec((ley, 1, Cp), lambda n: (0, 0, 0)),
            ],
            out_specs=pl.BlockSpec((1, H, W, Cp), lambda n: (n, 0, 0, 0)),
            scratch_shapes=[
                pltpu.VMEM((H + 2, W + 2, Cp), jnp.bfloat16),      # bf16 halo
            ],
        ),
        compiler_params=pltpu.CompilerParams(
            dimension_semantics=("parallel",),
        ),
    )(xp, w_all, bias_all)

    return out[:, :, :, :chans[-1]]


@jax.jit
def encoder_block_forward(x_nchw, params):
    """Forward pass.  Input/output NCHW (PyTorch convention)."""
    x = jnp.transpose(x_nchw, (0, 2, 3, 1)).astype(jnp.float32)   # NCHW -> NHWC
    y = encoder_block_forward_nhwc(x, params)
    return jnp.transpose(y, (0, 3, 1, 2))                          # NHWC -> NCHW


def init_encoder_block_params(key, in_ch, out_ch, ley):
    """Deterministic parameter init matching the module's shapes."""
    assert ley in (2, 3)
    params = []
    ch_in = in_ch
    for _ in range(ley):
        key, k_w, k_b, k_g, k_beta = jax.random.split(key, 5)
        w = jax.random.normal(k_w, (3, 3, ch_in, out_ch), jnp.float32) * 0.1  # HWIO
        b = jax.random.normal(k_b, (out_ch,), jnp.float32) * 0.1
        gamma = 1.0 + 0.1 * jax.random.normal(k_g, (out_ch,), jnp.float32)
        beta = 0.1 * jax.random.normal(k_beta, (out_ch,), jnp.float32)
        running_mean = jnp.zeros((out_ch,), jnp.float32)
        running_var = jnp.ones((out_ch,), jnp.float32)
        params.append(dict(w=w, b=b, gamma=gamma, beta=beta,
                           mean=running_mean, var=running_var))
        ch_in = out_ch
    return params


def _reference_forward(x_nchw, params):
    """Pure-JAX f32 reference (lax conv) for a sanity check."""
    eps = 1e-5
    x = jnp.transpose(x_nchw, (0, 2, 3, 1)).astype(jnp.float32)
    for p in params:
        y = jax.lax.conv_general_dilated(
            x, p["w"], window_strides=(1, 1), padding=((1, 1), (1, 1)),
            dimension_numbers=("NHWC", "HWIO", "NHWC"))
        y = y + p["b"]
        y = (y - p["mean"]) / jnp.sqrt(p["var"] + eps) * p["gamma"] + p["beta"]
        x = jnp.maximum(y, 0.0)
    return jnp.transpose(x, (0, 3, 1, 2))


if __name__ == "__main__":
    key = jax.random.PRNGKey(0)
    k_x, k_p = jax.random.split(key)

    # Small shapes consistent with the module: batch=2, in_ch=4, out_ch=8, 16x16, ley=2.
    N, in_ch, out_ch, H, W, ley = 2, 4, 8, 16, 16, 2
    x = jax.random.normal(k_x, (N, in_ch, H, W), jnp.float32)   # NCHW input
    params = init_encoder_block_params(k_p, in_ch, out_ch, ley)

    out = jax.block_until_ready(encoder_block_forward(x, params))
    ref = jax.block_until_ready(_reference_forward(x, params))

    assert out.shape == (N, out_ch, H, W)
    max_err = float(jnp.max(jnp.abs(out - ref)))
    # bf16 MXU operands / bf16 resident activations (f32 accumulation)
    # -> loosened tolerance vs the f32 reference.
    assert max_err < 5e-2, f"mismatch vs reference: {max_err}"

    print("KERNEL_OK")
</pallas_src>

<mosaic_0001>
module attributes {stable_mosaic.version = 11 : i64} {
  func.func @kernel(%arg0: i32, %arg1: memref<1x16x16x128xf32, #tpu.memory_space<vmem>>, %arg2: memref<18x128x128xbf16, #tpu.memory_space<vmem>>, %arg3: memref<2x1x128xf32, #tpu.memory_space<vmem>>, %arg4: memref<1x16x16x128xf32, #tpu.memory_space<vmem>>, %arg5: memref<18x18x128xbf16, #tpu.memory_space<vmem>>) attributes {dimension_semantics = [#tpu.dimension_semantics<parallel>], iteration_bounds = array<i64: 2>, scalar_prefetch = 0 : i64, scratch_operands = 1 : i64, tpu.core_type = #tpu.core_type<tc>, window_params = [{transform_indices = @transform_0, window_bounds = array<i64: 1, 16, 16, 128>}, {pipeline_mode = #tpu.pipeline_mode<synchronous>, transform_indices = @transform_1, window_bounds = array<i64: 18, 128, 128>}, {pipeline_mode = #tpu.pipeline_mode<synchronous>, transform_indices = @transform_2, window_bounds = array<i64: 2, 1, 128>}, {transform_indices = @transform_3, window_bounds = array<i64: 1, 16, 16, 128>}]} {
    %cst = arith.constant 0.000000e+00 : bf16
    %0 = vector.broadcast %cst : bf16 to vector<18x128xbf16>
    %cst_0 = arith.constant 0.000000e+00 : bf16
    %1 = vector.broadcast %cst_0 : bf16 to vector<16x1x128xbf16>
    %c0 = arith.constant 0 : index
    %c0_1 = arith.constant 0 : index
    %c0_2 = arith.constant 0 : index
    %2 = vector.load %arg5[%c0, %c0_1, %c0_2] : memref<18x18x128xbf16, #tpu.memory_space<vmem>>, vector<1x18x128xbf16>
    %3 = vector.shape_cast %2 : vector<1x18x128xbf16> to vector<18x128xbf16>
    %4 = vector.shape_cast %0 : vector<18x128xbf16> to vector<1x18x128xbf16>
    tpu.vector_store %arg5[%c0, %c0_1, %c0_2], %4 {strides = array<i32>} : memref<18x18x128xbf16, #tpu.memory_space<vmem>>, vector<1x18x128xbf16>,
    %c17 = arith.constant 17 : index
    %c0_3 = arith.constant 0 : index
    %c0_4 = arith.constant 0 : index
    %5 = vector.load %arg5[%c17, %c0_3, %c0_4] : memref<18x18x128xbf16, #tpu.memory_space<vmem>>, vector<1x18x128xbf16>
    %6 = vector.shape_cast %5 : vector<1x18x128xbf16> to vector<18x128xbf16>
    %7 = vector.shape_cast %0 : vector<18x128xbf16> to vector<1x18x128xbf16>
    tpu.vector_store %arg5[%c17, %c0_3, %c0_4], %7 {strides = array<i32>} : memref<18x18x128xbf16, #tpu.memory_space<vmem>>, vector<1x18x128xbf16>,
    %c0_5 = arith.constant 0 : index
    %c0_6 = arith.constant 0 : index
    %c0_7 = arith.constant 0 : index
    %c0_8 = arith.constant 0 : index
    %8 = vector.load %arg1[%c0_5, %c0_6, %c0_7, %c0_8] : memref<1x16x16x128xf32, #tpu.memory_space<vmem>>, vector<1x16x16x128xf32>
    %9 = vector.shape_cast %8 : vector<1x16x16x128xf32> to vector<16x16x128xf32>
    %10 = arith.truncf %9 : vector<16x16x128xf32> to vector<16x16x128xbf16>
    %11 = tpu.concatenate %1, %10, %1 in 1 : vector<16x1x128xbf16>, vector<16x16x128xbf16>, vector<16x1x128xbf16> -> vector<16x18x128xbf16>
    %c1 = arith.constant 1 : index
    %c0_9 = arith.constant 0 : index
    %c0_10 = arith.constant 0 : index
    %12 = vector.load %arg5[%c1, %c0_9, %c0_10] : memref<18x18x128xbf16, #tpu.memory_space<vmem>>, vector<16x18x128xbf16>
    tpu.vector_store %arg5[%c1, %c0_9, %c0_10], %11 {strides = array<i32>} : memref<18x18x128xbf16, #tpu.memory_space<vmem>>, vector<16x18x128xbf16>,
    %c0_11 = arith.constant 0 : index
    %c0_12 = arith.constant 0 : index
    %c0_13 = arith.constant 0 : index
    %13 = vector.load %arg5[%c0_11, %c0_12, %c0_13] : memref<18x18x128xbf16, #tpu.memory_space<vmem>>, vector<16x16x128xbf16>
    %14 = vector.shape_cast %13 : vector<16x16x128xbf16> to vector<256x128xbf16>
    %c0_14 = arith.constant 0 : index
    %c0_15 = arith.constant 0 : index
    %c0_16 = arith.constant 0 : index
    %15 = vector.load %arg2[%c0_14, %c0_15, %c0_16] : memref<18x128x128xbf16, #tpu.memory_space<vmem>>, vector<1x128x128xbf16>
    %16 = vector.shape_cast %15 : vector<1x128x128xbf16> to vector<128x128xbf16>
    %cst_17 = arith.constant dense<0.000000e+00> : vector<256x128xf32>
    %17 = tpu.matmul %14, %16, %cst_17 {dimension_numbers = #tpu.dot_dimension_numbers<[1], [0], [0], [1], [0, 0, 1, 1], [], []>} : vector<256x128xbf16>, vector<128x128xbf16>, vector<256x128xf32> -> vector<256x128xf32>
    %c0_18 = arith.constant 0 : index
    %c1_19 = arith.constant 1 : index
    %c0_20 = arith.constant 0 : index
    %18 = vector.load %arg5[%c0_18, %c1_19, %c0_20] : memref<18x18x128xbf16, #tpu.memory_space<vmem>>, vector<16x16x128xbf16>
    %19 = vector.shape_cast %18 : vector<16x16x128xbf16> to vector<256x128xbf16>
    %c1_21 = arith.constant 1 : index
    %c0_22 = arith.constant 0 : index
    %c0_23 = arith.constant 0 : index
    %20 = vector.load %arg2[%c1_21, %c0_22, %c0_23] : memref<18x128x128xbf16, #tpu.memory_space<vmem>>, vector<1x128x128xbf16>
    %21 = vector.shape_cast %20 : vector<1x128x128xbf16> to vector<128x128xbf16>
    %cst_24 = arith.constant dense<0.000000e+00> : vector<256x128xf32>
    %22 = tpu.matmul %19, %21, %cst_24 {dimension_numbers = #tpu.dot_dimension_numbers<[1], [0], [0], [1], [0, 0, 1, 1], [], []>} : vector<256x128xbf16>, vector<128x128xbf16>, vector<256x128xf32> -> vector<256x128xf32>
    %23 = arith.addf %17, %22 : vector<256x128xf32>
    %c0_25 = arith.constant 0 : index
    %c2 = arith.constant 2 : index
    %c0_26 = arith.constant 0 : index
    %24 = vector.load %arg5[%c0_25, %c2, %c0_26] : memref<18x18x128xbf16, #tpu.memory_space<vmem>>, vector<16x16x128xbf16>
    %25 = vector.shape_cast %24 : vector<16x16x128xbf16> to vector<256x128xbf16>
    %c2_27 = arith.constant 2 : index
    %c0_28 = arith.constant 0 : index
    %c0_29 = arith.constant 0 : index
    %26 = vector.load %arg2[%c2_27, %c0_28, %c0_29] : memref<18x128x128xbf16, #tpu.memory_space<vmem>>, vector<1x128x128xbf16>
    %27 = vector.shape_cast %26 : vector<1x128x128xbf16> to vector<128x128xbf16>
    %cst_30 = arith.constant dense<0.000000e+00> : vector<256x128xf32>
    %28 = tpu.matmul %25, %27, %cst_30 {dimension_numbers = #tpu.dot_dimension_numbers<[1], [0], [0], [1], [0, 0, 1, 1], [], []>} : vector<256x128xbf16>, vector<128x128xbf16>, vector<256x128xf32> -> vector<256x128xf32>
    %29 = arith.addf %23, %28 : vector<256x128xf32>
    %c1_31 = arith.constant 1 : index
    %c0_32 = arith.constant 0 : index
    %c0_33 = arith.constant 0 : index
    %30 = vector.load %arg5[%c1_31, %c0_32, %c0_33] : memref<18x18x128xbf16, #tpu.memory_space<vmem>>, vector<16x16x128xbf16>
    %31 = vector.shape_cast %30 : vector<16x16x128xbf16> to vector<256x128xbf16>
    %c3 = arith.constant 3 : index
    %c0_34 = arith.constant 0 : index
    %c0_35 = arith.constant 0 : index
    %32 = vector.load %arg2[%c3, %c0_34, %c0_35] : memref<18x128x128xbf16, #tpu.memory_space<vmem>>, vector<1x128x128xbf16>
    %33 = vector.shape_cast %32 : vector<1x128x128xbf16> to vector<128x128xbf16>
    %cst_36 = arith.constant dense<0.000000e+00> : vector<256x128xf32>
    %34 = tpu.matmul %31, %33, %cst_36 {dimension_numbers = #tpu.dot_dimension_numbers<[1], [0], [0], [1], [0, 0, 1, 1], [], []>} : vector<256x128xbf16>, vector<128x128xbf16>, vector<256x128xf32> -> vector<256x128xf32>
    %35 = arith.addf %29, %34 : vector<256x128xf32>
    %c1_37 = arith.constant 1 : index
    %c1_38 = arith.constant 1 : index
    %c0_39 = arith.constant 0 : index
    %36 = vector.load %arg5[%c1_37, %c1_38, %c0_39] : memref<18x18x128xbf16, #tpu.memory_space<vmem>>, vector<16x16x128xbf16>
    %37 = vector.shape_cast %36 : vector<16x16x128xbf16> to vector<256x128xbf16>
    %c4 = arith.constant 4 : index
    %c0_40 = arith.constant 0 : index
    %c0_41 = arith.constant 0 : index
    %38 = vector.load %arg2[%c4, %c0_40, %c0_41] : memref<18x128x128xbf16, #tpu.memory_space<vmem>>, vector<1x128x128xbf16>
    %39 = vector.shape_cast %38 : vector<1x128x128xbf16> to vector<128x128xbf16>
    %cst_42 = arith.constant dense<0.000000e+00> : vector<256x128xf32>
    %40 = tpu.matmul %37, %39, %cst_42 {dimension_numbers = #tpu.dot_dimension_numbers<[1], [0], [0], [1], [0, 0, 1, 1], [], []>} : vector<256x128xbf16>, vector<128x128xbf16>, vector<256x128xf32> -> vector<256x128xf32>
    %41 = arith.addf %35, %40 : vector<256x128xf32>
    %c1_43 = arith.constant 1 : index
    %c2_44 = arith.constant 2 : index
    %c0_45 = arith.constant 0 : index
    %42 = vector.load %arg5[%c1_43, %c2_44, %c0_45] : memref<18x18x128xbf16, #tpu.memory_space<vmem>>, vector<16x16x128xbf16>
    %43 = vector.shape_cast %42 : vector<16x16x128xbf16> to vector<256x128xbf16>
    %c5 = arith.constant 5 : index
    %c0_46 = arith.constant 0 : index
    %c0_47 = arith.constant 0 : index
    %44 = vector.load %arg2[%c5, %c0_46, %c0_47] : memref<18x128x128xbf16, #tpu.memory_space<vmem>>, vector<1x128x128xbf16>
    %45 = vector.shape_cast %44 : vector<1x128x128xbf16> to vector<128x128xbf16>
    %cst_48 = arith.constant dense<0.000000e+00> : vector<256x128xf32>
    %46 = tpu.matmul %43, %45, %cst_48 {dimension_numbers = #tpu.dot_dimension_numbers<[1], [0], [0], [1], [0, 0, 1, 1], [], []>} : vector<256x128xbf16>, vector<128x128xbf16>, vector<256x128xf32> -> vector<256x128xf32>
    %47 = arith.addf %41, %46 : vector<256x128xf32>
    %c2_49 = arith.constant 2 : index
    %c0_50 = arith.constant 0 : index
    %c0_51 = arith.constant 0 : index
    %48 = vector.load %arg5[%c2_49, %c0_50, %c0_51] : memref<18x18x128xbf16, #tpu.memory_space<vmem>>, vector<16x16x128xbf16>
    %49 = vector.shape_cast %48 : vector<16x16x128xbf16> to vector<256x128xbf16>
    %c6 = arith.constant 6 : index
    %c0_52 = arith.constant 0 : index
    %c0_53 = arith.constant 0 : index
    %50 = vector.load %arg2[%c6, %c0_52, %c0_53] : memref<18x128x128xbf16, #tpu.memory_space<vmem>>, vector<1x128x128xbf16>
    %51 = vector.shape_cast %50 : vector<1x128x128xbf16> to vector<128x128xbf16>
    %cst_54 = arith.constant dense<0.000000e+00> : vector<256x128xf32>
    %52 = tpu.matmul %49, %51, %cst_54 {dimension_numbers = #tpu.dot_dimension_numbers<[1], [0], [0], [1], [0, 0, 1, 1], [], []>} : vector<256x128xbf16>, vector<128x128xbf16>, vector<256x128xf32> -> vector<256x128xf32>
    %53 = arith.addf %47, %52 : vector<256x128xf32>
    %c2_55 = arith.constant 2 : index
    %c1_56 = arith.constant 1 : index
    %c0_57 = arith.constant 0 : index
    %54 = vector.load %arg5[%c2_55, %c1_56, %c0_57] : memref<18x18x128xbf16, #tpu.memory_space<vmem>>, vector<16x16x128xbf16>
    %55 = vector.shape_cast %54 : vector<16x16x128xbf16> to vector<256x128xbf16>
    %c7 = arith.constant 7 : index
    %c0_58 = arith.constant 0 : index
    %c0_59 = arith.constant 0 : index
    %56 = vector.load %arg2[%c7, %c0_58, %c0_59] : memref<18x128x128xbf16, #tpu.memory_space<vmem>>, vector<1x128x128xbf16>
    %57 = vector.shape_cast %56 : vector<1x128x128xbf16> to vector<128x128xbf16>
    %cst_60 = arith.constant dense<0.000000e+00> : vector<256x128xf32>
    %58 = tpu.matmul %55, %57, %cst_60 {dimension_numbers = #tpu.dot_dimension_numbers<[1], [0], [0], [1], [0, 0, 1, 1], [], []>} : vector<256x128xbf16>, vector<128x128xbf16>, vector<256x128xf32> -> vector<256x128xf32>
    %59 = arith.addf %53, %58 : vector<256x128xf32>
    %c2_61 = arith.constant 2 : index
    %c2_62 = arith.constant 2 : index
    %c0_63 = arith.constant 0 : index
    %60 = vector.load %arg5[%c2_61, %c2_62, %c0_63] : memref<18x18x128xbf16, #tpu.memory_space<vmem>>, vector<16x16x128xbf16>
    %61 = vector.shape_cast %60 : vector<16x16x128xbf16> to vector<256x128xbf16>
    %c8 = arith.constant 8 : index
    %c0_64 = arith.constant 0 : index
    %c0_65 = arith.constant 0 : index
    %62 = vector.load %arg2[%c8, %c0_64, %c0_65] : memref<18x128x128xbf16, #tpu.memory_space<vmem>>, vector<1x128x128xbf16>
    %63 = vector.shape_cast %62 : vector<1x128x128xbf16> to vector<128x128xbf16>
    %cst_66 = arith.constant dense<0.000000e+00> : vector<256x128xf32>
    %64 = tpu.matmul %61, %63, %cst_66 {dimension_numbers = #tpu.dot_dimension_numbers<[1], [0], [0], [1], [0, 0, 1, 1], [], []>} : vector<256x128xbf16>, vector<128x128xbf16>, vector<256x128xf32> -> vector<256x128xf32>
    %65 = arith.addf %59, %64 : vector<256x128xf32>
    %c0_67 = arith.constant 0 : index
    %c0_68 = arith.constant 0 : index
    %c0_69 = arith.constant 0 : index
    %66 = vector.load %arg3[%c0_67, %c0_68, %c0_69] : memref<2x1x128xf32, #tpu.memory_space<vmem>>, vector<1x1x128xf32>
    %67 = vector.shape_cast %66 : vector<1x1x128xf32> to vector<1x128xf32>
    %68 = vector.broadcast %67 : vector<1x128xf32> to vector<256x128xf32>
    %69 = arith.addf %65, %68 : vector<256x128xf32>
    %cst_70 = arith.constant 0.000000e+00 : f32
    %70 = vector.broadcast %cst_70 : f32 to vector<256x128xf32>
    %71 = arith.maximumf %69, %70 : vector<256x128xf32>
    %72 = vector.shape_cast %71 : vector<256x128xf32> to vector<16x16x128xf32>
    %73 = arith.truncf %72 : vector<16x16x128xf32> to vector<16x16x128xbf16>
    %74 = tpu.concatenate %1, %73, %1 in 1 : vector<16x1x128xbf16>, vector<16x16x128xbf16>, vector<16x1x128xbf16> -> vector<16x18x128xbf16>
    %c1_71 = arith.constant 1 : index
    %c0_72 = arith.constant 0 : index
    %c0_73 = arith.constant 0 : index
    %75 = vector.load %arg5[%c1_71, %c0_72, %c0_73] : memref<18x18x128xbf16, #tpu.memory_space<vmem>>, vector<16x18x128xbf16>
    tpu.vector_store %arg5[%c1_71, %c0_72, %c0_73], %74 {strides = array<i32>} : memref<18x18x128xbf16, #tpu.memory_space<vmem>>, vector<16x18x128xbf16>,
    %c0_74 = arith.constant 0 : index
    %c0_75 = arith.constant 0 : index
    %c0_76 = arith.constant 0 : index
    %76 = vector.load %arg5[%c0_74, %c0_75, %c0_76] : memref<18x18x128xbf16, #tpu.memory_space<vmem>>, vector<16x16x128xbf16>
    %77 = vector.shape_cast %76 : vector<16x16x128xbf16> to vector<256x128xbf16>
    %c9 = arith.constant 9 : index
    %c0_77 = arith.constant 0 : index
    %c0_78 = arith.constant 0 : index
    %78 = vector.load %arg2[%c9, %c0_77, %c0_78] : memref<18x128x128xbf16, #tpu.memory_space<vmem>>, vector<1x128x128xbf16>
    %79 = vector.shape_cast %78 : vector<1x128x128xbf16> to vector<128x128xbf16>
    %cst_79 = arith.constant dense<0.000000e+00> : vector<256x128xf32>
    %80 = tpu.matmul %77, %79, %cst_79 {dimension_numbers = #tpu.dot_dimension_numbers<[1], [0], [0], [1], [0, 0, 1, 1], [], []>} : vector<256x128xbf16>, vector<128x128xbf16>, vector<256x128xf32> -> vector<256x128xf32>
    %c0_80 = arith.constant 0 : index
    %c1_81 = arith.constant 1 : index
    %c0_82 = arith.constant 0 : index
    %81 = vector.load %arg5[%c0_80, %c1_81, %c0_82] : memref<18x18x128xbf16, #tpu.memory_space<vmem>>, vector<16x16x128xbf16>
    %82 = vector.shape_cast %81 : vector<16x16x128xbf16> to vector<256x128xbf16>
    %c10 = arith.constant 10 : index
    %c0_83 = arith.constant 0 : index
    %c0_84 = arith.constant 0 : index
    %83 = vector.load %arg2[%c10, %c0_83, %c0_84] : memref<18x128x128xbf16, #tpu.memory_space<vmem>>, vector<1x128x128xbf16>
    %84 = vector.shape_cast %83 : vector<1x128x128xbf16> to vector<128x128xbf16>
    %cst_85 = arith.constant dense<0.000000e+00> : vector<256x128xf32>
    %85 = tpu.matmul %82, %84, %cst_85 {dimension_numbers = #tpu.dot_dimension_numbers<[1], [0], [0], [1], [0, 0, 1, 1], [], []>} : vector<256x128xbf16>, vector<128x128xbf16>, vector<256x128xf32> -> vector<256x128xf32>
    %86 = arith.addf %80, %85 : vector<256x128xf32>
    %c0_86 = arith.constant 0 : index
    %c2_87 = arith.constant 2 : index
    %c0_88 = arith.constant 0 : index
    %87 = vector.load %arg5[%c0_86, %c2_87, %c0_88] : memref<18x18x128xbf16, #tpu.memory_space<vmem>>, vector<16x16x128xbf16>
    %88 = vector.shape_cast %87 : vector<16x16x128xbf16> to vector<256x128xbf16>
    %c11 = arith.constant 11 : index
    %c0_89 = arith.constant 0 : index
    %c0_90 = arith.constant 0 : index
    %89 = vector.load %arg2[%c11, %c0_89, %c0_90] : memref<18x128x128xbf16, #tpu.memory_space<vmem>>, vector<1x128x128xbf16>
    %90 = vector.shape_cast %89 : vector<1x128x128xbf16> to vector<128x128xbf16>
    %cst_91 = arith.constant dense<0.000000e+00> : vector<256x128xf32>
    %91 = tpu.matmul %88, %90, %cst_91 {dimension_numbers = #tpu.dot_dimension_numbers<[1], [0], [0], [1], [0, 0, 1, 1], [], []>} : vector<256x128xbf16>, vector<128x128xbf16>, vector<256x128xf32> -> vector<256x128xf32>
    %92 = arith.addf %86, %91 : vector<256x128xf32>
    %c1_92 = arith.constant 1 : index
    %c0_93 = arith.constant 0 : index
    %c0_94 = arith.constant 0 : index
    %93 = vector.load %arg5[%c1_92, %c0_93, %c0_94] : memref<18x18x128xbf16, #tpu.memory_space<vmem>>, vector<16x16x128xbf16>
    %94 = vector.shape_cast %93 : vector<16x16x128xbf16> to vector<256x128xbf16>
    %c12 = arith.constant 12 : index
    %c0_95 = arith.constant 0 : index
    %c0_96 = arith.constant 0 : index
    %95 = vector.load %arg2[%c12, %c0_95, %c0_96] : memref<18x128x128xbf16, #tpu.memory_space<vmem>>, vector<1x128x128xbf16>
    %96 = vector.shape_cast %95 : vector<1x128x128xbf16> to vector<128x128xbf16>
    %cst_97 = arith.constant dense<0.000000e+00> : vector<256x128xf32>
    %97 = tpu.matmul %94, %96, %cst_97 {dimension_numbers = #tpu.dot_dimension_numbers<[1], [0], [0], [1], [0, 0, 1, 1], [], []>} : vector<256x128xbf16>, vector<128x128xbf16>, vector<256x128xf32> -> vector<256x128xf32>
    %98 = arith.addf %92, %97 : vector<256x128xf32>
    %c1_98 = arith.constant 1 : index
    %c1_99 = arith.constant 1 : index
    %c0_100 = arith.constant 0 : index
    %99 = vector.load %arg5[%c1_98, %c1_99, %c0_100] : memref<18x18x128xbf16, #tpu.memory_space<vmem>>, vector<16x16x128xbf16>
    %100 = vector.shape_cast %99 : vector<16x16x128xbf16> to vector<256x128xbf16>
    %c13 = arith.constant 13 : index
    %c0_101 = arith.constant 0 : index
    %c0_102 = arith.constant 0 : index
    %101 = vector.load %arg2[%c13, %c0_101, %c0_102] : memref<18x128x128xbf16, #tpu.memory_space<vmem>>, vector<1x128x128xbf16>
    %102 = vector.shape_cast %101 : vector<1x128x128xbf16> to vector<128x128xbf16>
    %cst_103 = arith.constant dense<0.000000e+00> : vector<256x128xf32>
    %103 = tpu.matmul %100, %102, %cst_103 {dimension_numbers = #tpu.dot_dimension_numbers<[1], [0], [0], [1], [0, 0, 1, 1], [], []>} : vector<256x128xbf16>, vector<128x128xbf16>, vector<256x128xf32> -> vector<256x128xf32>
    %104 = arith.addf %98, %103 : vector<256x128xf32>
    %c1_104 = arith.constant 1 : index
    %c2_105 = arith.constant 2 : index
    %c0_106 = arith.constant 0 : index
    %105 = vector.load %arg5[%c1_104, %c2_105, %c0_106] : memref<18x18x128xbf16, #tpu.memory_space<vmem>>, vector<16x16x128xbf16>
    %106 = vector.shape_cast %105 : vector<16x16x128xbf16> to vector<256x128xbf16>
    %c14 = arith.constant 14 : index
    %c0_107 = arith.constant 0 : index
    %c0_108 = arith.constant 0 : index
    %107 = vector.load %arg2[%c14, %c0_107, %c0_108] : memref<18x128x128xbf16, #tpu.memory_space<vmem>>, vector<1x128x128xbf16>
    %108 = vector.shape_cast %107 : vector<1x128x128xbf16> to vector<128x128xbf16>
    %cst_109 = arith.constant dense<0.000000e+00> : vector<256x128xf32>
    %109 = tpu.matmul %106, %108, %cst_109 {dimension_numbers = #tpu.dot_dimension_numbers<[1], [0], [0], [1], [0, 0, 1, 1], [], []>} : vector<256x128xbf16>, vector<128x128xbf16>, vector<256x128xf32> -> vector<256x128xf32>
    %110 = arith.addf %104, %109 : vector<256x128xf32>
    %c2_110 = arith.constant 2 : index
    %c0_111 = arith.constant 0 : index
    %c0_112 = arith.constant 0 : index
    %111 = vector.load %arg5[%c2_110, %c0_111, %c0_112] : memref<18x18x128xbf16, #tpu.memory_space<vmem>>, vector<16x16x128xbf16>
    %112 = vector.shape_cast %111 : vector<16x16x128xbf16> to vector<256x128xbf16>
    %c15 = arith.constant 15 : index
    %c0_113 = arith.constant 0 : index
    %c0_114 = arith.constant 0 : index
    %113 = vector.load %arg2[%c15, %c0_113, %c0_114] : memref<18x128x128xbf16, #tpu.memory_space<vmem>>, vector<1x128x128xbf16>
    %114 = vector.shape_cast %113 : vector<1x128x128xbf16> to vector<128x128xbf16>
    %cst_115 = arith.constant dense<0.000000e+00> : vector<256x128xf32>
    %115 = tpu.matmul %112, %114, %cst_115 {dimension_numbers = #tpu.dot_dimension_numbers<[1], [0], [0], [1], [0, 0, 1, 1], [], []>} : vector<256x128xbf16>, vector<128x128xbf16>, vector<256x128xf32> -> vector<256x128xf32>
    %116 = arith.addf %110, %115 : vector<256x128xf32>
    %c2_116 = arith.constant 2 : index
    %c1_117 = arith.constant 1 : index
    %c0_118 = arith.constant 0 : index
    %117 = vector.load %arg5[%c2_116, %c1_117, %c0_118] : memref<18x18x128xbf16, #tpu.memory_space<vmem>>, vector<16x16x128xbf16>
    %118 = vector.shape_cast %117 : vector<16x16x128xbf16> to vector<256x128xbf16>
    %c16 = arith.constant 16 : index
    %c0_119 = arith.constant 0 : index
    %c0_120 = arith.constant 0 : index
    %119 = vector.load %arg2[%c16, %c0_119, %c0_120] : memref<18x128x128xbf16, #tpu.memory_space<vmem>>, vector<1x128x128xbf16>
    %120 = vector.shape_cast %119 : vector<1x128x128xbf16> to vector<128x128xbf16>
    %cst_121 = arith.constant dense<0.000000e+00> : vector<256x128xf32>
    %121 = tpu.matmul %118, %120, %cst_121 {dimension_numbers = #tpu.dot_dimension_numbers<[1], [0], [0], [1], [0, 0, 1, 1], [], []>} : vector<256x128xbf16>, vector<128x128xbf16>, vector<256x128xf32> -> vector<256x128xf32>
    %122 = arith.addf %116, %121 : vector<256x128xf32>
    %c2_122 = arith.constant 2 : index
    %c2_123 = arith.constant 2 : index
    %c0_124 = arith.constant 0 : index
    %123 = vector.load %arg5[%c2_122, %c2_123, %c0_124] : memref<18x18x128xbf16, #tpu.memory_space<vmem>>, vector<16x16x128xbf16>
    %124 = vector.shape_cast %123 : vector<16x16x128xbf16> to vector<256x128xbf16>
    %c17_125 = arith.constant 17 : index
    %c0_126 = arith.constant 0 : index
    %c0_127 = arith.constant 0 : index
    %125 = vector.load %arg2[%c17_125, %c0_126, %c0_127] : memref<18x128x128xbf16, #tpu.memory_space<vmem>>, vector<1x128x128xbf16>
    %126 = vector.shape_cast %125 : vector<1x128x128xbf16> to vector<128x128xbf16>
    %cst_128 = arith.constant dense<0.000000e+00> : vector<256x128xf32>
    %127 = tpu.matmul %124, %126, %cst_128 {dimension_numbers = #tpu.dot_dimension_numbers<[1], [0], [0], [1], [0, 0, 1, 1], [], []>} : vector<256x128xbf16>, vector<128x128xbf16>, vector<256x128xf32> -> vector<256x128xf32>
    %128 = arith.addf %122, %127 : vector<256x128xf32>
    %c1_129 = arith.constant 1 : index
    %c0_130 = arith.constant 0 : index
    %c0_131 = arith.constant 0 : index
    %129 = vector.load %arg3[%c1_129, %c0_130, %c0_131] : memref<2x1x128xf32, #tpu.memory_space<vmem>>, vector<1x1x128xf32>
    %130 = vector.shape_cast %129 : vector<1x1x128xf32> to vector<1x128xf32>
    %131 = vector.broadcast %130 : vector<1x128xf32> to vector<256x128xf32>
    %132 = arith.addf %128, %131 : vector<256x128xf32>
    %cst_132 = arith.constant 0.000000e+00 : f32
    %133 = vector.broadcast %cst_132 : f32 to vector<256x128xf32>
    %134 = arith.maximumf %132, %133 : vector<256x128xf32>
    %135 = vector.shape_cast %134 : vector<256x128xf32> to vector<16x16x128xf32>
    %c0_133 = arith.constant 0 : index
    %c0_134 = arith.constant 0 : index
    %c0_135 = arith.constant 0 : index
    %c0_136 = arith.constant 0 : index
    %136 = vector.load %arg4[%c0_133, %c0_134, %c0_135, %c0_136] : memref<1x16x16x128xf32, #tpu.memory_space<vmem>>, vector<1x16x16x128xf32>
    %137 = vector.shape_cast %136 : vector<1x16x16x128xf32> to vector<16x16x128xf32>
    %138 = vector.shape_cast %135 : vector<16x16x128xf32> to vector<1x16x16x128xf32>
    tpu.vector_store %arg4[%c0_133, %c0_134, %c0_135, %c0_136], %138 {strides = array<i32>} : memref<1x16x16x128xf32, #tpu.memory_space<vmem>>, vector<1x16x16x128xf32>,
    return
  }
  func.func @transform_0(%arg0: i32) -> (i32, i32, i32, i32) {
    %c0_i32 = arith.constant 0 : i32
    %c0_i32_0 = arith.constant 0 : i32
    %c0_i32_1 = arith.constant 0 : i32
    %c0_i32_2 = arith.constant 0 : i32
    return %arg0, %c0_i32, %c0_i32_0, %c0_i32_1 : i32, i32, i32, i32
  }
  func.func @transform_1(%arg0: i32) -> (i32, i32, i32) {
    %c0_i32 = arith.constant 0 : i32
    %c0_i32_0 = arith.constant 0 : i32
    %c0_i32_1 = arith.constant 0 : i32
    %c0_i32_2 = arith.constant 0 : i32
    return %c0_i32, %c0_i32_0, %c0_i32_1 : i32, i32, i32
  }
  func.func @transform_2(%arg0: i32) -> (i32, i32, i32) {
    %c0_i32 = arith.constant 0 : i32
    %c0_i32_0 = arith.constant 0 : i32
    %c0_i32_1 = arith.constant 0 : i32
    %c0_i32_2 = arith.constant 0 : i32
    return %c0_i32, %c0_i32_0, %c0_i32_1 : i32, i32, i32
  }
  func.func @transform_3(%arg0: i32) -> (i32, i32, i32, i32) {
    %c0_i32 = arith.constant 0 : i32
    %c0_i32_0 = arith.constant 0 : i32
    %c0_i32_1 = arith.constant 0 : i32
    %c0_i32_2 = arith.constant 0 : i32
    return %arg0, %c0_i32, %c0_i32_0, %c0_i32_1 : i32, i32, i32, i32
  }
}

</mosaic_0001>

<bundles_post_ra>
// kernel: encoder_block_forward.1
= control target key start
LH: loop header
LB: loop body
LE: loop exit
PB: predicated region body
PF: predicated region fallthrough
CT: control target
= control target key end

     0   :  { %s13396_s12 = smov 0   ;;  %s18208_s0 = inlined_call_operand.vmem [shape: f32[2,16,16,128], index: 0, kind: input, shape index: {}]   ;;  %s18209_s1 = inlined_call_operand.vmem [shape: bf16[18,128,128], index: 1, kind: input, shape index: {}]   ;;  %s18210_s2 = inlined_call_operand.vmem [shape: f32[2,1,128], index: 2, kind: input, shape index: {}]   ;;  %s18211_s3 = inlined_call_operand.vmem [shape: f32[2,16,16,128], index: 3, kind: output, shape index: {}]  }
   0x1 LB: > { %s10887_s13 = sadd.s32 4294967295, %s13373_s12   ;;  %p10891_p0 = scmp.ge.s32.totalorder %s13373_s12, 1  ;;  %s13373_s12 = sphi %s13396_s12, %s13_s12  }
   0x2   : > { %p137_p1 = scmp.lt.s32.totalorder %s13373_s12, 3 }
   0x4   : > { %p138_p2 = pnand %p10891_p0, %p137_p1 }
   0x6   : > { %141 = sbr.rel (%p138_p2) target bundleno = 1163 (0x48b), region = 32 }
   0xb   : > { %v13104_v0 = vld [vmem:[%s18209_s1 + $0x78] sm:$0xff]   ;;  %v13375_v2 = vmov 0   ;;  %v13106_v3 = vld [vmem:[%s18209_s1 + $0x70] sm:$0xff]   ;;  %v13108_v5 = vld [vmem:[%s18209_s1 + $0x68] sm:$0xff]   ;;  %p161_p3 = scmp.lt.s32.totalorder %s10887_s13, 1  ;;  %vm371_vm2 = vcmask 1040384  }
   0xc   : > { %v13105_v1 = vld [vmem:[%s18209_s1 + $0x38] sm:$0xff]   ;;  %172 = vst [vmem:[#allocation2] sm:$0xf] %v13375_v2  ;;  %173 = vst [vmem:[#allocation2 + $0x4] sm:$0xf] %v13375_v2  ;;  %12231 = vmatprep.subr.bf16.mxu0 %v13104_v0  ;;  %v13107_v4 = vld [vmem:[%s18209_s1 + $0x30] sm:$0xff]  }
   0xd   : > { %174 = vst [vmem:[#allocation2 + $0x8] sm:$0x1] %v13375_v2  ;;  %176 = vst [vmem:[#allocation2 + $0xcc] sm:$0xf] %v13375_v2  ;;  %12232 = vmatpush3.bf16.msra.mxu0 %v13104_v0  ;;  %12279 = vmatprep.subr.bf16.mxu1 %v13105_v1  ;;  %v13109_v6 = vld [vmem:[%s18209_s1 + $0x28] sm:$0xff]   ;;  %v13110_v7 = vld [vmem:[%s18209_s1 + $0x60] sm:$0xff]  }
   0xe   : > { %177 = vst [vmem:[#allocation2 + $0xd0] sm:$0xf] %v13375_v2  ;;  %178 = vst [vmem:[#allocation2 + $0xd4] sm:$0x1] %v13375_v2  ;;  %12280 = vmatpush3.bf16.msra.mxu1 %v13105_v1  ;;  %12233 = vmatprep.subr.bf16.mxu0 %v13106_v3  ;;  %v13111_v8 = vld [vmem:[%s18209_s1 + $0x20] sm:$0xff]   ;;  %s18587_s13 = smov (!%p161_p3, %s10887_s13), 1 }
   0xf   : > { %12281 = vmatprep.subr.bf16.mxu1 %v13107_v4  ;;  %v13112_v9 = vld [vmem:[%s18209_s1 + $0x58] sm:$0xff]   ;;  %s11797_s7 = sshll.u32 %s18587_s13, 8  ;;  %v13114_v11 = vld [vmem:[%s18209_s1 + $0x50] sm:$0xff]   ;;  %vm695_vm0 = vsmask.f32 3328  ;;  %v13116_v25 = vld [vmem:[%s18209_s1 + $0x48] sm:$0xff]  }
  0x10   : > { %v13113_v10 = vld [vmem:[%s18209_s1 + $0x18] sm:$0xff]   ;;  %v13115_v12 = vld [vmem:[%s18209_s1 + $0x10] sm:$0xff]   ;;  %s13456_s16 = scalar_lea.vmem %s18208_s0, %s11797_s7  ;;  %vm696_vm1 = vsmask.f32 7440  ;;  %v13117_v31 = vld [vmem:[%s18209_s1 + $0x8] sm:$0xff]   ;;  %vm1725_vm4 = vcmask 1042432   ;;  %s18028_s26 = scalar_lea.vmem %s18211_s3, %s11797_s7 }
  0x11   : > { %12234 = vmatpush3.bf16.msra.mxu0 %v13106_v3  ;;  %v179_v24 = vld [vmem:[%s13456_s16] sm:$0xff]  ;;  %v180_v30 = vld [vmem:[%s13456_s16 + $0x8] sm:$0xff]  ;;  %vm372_vm3 = vsmask.f32 256  ;;  %v181_v34 = vld [vmem:[%s13456_s16 + $0x10] sm:$0xff]  ;;  %v18234_v37 = vmov 0 }
  0x12   : > { %12282 = vmatpush3.bf16.msra.mxu1 %v13107_v4  ;;  %12235 = vmatprep.subr.bf16.mxu0 %v13108_v5  ;;  %v211_v33 = vpack.c.bf16 %v180_v30, %v179_v24  ;;  %v182_v35 = vld [vmem:[%s13456_s16 + $0x18] sm:$0xff]  ;;  %v13118_v36 = vld [vmem:[%s18209_s1 + $0x40] sm:$0xff]   ;;  %vm13478_vm5 = vmor %vm695_vm0, %vm696_vm1  ;;  %vm1726_vm6 = vcmask 1046532   ;;  %v18237_v58 = vmov 0 }
  0x13   : > { %12283 = vmatprep.subr.bf16.mxu1 %v13109_v6  ;;  %v631_v13 = vld [vmem:[#allocation2] sm:$0xf]  ;;  %v13447_v14 = vld [vmem:[#allocation2 + $0x4] sm:$0xf]  ;;  %v18235_v37 = vsel %vm13478_vm5, 4294967295, %v18234_v37  ;;  %v212_v39 = vpack.c.bf16 %v182_v35, %v181_v34  ;;  %v184_v45 = vld [vmem:[%s13456_s16 + $0x28] sm:$0xff] }
  0x14   : > { %v13449_v15 = vld [vmem:[#allocation2 + $0x8] sm:$0x1]  ;;  %v699_v16 = vshrl.u32 %v631_v13, 16  ;;  %v702_v17 = vshll.u32 %v631_v13, 16  ;;  %v708_v18 = vshll.u32 %v13447_v14, 16  ;;  %v712_v19 = vshrl.u32 %v13447_v14, 16  ;;  %vm13500_vm7 = vmand %vm371_vm2, %vm372_vm3 }
  0x15   : > { %12236 = vmatpush3.bf16.msra.mxu0 %v13108_v5  ;;  %v718_v20 = vshll.u32 %v13449_v15, 16  ;;  %v10984_v23 = vcombine.low %v631_v13, %v13447_v14  ;;  %v1733_v29 = vrot.slane %v13449_v15, 5  ;;  %18236 = vst [vmem:[#allocation3_spill] sm:$0xff] %v18235_v37  ;;  %v1730_v40 = vrot.slane %v13447_v14, 5  ;;  %v183_v44 = vld [vmem:[%s13456_s16 + $0x20] sm:$0xff]  ;;  %v185_v46 = vld [vmem:[%s13456_s16 + $0x30] sm:$0xff]  ;;  %vm13519_vm8 = vmor %vm1725_vm4, %vm1726_vm6 }
  0x16   : > { %12284 = vmatpush3.bf16.msra.mxu1 %v13109_v6  ;;  %12237 = vmatprep.subr.bf16.mxu0 %v13110_v7  ;;  %v701_v21 = vrot.slane %v699_v16, 4  ;;  %v704_v22 = vrot.slane %v702_v17, 5  ;;  %v710_v26 = vrot.slane %v708_v18, 5  ;;  %v714_v27 = vrot.slane %v712_v19, 4  ;;  %v186_v51 = vld [vmem:[%s13456_s16 + $0x38] sm:$0xff]  ;;  %v13119_v52 = vld [vmem:[%s18209_s1] sm:$0xff]  }
  0x17   : > { %12285 = vmatprep.subr.bf16.mxu1 %v13111_v8  ;;  %v720_v28 = vrot.slane %v718_v20, 5  ;;  %12295 = vmatprep.mubr.bf16.mxu1 %v10984_v23  ;;  %v228_v42 = vshrl.u32 %v211_v33, 16  ;;  %v231_v43 = vshll.u32 %v211_v33, 16  ;;  %v235_v48 = vshrl.u32 %v212_v39, 16  ;;  %v13509_v2 = vld [vmem:[%s18209_s1 + $0xb8] sm:$0xff]   ;;  %v189_v20 = vld [vmem:[%s13456_s16 + $0x50] sm:$0xff] }
  0x18   : > { %v705_v32 = vor.u32 %v704_v22, %v701_v21  ;;  %v715_v38 = vor.u32 %v714_v27, %v710_v26  ;;  %v238_v49 = vshll.u32 %v212_v39, 16  ;;  %v213_v50 = vpack.c.bf16 %v184_v45, %v183_v44  ;;  %v190_v21 = vld [vmem:[%s13456_s16 + $0x58] sm:$0xff]  ;;  %v191_v22 = vld [vmem:[%s13456_s16 + $0x60] sm:$0xff]  ;;  %v192_v23 = vld [vmem:[%s13456_s16 + $0x68] sm:$0xff] }
  0x19   : > { %12238 = vmatpush3.bf16.msra.mxu0 %v13110_v7  ;;  %v230_v54 = vrot.slane %v228_v42, 7  ;;  %v214_v55 = vpack.c.bf16 %v186_v51, %v185_v46  ;;  %v13494_v56 = vrot.slane %v1730_v40, 4  ;;  %v18238_v58 = vsel %vm13500_vm7, 4294967295, %v18237_v58  ;;  %v194_v30 = vld [vmem:[%s13456_s16 + $0x78] sm:$0xff]  ;;  %v195_v35 = vld [vmem:[%s13456_s16 + $0x80] sm:$0xff]  ;;  %v197_v44 = vld [vmem:[%s13456_s16 + $0x90] sm:$0xff] }
  0x1a   : > { %12286 = vmatpush3.bf16.msra.mxu1 %v13111_v8  ;;  %12239 = vmatprep.subr.bf16.mxu0 %v13112_v9  ;;  %v706_v41 = vrot.slane %v705_v32, 4  ;;  %v716_v47 = vrot.slane %v715_v38, 4  ;;  %18239 = vst [vmem:[#allocation4_spill] sm:$0xff] %v18238_v58  ;;  %v237_v59 = vrot.slane %v235_v48, 7  ;;  %v242_v60 = vshrl.u32 %v213_v50, 16  ;;  %v198_v48 = vld [vmem:[%s13456_s16 + $0x98] sm:$0xff] }
  0x1b   : > { %12287 = vmatprep.subr.bf16.mxu1 %v13113_v10  ;;  %v245_v61 = vshll.u32 %v213_v50, 16  ;;  %v233_v63 = vor.u32 %v231_v43, %v230_v54  ;;  %v390_v0 = vsel %vm13500_vm7, %v230_v54, 0  ;;  %v249_v1 = vshrl.u32 %v214_v55, 16  ;;  %v196_v43 = vld [vmem:[%s13456_s16 + $0x88] sm:$0xff] }
  0x1c   : > { %v711_v53 = vsel %vm13478_vm5, %v706_v41, %v710_v26  ;;  %v721_v57 = vsel %vm13478_vm5, %v716_v47, %v720_v28  ;;  %v10898_v3 = vcombine.low %v390_v0, %v390_v0  ;;  %v240_v4 = vor.u32 %v238_v49, %v237_v59  ;;  %v193_v28 = vld [vmem:[%s13456_s16 + $0x70] sm:$0xff] }
  0x1d   : > { %12240 = vmatpush3.bf16.msra.mxu0 %v13112_v9  ;;  %v10960_v62 = vcombine.low %v711_v53, %v721_v57  ;;  %v391_v5 = vsel %vm13500_vm7, %v237_v59, 0  ;;  %v244_v6 = vrot.slane %v242_v60, 7  ;;  %v374_v7 = vsel %vm13500_vm7, 0, %v233_v63  ;;  %v200_v53 = vld [vmem:[%s13456_s16 + $0xa8] sm:$0xff] }
  0x1e   : > { %12288 = vmatpush3.bf16.msra.mxu1 %v13113_v10  ;;  %12241 = vmatprep.subr.bf16.mxu0 %v13114_v11  ;;  %v10901_v8 = vcombine.low %v391_v5, %v391_v5  ;;  %v251_v9 = vrot.slane %v249_v1, 7  ;;  %v252_v10 = vshll.u32 %v214_v55, 16  ;;  %v18240_v13 = vmov 0  ;;  %585 = vst [vmem:[#allocation2 + $0x14] sm:$0x1] %v10898_v3 }
  0x1f   : > { %12289 = vmatprep.subr.bf16.mxu1 %v13115_v12  ;;  %12247 = vmatprep.mubr.bf16.mxu0 %v10960_v62  ;;  %v18241_v13 = vsel %vm13519_vm8, 4294967295, %v18240_v13  ;;  %v10896_v16 = vcombine.low %v374_v7, %v374_v7  ;;  %v10897_v17 = vcombine.high %v374_v7, %v374_v7  ;;  %v375_v18 = vsel %vm13500_vm7, 0, %v240_v4 }
  0x20   : > { %18242 = vst [vmem:[#allocation5_spill] sm:$0xff] %v18241_v13  ;;  %v247_v19 = vor.u32 %v245_v61, %v244_v6  ;;  %v10899_v24 = vcombine.low %v375_v18, %v375_v18  ;;  %588 = vst [vmem:[#allocation2 + $0x20] sm:$0x1] %v10901_v8  ;;  %v392_v26 = vsel %vm13500_vm7, %v244_v6, 0  ;;  %v254_v27 = vor.u32 %v252_v10, %v251_v9  ;;  %v13237_v13 = vld [vmem:[%s18209_s1 + $0x248] sm:$0xff]  }
  0x21   : > { %12242 = vmatpush3.bf16.msra.mxu0 %v13114_v11  ;;  %v187_v11 = vld [vmem:[%s13456_s16 + $0x40] sm:$0xff]  ;;  %583 = vst [vmem:[#allocation2 + $0xc] sm:$0xf] %v10896_v16  ;;  %584 = vst [vmem:[#allocation2 + $0x10] sm:$0xf] %v10897_v17  ;;  %v10904_v32 = vcombine.low %v392_v26, %v392_v26  ;;  %v393_v33 = vsel %vm13500_vm7, %v251_v9, 0  ;;  %v13550_v50 = vpack.c.bf16 %v190_v21, %v189_v20 }
  0x22   : > { %12290 = vmatpush3.bf16.msra.mxu1 %v13115_v12  ;;  %12243 = vmatprep.subr.bf16.mxu0 %v13116_v25  ;;  %v188_v12 = vld [vmem:[%s13456_s16 + $0x48] sm:$0xff]  ;;  %586 = vst [vmem:[#allocation2 + $0x18] sm:$0xf] %v10899_v24  ;;  %v377_v41 = vsel %vm13500_vm7, 0, %v254_v27  ;;  %v10907_v42 = vcombine.low %v393_v33, %v393_v33  ;;  %v13552_v51 = vpack.c.bf16 %v192_v23, %v191_v22  ;;  %v13136_v23 = vld [vmem:[%s18209_s1 + $0xf0] sm:$0xff]  }
  0x23   : > { %12291 = vmatprep.subr.bf16.mxu1 %v13117_v31  ;;  %v215_v34 = vpack.c.bf16 %v188_v12, %v187_v11  ;;  %591 = vst [vmem:[#allocation2 + $0x2c] sm:$0x1] %v10904_v32  ;;  %v10905_v45 = vcombine.low %v377_v41, %v377_v41  ;;  %v10906_v46 = vcombine.high %v377_v41, %v377_v41  ;;  %v263_v61 = vshrl.u32 %v13550_v50, 16 }
  0x24   : > { %594 = vst [vmem:[#allocation2 + $0x38] sm:$0x1] %v10907_v42  ;;  %v13556_v55 = vpack.c.bf16 %v194_v30, %v193_v28  ;;  %v13558_v57 = vpack.c.bf16 %v196_v43, %v195_v35  ;;  %v13565_v59 = vsel %vm13519_vm8, %v13494_v56, %v1733_v29  ;;  %v266_v62 = vshll.u32 %v13550_v50, 16  ;;  %v13146_v50 = vld [vmem:[%s18209_s1 + $0xd0] sm:$0xff]  }
  0x25   : > { %12244 = vmatpush3.bf16.msra.mxu0 %v13116_v25  ;;  %v10900_v25 = vcombine.high %v375_v18, %v375_v18  ;;  %v256_v47 = vshrl.u32 %v215_v34, 16  ;;  %v259_v49 = vshll.u32 %v215_v34, 16  ;;  %592 = vst [vmem:[#allocation2 + $0x30] sm:$0xf] %v10905_v45  ;;  %593 = vst [vmem:[#allocation2 + $0x34] sm:$0xf] %v10906_v46  ;;  %v13571_v63 = vpack.c.bf16 %v198_v48, %v197_v44 }
  0x26   : > { %12292 = vmatpush3.bf16.msra.mxu1 %v13117_v31  ;;  %12245 = vmatprep.subr.bf16.mxu0 %v13118_v36  ;;  %v376_v31 = vsel %vm13500_vm7, 0, %v247_v19  ;;  %v13567_v60 = vld [vmem:[#allocation2 + $0x14] sm:$0x1]  ;;  %v270_v4 = vshrl.u32 %v13552_v51, 16  ;;  %v273_v29 = vshll.u32 %v13552_v51, 16  ;;  %v13584_v9 = vrot.slane %v263_v61, 7 }
  0x27   : > { %12293 = vmatprep.subr.bf16.mxu1 %v13119_v52  ;;  %587 = vst [vmem:[#allocation2 + $0x1c] sm:$0xf] %v10900_v25  ;;  %v10902_v38 = vcombine.low %v376_v31, %v376_v31  ;;  %v10903_v39 = vcombine.high %v376_v31, %v376_v31  ;;  %v258_v54 = vrot.slane %v256_v47, 7  ;;  %v742_v1 = vshll.u32 %v13567_v60, 16  ;;  %v681_v3 = vld [vmem:[#allocation2 + $0x20] sm:$0x1] }
  0x28   : > { %v633_v56 = vld [vmem:[#allocation2 + $0xc] sm:$0xf]  ;;  %v13580_v5 = vld [vmem:[#allocation2 + $0x10] sm:$0xf]  ;;  %v766_v6 = vshll.u32 %v681_v3, 16 }
  0x29   : > { %12246 = vmatpush3.bf16.msra.mxu0 %v13118_v36  ;;  %v13542_v36 = vld [vmem:[%s18209_s1 + $0xf8] sm:$0xff]   ;;  %589 = vst [vmem:[#allocation2 + $0x24] sm:$0xf] %v10902_v38  ;;  %590 = vst [vmem:[#allocation2 + $0x28] sm:$0xf] %v10903_v39  ;;  %v394_v15 = vsel %vm13500_vm7, %v258_v54, 0  ;;  %v13582_v7 = vor.u32 %v259_v49, %v258_v54  ;;  %v10985_v19 = vcombine.low %v633_v56, %v13580_v5 }
  0x2a   : > { %12294 = vmatpush3.bf16.msra.mxu1 %v13119_v52  ;;  %12327 = vmatprep.subr.bf16.mxu0 %v13509_v2  ;;  %v199_v52 = vld [vmem:[%s13456_s16 + $0xa0] sm:$0xff]  ;;  %v10910_v8 = vcombine.low %v394_v15, %v394_v15  ;;  %v723_v10 = vshrl.u32 %v633_v56, 16  ;;  %v726_v11 = vshll.u32 %v633_v56, 16  ;;  %v732_v12 = vshll.u32 %v13580_v5, 16  ;;  %v635_v17 = vld [vmem:[#allocation2 + $0x18] sm:$0xf] }
  0x2b   : > { %12375 = vmatprep.subr.bf16.mxu1 %v13542_v36  ;;  %v13573_v0 = vpack.c.bf16 %v200_v53, %v199_v52  ;;  %v736_v16 = vshrl.u32 %v13580_v5, 16  ;;  %v744_v18 = vrot.slane %v742_v1, 5  ;;  %v747_v21 = vshrl.u32 %v635_v17, 16  ;;  %v682_v45 = vld [vmem:[#allocation2 + $0x2c] sm:$0x1] }
  0x2c   : > { %v750_v22 = vshll.u32 %v635_v17, 16  ;;  %597 = vst [vmem:[#allocation2 + $0x44] sm:$0x1] %v10910_v8  ;;  %v725_v24 = vrot.slane %v723_v10, 4  ;;  %v728_v25 = vrot.slane %v726_v11, 5  ;;  %v734_v26 = vrot.slane %v732_v12, 5 }
  0x2d   : > { %v738_v27 = vrot.slane %v736_v16, 4  ;;  %12296 = vmatmul.mubr.bf16.vlgmr.msra.gmra.mxu1 %v10985_v19  ;;  %v749_v30 = vrot.slane %v747_v21, 4  ;;  %v768_v39 = vrot.slane %v766_v6, 5  ;;  %v13140_v47 = vld [vmem:[%s18209_s1 + $0xe8] sm:$0xff]   ;;  %v639_v54 = vld [vmem:[#allocation2 + $0x30] sm:$0xf] }
  0x2e   : > { %v13589_v20 = vld [vmem:[#allocation2 + $0x1c] sm:$0xf]  ;;  %v752_v31 = vrot.slane %v750_v22, 5  ;;  %v729_v35 = vor.u32 %v728_v25, %v725_v24  ;;  %12376 = vmatpush3.bf16.msra.mxu1 %v13542_v36  ;;  %v13124_v36 = vld [vmem:[%s18209_s1 + $0xb0] sm:$0xff]   ;;  %v13141_v12 = vld [vmem:[%s18209_s1 + $0xe0] sm:$0xff]   ;;  %v790_v24 = vshll.u32 %v682_v45, 16 }
  0x2f   : > { %v756_v32 = vshll.u32 %v13589_v20, 16  ;;  %v760_v33 = vshrl.u32 %v13589_v20, 16  ;;  %v739_v38 = vor.u32 %v738_v27, %v734_v26  ;;  %v10986_v41 = vcombine.low %v635_v17, %v13589_v20  ;;  %12377 = vmatprep.subr.bf16.mxu1 %v13136_v23  ;;  %v640_v11 = vld [vmem:[#allocation2 + $0x34] sm:$0xf] }
  0x30   : > { %v637_v28 = vld [vmem:[#allocation2 + $0x24] sm:$0xf]  ;;  %v638_v34 = vld [vmem:[#allocation2 + $0x28] sm:$0xf]  ;;  %v753_v42 = vor.u32 %v752_v31, %v749_v30  ;;  %v730_v48 = vrot.slane %v729_v35, 4  ;;  %v798_v30 = vshll.u32 %v639_v54, 16 }
  0x31   : > { %v758_v43 = vrot.slane %v756_v32, 5  ;;  %v762_v44 = vrot.slane %v760_v33, 4  ;;  %v771_v46 = vshrl.u32 %v637_v28, 16  ;;  %v740_v49 = vrot.slane %v739_v38, 4  ;;  %12299 = vmatprep.mubr.bf16.mxu1 %v10986_v41 }
  0x32   : > { %v774_v52 = vshll.u32 %v637_v28, 16  ;;  %v780_v53 = vshll.u32 %v638_v34, 16  ;;  %v754_v61 = vrot.slane %v753_v42, 4  ;;  %v784_v15 = vshrl.u32 %v638_v34, 16  ;;  %12378 = vmatpush3.bf16.msra.mxu1 %v13136_v23 }
  0x33   : > { %v763_v1 = vor.u32 %v762_v44, %v758_v43  ;;  %v773_v3 = vrot.slane %v771_v46, 4  ;;  %v735_v56 = vsel %vm13478_vm5, %v730_v48, %v734_v26  ;;  %v745_v6 = vsel %vm13478_vm5, %v740_v49, %v744_v18  ;;  %12379 = vmatprep.subr.bf16.mxu1 %v13140_v47  ;;  %v683_v26 = vld [vmem:[#allocation2 + $0x38] sm:$0x1]  ;;  %v684_v32 = vld [vmem:[#allocation2 + $0x44] sm:$0x1] }
  0x34   : > { %v776_v8 = vrot.slane %v774_v52, 5  ;;  %v782_v10 = vrot.slane %v780_v53, 5  ;;  %v10961_v16 = vcombine.low %v735_v56, %v745_v6  ;;  %v759_v17 = vsel %vm13478_vm5, %v754_v61, %v758_v43  ;;  %v13145_v44 = vld [vmem:[%s18209_s1 + $0xd8] sm:$0xff]  }
  0x35   : > { %v764_v19 = vrot.slane %v763_v1, 4  ;;  %v786_v21 = vrot.slane %v784_v15, 4  ;;  %v10987_v25 = vcombine.low %v637_v28, %v638_v34  ;;  %v795_v18 = vshrl.u32 %v639_v54, 16 }
  0x36   : > { %v777_v22 = vor.u32 %v776_v8, %v773_v3  ;;  %12248 = vmatmul.mubr.bf16.vlgmr.msra.gmra.mxu0 %v10961_v16  ;;  %v804_v31 = vshll.u32 %v640_v11, 16  ;;  %v792_v38 = vrot.slane %v790_v24, 5  ;;  %v800_v28 = vrot.slane %v798_v30, 5  ;;  %12380 = vmatpush3.bf16.msra.mxu1 %v13140_v47  ;;  %v13150_v30 = vld [vmem:[%s18209_s1 + $0xc8] sm:$0xff]  }
  0x37   : > { %v769_v23 = vsel %vm13478_vm5, %v764_v19, %v768_v39  ;;  %v787_v27 = vor.u32 %v786_v21, %v782_v10  ;;  %12328 = vmatpush3.bf16.msra.mxu0 %v13509_v2  ;;  %12300 = vmatmul.mubr.bf16.gmra.mxu1 %v10987_v25  ;;  %v797_v41 = vrot.slane %v795_v18, 4  ;;  %v808_v43 = vshrl.u32 %v640_v11, 16  ;;  %v13127_v39 = vld [vmem:[%s18209_s1 + $0xa8] sm:$0xff]  }
  0x38   : > { %v10962_v33 = vcombine.low %v759_v17, %v769_v23  ;;  %v778_v35 = vrot.slane %v777_v22, 4  ;;  %12329 = vmatprep.subr.bf16.mxu0 %v13124_v36  ;;  %v806_v34 = vrot.slane %v804_v31, 5  ;;  %v814_v45 = vshll.u32 %v683_v26, 16  ;;  %12381 = vmatprep.subr.bf16.mxu1 %v13141_v12 }
  0x39   : > { %v788_v42 = vrot.slane %v787_v27, 4  ;;  %v10988_v46 = vcombine.low %v639_v54, %v640_v11  ;;  %v378_v48 = vsel %vm13500_vm7, 0, %v13582_v7  ;;  %v801_v52 = vor.u32 %v800_v28, %v797_v41 }
  0x3a   : > { %12251 = vmatprep.mubr.bf16.mxu0 %v10962_v33  ;;  %v783_v2 = vsel %vm13478_vm5, %v778_v35, %v782_v10  ;;  %v810_v47 = vrot.slane %v808_v43, 4  ;;  %v10908_v53 = vcombine.low %v378_v48, %v378_v48  ;;  %v816_v1 = vrot.slane %v814_v45, 5  ;;  %12382 = vmatpush3.bf16.msra.mxu1 %v13141_v12 }
  0x3b   : > { %v793_v49 = vsel %vm13478_vm5, %v788_v42, %v792_v38  ;;  %12330 = vmatpush3.bf16.msra.mxu0 %v13124_v36  ;;  %12303 = vmatprep.mubr.bf16.mxu1 %v10988_v46  ;;  %v10909_v3 = vcombine.high %v378_v48, %v378_v48  ;;  %v838_v15 = vshll.u32 %v684_v32, 16  ;;  %v802_v56 = vrot.slane %v801_v52, 4  ;;  %v13130_v36 = vld [vmem:[%s18209_s1 + $0xa0] sm:$0xff]  }
  0x3c   : > { %v10963_v61 = vcombine.low %v783_v2, %v793_v49  ;;  %v811_v6 = vor.u32 %v810_v47, %v806_v34  ;;  %12331 = vmatprep.subr.bf16.mxu0 %v13127_v39  ;;  %595 = vst [vmem:[#allocation2 + $0x3c] sm:$0xf] %v10908_v53  ;;  %v268_v7 = vor.u32 %v266_v62, %v13584_v9  ;;  %v395_v54 = vsel %vm13500_vm7, %v13584_v9, 0  ;;  %v13151_v52 = vld [vmem:[%s18209_s1 + $0xc0] sm:$0xff]  }
  0x3d   : > { %596 = vst [vmem:[#allocation2 + $0x40] sm:$0xf] %v10909_v3  ;;  %v13638_v8 = vrot.slane %v838_v15, 5  ;;  %v10913_v10 = vcombine.low %v395_v54, %v395_v54  ;;  %v272_v11 = vrot.slane %v270_v4, 7  ;;  %v277_v16 = vshrl.u32 %v13556_v55, 16  ;;  %12383 = vmatprep.subr.bf16.mxu1 %v13145_v44 }
  0x3e   : > { %12252 = vmatmul.mubr.bf16.gmra.mxu0 %v10963_v61  ;;  %v807_v62 = vsel %vm13478_vm5, %v802_v56, %v806_v34  ;;  %v812_v9 = vrot.slane %v811_v6, 4  ;;  %v379_v12 = vsel %vm13500_vm7, 0, %v268_v7  ;;  %v280_v17 = vshll.u32 %v13556_v55, 16  ;;  %v13133_v55 = vld [vmem:[%s18209_s1 + $0x98] sm:$0xff]   ;;  %12384 = vmatpush3.bf16.msra.mxu1 %v13145_v44  ;;  %v13138_v34 = vld [vmem:[%s18209_s1 + $0x90] sm:$0xff]  }
  0x3f   : > { %12332 = vmatpush3.bf16.msra.mxu0 %v13127_v39  ;;  %v10911_v19 = vcombine.low %v379_v12, %v379_v12  ;;  %v10912_v4 = vcombine.high %v379_v12, %v379_v12  ;;  %600 = vst [vmem:[#allocation2 + $0x50] sm:$0x1] %v10913_v10  ;;  %v275_v21 = vor.u32 %v273_v29, %v272_v11  ;;  %v396_v22 = vsel %vm13500_vm7, %v272_v11, 0 }
  0x40   : > { %v817_v24 = vsel %vm13478_vm5, %v812_v9, %v816_v1  ;;  %12333 = vmatprep.subr.bf16.mxu0 %v13130_v36  ;;  %v10916_v25 = vcombine.low %v396_v22, %v396_v22  ;;  %v279_v26 = vrot.slane %v277_v16, 7  ;;  %v284_v18 = vshrl.u32 %v13558_v57, 16  ;;  %12385 = vmatprep.subr.bf16.mxu1 %v13146_v50 }
  0x41   : > { %v10964_v23 = vcombine.low %v807_v62, %v817_v24  ;;  %598 = vst [vmem:[#allocation2 + $0x48] sm:$0xf] %v10911_v19  ;;  %599 = vst [vmem:[#allocation2 + $0x4c] sm:$0xf] %v10912_v4  ;;  %v380_v51 = vsel %vm13500_vm7, 0, %v275_v21  ;;  %v287_v29 = vshll.u32 %v13558_v57, 16 }
  0x42   : > { %v291_v27 = vshrl.u32 %v13571_v63, 16  ;;  %v10914_v31 = vcombine.low %v380_v51, %v380_v51  ;;  %v10915_v32 = vcombine.high %v380_v51, %v380_v51  ;;  %603 = vst [vmem:[#allocation2 + $0x5c] sm:$0x1] %v10916_v25  ;;  %v282_v33 = vor.u32 %v280_v17, %v279_v26  ;;  %12386 = vmatpush3.bf16.msra.mxu1 %v13146_v50  ;;  %v13143_v62 = vld [vmem:[%s18209_s1 + $0x88] sm:$0xff]  }
  0x43   : > { %v397_v35 = vsel %vm13500_vm7, %v279_v26, 0  ;;  %12255 = vmatprep.mubr.bf16.mxu0 %v10964_v23  ;;  %v641_v38 = vld [vmem:[#allocation2 + $0x3c] sm:$0xf]  ;;  %12334 = vmatpush3.bf16.msra.mxu0 %v13130_v36  ;;  %v286_v42 = vrot.slane %v284_v18, 7  ;;  %v294_v28 = vshll.u32 %v13571_v63, 16  ;;  %v298_v45 = vshrl.u32 %v13573_v0, 16 }
  0x44   : > { %v10919_v41 = vcombine.low %v397_v35, %v397_v35  ;;  %v13670_v57 = vrot.slane %v291_v27, 7  ;;  %v13676_v43 = vld [vmem:[#allocation2 + $0x40] sm:$0xf]  ;;  %v819_v39 = vshrl.u32 %v641_v38, 16  ;;  %v822_v44 = vshll.u32 %v641_v38, 16  ;;  %12335 = vmatprep.subr.bf16.mxu0 %v13133_v55  ;;  %12387 = vmatprep.subr.bf16.mxu1 %v13150_v30 }
  0x45   : > { %601 = vst [vmem:[#allocation2 + $0x54] sm:$0xf] %v10914_v31  ;;  %602 = vst [vmem:[#allocation2 + $0x58] sm:$0xf] %v10915_v32  ;;  %v381_v2 = vsel %vm13500_vm7, 0, %v282_v33  ;;  %v828_v46 = vshll.u32 %v13676_v43, 16  ;;  %v10989_v48 = vcombine.low %v641_v38, %v13676_v43  ;;  %v289_v3 = vor.u32 %v287_v29, %v286_v42 }
  0x46   : > { %v832_v63 = vshrl.u32 %v13676_v43, 16  ;;  %v10917_v49 = vcombine.low %v381_v2, %v381_v2  ;;  %606 = vst [vmem:[#allocation2 + $0x68] sm:$0x1] %v10919_v41  ;;  %v821_v47 = vrot.slane %v819_v39, 4  ;;  %v824_v53 = vrot.slane %v822_v44, 5  ;;  %12388 = vmatpush3.bf16.msra.mxu1 %v13150_v30  ;;  %v13148_v33 = vld [vmem:[%s18209_s1 + $0x80] sm:$0xff]  }
  0x47   : > { %v13687_v61 = vld [vmem:[#allocation2 + $0x50] sm:$0x1]  ;;  %v10918_v1 = vcombine.high %v381_v2, %v381_v2  ;;  %v830_v15 = vrot.slane %v828_v46, 5  ;;  %12304 = vmatmul.mubr.bf16.gmra.mxu1 %v10989_v48  ;;  %v398_v7 = vsel %vm13500_vm7, %v286_v42, 0  ;;  %12336 = vmatpush3.bf16.msra.mxu0 %v13133_v55  ;;  %v13696_v11 = vsel %vm13500_vm7, 0, %v289_v3 }
  0x48   : > { %v834_v56 = vrot.slane %v832_v63, 4  ;;  %v862_v6 = vshll.u32 %v13687_v61, 16  ;;  %604 = vst [vmem:[#allocation2 + $0x60] sm:$0xf] %v10917_v49  ;;  %v825_v54 = vor.u32 %v824_v53, %v821_v47  ;;  %v643_v36 = vld [vmem:[#allocation2 + $0x48] sm:$0xf]  ;;  %v10922_v16 = vcombine.low %v398_v7, %v398_v7  ;;  %12337 = vmatprep.subr.bf16.mxu0 %v13138_v34  ;;  %12389 = vmatprep.subr.bf16.mxu1 %v13151_v52 }
  0x49   : > { %v13692_v10 = vld [vmem:[#allocation2 + $0x4c] sm:$0xf]  ;;  %605 = vst [vmem:[#allocation2 + $0x64] sm:$0xf] %v10918_v1  ;;  %v13699_v50 = vor.u32 %v294_v28, %v13670_v57  ;;  %v843_v12 = vshrl.u32 %v643_v36, 16  ;;  %v846_v17 = vshll.u32 %v643_v36, 16 }
  0x4a   : > { %v835_v9 = vor.u32 %v834_v56, %v830_v15  ;;  %v852_v19 = vshll.u32 %v13692_v10, 16  ;;  %v826_v4 = vrot.slane %v825_v54, 4  ;;  %v856_v21 = vshrl.u32 %v13692_v10, 16  ;;  %v13707_v25 = vld [vmem:[#allocation2 + $0x5c] sm:$0x1]  ;;  %12390 = vmatpush3.bf16.msra.mxu1 %v13151_v52 }
  0x4b   : > { %v864_v22 = vrot.slane %v862_v6, 5  ;;  %v10990_v24 = vcombine.low %v643_v36, %v13692_v10  ;;  %609 = vst [vmem:[#allocation2 + $0x74] sm:$0x1] %v10922_v16  ;;  %v845_v55 = vrot.slane %v843_v12, 4  ;;  %v848_v18 = vrot.slane %v846_v17, 5  ;;  %12338 = vmatpush3.bf16.msra.mxu0 %v13138_v34  ;;  %v13728_v52 = vld [vmem:[%s18209_s1 + $0x138] sm:$0xff]  }
  0x4c   : > { %v836_v26 = vrot.slane %v835_v9, 4  ;;  %v854_v23 = vrot.slane %v852_v19, 5  ;;  %v645_v51 = vld [vmem:[#allocation2 + $0x54] sm:$0xf]  ;;  %v831_v29 = vsel %vm13478_vm5, %v826_v4, %v830_v15  ;;  %v858_v27 = vrot.slane %v856_v21, 4  ;;  %12339 = vmatprep.subr.bf16.mxu0 %v13143_v62 }
  0x4d   : > { %12307 = vmatprep.mubr.bf16.mxu1 %v10990_v24  ;;  %v13711_v30 = vld [vmem:[#allocation2 + $0x58] sm:$0xf]  ;;  %v867_v31 = vshrl.u32 %v645_v51, 16  ;;  %v870_v32 = vshll.u32 %v645_v51, 16  ;;  %v849_v38 = vor.u32 %v848_v18, %v845_v55  ;;  %v886_v49 = vshll.u32 %v13707_v25, 16 }
  0x4e   : > { %v841_v35 = vsel %vm13478_vm5, %v836_v26, %v13638_v8  ;;  %v876_v41 = vshll.u32 %v13711_v30, 16  ;;  %v880_v42 = vshrl.u32 %v13711_v30, 16  ;;  %v859_v34 = vor.u32 %v858_v27, %v854_v23  ;;  %v13732_v7 = vld [vmem:[#allocation2 + $0x68] sm:$0x1]  ;;  %v201_v27 = vld [vmem:[%s13456_s16 + $0xb0] sm:$0xff] }
  0x4f   : > { %v10965_v28 = vcombine.low %v831_v29, %v841_v35  ;;  %v869_v39 = vrot.slane %v867_v31, 4  ;;  %v872_v44 = vrot.slane %v870_v32, 5  ;;  %v647_v2 = vld [vmem:[#allocation2 + $0x60] sm:$0xf]  ;;  %v850_v46 = vrot.slane %v849_v38, 4  ;;  %12340 = vmatpush3.bf16.msra.mxu0 %v13143_v62  ;;  %v202_v31 = vld [vmem:[%s13456_s16 + $0xb8] sm:$0xff] }
  0x50   : > { %v878_v63 = vrot.slane %v876_v41, 5  ;;  %v882_v48 = vrot.slane %v880_v42, 4  ;;  %v13722_v47 = vld [vmem:[#allocation2 + $0x64] sm:$0xf]  ;;  %v860_v8 = vrot.slane %v859_v34, 4  ;;  %v10991_v1 = vcombine.low %v645_v51, %v13711_v30  ;;  %12341 = vmatprep.subr.bf16.mxu0 %v13148_v33  ;;  %v205_v35 = vld [vmem:[%s13456_s16 + $0xd0] sm:$0xff] }
  0x51   : > { %12256 = vmatmul.mubr.bf16.gmra.mxu0 %v10965_v28  ;;  %v873_v53 = vor.u32 %v872_v44, %v869_v39  ;;  %v891_v3 = vshrl.u32 %v647_v2, 16  ;;  %v855_v15 = vsel %vm13478_vm5, %v850_v46, %v854_v23  ;;  %v888_v6 = vrot.slane %v886_v49, 5  ;;  %v203_v32 = vld [vmem:[%s13456_s16 + $0xc0] sm:$0xff]  ;;  %v206_v38 = vld [vmem:[%s13456_s16 + $0xd8] sm:$0xff]  ;;  %v208_v44 = vld [vmem:[%s13456_s16 + $0xe8] sm:$0xff] }
  0x52   : > { %v883_v56 = vor.u32 %v882_v48, %v878_v63  ;;  %v894_v54 = vshll.u32 %v647_v2, 16  ;;  %v865_v36 = vsel %vm13478_vm5, %v860_v8, %v864_v22  ;;  %12308 = vmatmul.mubr.bf16.gmra.mxu1 %v10991_v1  ;;  %v900_v9 = vshll.u32 %v13722_v47, 16  ;;  %v13738_v21 = vld [vmem:[#allocation2 + $0x74] sm:$0x1]  ;;  %v207_v39 = vld [vmem:[%s13456_s16 + $0xe0] sm:$0xff]  ;;  %v13769_v49 = vld [vmem:[%s18209_s1 + $0x178] sm:$0xff]  }
  0x53   : > { %v874_v16 = vrot.slane %v873_v53, 4  ;;  %v893_v62 = vrot.slane %v891_v3, 4  ;;  %v10966_v12 = vcombine.low %v855_v15, %v865_v36  ;;  %v904_v4 = vshrl.u32 %v13722_v47, 16  ;;  %12342 = vmatpush3.bf16.msra.mxu0 %v13148_v33  ;;  %v204_v33 = vld [vmem:[%s13456_s16 + $0xc8] sm:$0xff]  ;;  %v13773_v3 = vld [vmem:[#allocation2] sm:$0xe]  ;;  %12471 = vmatprep.subr.bf16.mxu1 %v13769_v49 }
  0x54   : > { %v884_v17 = vrot.slane %v883_v56, 4  ;;  %v896_v19 = vrot.slane %v894_v54, 5  ;;  %v902_v24 = vrot.slane %v900_v9, 5  ;;  %v910_v26 = vshll.u32 %v13732_v7, 16  ;;  %12423 = vmatprep.subr.bf16.mxu0 %v13728_v52  ;;  %v13356_v37 = vld [vmem:[#allocation2 + $0x40] sm:$0xf] }
  0x55   : > { %v879_v22 = vsel %vm13478_vm5, %v874_v16, %v878_v63  ;;  %v10992_v55 = vcombine.low %v647_v2, %v13722_v47  ;;  %12259 = vmatprep.mubr.bf16.mxu0 %v10966_v12  ;;  %v906_v51 = vrot.slane %v904_v4, 4  ;;  %v10920_v29 = vcombine.low %v13696_v11, %v13696_v11 }
  0x56   : > { %v889_v18 = vsel %vm13478_vm5, %v884_v17, %v888_v6  ;;  %v897_v23 = vor.u32 %v896_v19, %v893_v62  ;;  %v912_v42 = vrot.slane %v910_v26, 5  ;;  %v10921_v28 = vcombine.high %v13696_v11, %v13696_v11 }
  0x57   : > { %v10967_v41 = vcombine.low %v879_v22, %v889_v18  ;;  %12311 = vmatprep.mubr.bf16.mxu1 %v10992_v55  ;;  %v934_v34 = vshll.u32 %v13738_v21, 16  ;;  %v907_v46 = vor.u32 %v906_v51, %v902_v24  ;;  %607 = vst [vmem:[#allocation2 + $0x6c] sm:$0xf] %v10920_v29  ;;  %v383_v63 = vsel %vm13500_vm7, 0, %v13699_v50 }
  0x58   : > { %v898_v2 = vrot.slane %v897_v23, 4  ;;  %v399_v48 = vsel %vm13500_vm7, %v13670_v57, 0  ;;  %608 = vst [vmem:[#allocation2 + $0x70] sm:$0xf] %v10921_v28  ;;  %v10923_v8 = vcombine.low %v383_v63, %v383_v63  ;;  %v10924_v53 = vcombine.high %v383_v63, %v383_v63 }
  0x59   : > { %12260 = vmatmul.mubr.bf16.gmra.mxu0 %v10967_v41  ;;  %v13771_v11 = vrot.slane %v934_v34, 5  ;;  %v10925_v1 = vcombine.low %v399_v48, %v399_v48  ;;  %v908_v15 = vrot.slane %v907_v46, 4  ;;  %v300_v57 = vrot.slane %v298_v45, 7 }
  0x5a   : > { %v903_v50 = vsel %vm13478_vm5, %v898_v2, %v902_v24  ;;  %v301_v56 = vshll.u32 %v13573_v0, 16  ;;  %610 = vst [vmem:[#allocation2 + $0x78] sm:$0xf] %v10923_v8  ;;  %611 = vst [vmem:[#allocation2 + $0x7c] sm:$0xf] %v10924_v53  ;;  %v222_v6 = vpack.c.bf16 %v202_v31, %v201_v27  ;;  %v223_v54 = vpack.c.bf16 %v204_v33, %v203_v32 }
  0x5b   : > { %612 = vst [vmem:[#allocation2 + $0x80] sm:$0x1] %v10925_v1  ;;  %v224_v36 = vpack.c.bf16 %v206_v38, %v205_v35  ;;  %v13781_v16 = vpack.c.bf16 %v208_v44, %v207_v39  ;;  %v913_v62 = vsel %vm13478_vm5, %v908_v15, %v912_v42  ;;  %v400_v12 = vsel %vm13500_vm7, %v300_v57, 0 }
  0x5c   : > { %v303_v9 = vor.u32 %v301_v56, %v300_v57  ;;  %v11008_v45 = vrot.slane %v13773_v3, 9  ;;  %v10968_v0 = vcombine.low %v903_v50, %v913_v62  ;;  %v10928_v17 = vcombine.low %v400_v12, %v400_v12 }
  0x5d   : > { %v305_v19 = vshrl.u32 %v222_v6, 16  ;;  %v308_v4 = vshll.u32 %v222_v6, 16  ;;  %v312_v24 = vshrl.u32 %v223_v54, 16  ;;  %v315_v26 = vshll.u32 %v223_v54, 16 }
  0x5e   : > { %v384_v22 = vsel %vm13500_vm7, 0, %v303_v9  ;;  %v319_v55 = vshrl.u32 %v224_v36, 16  ;;  %12263 = vmatprep.mubr.bf16.mxu0 %v10968_v0  ;;  %v649_v18 = vld [vmem:[#allocation2 + $0x6c] sm:$0xf]  ;;  %615 = vst [vmem:[#allocation2 + $0x8c] sm:$0x1] %v10928_v17 }
  0x5f   : > { %v10926_v23 = vcombine.low %v384_v22, %v384_v22  ;;  %v10927_v51 = vcombine.high %v384_v22, %v384_v22  ;;  %v307_v29 = vrot.slane %v305_v19, 7  ;;  %v322_v27 = vshll.u32 %v224_v36, 16  ;;  %v13790_v31 = vld [vmem:[#allocation2 + $0x70] sm:$0xf] }
  0x60   : > { %v915_v32 = vshrl.u32 %v649_v18, 16  ;;  %v918_v33 = vshll.u32 %v649_v18, 16  ;;  %v13792_v35 = vrot.slane %v312_v24, 7  ;;  %v13794_v38 = vrot.slane %v319_v55, 7 }
  0x61   : > { %v924_v41 = vshll.u32 %v13790_v31, 16  ;;  %v928_v42 = vshrl.u32 %v13790_v31, 16  ;;  %v10993_v28 = vcombine.low %v649_v18, %v13790_v31  ;;  %613 = vst [vmem:[#allocation2 + $0x84] sm:$0xf] %v10926_v23  ;;  %614 = vst [vmem:[#allocation2 + $0x88] sm:$0xf] %v10927_v51  ;;  %v310_v34 = vor.u32 %v308_v4, %v307_v29 }
  0x62   : > { %v917_v39 = vrot.slane %v915_v32, 4  ;;  %v920_v44 = vrot.slane %v918_v33, 5  ;;  %v651_v2 = vld [vmem:[#allocation2 + $0x78] sm:$0xf]  ;;  %v13799_v46 = vld [vmem:[#allocation2 + $0x7c] sm:$0xf]  ;;  %v317_v63 = vor.u32 %v315_v26, %v13792_v35  ;;  %v324_v48 = vor.u32 %v322_v27, %v13794_v38 }
  0x63   : > { %v926_v8 = vrot.slane %v924_v41, 5  ;;  %v930_v53 = vrot.slane %v928_v42, 4  ;;  %12312 = vmatmul.mubr.bf16.gmra.mxu1 %v10993_v28  ;;  %v13803_v1 = vld [vmem:[#allocation2 + $0x80] sm:$0x1]  ;;  %v939_v50 = vshrl.u32 %v651_v2, 16  ;;  %v942_v15 = vshll.u32 %v651_v2, 16 }
  0x64   : > { %v921_v57 = vor.u32 %v920_v44, %v917_v39  ;;  %v948_v56 = vshll.u32 %v13799_v46, 16  ;;  %v952_v6 = vshrl.u32 %v13799_v46, 16  ;;  %v958_v54 = vshll.u32 %v13803_v1, 16 }
  0x65   : > { %v931_v36 = vor.u32 %v930_v53, %v926_v8  ;;  %v941_v62 = vrot.slane %v939_v50, 4  ;;  %v944_v9 = vrot.slane %v942_v15, 5  ;;  %v10994_v12 = vcombine.low %v651_v2, %v13799_v46  ;;  %v13809_v22 = vld [vmem:[#allocation2 + $0x8c] sm:$0x1] }
  0x66   : > { %v922_v0 = vrot.slane %v921_v57, 4  ;;  %v950_v17 = vrot.slane %v948_v56, 5  ;;  %v954_v19 = vrot.slane %v952_v6, 4  ;;  %v960_v4 = vrot.slane %v958_v54, 5 }
  0x67   : > { %v932_v24 = vrot.slane %v931_v36, 4  ;;  %v945_v26 = vor.u32 %v944_v9, %v941_v62  ;;  %12315 = vmatprep.mubr.bf16.mxu1 %v10994_v12  ;;  %v982_v55 = vshll.u32 %v13809_v22, 16  ;;  %v385_v18 = vsel %vm13500_vm7, 0, %v310_v34 }
  0x68   : > { %v927_v23 = vsel %vm13478_vm5, %v922_v0, %v926_v8  ;;  %v955_v51 = vor.u32 %v954_v19, %v950_v17  ;;  %v653_v27 = vld [vmem:[#allocation2 + $0x84] sm:$0xf]  ;;  %v13816_v32 = vld [vmem:[#allocation2 + $0x88] sm:$0xf]  ;;  %v401_v33 = vsel %vm13500_vm7, %v307_v29, 0  ;;  %v10929_v41 = vcombine.low %v385_v18, %v385_v18 }
  0x69   : > { %v937_v42 = vsel %vm13478_vm5, %v932_v24, %v13771_v11  ;;  %v946_v28 = vrot.slane %v945_v26, 4  ;;  %v963_v39 = vshrl.u32 %v653_v27, 16  ;;  %v966_v44 = vshll.u32 %v653_v27, 16 }
  0x6a   : > { %v10969_v2 = vcombine.low %v927_v23, %v937_v42  ;;  %v956_v34 = vrot.slane %v955_v51, 4  ;;  %v972_v53 = vshll.u32 %v13816_v32, 16  ;;  %v976_v8 = vshrl.u32 %v13816_v32, 16  ;;  %616 = vst [vmem:[#allocation2 + $0x90] sm:$0xf] %v10929_v41 }
  0x6b   : > { %v951_v50 = vsel %vm13478_vm5, %v946_v28, %v950_v17  ;;  %v965_v15 = vrot.slane %v963_v39, 4  ;;  %v968_v29 = vrot.slane %v966_v44, 5  ;;  %v984_v57 = vrot.slane %v982_v55, 5  ;;  %v1678_v23 = vld [vmem:[#allocation2 + $0xc] sm:$0xe] }
  0x6c   : > { %12264 = vmatmul.mubr.bf16.gmra.mxu0 %v10969_v2  ;;  %v961_v11 = vsel %vm13478_vm5, %v956_v34, %v960_v4  ;;  %v974_v56 = vrot.slane %v972_v53, 5  ;;  %v978_v6 = vrot.slane %v976_v8, 4  ;;  %v10995_v54 = vcombine.low %v653_v27, %v13816_v32  ;;  %v13854_v34 = vld [vmem:[#allocation2 + $0x18] sm:$0xe] }
  0x6d   : > { %v10970_v36 = vcombine.low %v951_v50, %v961_v11  ;;  %v969_v62 = vor.u32 %v968_v29, %v965_v15  ;;  %v10930_v9 = vcombine.high %v385_v18, %v385_v18  ;;  %v10931_v12 = vcombine.low %v401_v33, %v401_v33 }
  0x6e   : > { %v979_v0 = vor.u32 %v978_v6, %v974_v56  ;;  %12316 = vmatmul.mubr.bf16.gmra.mxu1 %v10995_v54  ;;  %v386_v17 = vsel %vm13500_vm7, 0, %v317_v63  ;;  %v402_v19 = vsel %vm13500_vm7, %v13792_v35, 0  ;;  %v387_v4 = vsel %vm13500_vm7, 0, %v324_v48 }
  0x6f   : > { %12267 = vmatprep.mubr.bf16.mxu0 %v10970_v36  ;;  %v970_v24 = vrot.slane %v969_v62, 4  ;;  %617 = vst [vmem:[#allocation2 + $0x94] sm:$0xf] %v10930_v9  ;;  %618 = vst [vmem:[#allocation2 + $0x98] sm:$0x1] %v10931_v12  ;;  %v10932_v26 = vcombine.low %v386_v17, %v386_v17  ;;  %v10933_v55 = vcombine.high %v386_v17, %v386_v17  ;;  %v403_v63 = vsel %vm13500_vm7, %v13794_v38, 0 }
  0x70   : > { %v10934_v18 = vcombine.low %v402_v19, %v402_v19  ;;  %v980_v51 = vrot.slane %v979_v0, 4  ;;  %v10935_v27 = vcombine.low %v387_v4, %v387_v4  ;;  %v10936_v33 = vcombine.high %v387_v4, %v387_v4  ;;  %v13870_v9 = vld [vmem:[#allocation2 + $0x20] sm:$0x1] }
  0x71   : > { %v975_v35 = vsel %vm13478_vm5, %v970_v24, %v974_v56  ;;  %v655_v41 = vld [vmem:[#allocation2 + $0x90] sm:$0xf]  ;;  %619 = vst [vmem:[#allocation2 + $0x9c] sm:$0xf] %v10932_v26  ;;  %620 = vst [vmem:[#allocation2 + $0xa0] sm:$0xf] %v10933_v55  ;;  %v10937_v48 = vcombine.low %v403_v63, %v403_v63  ;;  %v13852_v38 = vsel %vm13519_vm8, %v11008_v45, %v1730_v40 }
  0x72   : > { %621 = vst [vmem:[#allocation2 + $0xa4] sm:$0x1] %v10934_v18  ;;  %v326_v42 = vshrl.u32 %v13781_v16, 16  ;;  %v329_v28 = vshll.u32 %v13781_v16, 16  ;;  %v985_v39 = vsel %vm13478_vm5, %v980_v51, %v984_v57  ;;  %v987_v44 = vshrl.u32 %v655_v41, 16 }
  0x73   : > { %v990_v2 = vshll.u32 %v655_v41, 16  ;;  %622 = vst [vmem:[#allocation2 + $0xa8] sm:$0xf] %v10935_v27  ;;  %623 = vst [vmem:[#allocation2 + $0xac] sm:$0xf] %v10936_v33  ;;  %v1740_v53 = vrot.slane %v13567_v60, 5  ;;  %v10971_v16 = vcombine.low %v975_v35, %v985_v39 }
  0x74   : > { %624 = vst [vmem:[#allocation2 + $0xb0] sm:$0x1] %v10937_v48  ;;  %v328_v8 = vrot.slane %v326_v42, 7  ;;  %v989_v15 = vrot.slane %v987_v44, 4  ;;  %v11009_v57 = vrot.slane %v1678_v23, 9  ;;  %v1737_v14 = vrot.slane %v13580_v5, 5 }
  0x75   : > { %v992_v29 = vrot.slane %v990_v2, 5  ;;  %12268 = vmatmul.mubr.bf16.gmra.mxu0 %v10971_v16  ;;  %v11010_v45 = vrot.slane %v13854_v34, 9  ;;  %v1744_v11 = vrot.slane %v13589_v20, 5 }
  0x76   : > { %v331_v3 = vor.u32 %v329_v28, %v328_v8  ;;  %v404_v40 = vsel %vm13500_vm7, %v328_v8, 0  ;;  %v13864_v56 = vld [vmem:[#allocation2 + $0x94] sm:$0xf]  ;;  %v13866_v6 = vld [vmem:[#allocation2 + $0x98] sm:$0x1]  ;;  %v13868_v62 = vrot.slane %v1737_v14, 4  ;;  %v13883_v18 = vsel %vm13519_vm8, %v11009_v57, %v1737_v14 }
  0x77   : > { %v993_v54 = vor.u32 %v992_v29, %v989_v15  ;;  %v10940_v36 = vcombine.low %v404_v40, %v404_v40  ;;  %v996_v12 = vshll.u32 %v13864_v56, 16  ;;  %v1000_v0 = vshrl.u32 %v13864_v56, 16 }
  0x78   : > { %v1006_v17 = vshll.u32 %v13866_v6, 16  ;;  %v10996_v19 = vcombine.low %v655_v41, %v13864_v56  ;;  %v657_v24 = vld [vmem:[#allocation2 + $0x9c] sm:$0xf]  ;;  %v13877_v26 = vld [vmem:[#allocation2 + $0xa0] sm:$0xf]  ;;  %v388_v55 = vsel %vm13500_vm7, 0, %v331_v3  ;;  %v13927_v60 = vsel %vm13519_vm8, %v11010_v45, %v1744_v11 }
  0x79   : > { %v994_v4 = vrot.slane %v993_v54, 4  ;;  %627 = vst [vmem:[#allocation2 + $0xbc] sm:$0x1] %v10940_v36  ;;  %v998_v23 = vrot.slane %v996_v12, 5  ;;  %v1002_v51 = vrot.slane %v1000_v0, 4  ;;  %v1011_v33 = vshrl.u32 %v657_v24, 16 }
  0x7a   : > { %v1008_v63 = vrot.slane %v1006_v17, 5  ;;  %12319 = vmatprep.mubr.bf16.mxu1 %v10996_v19  ;;  %v13885_v27 = vld [vmem:[#allocation2 + $0xa4] sm:$0x1]  ;;  %v1014_v35 = vshll.u32 %v657_v24, 16  ;;  %v1020_v41 = vshll.u32 %v13877_v26, 16  ;;  %v1024_v48 = vshrl.u32 %v13877_v26, 16 }
  0x7b   : > { %v1030_v42 = vshll.u32 %v13885_v27, 16  ;;  %v659_v28 = vld [vmem:[#allocation2 + $0xa8] sm:$0xf]  ;;  %v999_v39 = vsel %vm13478_vm5, %v994_v4, %v998_v23  ;;  %v1003_v44 = vor.u32 %v1002_v51, %v998_v23  ;;  %v1013_v2 = vrot.slane %v1011_v33, 4  ;;  %v13893_v8 = vld [vmem:[#allocation2 + $0xac] sm:$0xf] }
  0x7c   : > { %v10997_v16 = vcombine.low %v657_v24, %v13877_v26  ;;  %v13895_v15 = vld [vmem:[#allocation2 + $0xb0] sm:$0x1]  ;;  %v1016_v29 = vrot.slane %v1014_v35, 5  ;;  %v1022_v57 = vrot.slane %v1020_v41, 5  ;;  %v1026_v14 = vrot.slane %v1024_v48, 4 }
  0x7d   : > { %v1032_v3 = vrot.slane %v1030_v42, 5  ;;  %v1004_v40 = vrot.slane %v1003_v44, 4  ;;  %v1035_v54 = vshrl.u32 %v659_v28, 16  ;;  %v1038_v36 = vshll.u32 %v659_v28, 16 }
  0x7e   : > { %12320 = vmatmul.mubr.bf16.gmra.mxu1 %v10997_v16  ;;  %v1044_v12 = vshll.u32 %v13893_v8, 16  ;;  %v1017_v0 = vor.u32 %v1016_v29, %v1013_v2  ;;  %v1027_v17 = vor.u32 %v1026_v14, %v1022_v57  ;;  %v1048_v19 = vshrl.u32 %v13893_v8, 16  ;;  %v1680_v14 = vld [vmem:[#allocation2 + $0x24] sm:$0xe] }
  0x7f   : > { %v1054_v4 = vshll.u32 %v13895_v15, 16  ;;  %v1009_v24 = vsel %vm13478_vm5, %v1004_v40, %v1008_v63  ;;  %v1037_v23 = vrot.slane %v1035_v54, 4  ;;  %v1040_v51 = vrot.slane %v1038_v36, 5 }
  0x80   : > { %v1046_v33 = vrot.slane %v1044_v12, 5  ;;  %v13902_v35 = vld [vmem:[#allocation2 + $0xbc] sm:$0x1]  ;;  %v10972_v41 = vcombine.low %v999_v39, %v1009_v24  ;;  %v1018_v48 = vrot.slane %v1017_v0, 4  ;;  %v1028_v42 = vrot.slane %v1027_v17, 4 }
  0x81   : > { %v1050_v44 = vrot.slane %v1048_v19, 4  ;;  %v1041_v16 = vor.u32 %v1040_v51, %v1037_v23  ;;  %v1056_v50 = vrot.slane %v1054_v4, 5  ;;  %v10998_v2 = vcombine.low %v659_v28, %v13893_v8  ;;  %v1681_v0 = vld [vmem:[#allocation2 + $0x30] sm:$0xe]  ;;  %v1682_v4 = vld [vmem:[#allocation2 + $0x3c] sm:$0xe] }
  0x82   : > { %v10938_v29 = vcombine.low %v388_v55, %v388_v55  ;;  %12271 = vmatprep.mubr.bf16.mxu0 %v10972_v41  ;;  %v1023_v5 = vsel %vm13478_vm5, %v1018_v48, %v1022_v57  ;;  %v1033_v63 = vsel %vm13478_vm5, %v1028_v42, %v1032_v3  ;;  %v10939_v54 = vcombine.high %v388_v55, %v388_v55 }
  0x83   : > { %v1051_v40 = vor.u32 %v1050_v44, %v1046_v33  ;;  %v10973_v36 = vcombine.low %v1023_v5, %v1033_v63  ;;  %v1042_v39 = vrot.slane %v1041_v16, 4  ;;  %12323 = vmatprep.mubr.bf16.mxu1 %v10998_v2  ;;  %v1078_v12 = vshll.u32 %v13902_v35, 16  ;;  %v13345_v5 = vld [vmem:[#allocation2 + $0x28] sm:$0xf] }
  0x84   : > { %625 = vst [vmem:[#allocation2 + $0xb4] sm:$0xf] %v10938_v29  ;;  %v13915_v28 = vsel %vm13519_vm8, %v13868_v62, %v1740_v53  ;;  %626 = vst [vmem:[#allocation2 + $0xb8] sm:$0xf] %v10939_v54  ;;  %v1746_v3 = vrot.slane %v1744_v11, 4  ;;  %v11011_v55 = vrot.slane %v1680_v14, 9 }
  0x85   : > { %v1052_v57 = vrot.slane %v1051_v40, 4  ;;  %v1751_v17 = vrot.slane %v13345_v5, 5  ;;  %12272 = vmatmul.mubr.bf16.gmra.mxu0 %v10973_v36  ;;  %v1047_v19 = vsel %vm13478_vm5, %v1042_v39, %v1046_v33  ;;  %v13346_v53 = vld [vmem:[#allocation2 + $0x2c] sm:$0x1]  ;;  %v18243_v23 = vrot.slane %v13870_v9, 5 }
  0x86   : > { %v1754_v62 = vrot.slane %v13346_v53, 5  ;;  %v11012_v20 = vrot.slane %v1681_v0, 9  ;;  %v11041_v34 = vcombine.low %v13883_v18, %v13915_v28  ;;  %v13347_v11 = vld [vmem:[#allocation2 + $0x34] sm:$0xf]  ;;  %v13943_v42 = vrot.slane %v1078_v12, 5  ;;  %v13160_v18 = vld [vmem:[#allocation2 + $0x48] sm:$0xff]  }
  0x87   : > { %v1057_v24 = vsel %vm13478_vm5, %v1052_v57, %v1056_v50  ;;  %v13935_v51 = vsel %vm13519_vm8, %v1746_v3, %v18243_v23  ;;  %v1753_v33 = vrot.slane %v1751_v17, 4  ;;  %v13941_v45 = vsel %vm13519_vm8, %v11011_v55, %v1751_v17  ;;  %v1683_v16 = vld [vmem:[#allocation2 + $0x48] sm:$0xe]  ;;  %v13348_v14 = vld [vmem:[#allocation2 + $0x38] sm:$0x1]  ;;  %v13153_v17 = vld [vmem:[#allocation2 + $0xc] sm:$0xff]  }
  0x88   : > { %v10974_v41 = vcombine.low %v1047_v19, %v1057_v24  ;;  %v1758_v48 = vrot.slane %v13347_v11, 5  ;;  %v11013_v9 = vrot.slane %v1682_v4, 9  ;;  %v1765_v44 = vrot.slane %v13676_v43, 5  ;;  %v13349_v40 = vld [vmem:[#allocation2 + $0x44] sm:$0x1] }
  0x89   : > { %v13947_v50 = vsel %vm13519_vm8, %v1753_v33, %v1754_v62  ;;  %v11042_v2 = vcombine.low %v13927_v60, %v13935_v51  ;;  %v1761_v63 = vrot.slane %v13348_v14, 5  ;;  %v1768_v54 = vrot.slane %v13349_v40, 5  ;;  %v1684_v57 = vld [vmem:[#allocation2 + $0x54] sm:$0xe] }
  0x8a   : > { %12275 = vmatprep.mubr.bf16.mxu0 %v10974_v41  ;;  %v1760_v29 = vrot.slane %v1758_v48, 4  ;;  %v11043_v39 = vcombine.low %v13941_v45, %v13947_v50  ;;  %v13956_v12 = vsel %vm13519_vm8, %v11012_v20, %v1758_v48  ;;  %v1767_v0 = vrot.slane %v1765_v44, 4 }
  0x8b   : > { %v661_v36 = vld [vmem:[#allocation2 + $0xb4] sm:$0xf]  ;;  %v1772_v43 = vrot.slane %v13692_v10, 5  ;;  %v13959_v3 = vld [vmem:[#allocation2 + $0xb8] sm:$0xf]  ;;  %v13963_v19 = vsel %vm13519_vm8, %v11013_v9, %v1765_v44  ;;  %v11014_v53 = vrot.slane %v1683_v16, 9 }
  0x8c   : > { %v1059_v55 = vshrl.u32 %v661_v36, 16  ;;  %v1062_v5 = vshll.u32 %v661_v36, 16  ;;  %v1068_v62 = vshll.u32 %v13959_v3, 16  ;;  %v1072_v4 = vshrl.u32 %v13959_v3, 16  ;;  %v1685_v16 = vld [vmem:[#allocation2 + $0x60] sm:$0xe] }
  0x8d   : > { %v10999_v24 = vcombine.low %v661_v36, %v13959_v3  ;;  %v1775_v23 = vrot.slane %v13687_v61, 5  ;;  %v13971_v20 = vsel %vm13519_vm8, %v1760_v29, %v1761_v63  ;;  %v11015_v41 = vrot.slane %v1684_v57, 9  ;;  %v1686_v57 = vld [vmem:[#allocation2 + $0x6c] sm:$0xe] }
  0x8e   : > { %v1061_v10 = vrot.slane %v1059_v55, 4  ;;  %v1064_v33 = vrot.slane %v1062_v5, 5  ;;  %v1070_v11 = vrot.slane %v1068_v62, 5  ;;  %v1074_v48 = vrot.slane %v1072_v4, 4 }
  0x8f   : > { %12324 = vmatmul.mubr.bf16.gmra.mxu1 %v10999_v24  ;;  %v13975_v9 = vsel %vm13519_vm8, %v1767_v0, %v1768_v54  ;;  %v1774_v44 = vrot.slane %v1772_v43, 4  ;;  %v13979_v61 = vsel %vm13519_vm8, %v11014_v53, %v1772_v43  ;;  %v1779_v40 = vrot.slane %v13711_v30, 5  ;;  %v1687_v30 = vld [vmem:[#allocation2 + $0x78] sm:$0xe] }
  0x90   : > { %v1065_v14 = vor.u32 %v1064_v33, %v1061_v10  ;;  %12391 = vmatprep.mubr.bf16.mxu1 %v13153_v17  ;;  %v1782_v29 = vrot.slane %v13707_v25, 5  ;;  %v1075_v63 = vor.u32 %v1074_v48, %v1070_v11  ;;  %v11044_v36 = vcombine.low %v13956_v12, %v13971_v20  ;;  %v13154_v25 = vld [vmem:[#allocation2 + $0x18] sm:$0xff]  }
  0x91   : > { %v13987_v54 = vsel %vm13519_vm8, %v1774_v44, %v1775_v23  ;;  %v1786_v0 = vrot.slane %v13722_v47, 5  ;;  %v11045_v43 = vcombine.low %v13963_v19, %v13975_v9  ;;  %v1781_v5 = vrot.slane %v1779_v40, 4  ;;  %v13156_v23 = vld [vmem:[#allocation2 + $0x24] sm:$0xff]   ;;  %v13166_v9 = vld [vmem:[#allocation2 + $0x78] sm:$0xff]  }
  0x92   : > { %v1066_v55 = vrot.slane %v1065_v14, 4  ;;  %v11016_v17 = vrot.slane %v1685_v16, 9  ;;  %v1076_v53 = vrot.slane %v1075_v63, 4  ;;  %v13996_v4 = vsel %vm13519_vm8, %v11015_v41, %v1779_v40  ;;  %v1688_v44 = vld [vmem:[#allocation2 + $0x84] sm:$0xe] }
  0x93   : > { %v1789_v24 = vrot.slane %v13732_v7, 5  ;;  %v14003_v10 = vsel %vm13519_vm8, %v1781_v5, %v1782_v29  ;;  %v1788_v33 = vrot.slane %v1786_v0, 4  ;;  %v1793_v48 = vrot.slane %v13790_v31, 5  ;;  %v1689_v40 = vld [vmem:[#allocation2 + $0x90] sm:$0xe] }
  0x94   : > { %v1071_v47 = vsel %vm13478_vm5, %v1066_v55, %v1070_v11  ;;  %v1081_v16 = vsel %vm13478_vm5, %v1076_v53, %v13943_v42  ;;  %v11017_v41 = vrot.slane %v1686_v57, 9  ;;  %v1796_v14 = vrot.slane %v13738_v21, 5  ;;  %v13168_v31 = vld [vmem:[%s18209_s1 + $0x170] sm:$0xff]   ;;  %v3303_v11 = vld [vmem:[#allocation2 + $0x18] sm:$0xe] }
  0x95   : > { %v11018_v7 = vrot.slane %v1687_v30, 9  ;;  %v10975_v63 = vcombine.low %v1071_v47, %v1081_v16  ;;  %v14014_v29 = vsel %vm13519_vm8, %v11016_v17, %v1786_v0  ;;  %v1795_v55 = vrot.slane %v1793_v48, 4  ;;  %v1690_v47 = vld [vmem:[#allocation2 + $0x9c] sm:$0xe] }
  0x96   : > { %v1800_v42 = vrot.slane %v13799_v46, 5  ;;  %v1803_v21 = vrot.slane %v13803_v1, 5  ;;  %v11019_v57 = vrot.slane %v1688_v44, 9  ;;  %v1807_v5 = vrot.slane %v13816_v32, 5  ;;  %v13157_v1 = vld [vmem:[#allocation2 + $0x30] sm:$0xff]  }
  0x97   : > { %12392 = vmatmul.mubr.bf16.vlgmr.msra.gmra.mxu1 %v13154_v25  ;;  %12276 = vmatmul.mubr.bf16.gmra.mxu0 %v10975_v63  ;;  %v14024_v30 = vsel %vm13519_vm8, %v1788_v33, %v1789_v24  ;;  %v1810_v0 = vrot.slane %v13809_v22, 5  ;;  %v11020_v17 = vrot.slane %v1689_v40, 9  ;;  %v1814_v53 = vrot.slane %v13864_v56, 5  ;;  %v13172_v24 = vld [vmem:[%s18209_s1 + $0x168] sm:$0xff]  }
  0x98   : > { %12395 = vmatprep.mubr.bf16.mxu1 %v13156_v23  ;;  %v18244_v46 = vcombine.low %v13852_v38, %v13565_v59  ;;  %v14033_v32 = vsel %vm13519_vm8, %v11017_v41, %v1793_v48  ;;  %v14037_v25 = vsel %vm13519_vm8, %v1795_v55, %v1796_v14  ;;  %12472 = vmatpush3.bf16.msra.mxu1 %v13769_v49  ;;  %v1802_v56 = vrot.slane %v1800_v42, 4  ;;  %v1691_v33 = vld [vmem:[#allocation2 + $0xa8] sm:$0xe]  ;;  %v13159_v48 = vld [vmem:[#allocation2 + $0x3c] sm:$0xff]  }
  0x99   : > { %v14042_v22 = vsel %vm13519_vm8, %v11018_v7, %v1800_v42  ;;  %12473 = vmatprep.subr.bf16.mxu1 %v13168_v31  ;;  %v14046_v59 = vsel %vm13519_vm8, %v11019_v57, %v1807_v5  ;;  %v1809_v38 = vrot.slane %v1807_v5, 4  ;;  %v1816_v23 = vrot.slane %v1814_v53, 4  ;;  %v1692_v7 = vld [vmem:[#allocation2 + $0xb4] sm:$0xe] }
  0x9a   : > { %12343 = vmatprep.mubr.bf16.mxu0 %v18244_v46  ;;  %v1817_v49 = vrot.slane %v13866_v6, 5  ;;  %v14054_v44 = vsel %vm13519_vm8, %v1802_v56, %v1803_v21  ;;  %v11021_v16 = vrot.slane %v1690_v47, 9  ;;  %v1821_v41 = vrot.slane %v13877_v26, 5  ;;  %v209_v42 = vld [vmem:[%s13456_s16 + $0xf0] sm:$0xff]  ;;  %v210_v21 = vld [vmem:[%s13456_s16 + $0xf8] sm:$0xff]  ;;  %v13173_v56 = vld [vmem:[%s18209_s1 + $0x160] sm:$0xff]  }
  0x9b   : > { %v1824_v14 = vrot.slane %v13885_v27, 5  ;;  %v14064_v6 = vsel %vm13519_vm8, %v1809_v38, %v1810_v0  ;;  %v14068_v55 = vsel %vm13519_vm8, %v11020_v17, %v1814_v53  ;;  %v2548_v26 = vld [vmem:[#allocation2 + $0xc] sm:$0xf]  ;;  %v11022_v47 = vrot.slane %v1691_v33, 9  ;;  %v13155_v0 = vld [vmem:[%s18209_s1 + $0x130] sm:$0xff]  }
  0x9c   : > { %12474 = vmatpush3.bf16.msra.mxu1 %v13168_v31  ;;  %v14076_v57 = vsel %vm13519_vm8, %v1816_v23, %v1817_v49  ;;  %v1823_v5 = vrot.slane %v1821_v41, 4  ;;  %v14085_v53 = vsel %vm13519_vm8, %v11021_v16, %v1821_v41  ;;  %v1828_v31 = vrot.slane %v13893_v8, 5  ;;  %v14096_v33 = vld [vmem:[#allocation2 + $0x10] sm:$0xf]  ;;  %v14104_v8 = vld [vmem:[%s18209_s1 + $0x128] sm:$0xff]  }
  0x9d   : > { %12475 = vmatprep.subr.bf16.mxu1 %v13172_v24  ;;  %v11023_v46 = vrot.slane %v1692_v7, 9  ;;  %v1835_v23 = vrot.slane %v13959_v3, 5  ;;  %v226_v49 = vpack.c.bf16 %v210_v21, %v209_v42  ;;  %v2597_v17 = vshrl.u32 %v2548_v26, 16  ;;  %v2551_v7 = vld [vmem:[#allocation2 + $0x18] sm:$0xf] }
  0x9e   : > { %v14093_v38 = vsel %vm13519_vm8, %v1823_v5, %v1824_v14  ;;  %v1830_v16 = vrot.slane %v1828_v31, 4  ;;  %v1831_v3 = vrot.slane %v13895_v15, 5  ;;  %v1838_v41 = vrot.slane %v13902_v35, 5  ;;  %v14110_v14 = vld [vmem:[#allocation2 + $0x14] sm:$0x1]  ;;  %v13177_v5 = vld [vmem:[%s18209_s1 + $0x158] sm:$0xff]  }
  0x9f   : > { %12396 = vmatmul.mubr.bf16.gmra.mxu1 %v13157_v1  ;;  %12344 = vmatmul.mubr.bf16.vlgmr.msra.gmra.mxu0 %v11041_v34  ;;  %v14120_v34 = vsel %vm13519_vm8, %v11022_v47, %v1828_v31  ;;  %v336_v15 = vshll.u32 %v226_v49, 16  ;;  %v14122_v42 = vld [vmem:[#allocation2 + $0x1c] sm:$0xf]  ;;  %v2600_v21 = vshll.u32 %v2548_v26, 16  ;;  %v2606_v60 = vshll.u32 %v14096_v33, 16  ;;  %v13162_v26 = vld [vmem:[#allocation2 + $0x54] sm:$0xff]  }
  0xa0   : > { %12399 = vmatprep.mubr.bf16.mxu1 %v13159_v48  ;;  %12424 = vmatpush3.bf16.msra.mxu0 %v13728_v52  ;;  %v333_v48 = vshrl.u32 %v226_v49, 16  ;;  %v2599_v52 = vrot.slane %v2597_v17, 4  ;;  %v2610_v51 = vshrl.u32 %v14096_v33, 16  ;;  %v14133_v47 = vsel %vm13519_vm8, %v11023_v46, %v1835_v23 }
  0xa1   : > { %12347 = vmatprep.mubr.bf16.mxu0 %v11042_v2  ;;  %12425 = vmatprep.subr.bf16.mxu0 %v13155_v0  ;;  %v14126_v2 = vld [vmem:[#allocation2 + $0x20] sm:$0x1]  ;;  %v1837_v31 = vrot.slane %v1835_v23, 4  ;;  %v14138_v17 = vsel %vm13519_vm8, %v1830_v16, %v1831_v3  ;;  %v2602_v28 = vrot.slane %v2600_v21, 5  ;;  %v14140_v1 = vrot.slane %v2606_v60, 5  ;;  %v13178_v3 = vld [vmem:[%s18209_s1 + $0x150] sm:$0xff]  }
  0xa2   : > { %12476 = vmatpush3.bf16.msra.mxu1 %v13172_v24  ;;  %v335_v49 = vrot.slane %v333_v48, 7  ;;  %v2616_v24 = vshll.u32 %v14110_v14, 16  ;;  %v2612_v27 = vrot.slane %v2610_v51, 4  ;;  %v2621_v23 = vshrl.u32 %v2551_v7, 16  ;;  %v13161_v16 = vld [vmem:[%s18209_s1 + $0x120] sm:$0xff]  }
  0xa3   : > { %12477 = vmatprep.subr.bf16.mxu1 %v13173_v56  ;;  %v2630_v21 = vshll.u32 %v14122_v42, 16  ;;  %v3302_v60 = vld [vmem:[#allocation2 + $0xc] sm:$0xe]  ;;  %v3368_v20 = vrot.slane %v14096_v33, 5  ;;  %v18245_v19 = vcombine.low %v13979_v61, %v13987_v54  ;;  %v13170_v54 = vld [vmem:[#allocation2 + $0x84] sm:$0xff]  }
  0xa4   : > { %12426 = vmatpush3.bf16.msra.mxu0 %v13155_v0  ;;  %v338_v63 = vor.u32 %v336_v15, %v335_v49  ;;  %v14144_v40 = vsel %vm13500_vm7, %v335_v49, 0  ;;  %v14146_v46 = vrot.slane %v2616_v24, 5  ;;  %v2603_v0 = vor.u32 %v2602_v28, %v2599_v52 }
  0xa5   : > { %12427 = vmatprep.subr.bf16.mxu0 %v14104_v8  ;;  %v2613_v48 = vor.u32 %v2612_v27, %v14140_v1  ;;  %v2624_v15 = vshll.u32 %v2551_v7, 16  ;;  %v2623_v49 = vrot.slane %v2621_v23, 4  ;;  %v2634_v24 = vshrl.u32 %v14122_v42, 16  ;;  %v13164_v27 = vld [vmem:[%s18209_s1 + $0x118] sm:$0xff]  }
  0xa6   : > { %12478 = vmatpush3.bf16.msra.mxu1 %v13173_v56  ;;  %v389_v51 = vsel %vm13500_vm7, 0, %v338_v63  ;;  %v2640_v56 = vshll.u32 %v14126_v2, 16  ;;  %v2604_v7 = vrot.slane %v2603_v0, 4  ;;  %v2554_v63 = vld [vmem:[#allocation2 + $0x24] sm:$0xf]  ;;  %v14171_v62 = vrot.slane %v2630_v21, 5 }
  0xa7   : > { %12400 = vmatmul.mubr.bf16.gmra.mxu1 %v13160_v18  ;;  %12479 = vmatprep.subr.bf16.mxu1 %v13177_v5  ;;  %v10941_v18 = vcombine.low %v389_v51, %v389_v51  ;;  %v10942_v28 = vcombine.high %v389_v51, %v389_v51  ;;  %v2614_v52 = vrot.slane %v2613_v48, 4  ;;  %v2626_v23 = vrot.slane %v2624_v15, 5 }
  0xa8   : > { %12348 = vmatmul.mubr.bf16.gmra.mxu0 %v11043_v39  ;;  %12403 = vmatprep.mubr.bf16.mxu1 %v13162_v26  ;;  %v2636_v45 = vrot.slane %v2634_v24, 4  ;;  %v14173_v50 = vrot.slane %v2640_v56, 5  ;;  %v14181_v26 = vsel %vm13519_vm8, %v1837_v31, %v1838_v41  ;;  %v11144_v12 = vrot.slane %v3302_v60, 9  ;;  %v13165_v31 = vld [vmem:[#allocation2 + $0x6c] sm:$0xff]   ;;  %v14196_v60 = vld [vmem:[#allocation2 + $0x28] sm:$0xf] }
  0xa9   : > { %12351 = vmatprep.mubr.bf16.mxu0 %v11044_v36  ;;  %12428 = vmatpush3.bf16.msra.mxu0 %v14104_v8  ;;  %628 = vst [vmem:[#allocation2 + $0xc0] sm:$0xf] %v10941_v18  ;;  %629 = vst [vmem:[#allocation2 + $0xc4] sm:$0xf] %v10942_v28  ;;  %v13163_v36 = vld [vmem:[#allocation2 + $0x60] sm:$0xff]   ;;  %v13182_v8 = vld [vmem:[%s18209_s1 + $0x148] sm:$0xff]   ;;  %v2627_v35 = vor.u32 %v2626_v23, %v2623_v49  ;;  %v2619_v33 = vsel %vm13478_vm5, %v2614_v52, %v14146_v46 }
  0xaa   : > { %12429 = vmatprep.subr.bf16.mxu0 %v13161_v16  ;;  %12480 = vmatpush3.bf16.msra.mxu1 %v13177_v5  ;;  %v2609_v5 = vsel %vm13478_vm5, %v2604_v7, %v14140_v1  ;;  %v2637_v0 = vor.u32 %v2636_v45, %v14171_v62  ;;  %v3371_v41 = vrot.slane %v14110_v14, 5  ;;  %v3370_v48 = vrot.slane %v3368_v20, 4  ;;  %v13169_v14 = vld [vmem:[%s18209_s1 + $0x110] sm:$0xff]   ;;  %v13183_v56 = vld [vmem:[%s18209_s1 + $0x140] sm:$0xff]   ;;  %v14225_v28 = vld [vmem:[#allocation2 + $0x2c] sm:$0x1] }
  0xab   : > { %12481 = vmatprep.subr.bf16.mxu1 %v13178_v3  ;;  %v11145_v15 = vrot.slane %v3303_v11, 9  ;;  %v3375_v21 = vrot.slane %v14122_v42, 5  ;;  %v14198_v51 = vrot.slane %v2627_v35, 4  ;;  %v3378_v49 = vrot.slane %v14126_v2, 5  ;;  %v2557_v52 = vld [vmem:[#allocation2 + $0x30] sm:$0xf] }
  0xac   : > { %v14200_v1 = vrot.slane %v2637_v0, 4  ;;  %v2645_v24 = vshrl.u32 %v2554_v63, 16  ;;  %v14208_v11 = vsel %vm13519_vm8, %v11144_v12, %v3368_v20  ;;  %v14212_v42 = vsel %vm13519_vm8, %v3370_v48, %v3371_v41  ;;  %v14239_v20 = vld [vmem:[#allocation2 + $0x34] sm:$0xf]  ;;  %v3304_v41 = vld [vmem:[#allocation2 + $0x24] sm:$0xe] }
  0xad   : > { %12430 = vmatpush3.bf16.msra.mxu0 %v13161_v16  ;;  %v3377_v46 = vrot.slane %v3375_v21, 4  ;;  %v2648_v16 = vshll.u32 %v2554_v63, 16  ;;  %v14223_v18 = vsel %vm13519_vm8, %v11145_v15, %v3375_v21  ;;  %v2633_v63 = vsel %vm13478_vm5, %v14198_v51, %v14171_v62  ;;  %v14262_v15 = vld [vmem:[%s18209_s1 + $0x1f8] sm:$0xff]  }
  0xae   : > { %12431 = vmatprep.subr.bf16.mxu0 %v13164_v27  ;;  %12482 = vmatpush3.bf16.msra.mxu1 %v13178_v3  ;;  %v14219_v3 = vcombine.low %v2609_v5, %v2619_v33  ;;  %v2647_v7 = vrot.slane %v2645_v24, 4  ;;  %v2643_v23 = vsel %vm13478_vm5, %v14200_v1, %v14173_v50  ;;  %v2654_v12 = vshll.u32 %v14196_v60, 16 }
  0xaf   : > { %12404 = vmatmul.mubr.bf16.gmra.mxu1 %v13163_v36  ;;  %12483 = vmatprep.subr.bf16.mxu1 %v13182_v8  ;;  %v2650_v45 = vrot.slane %v2648_v16, 5  ;;  %v14241_v36 = vld [vmem:[#allocation2 + $0x38] sm:$0x1]  ;;  %v11176_v5 = vcombine.low %v14208_v11, %v14212_v42  ;;  %v14253_v35 = vsel %vm13519_vm8, %v3377_v46, %v3378_v49  ;;  %v2658_v0 = vshrl.u32 %v14196_v60, 16  ;;  %v3305_v46 = vld [vmem:[#allocation2 + $0x30] sm:$0xe] }
  0xb0   : > { %12352 = vmatmul.mubr.bf16.gmra.mxu0 %v11045_v43  ;;  %12407 = vmatprep.mubr.bf16.mxu1 %v13165_v31  ;;  %v13174_v43 = vld [vmem:[%s18209_s1 + $0x108] sm:$0xff]   ;;  %v10943_v61 = vcombine.low %v14144_v40, %v14144_v40  ;;  %v2656_v31 = vrot.slane %v2654_v12, 5  ;;  %v2664_v33 = vshll.u32 %v14225_v28, 16  ;;  %v2669_v48 = vshrl.u32 %v2557_v52, 16 }
  0xb1   : > { %12355 = vmatprep.mubr.bf16.mxu0 %v18245_v19  ;;  %12432 = vmatpush3.bf16.msra.mxu0 %v13164_v27  ;;  %v2651_v27 = vor.u32 %v2650_v45, %v2647_v7  ;;  %v2660_v21 = vrot.slane %v2658_v0, 4  ;;  %v2672_v49 = vshll.u32 %v2557_v52, 16  ;;  %v2678_v24 = vshll.u32 %v14239_v20, 16  ;;  %v13179_v52 = vld [vmem:[%s18209_s1 + $0x100] sm:$0xff]  }
  0xb2   : > { %12433 = vmatprep.subr.bf16.mxu0 %v13169_v14  ;;  %12484 = vmatpush3.bf16.msra.mxu1 %v13182_v8  ;;  %v2682_v40 = vshrl.u32 %v14239_v20, 16  ;;  %630 = vst [vmem:[#allocation2 + $0xc8] sm:$0x1] %v10943_v61  ;;  %v2666_v16 = vrot.slane %v2664_v33, 5  ;;  %v2671_v7 = vrot.slane %v2669_v48, 4  ;;  %v2688_v45 = vshll.u32 %v14241_v36, 16 }
  0xb3   : > { %12485 = vmatprep.subr.bf16.mxu1 %v13183_v56  ;;  %v2652_v8 = vrot.slane %v2651_v27, 4  ;;  %v2661_v12 = vor.u32 %v2660_v21, %v2656_v31  ;;  %v2674_v19 = vrot.slane %v2672_v49, 5  ;;  %v14267_v2 = vrot.slane %v2678_v24, 5  ;;  %v2560_v24 = vld [vmem:[#allocation2 + $0x3c] sm:$0xf] }
  0xb4   : > { %v2684_v39 = vrot.slane %v2682_v40, 4  ;;  %v14274_v61 = vrot.slane %v2688_v45, 5  ;;  %v11146_v27 = vrot.slane %v3304_v41, 9  ;;  %v3382_v33 = vrot.slane %v14196_v60, 5  ;;  %v14279_v40 = vld [vmem:[#allocation2 + $0x40] sm:$0xf] }
  0xb5   : > { %12434 = vmatpush3.bf16.msra.mxu0 %v13169_v14  ;;  %v2657_v0 = vsel %vm13478_vm5, %v2652_v8, %v2656_v31  ;;  %v2662_v14 = vrot.slane %v2661_v12, 4  ;;  %v2675_v48 = vor.u32 %v2674_v19, %v2671_v7  ;;  %v3385_v49 = vrot.slane %v14225_v28, 5  ;;  %v13171_v31 = vld [vmem:[#allocation2 + $0x90] sm:$0xff]   ;;  %v13175_v7 = vld [vmem:[#allocation2 + $0x9c] sm:$0xff]  }
  0xb6   : > { %12435 = vmatprep.subr.bf16.mxu0 %v13174_v43  ;;  %12486 = vmatpush3.bf16.msra.mxu1 %v13183_v56  ;;  %v2685_v21 = vor.u32 %v2684_v39, %v14267_v2  ;;  %v18246_v56 = vcombine.low %v13996_v4, %v14003_v10  ;;  %v14287_v60 = vsel %vm13519_vm8, %v11146_v27, %v3382_v33  ;;  %v11147_v41 = vrot.slane %v3305_v46, 9  ;;  %v14323_v46 = vld [vmem:[#allocation2 + $0x44] sm:$0x1] }
  0xb7   : > { %12408 = vmatmul.mubr.bf16.gmra.mxu1 %v13166_v9  ;;  %12567 = vmatprep.subr.bf16.mxu1 %v14262_v15  ;;  %v3384_v9 = vrot.slane %v3382_v33, 4  ;;  %v3389_v39 = vrot.slane %v14239_v20, 5  ;;  %v18247_v28 = vcombine.low %v14014_v29, %v14024_v30  ;;  %v2667_v8 = vsel %vm13478_vm5, %v2662_v14, %v2666_v16  ;;  %v14303_v20 = vld [vmem:[%s18209_s1 + $0x1b8] sm:$0xff]   ;;  %v2563_v16 = vld [vmem:[#allocation2 + $0x48] sm:$0xf] }
  0xb8   : > { %12356 = vmatmul.mubr.bf16.gmra.mxu0 %v18246_v56  ;;  %12411 = vmatprep.mubr.bf16.mxu1 %v13170_v54  ;;  %v14295_v4 = vrot.slane %v2675_v48, 4  ;;  %v14297_v10 = vrot.slane %v2685_v21, 4  ;;  %v3392_v54 = vrot.slane %v14241_v36, 5  ;;  %v14315_v29 = vcombine.low %v2633_v63, %v2643_v23  ;;  %v14335_v63 = vld [vmem:[#allocation2 + $0x4c] sm:$0xf] }
  0xb9   : > { %12359 = vmatprep.mubr.bf16.mxu0 %v18247_v28  ;;  %12436 = vmatpush3.bf16.msra.mxu0 %v13174_v43  ;;  %v11177_v30 = vcombine.low %v14223_v18, %v14253_v35  ;;  %v14321_v36 = vsel %vm13519_vm8, %v3384_v9, %v3385_v49  ;;  %v3391_v43 = vrot.slane %v3389_v39, 4  ;;  %v14325_v50 = vcombine.low %v2657_v0, %v2667_v8  ;;  %v14337_v23 = vld [vmem:[#allocation2 + $0x50] sm:$0x1]  ;;  %v3306_v0 = vld [vmem:[#allocation2 + $0x3c] sm:$0xe] }
  0xba   : > { %12437 = vmatprep.subr.bf16.mxu0 %v13179_v52  ;;  %v2681_v62 = vsel %vm13478_vm5, %v14295_v4, %v14267_v2  ;;  %v14333_v51 = vsel %vm13519_vm8, %v11147_v41, %v3389_v39  ;;  %v2693_v1 = vshrl.u32 %v2560_v24, 16  ;;  %v2691_v45 = vsel %vm13478_vm5, %v14297_v10, %v14274_v61 }
  0xbb   : > { %v11178_v12 = vcombine.low %v14287_v60, %v14321_v36  ;;  %v2696_v19 = vshll.u32 %v2560_v24, 16  ;;  %v2702_v2 = vshll.u32 %v14279_v40, 16  ;;  %v14348_v27 = vsel %vm13519_vm8, %v3391_v43, %v3392_v54  ;;  %v3307_v54 = vld [vmem:[#allocation2 + $0x48] sm:$0xe]  ;;  %v3311_v36 = vld [vmem:[#allocation2 + $0x78] sm:$0xe] }
  0xbc   : > { %v2695_v33 = vrot.slane %v2693_v1, 4  ;;  %v2706_v14 = vshrl.u32 %v14279_v40, 16  ;;  %v2712_v48 = vshll.u32 %v14323_v46, 16  ;;  %v2717_v49 = vshrl.u32 %v2563_v16, 16 }
  0xbd   : > { %12438 = vmatpush3.bf16.msra.mxu0 %v13179_v52  ;;  %v2698_v61 = vrot.slane %v2696_v19, 5  ;;  %v2704_v21 = vrot.slane %v2702_v2, 5  ;;  %v2720_v56 = vshll.u32 %v2563_v16, 16  ;;  %v2726_v52 = vshll.u32 %v14335_v63, 16 }
  0xbe   : > { %12519 = vmatprep.subr.bf16.mxu0 %v14303_v20  ;;  %v2708_v24 = vrot.slane %v2706_v14, 4  ;;  %v2714_v9 = vrot.slane %v2712_v48, 5  ;;  %v2730_v41 = vshrl.u32 %v14335_v63, 16  ;;  %v18248_v39 = vcombine.low %v14033_v32, %v14037_v25  ;;  %v2566_v25 = vld [vmem:[#allocation2 + $0x54] sm:$0xf] }
  0xbf   : > { %12412 = vmatmul.mubr.bf16.gmra.mxu1 %v13171_v31  ;;  %v2699_v28 = vor.u32 %v2698_v61, %v2695_v33  ;;  %v2719_v8 = vrot.slane %v2717_v49, 4  ;;  %v2722_v4 = vrot.slane %v2720_v56, 5  ;;  %v2736_v10 = vshll.u32 %v14337_v23, 16 }
  0xc0   : > { %12360 = vmatmul.mubr.bf16.gmra.mxu0 %v18248_v39  ;;  %12415 = vmatprep.mubr.bf16.mxu1 %v13175_v7  ;;  %v18249_v31 = vcombine.low %v14042_v22, %v14054_v44  ;;  %v2709_v43 = vor.u32 %v2708_v24, %v2704_v21  ;;  %v2728_v16 = vrot.slane %v2726_v52, 5  ;;  %v2732_v1 = vrot.slane %v2730_v41, 4  ;;  %v13176_v7 = vld [vmem:[#allocation2 + $0xa8] sm:$0xff]   ;;  %v13180_v39 = vld [vmem:[#allocation2 + $0xb4] sm:$0xff]  }
  0xc1   : > { %v11148_v19 = vrot.slane %v3306_v0, 9  ;;  %v2700_v2 = vrot.slane %v2699_v28, 4  ;;  %v2723_v14 = vor.u32 %v2722_v4, %v2719_v8  ;;  %v2738_v48 = vrot.slane %v2736_v10, 5  ;;  %v2568_v10 = vld [vmem:[#allocation2 + $0x5c] sm:$0x1] }
  0xc2   : > { %12363 = vmatprep.mubr.bf16.mxu0 %v18249_v31  ;;  %v3396_v32 = vrot.slane %v14279_v40, 5  ;;  %v2710_v33 = vrot.slane %v2709_v43, 4  ;;  %v2733_v61 = vor.u32 %v2732_v1, %v2728_v16  ;;  %v3399_v49 = vrot.slane %v14323_v46, 5  ;;  %v2567_v46 = vld [vmem:[#allocation2 + $0x58] sm:$0xf] }
  0xc3   : > { %v11149_v56 = vrot.slane %v3307_v54, 9  ;;  %v2705_v22 = vsel %vm13478_vm5, %v2700_v2, %v2704_v21  ;;  %v2724_v44 = vrot.slane %v2723_v14, 4  ;;  %v14370_v52 = vcombine.low %v2681_v62, %v2691_v45  ;;  %v2569_v62 = vld [vmem:[#allocation2 + $0x60] sm:$0xf]  ;;  %v14390_v43 = vld [vmem:[#allocation2 + $0x64] sm:$0xf] }
  0xc4   : > { %v14368_v0 = vsel %vm13519_vm8, %v11148_v19, %v3396_v32  ;;  %v3398_v24 = vrot.slane %v3396_v32, 4  ;;  %v2715_v40 = vsel %vm13478_vm5, %v2710_v33, %v2714_v9  ;;  %v2734_v41 = vrot.slane %v2733_v61, 4  ;;  %v14392_v1 = vld [vmem:[#allocation2 + $0x68] sm:$0x1] }
  0xc5   : > { %v3403_v28 = vrot.slane %v14335_v63, 5  ;;  %v11179_v8 = vcombine.low %v14333_v51, %v14348_v27  ;;  %v3406_v4 = vrot.slane %v14337_v23, 5  ;;  %v2741_v54 = vshrl.u32 %v2566_v25, 16 }
  0xc6   : > { %v14379_v21 = vsel %vm13519_vm8, %v3398_v24, %v3399_v49  ;;  %v14382_v45 = vcombine.low %v2705_v22, %v2715_v40  ;;  %v2729_v9 = vsel %vm13478_vm5, %v2724_v44, %v2728_v16  ;;  %v2739_v63 = vsel %vm13478_vm5, %v2734_v41, %v2738_v48  ;;  %v3308_v48 = vld [vmem:[#allocation2 + $0x54] sm:$0xe]  ;;  %v13181_v22 = vld [vmem:[#allocation2 + $0xc0] sm:$0xff]  }
  0xc7   : > { %12416 = vmatmul.mubr.bf16.gmra.mxu1 %v13176_v7  ;;  %v11180_v31 = vcombine.low %v14368_v0, %v14379_v21  ;;  %v18250_v23 = vcombine.low %v14046_v59, %v14064_v6  ;;  %v14399_v19 = vsel %vm13519_vm8, %v11149_v56, %v3403_v28  ;;  %v2743_v16 = vrot.slane %v2741_v54, 4 }
  0xc8   : > { %12419 = vmatprep.mubr.bf16.mxu1 %v13180_v39  ;;  %v2744_v2 = vshll.u32 %v2566_v25, 16  ;;  %v2750_v14 = vshll.u32 %v2567_v46, 16  ;;  %v18251_v32 = vcombine.low %v14068_v55, %v14076_v57  ;;  %v3405_v7 = vrot.slane %v3403_v28, 4 }
  0xc9   : > { %12364 = vmatmul.mubr.bf16.gmra.mxu0 %v18250_v23  ;;  %v2754_v33 = vshrl.u32 %v2567_v46, 16  ;;  %v2760_v61 = vshll.u32 %v2568_v10, 16  ;;  %v2765_v49 = vshrl.u32 %v2569_v62, 16  ;;  %v14404_v59 = vcombine.low %v2729_v9, %v2739_v63 }
  0xca   : > { %12367 = vmatprep.mubr.bf16.mxu0 %v18251_v32  ;;  %v2746_v6 = vrot.slane %v2744_v2, 5  ;;  %v2752_v39 = vrot.slane %v2750_v14, 5  ;;  %v2768_v44 = vshll.u32 %v2569_v62, 16  ;;  %v2774_v25 = vshll.u32 %v14390_v43, 16 }
  0xcb   : > { %v2756_v56 = vrot.slane %v2754_v33, 4  ;;  %v2762_v24 = vrot.slane %v2760_v61, 5  ;;  %v2767_v40 = vrot.slane %v2765_v49, 4  ;;  %v2778_v55 = vshrl.u32 %v14390_v43, 16  ;;  %v3309_v33 = vld [vmem:[#allocation2 + $0x60] sm:$0xe] }
  0xcc   : > { %v2747_v41 = vor.u32 %v2746_v6, %v2743_v16  ;;  %v2770_v54 = vrot.slane %v2768_v44, 5  ;;  %v2784_v57 = vshll.u32 %v14392_v1, 16  ;;  %v14409_v23 = vrot.slane %v2774_v25, 5  ;;  %v14447_v25 = vld [vmem:[#allocation2 + $0x7c] sm:$0xf] }
  0xcd   : > { %v2757_v28 = vor.u32 %v2756_v56, %v2752_v39  ;;  %v11150_v32 = vrot.slane %v3308_v48, 9  ;;  %v3410_v9 = vrot.slane %v2567_v46, 5  ;;  %v14413_v63 = vsel %vm13519_vm8, %v3405_v7, %v3406_v4 }
  0xce   : > { %v2748_v62 = vrot.slane %v2747_v41, 4  ;;  %v2771_v2 = vor.u32 %v2770_v54, %v2767_v40  ;;  %v2780_v14 = vrot.slane %v2778_v55, 4  ;;  %v2786_v61 = vrot.slane %v2784_v57, 5  ;;  %v14452_v57 = vld [vmem:[#allocation2 + $0x80] sm:$0x1] }
  0xcf   : > { %12420 = vmatmul.mubr.bf16.gmra.mxu1 %v13181_v22  ;;  %v2758_v16 = vrot.slane %v2757_v28, 4  ;;  %v3412_v49 = vrot.slane %v3410_v9, 4  ;;  %v3413_v6 = vrot.slane %v2568_v10, 5  ;;  %v18252_v44 = vcombine.low %v14085_v53, %v14093_v38  ;;  %v2572_v22 = vld [vmem:[#allocation2 + $0x6c] sm:$0xf] }
  0xd0   : > { %12487 = vmatprep.mubr.bf16.mxu1 %v11176_v5  ;;  %v2753_v46 = vsel %vm13478_vm5, %v2748_v62, %v2752_v39  ;;  %v2772_v4 = vrot.slane %v2771_v2, 4  ;;  %v2781_v48 = vor.u32 %v2780_v14, %v14409_v23  ;;  %v14426_v7 = vsel %vm13519_vm8, %v11150_v32, %v3410_v9  ;;  %v14438_v5 = vld [vmem:[#allocation2 + $0x70] sm:$0xf]  ;;  %v14440_v39 = vld [vmem:[#allocation2 + $0x74] sm:$0x1] }
  0xd1   : > { %12368 = vmatmul.mubr.bf16.gmra.mxu0 %v18252_v44  ;;  %v18253_v10 = vcombine.low %v14120_v34, %v14138_v17  ;;  %v2763_v53 = vsel %vm13478_vm5, %v2758_v16, %v2762_v24  ;;  %v14435_v38 = vsel %vm13519_vm8, %v3412_v49, %v3413_v6  ;;  %v11151_v11 = vrot.slane %v3309_v33, 9  ;;  %v2575_v24 = vld [vmem:[#allocation2 + $0x78] sm:$0xf]  ;;  %v3310_v28 = vld [vmem:[#allocation2 + $0x6c] sm:$0xe] }
  0xd2   : > { %v3417_v42 = vrot.slane %v14390_v43, 5  ;;  %v11181_v56 = vcombine.low %v14399_v19, %v14413_v63  ;;  %v14444_v40 = vcombine.low %v2753_v46, %v2763_v53  ;;  %v2782_v34 = vrot.slane %v2781_v48, 4  ;;  %v13190_v46 = vld [vmem:[%s18209_s1 + $0x1f0] sm:$0xff]  }
  0xd3   : > { %12371 = vmatprep.mubr.bf16.mxu0 %v18253_v10  ;;  %v3420_v17 = vrot.slane %v14392_v1, 5  ;;  %v2777_v41 = vsel %vm13478_vm5, %v2772_v4, %v14409_v23  ;;  %v2789_v54 = vshrl.u32 %v2572_v22, 16  ;;  %v2792_v55 = vshll.u32 %v2572_v22, 16 }
  0xd4   : > { %v3419_v43 = vrot.slane %v3417_v42, 4  ;;  %v11182_v32 = vcombine.low %v14426_v7, %v14435_v38  ;;  %v2798_v9 = vshll.u32 %v14438_v5, 16  ;;  %v2802_v1 = vshrl.u32 %v14438_v5, 16 }
  0xd5   : > { %v2808_v62 = vshll.u32 %v14440_v39, 16  ;;  %v2787_v2 = vsel %vm13478_vm5, %v2782_v34, %v2786_v61  ;;  %v14463_v23 = vsel %vm13519_vm8, %v11151_v11, %v3417_v42  ;;  %v2791_v14 = vrot.slane %v2789_v54, 4 }
  0xd6   : > { %v2794_v33 = vrot.slane %v2792_v55, 5  ;;  %v14467_v16 = vsel %vm13519_vm8, %v3419_v43, %v3420_v17  ;;  %v2800_v49 = vrot.slane %v2798_v9, 5  ;;  %v2804_v6 = vrot.slane %v2802_v1, 4  ;;  %v14499_v1 = vld [vmem:[#allocation2 + $0x88] sm:$0xf] }
  0xd7   : > { %v2810_v44 = vrot.slane %v2808_v62, 5  ;;  %12488 = vmatmul.mubr.bf16.vlgmr.msra.gmra.mxu1 %v11177_v30  ;;  %v2813_v4 = vshrl.u32 %v2575_v24, 16  ;;  %v2816_v48 = vshll.u32 %v2575_v24, 16  ;;  %v2822_v22 = vshll.u32 %v14447_v25, 16  ;;  %v14501_v62 = vld [vmem:[#allocation2 + $0x8c] sm:$0x1] }
  0xd8   : > { %v2795_v61 = vor.u32 %v2794_v33, %v2791_v14  ;;  %v18254_v10 = vcombine.low %v14133_v47, %v14181_v26  ;;  %12491 = vmatprep.mubr.bf16.mxu1 %v11178_v12  ;;  %v2805_v53 = vor.u32 %v2804_v6, %v2800_v49  ;;  %v2826_v11 = vshrl.u32 %v14447_v25, 16  ;;  %12568 = vmatpush3.bf16.msra.mxu1 %v14262_v15  ;;  %v13192_v12 = vld [vmem:[%s18209_s1 + $0x1e8] sm:$0xff]   ;;  %v2578_v15 = vld [vmem:[#allocation2 + $0x84] sm:$0xf]  ;;  %v2581_v6 = vld [vmem:[#allocation2 + $0x90] sm:$0xf] }
  0xd9   : > { %v2832_v42 = vshll.u32 %v14452_v57, 16  ;;  %v11152_v18 = vrot.slane %v3310_v28, 9  ;;  %v2815_v30 = vrot.slane %v2813_v4, 4  ;;  %v2818_v34 = vrot.slane %v2816_v48, 5  ;;  %12569 = vmatprep.subr.bf16.mxu1 %v13190_v46 }
  0xda   : > { %12372 = vmatmul.mubr.bf16.gmra.mxu0 %v18254_v10  ;;  %v2796_v35 = vrot.slane %v2795_v61, 4  ;;  %v2824_v17 = vrot.slane %v2822_v22, 5  ;;  %v14486_v47 = vcombine.low %v2777_v41, %v2787_v2  ;;  %v2806_v26 = vrot.slane %v2805_v53, 4  ;;  %v13185_v2 = vld [vmem:[%s18209_s1 + $0x1b0] sm:$0xff]   ;;  %v13193_v10 = vld [vmem:[%s18209_s1 + $0x1e0] sm:$0xff]  }
  0xdb   : > { %12439 = vmatprep.mubr.bf16.mxu0 %v14219_v3  ;;  %v2828_v24 = vrot.slane %v2826_v11, 4  ;;  %v3424_v60 = vrot.slane %v14438_v5, 5  ;;  %v11183_v3 = vcombine.low %v14463_v23, %v14467_v16  ;;  %v2819_v43 = vor.u32 %v2818_v34, %v2815_v30  ;;  %v14515_v22 = vld [vmem:[#allocation2 + $0x94] sm:$0xf]  ;;  %v3315_v23 = vld [vmem:[#allocation2 + $0xa8] sm:$0xe] }
  0xdc   : > { %v2834_v54 = vrot.slane %v2832_v42, 5  ;;  %v3427_v55 = vrot.slane %v14440_v39, 5  ;;  %v2801_v41 = vsel %vm13478_vm5, %v2796_v35, %v2800_v49  ;;  %v2811_v5 = vsel %vm13478_vm5, %v2806_v26, %v2810_v44  ;;  %12570 = vmatpush3.bf16.msra.mxu1 %v13190_v46 }
  0xdd   : > { %v2829_v28 = vor.u32 %v2828_v24, %v2824_v17  ;;  %v3426_v9 = vrot.slane %v3424_v60, 4  ;;  %v2820_v14 = vrot.slane %v2819_v43, 4  ;;  %v14508_v39 = vsel %vm13519_vm8, %v11152_v18, %v3424_v60  ;;  %12571 = vmatprep.subr.bf16.mxu1 %v13192_v12  ;;  %v3312_v60 = vld [vmem:[#allocation2 + $0x84] sm:$0xe] }
  0xde   : > { %v11153_v33 = vrot.slane %v3311_v36, 9  ;;  %v3431_v49 = vrot.slane %v14447_v25, 5  ;;  %v2837_v4 = vshrl.u32 %v2578_v15, 16  ;;  %v2840_v48 = vshll.u32 %v2578_v15, 16  ;;  %v13195_v36 = vld [vmem:[%s18209_s1 + $0x1d8] sm:$0xff]  }
  0xdf   : > { %v2830_v44 = vrot.slane %v2829_v28, 4  ;;  %v14513_v61 = vsel %vm13519_vm8, %v3426_v9, %v3427_v55  ;;  %12492 = vmatmul.mubr.bf16.gmra.mxu1 %v11179_v8  ;;  %v14523_v25 = vcombine.low %v2801_v41, %v2811_v5  ;;  %v2825_v46 = vsel %vm13478_vm5, %v2820_v14, %v2824_v17  ;;  %v3313_v15 = vld [vmem:[#allocation2 + $0x90] sm:$0xe]  ;;  %v2584_v14 = vld [vmem:[#allocation2 + $0x9c] sm:$0xf] }
  0xe0   : > { %v3433_v53 = vrot.slane %v3431_v49, 4  ;;  %v3434_v11 = vrot.slane %v14452_v57, 5  ;;  %12495 = vmatprep.mubr.bf16.mxu1 %v11180_v31  ;;  %v2839_v18 = vrot.slane %v2837_v4, 4  ;;  %v2842_v51 = vrot.slane %v2840_v48, 5  ;;  %v14545_v31 = vld [vmem:[#allocation2 + $0x98] sm:$0x1]  ;;  %12572 = vmatpush3.bf16.msra.mxu1 %v13192_v12 }
  0xe1   : > { %v2835_v42 = vsel %vm13478_vm5, %v2830_v44, %v2834_v54  ;;  %v2846_v27 = vshll.u32 %v14499_v1, 16  ;;  %v11184_v8 = vcombine.low %v14508_v39, %v14513_v61  ;;  %v2850_v0 = vshrl.u32 %v14499_v1, 16  ;;  %12573 = vmatprep.subr.bf16.mxu1 %v13193_v10 }
  0xe2   : > { %12440 = vmatmul.mubr.bf16.vlgmr.msra.gmra.mxu0 %v14315_v29  ;;  %v14541_v29 = vsel %vm13519_vm8, %v11153_v33, %v3431_v49  ;;  %v2856_v21 = vshll.u32 %v14501_v62, 16  ;;  %v14550_v57 = vcombine.low %v2825_v46, %v2835_v42  ;;  %v2861_v30 = vshrl.u32 %v2581_v6, 16  ;;  %v13187_v33 = vld [vmem:[%s18209_s1 + $0x1a0] sm:$0xff]   ;;  %v13196_v42 = vld [vmem:[%s18209_s1 + $0x1d0] sm:$0xff]  }
  0xe3   : > { %12520 = vmatpush3.bf16.msra.mxu0 %v14303_v20  ;;  %12443 = vmatprep.mubr.bf16.mxu0 %v14325_v50  ;;  %v13186_v20 = vld [vmem:[%s18209_s1 + $0x1a8] sm:$0xff]   ;;  %v2843_v50 = vor.u32 %v2842_v51, %v2839_v18  ;;  %v2848_v35 = vrot.slane %v2846_v27, 5  ;;  %v14554_v34 = vsel %vm13519_vm8, %v3433_v53, %v3434_v11  ;;  %v2852_v17 = vrot.slane %v2850_v0, 4  ;;  %v14572_v11 = vld [vmem:[#allocation2 + $0xa0] sm:$0xf] }
  0xe4   : > { %12521 = vmatprep.subr.bf16.mxu0 %v13185_v2  ;;  %v2864_v26 = vshll.u32 %v2581_v6, 16  ;;  %v2870_v24 = vshll.u32 %v14515_v22, 16  ;;  %v2863_v54 = vrot.slane %v2861_v30, 4  ;;  %v2874_v55 = vshrl.u32 %v14515_v22, 16  ;;  %12574 = vmatpush3.bf16.msra.mxu1 %v13193_v10  ;;  %v13188_v10 = vld [vmem:[%s18209_s1 + $0x198] sm:$0xff]   ;;  %v13198_v30 = vld [vmem:[%s18209_s1 + $0x1c8] sm:$0xff]  }
  0xe5   : > { %v2844_v43 = vrot.slane %v2843_v50, 4  ;;  %v2880_v12 = vshll.u32 %v14545_v31, 16  ;;  %v2853_v41 = vor.u32 %v2852_v17, %v2848_v35  ;;  %v2858_v5 = vrot.slane %v2856_v21, 5  ;;  %12575 = vmatprep.subr.bf16.mxu1 %v13195_v36  ;;  %v2587_v0 = vld [vmem:[#allocation2 + $0xa8] sm:$0xf] }
  0xe6   : > { %v2866_v28 = vrot.slane %v2864_v26, 5  ;;  %v2872_v9 = vrot.slane %v2870_v24, 5  ;;  %v11185_v49 = vcombine.low %v14541_v29, %v14554_v34  ;;  %v2876_v6 = vrot.slane %v2874_v55, 4 }
  0xe7   : > { %12522 = vmatpush3.bf16.msra.mxu0 %v13185_v2  ;;  %v11154_v44 = vrot.slane %v3312_v60, 9  ;;  %v3438_v4 = vrot.slane %v14499_v1, 5  ;;  %12496 = vmatmul.mubr.bf16.gmra.mxu1 %v11181_v56  ;;  %v2854_v2 = vrot.slane %v2853_v41, 4  ;;  %v3441_v46 = vrot.slane %v14501_v62, 5  ;;  %v14583_v62 = vld [vmem:[#allocation2 + $0xa4] sm:$0x1] }
  0xe8   : > { %12523 = vmatprep.subr.bf16.mxu0 %v13186_v20  ;;  %v2867_v48 = vor.u32 %v2866_v28, %v2863_v54  ;;  %v11155_v53 = vrot.slane %v3313_v15, 9  ;;  %12499 = vmatprep.mubr.bf16.mxu1 %v11182_v32  ;;  %v2849_v19 = vsel %vm13478_vm5, %v2844_v43, %v2848_v35  ;;  %v2877_v63 = vor.u32 %v2876_v6, %v2872_v9  ;;  %v14609_v35 = vld [vmem:[#allocation2 + $0xac] sm:$0xf]  ;;  %v14618_v60 = vld [vmem:[#allocation2 + $0xb0] sm:$0x1] }
  0xe9   : > { %v2882_v56 = vrot.slane %v2880_v12, 5  ;;  %v3440_v1 = vrot.slane %v3438_v4, 4  ;;  %v3445_v38 = vrot.slane %v14515_v22, 5  ;;  %v2885_v32 = vshrl.u32 %v2584_v14, 16  ;;  %12576 = vmatpush3.bf16.msra.mxu1 %v13195_v36  ;;  %v13191_v36 = vld [vmem:[%s18209_s1 + $0x190] sm:$0xff]  }
  0xea   : > { %12444 = vmatmul.mubr.bf16.gmra.mxu0 %v14370_v52  ;;  %v2859_v52 = vsel %vm13478_vm5, %v2854_v2, %v2858_v5  ;;  %v2868_v7 = vrot.slane %v2867_v48, 4  ;;  %v2878_v18 = vrot.slane %v2877_v63, 4  ;;  %v14594_v51 = vsel %vm13519_vm8, %v11154_v44, %v3438_v4  ;;  %12577 = vmatprep.subr.bf16.mxu1 %v13196_v42  ;;  %v3314_v15 = vld [vmem:[#allocation2 + $0x9c] sm:$0xe]  ;;  %v13194_v63 = vld [vmem:[%s18209_s1 + $0x188] sm:$0xff]  }
  0xeb   : > { %12447 = vmatprep.mubr.bf16.mxu0 %v14382_v45  ;;  %12524 = vmatpush3.bf16.msra.mxu0 %v13186_v20  ;;  %v14598_v45 = vsel %vm13519_vm8, %v3440_v1, %v3441_v46  ;;  %v3448_v27 = vrot.slane %v14545_v31, 5  ;;  %v14601_v21 = vcombine.low %v2849_v19, %v2859_v52  ;;  %v14607_v20 = vsel %vm13519_vm8, %v11155_v53, %v3445_v38 }
  0xec   : > { %12525 = vmatprep.subr.bf16.mxu0 %v13187_v33  ;;  %v2873_v22 = vsel %vm13478_vm5, %v2868_v7, %v2872_v9  ;;  %v2887_v50 = vrot.slane %v2885_v32, 4  ;;  %v2883_v31 = vsel %vm13478_vm5, %v2878_v18, %v2882_v56  ;;  %v2888_v17 = vshll.u32 %v2584_v14, 16  ;;  %v13199_v14 = vld [vmem:[%s18209_s1 + $0x1c0] sm:$0xff]   ;;  %v2590_v7 = vld [vmem:[#allocation2 + $0xb4] sm:$0xf] }
  0xed   : > { %v2894_v26 = vshll.u32 %v14572_v11, 16  ;;  %v2898_v24 = vshrl.u32 %v14572_v11, 16  ;;  %v11186_v43 = vcombine.low %v14594_v51, %v14598_v45  ;;  %v3447_v54 = vrot.slane %v3445_v38, 4  ;;  %12578 = vmatpush3.bf16.msra.mxu1 %v13196_v42  ;;  %v14641_v16 = vpop.f32.mrf.mxu1 }
  0xee   : > { %v2904_v55 = vshll.u32 %v14583_v62, 16  ;;  %v2909_v12 = vshrl.u32 %v2587_v0, 16  ;;  %v14626_v41 = vcombine.low %v2873_v22, %v2883_v31  ;;  %v2890_v5 = vrot.slane %v2888_v17, 5  ;;  %12579 = vmatprep.subr.bf16.mxu1 %v13198_v30  ;;  %v14670_v22 = vld [vmem:[#allocation2 + $0xbc] sm:$0x1] }
  0xef   : > { %12526 = vmatpush3.bf16.msra.mxu0 %v13187_v33  ;;  %v2896_v28 = vrot.slane %v2894_v26, 5  ;;  %v2900_v9 = vrot.slane %v2898_v24, 4  ;;  %12500 = vmatmul.mubr.bf16.gmra.mxu1 %v11183_v3  ;;  %v2912_v44 = vshll.u32 %v2587_v0, 16  ;;  %v2918_v4 = vshll.u32 %v14609_v35, 16  ;;  %v14668_v0 = vld [vmem:[#allocation2 + $0xb8] sm:$0xf] }
  0xf0   : > { %12527 = vmatprep.subr.bf16.mxu0 %v13188_v10  ;;  %v2906_v33 = vrot.slane %v2904_v55, 5  ;;  %v2911_v6 = vrot.slane %v2909_v12, 4  ;;  %12503 = vmatprep.mubr.bf16.mxu1 %v11184_v8  ;;  %v2891_v2 = vor.u32 %v2890_v5, %v2887_v50  ;;  %v2922_v46 = vshrl.u32 %v14609_v35, 16  ;;  %v2593_v26 = vld [vmem:[#allocation2 + $0xc0] sm:$0xf] }
  0xf1   : > { %v2901_v48 = vor.u32 %v2900_v9, %v2896_v28  ;;  %v2928_v53 = vshll.u32 %v14618_v60, 16  ;;  %v2914_v3 = vrot.slane %v2912_v44, 5  ;;  %v14644_v42 = vrot.slane %v2918_v4, 5  ;;  %12580 = vmatpush3.bf16.msra.mxu1 %v13198_v30  ;;  %v14696_v9 = vld [vmem:[#allocation2 + $0xc8] sm:$0x1] }
  0xf2   : > { %12448 = vmatmul.mubr.bf16.gmra.mxu0 %v14404_v59  ;;  %v11156_v59 = vrot.slane %v3314_v15, 9  ;;  %v3452_v19 = vrot.slane %v14572_v11, 5  ;;  %v14649_v39 = vsel %vm13519_vm8, %v3447_v54, %v3448_v27  ;;  %v2892_v61 = vrot.slane %v2891_v2, 4  ;;  %12581 = vmatprep.subr.bf16.mxu1 %v13199_v14  ;;  %v14685_v15 = vld [vmem:[#allocation2 + $0xc4] sm:$0xf] }
  0xf3   : > { %12451 = vmatprep.mubr.bf16.mxu0 %v14444_v40  ;;  %12528 = vmatpush3.bf16.msra.mxu0 %v13188_v10  ;;  %v2902_v8 = vrot.slane %v2901_v48, 4  ;;  %v2924_v56 = vrot.slane %v2922_v46, 4  ;;  %v14654_v40 = vpop.f32.mrf.mxu1  ;;  %v2915_v1 = vor.u32 %v2914_v3, %v2911_v6  ;;  %v14656_v10 = vrot.slane %v2928_v53, 5  ;;  %v3316_v48 = vld [vmem:[#allocation2 + $0xb4] sm:$0xe]  ;;  %v14727_v46 = vld [vmem:[%s18209_s1 + $0x238] sm:$0xff]  }
  0xf4   : > { %12529 = vmatprep.subr.bf16.mxu0 %v13191_v36  ;;  %v3454_v52 = vrot.slane %v3452_v19, 4  ;;  %v3455_v11 = vrot.slane %v14583_v62, 5  ;;  %v2897_v38 = vsel %vm13478_vm5, %v2892_v61, %v2896_v28  ;;  %v14666_v27 = vsel %vm13519_vm8, %v11156_v59, %v3452_v19 }
  0xf5   : > { %v2907_v32 = vsel %vm13478_vm5, %v2902_v8, %v2906_v33  ;;  %v2925_v18 = vor.u32 %v2924_v56, %v14644_v42  ;;  %v14672_v50 = vpop.f32.mrf.mxu1  ;;  %v2916_v62 = vrot.slane %v2915_v1, 4  ;;  %v11157_v31 = vrot.slane %v3315_v23, 9  ;;  %12582 = vmatpush3.bf16.msra.mxu1 %v13199_v14 }
  0xf6   : > { %v14676_v30 = vsel %vm13519_vm8, %v3454_v52, %v3455_v11  ;;  %v3459_v17 = vrot.slane %v14609_v35, 5  ;;  %v11187_v24 = vcombine.low %v14607_v20, %v14649_v39  ;;  %v3462_v55 = vrot.slane %v14618_v60, 5  ;;  %v12249_v33 = vpop.f32.mrf.mxu0  ;;  %v3317_v11 = vld [vmem:[#allocation2 + $0xc0] sm:$0xe] }
  0xf7   : > { %12530 = vmatpush3.bf16.msra.mxu0 %v13191_v36  ;;  %v2926_v54 = vrot.slane %v2925_v18, 4  ;;  %v2933_v12 = vshrl.u32 %v2590_v7, 16  ;;  %v13197_v36 = vld [vmem:[%s18209_s1 + $0x180] sm:$0xff]   ;;  %v14687_v5 = vpop.f32.mrf.mxu1  ;;  %12504 = vmatmul.mubr.bf16.gmra.mxu1 %v11185_v49  ;;  %v14692_v35 = vcombine.low %v2897_v38, %v2907_v32  ;;  %v11188_v20 = vcombine.low %v14666_v27, %v14676_v30 }
  0xf8   : > { %12531 = vmatprep.subr.bf16.mxu0 %v13194_v63  ;;  %v3461_v60 = vrot.slane %v3459_v17, 4  ;;  %v2936_v28 = vshll.u32 %v2590_v7, 16  ;;  %12507 = vmatprep.mubr.bf16.mxu1 %v11186_v43  ;;  %v2921_v29 = vsel %vm13478_vm5, %v2916_v62, %v14644_v42  ;;  %v2942_v49 = vshll.u32 %v14668_v0, 16  ;;  %v14729_v53 = vpop.f32.mrf.mxu0  ;;  %v4187_v62 = vld [vmem:[#allocation2 + $0x18] sm:$0xf] }
  0xf9   : > { %v2935_v34 = vrot.slane %v2933_v12, 4  ;;  %v2946_v14 = vshrl.u32 %v14668_v0, 16  ;;  %v14713_v51 = vsel %vm13519_vm8, %v11157_v31, %v3459_v17  ;;  %v2952_v43 = vshll.u32 %v14670_v22, 16  ;;  %v14716_v6 = vpop.f32.mrf.mxu1 }
  0xfa   : > { %12452 = vmatmul.mubr.bf16.gmra.mxu0 %v14486_v47  ;;  %v2931_v47 = vsel %vm13478_vm5, %v2926_v54, %v14656_v10  ;;  %v2938_v45 = vrot.slane %v2936_v28, 5  ;;  %v14720_v44 = vsel %vm13519_vm8, %v3461_v60, %v3462_v55  ;;  %v14722_v4 = vrot.slane %v2942_v49, 5  ;;  %v4188_v55 = vld [vmem:[#allocation2 + $0x1c] sm:$0xf]  ;;  %v4189_v60 = vld [vmem:[#allocation2 + $0x20] sm:$0x1] }
  0xfb   : > { %12455 = vmatprep.mubr.bf16.mxu0 %v14523_v25  ;;  %12532 = vmatpush3.bf16.msra.mxu0 %v13194_v63  ;;  %v2948_v25 = vrot.slane %v2946_v14, 4  ;;  %v2957_v2 = vshrl.u32 %v2593_v26, 16  ;;  %v2954_v3 = vrot.slane %v2952_v43, 5  ;;  %v2960_v42 = vshll.u32 %v2593_v26, 16  ;;  %v14735_v63 = vpop.f32.mrf.mxu0  ;;  %v14737_v7 = vpop.f32.mrf.mxu1 }
  0xfc   : > { %12533 = vmatprep.subr.bf16.mxu0 %v13197_v36  ;;  %v2939_v23 = vor.u32 %v2938_v45, %v2935_v34  ;;  %v2966_v59 = vshll.u32 %v14685_v15, 16  ;;  %v2970_v61 = vshrl.u32 %v14685_v15, 16  ;;  %v2976_v8 = vshll.u32 %v14696_v9, 16 }
  0xfd   : > { %v2949_v19 = vor.u32 %v2948_v25, %v14722_v4  ;;  %v2959_v39 = vrot.slane %v2957_v2, 4  ;;  %v2962_v1 = vrot.slane %v2960_v42, 5  ;;  %v11158_v52 = vrot.slane %v3316_v48, 9  ;;  %v14743_v30 = vpop.f32.mrf.mxu0  ;;  %v4190_v48 = vld [vmem:[#allocation2 + $0x24] sm:$0xf] }
  0xfe   : > { %v2940_v56 = vrot.slane %v2939_v23, 4  ;;  %v2968_v10 = vrot.slane %v2966_v59, 5  ;;  %v14739_v38 = vcombine.low %v2921_v29, %v2931_v47  ;;  %v2972_v18 = vrot.slane %v2970_v61, 4  ;;  %v4191_v42 = vld [vmem:[#allocation2 + $0x28] sm:$0xf] }
  0xff   : > { %12534 = vmatpush3.bf16.msra.mxu0 %v13197_v36  ;;  %v2950_v32 = vrot.slane %v2949_v19, 4  ;;  %v3466_v27 = vrot.slane %v14668_v0, 5  ;;  %12508 = vmatmul.mubr.bf16.gmra.mxu1 %v11187_v24  ;;  %v11189_v31 = vcombine.low %v14713_v51, %v14720_v44  ;;  %v2963_v17 = vor.u32 %v2962_v1, %v2959_v39  ;;  %v12253_v51 = vpop.f32.mrf.mxu0  ;;  %v4192_v59 = vld [vmem:[#allocation2 + $0x2c] sm:$0x1] }
 0x100   : > { %12615 = vmatprep.subr.bf16.mxu0 %v14727_v46  ;;  %v2978_v26 = vrot.slane %v2976_v8, 5  ;;  %v3469_v54 = vrot.slane %v14670_v22, 5  ;;  %12511 = vmatprep.mubr.bf16.mxu1 %v11188_v20  ;;  %v2945_v0 = vsel %vm13478_vm5, %v2940_v56, %v14722_v4  ;;  %v2973_v12 = vor.u32 %v2972_v18, %v2968_v10  ;;  %v14758_v20 = vpop.f32.mrf.mxu1 }
 0x101   : > { %v3467_v36 = vsel %vm13519_vm8, %v11158_v52, %v3466_v27  ;;  %v3468_v24 = vrot.slane %v3466_v27, 4  ;;  %v2955_v28 = vsel %vm13478_vm5, %v2950_v32, %v2954_v3  ;;  %v2964_v22 = vrot.slane %v2963_v17, 4  ;;  %v1261_v56 = vpop.f32.mrf.mxu0  ;;  %v4193_v32 = vld [vmem:[#allocation2 + $0x30] sm:$0xf] }
 0x102   : > { %12456 = vmatmul.mubr.bf16.gmra.mxu0 %v14550_v57  ;;  %v11159_v29 = vrot.slane %v3317_v11, 9  ;;  %v3473_v57 = vrot.slane %v14685_v15, 5  ;;  %v2974_v34 = vrot.slane %v2973_v12, 4  ;;  %v14763_v14 = vadd.f32 %v14641_v16, %v12249_v33  ;;  %v14774_v19 = vpop.f32.mrf.mxu1 }
 0x103   : > { %12459 = vmatprep.mubr.bf16.mxu0 %v14601_v21  ;;  %v3470_v49 = vsel %vm13519_vm8, %v3468_v24, %v3469_v54  ;;  %v4236_v47 = vshrl.u32 %v4187_v62, 16  ;;  %v2969_v21 = vsel %vm13478_vm5, %v2964_v22, %v2968_v10  ;;  %v3476_v44 = vrot.slane %v14696_v9, 5 }
 0x104   : > { %v11190_v45 = vcombine.low %v3467_v36, %v3470_v49  ;;  %v3475_v43 = vrot.slane %v3473_v57, 4  ;;  %v2979_v15 = vsel %vm13478_vm5, %v2974_v34, %v2978_v26  ;;  %v4239_v25 = vshll.u32 %v4187_v62, 16  ;;  %v4194_v26 = vld [vmem:[#allocation2 + $0x34] sm:$0xf] }
 0x105   : > { %v4238_v4 = vrot.slane %v4236_v47, 4  ;;  %v4245_v2 = vshll.u32 %v4188_v55, 16  ;;  %v14770_v23 = vcombine.low %v2945_v0, %v2955_v28  ;;  %v3474_v16 = vsel %vm13519_vm8, %v11159_v29, %v3473_v57  ;;  %v4195_v47 = vld [vmem:[#allocation2 + $0x38] sm:$0x1] }
 0x106   : > { %v4249_v33 = vshrl.u32 %v4188_v55, 16  ;;  %v4255_v3 = vshll.u32 %v4189_v60, 16  ;;  %v14776_v39 = vcombine.low %v2969_v21, %v2979_v15  ;;  %v4241_v9 = vrot.slane %v4239_v25, 5  ;;  %v12254_v60 = vpop.f32.mrf.mxu0 }
 0x107   : > { %v4247_v61 = vrot.slane %v4245_v2, 5  ;;  %v14780_v8 = vadd.f32 %v14654_v40, %v14729_v53  ;;  %12512 = vmatmul.mubr.bf16.gmra.mxu1 %v11189_v31  ;;  %v3477_v1 = vsel %vm13519_vm8, %v3475_v43, %v3476_v44  ;;  %v4260_v52 = vshrl.u32 %v4190_v48, 16  ;;  %v14786_v55 = vpop.f32.mrf.mxu1 }
 0x108   : > { %v4251_v10 = vrot.slane %v4249_v33, 4  ;;  %v4263_v11 = vshll.u32 %v4190_v48, 16  ;;  %12515 = vmatprep.mubr.bf16.mxu1 %v11190_v45  ;;  %v4242_v18 = vor.u32 %v4241_v9, %v4238_v4  ;;  %v4269_v27 = vshll.u32 %v4191_v42, 16  ;;  %v4196_v4 = vld [vmem:[#allocation2 + $0x3c] sm:$0xf] }
 0x109   : > { %v4273_v62 = vshrl.u32 %v4191_v42, 16  ;;  %v4279_v17 = vshll.u32 %v4192_v59, 16  ;;  %v4257_v53 = vrot.slane %v4255_v3, 5  ;;  %v4262_v31 = vrot.slane %v4260_v52, 4  ;;  %v14792_v57 = vpop.f32.mrf.mxu1  ;;  %v4197_v42 = vld [vmem:[#allocation2 + $0x40] sm:$0xf] }
 0x10a   : > { %12460 = vmatmul.mubr.bf16.gmra.mxu0 %v14626_v41  ;;  %v4252_v40 = vor.u32 %v4251_v10, %v4247_v61  ;;  %v4265_v54 = vrot.slane %v4263_v11, 5  ;;  %v11191_v0 = vcombine.low %v3474_v16, %v3477_v1  ;;  %v4243_v12 = vrot.slane %v4242_v18, 4  ;;  %v1264_v16 = vpop.f32.mrf.mxu0  ;;  %v4198_v1 = vld [vmem:[#allocation2 + $0x44] sm:$0x1] }
 0x10b   : > { %12463 = vmatprep.mubr.bf16.mxu0 %v14692_v35  ;;  %v4271_v36 = vrot.slane %v4269_v27, 5  ;;  %v4275_v24 = vrot.slane %v4273_v62, 4  ;;  %v4281_v22 = vrot.slane %v4279_v17, 5  ;;  %v14790_v29 = vadd.f32 %v14672_v50, %v14735_v63  ;;  %v14801_v50 = vpop.f32.mrf.mxu1 }
 0x10c   : > { %v4253_v41 = vrot.slane %v4252_v40, 4  ;;  %v4266_v28 = vor.u32 %v4265_v54, %v4262_v31  ;;  %v4248_v35 = vsel %vm13478_vm5, %v4243_v12, %v4247_v61  ;;  %v14797_v49 = vadd.f32 %v14716_v6, %v12253_v51 }
 0x10d   : > { %v4276_v34 = vor.u32 %v4275_v24, %v4271_v36  ;;  %v4284_v21 = vshrl.u32 %v4193_v32, 16  ;;  %v4287_v44 = vshll.u32 %v4193_v32, 16  ;;  %v4293_v15 = vshll.u32 %v4194_v26, 16  ;;  %v14811_v52 = vpop.f32.mrf.mxu1  ;;  %v14820_v24 = vld [vmem:[#allocation2 + $0x4c] sm:$0xf] }
 0x10e   : > { %v4258_v45 = vsel %vm13478_vm5, %v4253_v41, %v4257_v53  ;;  %v4267_v43 = vrot.slane %v4266_v28, 4  ;;  %v4297_v48 = vshrl.u32 %v4194_v26, 16  ;;  %v4303_v3 = vshll.u32 %v4195_v47, 16 }
 0x10f   : > { %v11256_v63 = vcombine.low %v4248_v35, %v4258_v45  ;;  %v4277_v25 = vrot.slane %v4276_v34, 4  ;;  %v4286_v2 = vrot.slane %v4284_v21, 4  ;;  %12516 = vmatmul.mubr.bf16.gmra.mxu1 %v11191_v0  ;;  %v4289_v51 = vrot.slane %v4287_v44, 5 }
 0x110   : > { %v4272_v6 = vsel %vm13478_vm5, %v4267_v43, %v4271_v36  ;;  %v4295_v33 = vrot.slane %v4293_v15, 5  ;;  %v4299_v9 = vrot.slane %v4297_v48, 4  ;;  %v14809_v61 = vadd.f32 %v14737_v7, %v1261_v56  ;;  %v4199_v56 = vld [vmem:[#allocation2 + $0x48] sm:$0xf] }
 0x111   : > { %12583 = vmatprep.mubr.bf16.mxu1 %v11256_v63  ;;  %v4282_v59 = vsel %vm13478_vm5, %v4277_v25, %v4281_v22  ;;  %v4308_v10 = vshrl.u32 %v4196_v4, 16  ;;  %v4290_v32 = vor.u32 %v4289_v51, %v4286_v2  ;;  %v4305_v18 = vrot.slane %v4303_v3, 5  ;;  %v12257_v40 = vpop.f32.mrf.mxu0  ;;  %v13200_v22 = vld [vmem:[#allocation2 + $0x18] sm:$0xff]   ;;  %v4202_v2 = vld [vmem:[#allocation2 + $0x54] sm:$0xf] }
 0x112   : > { %12464 = vmatmul.mubr.bf16.gmra.mxu0 %v14739_v38  ;;  %v11257_v11 = vcombine.low %v4272_v6, %v4282_v59  ;;  %v4311_v27 = vshll.u32 %v4196_v4, 16  ;;  %v4300_v62 = vor.u32 %v4299_v9, %v4295_v33  ;;  %v4317_v17 = vshll.u32 %v4197_v42, 16  ;;  %v14822_v28 = vpop.f32.mrf.mxu1  ;;  %v14834_v51 = vld [vmem:[#allocation2 + $0x58] sm:$0xf] }
 0x113   : > { %12467 = vmatprep.mubr.bf16.mxu0 %v14770_v23  ;;  %v4310_v38 = vrot.slane %v4308_v10, 4  ;;  %v4321_v26 = vshrl.u32 %v4197_v42, 16  ;;  %v4291_v53 = vrot.slane %v4290_v32, 4  ;;  %v4327_v54 = vshll.u32 %v4198_v1, 16  ;;  %v1277_v41 = vpop.f32.mrf.mxu0  ;;  %v13202_v10 = vld [vmem:[#allocation2 + $0x24] sm:$0xff]  }
 0x114   : > { %v4313_v31 = vrot.slane %v4311_v27, 5  ;;  %v14815_v7 = vadd.f32 %v14758_v20, %v12254_v60  ;;  %v4301_v0 = vrot.slane %v4300_v62, 4  ;;  %v4319_v12 = vrot.slane %v4317_v17, 5  ;;  %v4201_v60 = vld [vmem:[#allocation2 + $0x50] sm:$0x1]  ;;  %v14836_v3 = vpop.f32.mrf.mxu1 }
 0x115   : > { %v4323_v36 = vrot.slane %v4321_v26, 4  ;;  %v14818_v23 = vadd.f32 %v14774_v19, %v1264_v16  ;;  %v4296_v35 = vsel %vm13478_vm5, %v4291_v53, %v4295_v33  ;;  %v4329_v47 = vrot.slane %v4327_v54, 5  ;;  %v12258_v44 = vpop.f32.mrf.mxu0  ;;  %v13203_v17 = vld [vmem:[#allocation2 + $0x30] sm:$0xff]   ;;  %v14846_v54 = vld [vmem:[#allocation2 + $0x64] sm:$0xf] }
 0x116   : > { %v4314_v34 = vor.u32 %v4313_v31, %v4310_v38  ;;  %v14827_v20 = vadd.f32 %v14786_v55, %v12257_v40  ;;  %v4306_v21 = vsel %vm13478_vm5, %v4301_v0, %v4305_v18  ;;  %v4332_v45 = vshrl.u32 %v4199_v56, 16  ;;  %v4205_v38 = vld [vmem:[#allocation2 + $0x60] sm:$0xf] }
 0x117   : > { %v4324_v19 = vor.u32 %v4323_v36, %v4319_v12  ;;  %v4335_v43 = vshll.u32 %v4199_v56, 16  ;;  %12584 = vmatmul.mubr.bf16.vlgmr.msra.gmra.mxu1 %v11257_v11  ;;  %v11258_v15 = vcombine.low %v4296_v35, %v4306_v21  ;;  %v4341_v63 = vshll.u32 %v14820_v24, 16  ;;  %v1280_v33 = vpop.f32.mrf.mxu0  ;;  %v14849_v36 = vld [vmem:[#allocation2 + $0x68] sm:$0x1]  ;;  %v13204_v35 = vld [vmem:[%s18209_s1 + $0x230] sm:$0xff]  }
 0x118   : > { %v4315_v4 = vrot.slane %v4314_v34, 4  ;;  %v4345_v25 = vshrl.u32 %v14820_v24, 16  ;;  %v4334_v48 = vrot.slane %v4332_v45, 4  ;;  %v4351_v6 = vshll.u32 %v4201_v60, 16 }
 0x119   : > { %v4325_v55 = vrot.slane %v4324_v19, 4  ;;  %v4337_v16 = vrot.slane %v4335_v43, 5  ;;  %12587 = vmatprep.mubr.bf16.mxu1 %v11258_v15  ;;  %v4343_v59 = vrot.slane %v4341_v63, 5  ;;  %v14841_v1 = vadd.f32 %v14792_v57, %v1277_v41  ;;  %v12261_v62 = vpop.f32.mrf.mxu0 }
 0x11a   : > { %12468 = vmatmul.mubr.bf16.gmra.mxu0 %v14776_v39  ;;  %v4320_v42 = vsel %vm13478_vm5, %v4315_v4, %v4319_v12  ;;  %v4347_v9 = vrot.slane %v4345_v25, 4  ;;  %v4204_v39 = vld [vmem:[#allocation2 + $0x5c] sm:$0x1]  ;;  %v4353_v18 = vrot.slane %v4351_v6, 5  ;;  %v4356_v27 = vshrl.u32 %v4202_v2, 16 }
 0x11b   : > { %12535 = vmatprep.mubr.bf16.mxu0 %v13200_v22  ;;  %v4330_v11 = vsel %vm13478_vm5, %v4325_v55, %v4329_v47  ;;  %v4338_v32 = vor.u32 %v4337_v16, %v4334_v48  ;;  %v4359_v53 = vshll.u32 %v4202_v2, 16  ;;  %v4365_v31 = vshll.u32 %v14834_v51, 16  ;;  %v1293_v41 = vpop.f32.mrf.mxu0  ;;  %v14851_v22 = vpop.f32.mrf.mxu1  ;;  %v4208_v4 = vld [vmem:[#allocation2 + $0x6c] sm:$0xf] }
 0x11c   : > { %v11259_v26 = vcombine.low %v4320_v42, %v4330_v11  ;;  %v4348_v40 = vor.u32 %v4347_v9, %v4343_v59  ;;  %v4358_v56 = vrot.slane %v4356_v27, 4  ;;  %v4369_v0 = vshrl.u32 %v14834_v51, 16  ;;  %v13207_v11 = vld [vmem:[%s18209_s1 + $0x228] sm:$0xff]  }
 0x11d   : > { %v4339_v57 = vrot.slane %v4338_v32, 4  ;;  %v4375_v12 = vshll.u32 %v4204_v39, 16  ;;  %v4361_v47 = vrot.slane %v4359_v53, 5  ;;  %v4367_v60 = vrot.slane %v4365_v31, 5  ;;  %v14875_v39 = vld [vmem:[#allocation2 + $0x74] sm:$0x1] }
 0x11e   : > { %v4349_v34 = vrot.slane %v4348_v40, 4  ;;  %v14857_v21 = vadd.f32 %v14801_v50, %v12258_v44  ;;  %v4371_v45 = vrot.slane %v4369_v0, 4  ;;  %v14862_v15 = vadd.f32 %v14811_v52, %v1280_v33  ;;  %v14869_v50 = vld [vmem:[#allocation2 + $0x70] sm:$0xf]  ;;  %v12262_v52 = vpop.f32.mrf.mxu0  ;;  %v1601_v33 = vpop.f32.mrf.mxu1  ;;  %v4211_v53 = vld [vmem:[#allocation2 + $0x78] sm:$0xf] }
 0x11f   : > { %v4344_v19 = vsel %vm13478_vm5, %v4339_v57, %v4343_v59  ;;  %v4377_v43 = vrot.slane %v4375_v12, 5  ;;  %12588 = vmatmul.mubr.bf16.gmra.mxu1 %v11259_v26  ;;  %v4362_v25 = vor.u32 %v4361_v47, %v4358_v56  ;;  %v14867_v2 = vadd.f32 %v14822_v28, %v12261_v62  ;;  %v13206_v62 = vld [vmem:[#allocation2 + $0x48] sm:$0xff]   ;;  %v13210_v57 = vld [vmem:[%s18209_s1 + $0x220] sm:$0xff]  }
 0x120   : > { %v4354_v63 = vsel %vm13478_vm5, %v4349_v34, %v4353_v18  ;;  %v4380_v55 = vshrl.u32 %v4205_v38, 16  ;;  %v4372_v48 = vor.u32 %v4371_v45, %v4367_v60  ;;  %v4383_v16 = vshll.u32 %v4205_v38, 16  ;;  %v1296_v12 = vpop.f32.mrf.mxu0  ;;  %v14891_v34 = vld [vmem:[#allocation2 + $0x7c] sm:$0xf] }
 0x121   : > { %v11260_v44 = vcombine.low %v4344_v19, %v4354_v63  ;;  %v4389_v6 = vshll.u32 %v14846_v54, 16  ;;  %v4363_v42 = vrot.slane %v4362_v25, 4  ;;  %v4393_v9 = vshrl.u32 %v14846_v54, 16 }
 0x122   : > { %12536 = vmatmul.mubr.bf16.vlgmr.msra.gmra.mxu0 %v13202_v10  ;;  %v4382_v59 = vrot.slane %v4380_v55, 4  ;;  %v4399_v28 = vshll.u32 %v14849_v36, 16  ;;  %v13205_v10 = vld [vmem:[#allocation2 + $0x3c] sm:$0xff]   ;;  %v4373_v32 = vrot.slane %v4372_v48, 4  ;;  %v4385_v18 = vrot.slane %v4383_v16, 5 }
 0x123   : > { %12616 = vmatpush3.bf16.msra.mxu0 %v14727_v46  ;;  %12539 = vmatprep.mubr.bf16.mxu0 %v13203_v17  ;;  %v4391_v27 = vrot.slane %v4389_v6, 5  ;;  %v14881_v46 = vadd.f32 %v14836_v3, %v1293_v41  ;;  %v4368_v38 = vsel %vm13478_vm5, %v4363_v42, %v4367_v60  ;;  %v4395_v17 = vrot.slane %v4393_v9, 4  ;;  %v12313_v41 = vpop.f32.mrf.mxu1  ;;  %v4214_v42 = vld [vmem:[#allocation2 + $0x84] sm:$0xf] }
 0x124   : > { %12617 = vmatprep.subr.bf16.mxu0 %v13204_v35  ;;  %12591 = vmatprep.mubr.bf16.mxu1 %v11260_v44  ;;  %v4401_v26 = vrot.slane %v4399_v28, 5  ;;  %v4404_v40 = vshrl.u32 %v4208_v4, 16  ;;  %v4378_v31 = vsel %vm13478_vm5, %v4373_v32, %v4377_v43  ;;  %v4386_v56 = vor.u32 %v4385_v18, %v4382_v59  ;;  %v14895_v44 = vld [vmem:[#allocation2 + $0x80] sm:$0x1]  ;;  %v14906_v18 = vld [vmem:[#allocation2 + $0x88] sm:$0xf] }
 0x125   : > { %v4407_v0 = vshll.u32 %v4208_v4, 16  ;;  %v4413_v3 = vshll.u32 %v14869_v50, 16  ;;  %v11261_v47 = vcombine.low %v4368_v38, %v4378_v31  ;;  %v4396_v60 = vor.u32 %v4395_v17, %v4391_v27  ;;  %v14897_v4 = vpop.f32.mrf.mxu1  ;;  %v13213_v31 = vld [vmem:[%s18209_s1 + $0x218] sm:$0xff]  }
 0x126   : > { %v4406_v19 = vrot.slane %v4404_v40, 4  ;;  %v4417_v45 = vshrl.u32 %v14869_v50, 16  ;;  %v4387_v43 = vrot.slane %v4386_v56, 4  ;;  %v4423_v55 = vshll.u32 %v14875_v39, 16 }
 0x127   : > { %12618 = vmatpush3.bf16.msra.mxu0 %v13204_v35  ;;  %v4409_v63 = vrot.slane %v4407_v0, 5  ;;  %v4415_v25 = vrot.slane %v4413_v3, 5  ;;  %12592 = vmatmul.mubr.bf16.gmra.mxu1 %v11261_v47  ;;  %v4397_v48 = vrot.slane %v4396_v60, 4  ;;  %v14900_v35 = vadd.f32 %v14851_v22, %v12262_v52  ;;  %v14908_v38 = vpop.f32.mrf.mxu1  ;;  %v4217_v47 = vld [vmem:[#allocation2 + $0x90] sm:$0xf]  ;;  %v13209_v60 = vld [vmem:[#allocation2 + $0x60] sm:$0xff]  }
 0x128   : > { %12619 = vmatprep.subr.bf16.mxu0 %v13207_v11  ;;  %v4419_v16 = vrot.slane %v4417_v45, 4  ;;  %v14902_v6 = vadd.f32 %v1601_v33, %v1296_v12  ;;  %v4392_v59 = vsel %vm13478_vm5, %v4387_v43, %v4391_v27  ;;  %v4425_v28 = vrot.slane %v4423_v55, 5  ;;  %v14918_v12 = vld [vmem:[#allocation2 + $0x8c] sm:$0x1] }
 0x129   : > { %18255 = vst [vmem:[#allocation6_spill] sm:$0xff] %v14900_v35  ;;  %v4410_v9 = vor.u32 %v4409_v63, %v4406_v19  ;;  %v4428_v32 = vshrl.u32 %v4211_v53, 16  ;;  %v4402_v22 = vsel %vm13478_vm5, %v4397_v48, %v4401_v26  ;;  %v4431_v33 = vshll.u32 %v4211_v53, 16  ;;  %v14920_v53 = vpop.f32.mrf.mxu1 }
 0x12a   : > { %18256 = vst [vmem:[#allocation7_spill] sm:$0xff] %v14902_v6  ;;  %12540 = vmatmul.mubr.bf16.gmra.mxu0 %v13205_v10  ;;  %v4420_v52 = vor.u32 %v4419_v16, %v4415_v25  ;;  %v4437_v17 = vshll.u32 %v14891_v34, 16  ;;  %v13208_v10 = vld [vmem:[#allocation2 + $0x54] sm:$0xff]   ;;  %v11262_v40 = vcombine.low %v4392_v59, %v4402_v22  ;;  %v4441_v0 = vshrl.u32 %v14891_v34, 16  ;;  %18257 = vst [vmem:[#allocation8_spill] sm:$0xff] %v14920_v53 }
 0x12b   : > { %12543 = vmatprep.mubr.bf16.mxu0 %v13206_v62  ;;  %12620 = vmatpush3.bf16.msra.mxu0 %v13207_v11  ;;  %v4411_v27 = vrot.slane %v4410_v9, 4  ;;  %v4430_v56 = vrot.slane %v4428_v32, 4  ;;  %v4433_v11 = vrot.slane %v4431_v33, 5  ;;  %v4447_v26 = vshll.u32 %v14895_v44, 16 }
 0x12c   : > { %12621 = vmatprep.subr.bf16.mxu0 %v13210_v57  ;;  %v4421_v62 = vrot.slane %v4420_v52, 4  ;;  %v4439_v3 = vrot.slane %v4437_v17, 5  ;;  %12595 = vmatprep.mubr.bf16.mxu1 %v11262_v40  ;;  %v4443_v45 = vrot.slane %v4441_v0, 4  ;;  %v4452_v43 = vshrl.u32 %v4214_v42, 16  ;;  %v12265_v48 = vpop.f32.mrf.mxu0  ;;  %v14935_v0 = vld [vmem:[#allocation2 + $0x98] sm:$0x1] }
 0x12d   : > { %v4416_v19 = vsel %vm13478_vm5, %v4411_v27, %v4415_v25  ;;  %v4455_v63 = vshll.u32 %v4214_v42, 16  ;;  %v4434_v16 = vor.u32 %v4433_v11, %v4430_v56  ;;  %v4449_v59 = vrot.slane %v4447_v26, 5  ;;  %v13216_v25 = vld [vmem:[%s18209_s1 + $0x210] sm:$0xff]  }
 0x12e   : > { %v4426_v55 = vsel %vm13478_vm5, %v4421_v62, %v4425_v28  ;;  %v4461_v9 = vshll.u32 %v14906_v18, 16  ;;  %v14927_v22 = vadd.f32 %v12313_v41, %v12265_v48  ;;  %v4444_v52 = vor.u32 %v4443_v45, %v4439_v3  ;;  %v12317_v27 = vpop.f32.mrf.mxu1  ;;  %v14933_v56 = vld [vmem:[#allocation2 + $0x94] sm:$0xf]  ;;  %v13219_v45 = vld [vmem:[%s18209_s1 + $0x208] sm:$0xff]  }
 0x12f   : > { %12622 = vmatpush3.bf16.msra.mxu0 %v13210_v57  ;;  %v11263_v32 = vcombine.low %v4416_v19, %v4426_v55  ;;  %v4454_v33 = vrot.slane %v4452_v43, 4  ;;  %v4435_v42 = vrot.slane %v4434_v16, 4  ;;  %v1309_v57 = vpop.f32.mrf.mxu0  ;;  %v4457_v17 = vrot.slane %v4455_v63, 5  ;;  %v4220_v19 = vld [vmem:[#allocation2 + $0x9c] sm:$0xf]  ;;  %v13211_v16 = vld [vmem:[#allocation2 + $0x6c] sm:$0xff]  }
 0x130   : > { %12623 = vmatprep.subr.bf16.mxu0 %v13213_v31  ;;  %18258 = vst [vmem:[#allocation9_spill] sm:$0xff] %v14927_v22  ;;  %v4463_v40 = vrot.slane %v4461_v9, 5  ;;  %v4465_v28 = vshrl.u32 %v14906_v18, 16  ;;  %v4445_v41 = vrot.slane %v4444_v52, 4  ;;  %v14938_v62 = vadd.f32 %v14897_v4, %v1309_v57  ;;  %v13212_v57 = vld [vmem:[#allocation2 + $0x78] sm:$0xff]  }
 0x131   : > { %12596 = vmatmul.mubr.bf16.gmra.mxu1 %v11263_v32  ;;  %v4471_v11 = vshll.u32 %v14918_v12, 16  ;;  %v4476_v26 = vshrl.u32 %v4217_v47, 16  ;;  %v4440_v43 = vsel %vm13478_vm5, %v4435_v42, %v4439_v3  ;;  %v4458_v63 = vor.u32 %v4457_v17, %v4454_v33  ;;  %v12266_v55 = vpop.f32.mrf.mxu0  ;;  %v1630_v33 = vpop.f32.mrf.mxu1  ;;  %v14953_v42 = vld [vmem:[#allocation2 + $0xa0] sm:$0xf] }
 0x132   : > { %12544 = vmatmul.mubr.bf16.gmra.mxu0 %v13208_v10  ;;  %18259 = vst [vmem:[#allocation10_spill] sm:$0xff] %v14938_v62  ;;  %v4467_v10 = vrot.slane %v4465_v28, 4  ;;  %v4479_v48 = vshll.u32 %v4217_v47, 16  ;;  %v4450_v4 = vsel %vm13478_vm5, %v4445_v41, %v4449_v59  ;;  %v14949_v32 = vadd.f32 %v14908_v38, %v12266_v55  ;;  %v14958_v38 = vld [vmem:[#allocation2 + $0xa4] sm:$0x1] }
 0x133   : > { %12547 = vmatprep.mubr.bf16.mxu0 %v13209_v60  ;;  %12624 = vmatpush3.bf16.msra.mxu0 %v13213_v31  ;;  %v4473_v9 = vrot.slane %v4471_v11, 5  ;;  %v4478_v52 = vrot.slane %v4476_v26, 4  ;;  %v11264_v60 = vcombine.low %v4440_v43, %v4450_v4  ;;  %v4459_v31 = vrot.slane %v4458_v63, 4  ;;  %v14951_v53 = vpop.f32.mrf.mxu0  ;;  %v13222_v28 = vld [vmem:[%s18209_s1 + $0x200] sm:$0xff]   ;;  %v4223_v63 = vld [vmem:[#allocation2 + $0xa8] sm:$0xf]  ;;  %v12318_v6 = vpop.f32.mrf.mxu1 }
 0x134   : > { %18260 = vst [vmem:[#allocation11_spill] sm:$0xff] %v14949_v32  ;;  %12625 = vmatprep.subr.bf16.mxu0 %v13216_v25  ;;  %v4468_v58 = vor.u32 %v4467_v10, %v4463_v40  ;;  %18261 = vst [vmem:[#allocation12_spill] sm:$0xff] %v14951_v53  ;;  %v4481_v3 = vrot.slane %v4479_v48, 5  ;;  %v4485_v47 = vshll.u32 %v14933_v56, 16  ;;  %v4489_v59 = vshrl.u32 %v14933_v56, 16 }
 0x135   : > { %v4495_v17 = vshll.u32 %v14935_v0, 16  ;;  %12599 = vmatprep.mubr.bf16.mxu1 %v11264_v60  ;;  %v4464_v41 = vsel %vm13478_vm5, %v4459_v31, %v4463_v40  ;;  %v4500_v43 = vshrl.u32 %v4220_v19, 16  ;;  %v12269_v10 = vpop.f32.mrf.mxu0  ;;  %v4503_v53 = vshll.u32 %v4220_v19, 16  ;;  %v14969_v40 = vld [vmem:[#allocation2 + $0xac] sm:$0xf] }
 0x136   : > { %v4469_v11 = vrot.slane %v4468_v58, 4  ;;  %v4482_v26 = vor.u32 %v4481_v3, %v4478_v52  ;;  %v4487_v55 = vrot.slane %v4485_v47, 5  ;;  %v4491_v48 = vrot.slane %v4489_v59, 4  ;;  %v14978_v59 = vld [vmem:[#allocation2 + $0xb0] sm:$0x1] }
 0x137   : > { %12626 = vmatpush3.bf16.msra.mxu0 %v13216_v25  ;;  %v4497_v4 = vrot.slane %v4495_v17, 5  ;;  %v14967_v62 = vadd.f32 %v12317_v27, %v12269_v10  ;;  %v4502_v22 = vrot.slane %v4500_v43, 4  ;;  %v1325_v52 = vpop.f32.mrf.mxu0  ;;  %v4505_v31 = vrot.slane %v4503_v53, 5  ;;  %18264 = vst [vmem:[#allocation15_spill] sm:$0xff] %v14978_v59 }
 0x138   : > { %12627 = vmatprep.subr.bf16.mxu0 %v13219_v45  ;;  %v4474_v32 = vsel %vm13478_vm5, %v4469_v11, %v4473_v9  ;;  %v4483_v60 = vrot.slane %v4482_v26, 4  ;;  %v4492_v25 = vor.u32 %v4491_v48, %v4487_v55  ;;  %v4509_v3 = vshll.u32 %v14953_v42, 16 }
 0x139   : > { %18262 = vst [vmem:[#allocation13_spill] sm:$0xff] %v14967_v62  ;;  %v11265_v58 = vcombine.low %v4464_v41, %v4474_v32  ;;  %v14974_v47 = vadd.f32 %v1630_v33, %v1325_v52  ;;  %v4513_v27 = vshrl.u32 %v14953_v42, 16  ;;  %v4519_v9 = vshll.u32 %v14958_v38, 16  ;;  %v12270_v41 = vpop.f32.mrf.mxu0  ;;  %v14982_v33 = vpop.f32.mrf.mxu1 }
 0x13a   : > { %12548 = vmatmul.mubr.bf16.gmra.mxu0 %v13211_v16  ;;  %v4488_v19 = vsel %vm13478_vm5, %v4483_v60, %v4487_v55  ;;  %v13214_v16 = vld [vmem:[#allocation2 + $0x84] sm:$0xff]   ;;  %v4493_v32 = vrot.slane %v4492_v25, 4  ;;  %v4506_v17 = vor.u32 %v4505_v31, %v4502_v22  ;;  %v4511_v53 = vrot.slane %v4509_v3, 5  ;;  %18266 = vst [vmem:[#allocation17_spill] sm:$0xff] %v14982_v33  ;;  %v14984_v55 = vld [vmem:[#allocation2 + $0xb8] sm:$0xf] }
 0x13b   : > { %12551 = vmatprep.mubr.bf16.mxu0 %v13212_v57  ;;  %18263 = vst [vmem:[#allocation14_spill] sm:$0xff] %v14974_v47  ;;  %12628 = vmatpush3.bf16.msra.mxu0 %v13219_v45  ;;  %v4524_v11 = vshrl.u32 %v4223_v63, 16  ;;  %v4226_v57 = vld [vmem:[#allocation2 + $0xb4] sm:$0xf]  ;;  %v4515_v26 = vrot.slane %v4513_v27, 4  ;;  %v14980_v43 = vadd.f32 %v12318_v6, %v12270_v41  ;;  %v4527_v10 = vshll.u32 %v4223_v63, 16 }
 0x13c   : > { %12600 = vmatmul.mubr.bf16.gmra.mxu1 %v11265_v58  ;;  %12629 = vmatprep.subr.bf16.mxu0 %v13222_v28  ;;  %18267 = vst [vmem:[#allocation18_spill] sm:$0xff] %v14984_v55  ;;  %v13215_v45 = vld [vmem:[#allocation2 + $0x90] sm:$0xff]   ;;  %v4498_v48 = vsel %vm13478_vm5, %v4493_v32, %v4497_v4  ;;  %v4507_v60 = vrot.slane %v4506_v17, 4  ;;  %v4533_v22 = vshll.u32 %v14969_v40, 16  ;;  %v4521_v31 = vrot.slane %v4519_v9, 5 }
 0x13d   : > { %18265 = vst [vmem:[#allocation16_spill] sm:$0xff] %v14980_v43  ;;  %v4526_v58 = vrot.slane %v4524_v11, 4  ;;  %v11266_v25 = vcombine.low %v4488_v19, %v4498_v48  ;;  %v4516_v52 = vor.u32 %v4515_v26, %v4511_v53  ;;  %v4529_v3 = vrot.slane %v4527_v10, 5  ;;  %v14993_v33 = vld [vmem:[#allocation2 + $0xbc] sm:$0x1] }
 0x13e   : > { %v4512_v6 = vsel %vm13478_vm5, %v4507_v60, %v4511_v53  ;;  %v4535_v27 = vrot.slane %v4533_v22, 5  ;;  %v4537_v63 = vshrl.u32 %v14969_v40, 16  ;;  %v4543_v41 = vshll.u32 %v14978_v59, 16  ;;  %18268 = vst [vmem:[#allocation19_spill] sm:$0xff] %v14993_v33  ;;  %v4229_v4 = vld [vmem:[#allocation2 + $0xc0] sm:$0xf]  ;;  %v12321_v17 = vpop.f32.mrf.mxu1 }
 0x13f   : > { %12630 = vmatpush3.bf16.msra.mxu0 %v13222_v28  ;;  %12603 = vmatprep.mubr.bf16.mxu1 %v11266_v25  ;;  %v4517_v32 = vrot.slane %v4516_v52, 4  ;;  %v4530_v11 = vor.u32 %v4529_v3, %v4526_v58  ;;  %v4548_v19 = vshrl.u32 %v4226_v57, 16  ;;  %v4551_v26 = vshll.u32 %v4226_v57, 16  ;;  %v14995_v9 = vld [vmem:[#allocation2 + $0xc4] sm:$0xf]  ;;  %v13217_v43 = vld [vmem:[#allocation2 + $0x9c] sm:$0xff]   ;;  %v15001_v3 = vpop.f32.mrf.mxu0 }
 0x140   : > { %18269 = vst [vmem:[#allocation20_spill] sm:$0xff] %v14995_v9  ;;  %v4539_v28 = vrot.slane %v4537_v63, 4  ;;  %v4545_v10 = vrot.slane %v4543_v41, 5  ;;  %v4557_v53 = vshll.u32 %v14984_v55, 16  ;;  %v4561_v48 = vshrl.u32 %v14984_v55, 16  ;;  %18270 = vst [vmem:[#allocation21_spill] sm:$0xff] %v15001_v3  ;;  %v1646_v41 = vpop.f32.mrf.mxu1 }
 0x141   : > { %v4522_v60 = vsel %vm13478_vm5, %v4517_v32, %v4521_v31  ;;  %v4531_v22 = vrot.slane %v4530_v11, 4  ;;  %v4550_v25 = vrot.slane %v4548_v19, 4  ;;  %v4553_v52 = vrot.slane %v4551_v26, 5  ;;  %v15006_v55 = vld [vmem:[#allocation2 + $0xc8] sm:$0x1] }
 0x142   : > { %12552 = vmatmul.mubr.bf16.gmra.mxu0 %v13214_v16  ;;  %v11267_v58 = vcombine.low %v4512_v6, %v4522_v60  ;;  %v4540_v57 = vor.u32 %v4539_v28, %v4535_v27  ;;  %v4559_v47 = vrot.slane %v4557_v53, 5  ;;  %v4563_v16 = vrot.slane %v4561_v48, 4  ;;  %v4232_v32 = vld [vmem:[#allocation2 + $0xcc] sm:$0xf] }
 0x143   : > { %12555 = vmatprep.mubr.bf16.mxu0 %v13215_v45  ;;  %v4536_v63 = vsel %vm13478_vm5, %v4531_v22, %v4535_v27  ;;  %v4554_v62 = vor.u32 %v4553_v52, %v4550_v25  ;;  %v4567_v45 = vshll.u32 %v14993_v33, 16  ;;  %v4572_v31 = vshrl.u32 %v4229_v4, 16  ;;  %v13218_v11 = vld [vmem:[#allocation2 + $0xa8] sm:$0xff]   ;;  %v15010_v22 = vld [vmem:[#allocation2 + $0xd0] sm:$0xf] }
 0x144   : > { %12604 = vmatmul.mubr.bf16.gmra.mxu1 %v11267_v58  ;;  %v4541_v19 = vrot.slane %v4540_v57, 4  ;;  %v4564_v6 = vor.u32 %v4563_v16, %v4559_v47  ;;  %v4575_v26 = vshll.u32 %v4229_v4, 16  ;;  %v4581_v28 = vshll.u32 %v14995_v9, 16 }
 0x145   : > { %v4555_v53 = vrot.slane %v4554_v62, 4  ;;  %v4569_v48 = vrot.slane %v4567_v45, 5  ;;  %v4574_v60 = vrot.slane %v4572_v31, 4  ;;  %v4585_v27 = vshrl.u32 %v14995_v9, 16  ;;  %v12273_v25 = vpop.f32.mrf.mxu0  ;;  %v12322_v62 = vpop.f32.mrf.mxu1  ;;  %v15018_v45 = vld [vmem:[#allocation2 + $0xd4] sm:$0x1] }
 0x146   : > { %v4546_v52 = vsel %vm13478_vm5, %v4541_v19, %v4545_v10  ;;  %v4565_v3 = vrot.slane %v4564_v6, 4  ;;  %v4577_v33 = vrot.slane %v4575_v26, 5  ;;  %v4583_v58 = vrot.slane %v4581_v28, 5  ;;  %v4941_v26 = vld [vmem:[#allocation2 + $0x18] sm:$0xe] }
 0x147   : > { %v15014_v59 = vadd.f32 %v12321_v17, %v12273_v25  ;;  %v11268_v57 = vcombine.low %v4536_v63, %v4546_v52  ;;  %v4560_v4 = vsel %vm13478_vm5, %v4555_v53, %v4559_v47  ;;  %v4587_v16 = vrot.slane %v4585_v27, 4  ;;  %v1341_v31 = vpop.f32.mrf.mxu0 }
 0x148   : > { %v4570_v9 = vsel %vm13478_vm5, %v4565_v3, %v4569_v48  ;;  %v4578_v35 = vor.u32 %v4577_v33, %v4574_v60  ;;  %v4591_v10 = vshll.u32 %v15006_v55, 16  ;;  %v4596_v19 = vshrl.u32 %v4232_v32, 16  ;;  %v15028_v33 = vpop.f32.mrf.mxu1  ;;  %v13221_v60 = vld [vmem:[#allocation2 + $0xc0] sm:$0xff]  }
 0x149   : > { %12607 = vmatprep.mubr.bf16.mxu1 %v11268_v57  ;;  %v15023_v17 = vadd.f32 %v1646_v41, %v1341_v31  ;;  %v11269_v63 = vcombine.low %v4560_v4, %v4570_v9  ;;  %v4588_v6 = vor.u32 %v4587_v16, %v4583_v58  ;;  %v4599_v47 = vshll.u32 %v4232_v32, 16  ;;  %v12274_v28 = vpop.f32.mrf.mxu0  ;;  %18273 = vst [vmem:[#allocation24_spill] sm:$0xff] %v15028_v33  ;;  %v13220_v41 = vld [vmem:[#allocation2 + $0xb4] sm:$0xff]  }
 0x14a   : > { %12556 = vmatmul.mubr.bf16.gmra.mxu0 %v13217_v43  ;;  %v4579_v53 = vrot.slane %v4578_v35, 4  ;;  %v4593_v27 = vrot.slane %v4591_v10, 5  ;;  %v4598_v43 = vrot.slane %v4596_v19, 4  ;;  %v4605_v25 = vshll.u32 %v15010_v22, 16  ;;  %v13350_v10 = vld [vmem:[#allocation2 + $0x1c] sm:$0xf] }
 0x14b   : > { %12559 = vmatprep.mubr.bf16.mxu0 %v13218_v11  ;;  %18271 = vst [vmem:[#allocation22_spill] sm:$0xff] %v15023_v17  ;;  %v15026_v52 = vadd.f32 %v12322_v62, %v12274_v28  ;;  %v4589_v3 = vrot.slane %v4588_v6, 4  ;;  %v4601_v48 = vrot.slane %v4599_v47, 5  ;;  %v4609_v11 = vshrl.u32 %v15010_v22, 16  ;;  %v13351_v6 = vld [vmem:[#allocation2 + $0x20] sm:$0x1] }
 0x14c   : > { %12608 = vmatmul.mubr.bf16.gmra.mxu1 %v11269_v63  ;;  %v4584_v9 = vsel %vm13478_vm5, %v4579_v53, %v4583_v58  ;;  %v4607_v32 = vrot.slane %v4605_v25, 5  ;;  %v4615_v35 = vshll.u32 %v15018_v45, 16  ;;  %v11280_v31 = vrot.slane %v4941_v26, 9  ;;  %v4942_v53 = vld [vmem:[#allocation2 + $0x24] sm:$0xe] }
 0x14d   : > { %18272 = vst [vmem:[#allocation23_spill] sm:$0xff] %v15026_v52  ;;  %v4594_v57 = vsel %vm13478_vm5, %v4589_v3, %v4593_v27  ;;  %v4602_v4 = vor.u32 %v4601_v48, %v4598_v43  ;;  %v4611_v62 = vrot.slane %v4609_v11, 4  ;;  %v5007_v19 = vrot.slane %v13350_v10, 5  ;;  %v13352_v3 = vld [vmem:[#allocation2 + $0x28] sm:$0xf] }
 0x14e   : > { %v11270_v16 = vcombine.low %v4584_v9, %v4594_v57  ;;  %v5010_v47 = vrot.slane %v13351_v6, 5  ;;  %v4617_v52 = vrot.slane %v4615_v35, 5  ;;  %v5014_v26 = vrot.slane %v13352_v3, 5  ;;  %v13353_v9 = vld [vmem:[#allocation2 + $0x34] sm:$0xf] }
 0x14f   : > { %v12325_v28 = vpop.f32.mrf.mxu1  ;;  %v4603_v63 = vrot.slane %v4602_v4, 4  ;;  %v4612_v33 = vor.u32 %v4611_v62, %v4607_v32  ;;  %v5009_v58 = vrot.slane %v5007_v19, 4  ;;  %v5008_v48 = vsel %vm13519_vm8, %v11280_v31, %v5007_v19  ;;  %v15044_v4 = vpop.f32.mrf.mxu0  ;;  %v13223_v62 = vld [vmem:[#allocation2 + $0xcc] sm:$0xff]  }
 0x150   : > { %12611 = vmatprep.mubr.bf16.mxu1 %v11270_v16  ;;  %v5021_v35 = vrot.slane %v13353_v9, 5  ;;  %18274 = vst [vmem:[#allocation25_spill] sm:$0xff] %v15044_v4  ;;  %v11281_v31 = vrot.slane %v4942_v53, 9  ;;  %v5016_v19 = vrot.slane %v5014_v26, 4  ;;  %v5028_v4 = vrot.slane %v13356_v37, 5 }
 0x151   : > { %v1662_v25 = vpop.f32.mrf.mxu1  ;;  %v4608_v27 = vsel %vm13478_vm5, %v4603_v63, %v4607_v32  ;;  %v4613_v43 = vrot.slane %v4612_v33, 4  ;;  %v5011_v11 = vsel %vm13519_vm8, %v5009_v58, %v5010_v47  ;;  %v13354_v33 = vld [vmem:[#allocation2 + $0x2c] sm:$0x1]  ;;  %v13355_v58 = vld [vmem:[#allocation2 + $0x38] sm:$0x1] }
 0x152   : > { %12560 = vmatmul.mubr.bf16.gmra.mxu0 %v13220_v41  ;;  %v5017_v16 = vrot.slane %v13354_v33, 5  ;;  %v11312_v6 = vcombine.low %v5008_v48, %v5011_v11  ;;  %v5023_v63 = vrot.slane %v5021_v35, 4  ;;  %v5024_v3 = vrot.slane %v13355_v58, 5  ;;  %v4945_v33 = vld [vmem:[#allocation2 + $0x48] sm:$0xe] }
 0x153   : > { %12563 = vmatprep.mubr.bf16.mxu0 %v13221_v60  ;;  %v4618_v41 = vsel %vm13478_vm5, %v4613_v43, %v4617_v52  ;;  %v12326_v57 = vpop.f32.mrf.mxu1  ;;  %v4943_v60 = vld [vmem:[#allocation2 + $0x30] sm:$0xe]  ;;  %v4944_v43 = vld [vmem:[#allocation2 + $0x3c] sm:$0xe]  ;;  %v13357_v58 = vld [vmem:[#allocation2 + $0x44] sm:$0x1] }
 0x154   : > { %v11271_v32 = vcombine.low %v4608_v27, %v4618_v41  ;;  %v11282_v47 = vrot.slane %v4943_v60, 9  ;;  %v5015_v27 = vsel %vm13519_vm8, %v11281_v31, %v5014_v26  ;;  %v5018_v53 = vsel %vm13519_vm8, %v5016_v19, %v5017_v16 }
 0x155   : > { %v15046_v10 = vpop.f32.mrf.mxu1  ;;  %v5025_v60 = vsel %vm13519_vm8, %v5023_v63, %v5024_v3  ;;  %v11313_v26 = vcombine.low %v5015_v27, %v5018_v53  ;;  %v5030_v31 = vrot.slane %v5028_v4, 4  ;;  %v5031_v16 = vrot.slane %v13357_v58, 5 }
 0x156   : > { %18275 = vst [vmem:[#allocation26_spill] sm:$0xff] %v15046_v10  ;;  %12612 = vmatmul.mubr.bf16.gmra.mxu1 %v11271_v32  ;;  %v5022_v41 = vsel %vm13519_vm8, %v11282_v47, %v5021_v35  ;;  %v11283_v32 = vrot.slane %v4944_v43, 9  ;;  %v11284_v47 = vrot.slane %v4945_v33, 9  ;;  %v4947_v43 = vld [vmem:[#allocation2 + $0x60] sm:$0xe]  ;;  %v5042_v27 = vrot.slane %v14834_v51, 5 }
 0x157   : > { %v12393_v9 = vpop.f32.mrf.mxu1  ;;  %v12277_v52 = vpop.f32.mrf.mxu0  ;;  %v5049_v53 = vrot.slane %v14846_v54, 5 }
 0x158   : > { %v15048_v17 = vadd.f32 %v12325_v28, %v12277_v52  ;;  %v11314_v52 = vcombine.low %v5022_v41, %v5025_v60  ;;  %v5029_v41 = vsel %vm13519_vm8, %v11283_v32, %v5028_v4  ;;  %v5032_v60 = vsel %vm13519_vm8, %v5030_v31, %v5031_v16 }
 0x159   : > { %v2389_v48 = vpop.f32.mrf.mxu1  ;;  %v1357_v11 = vpop.f32.mrf.mxu0  ;;  %v11286_v4 = vrot.slane %v4947_v43, 9  ;;  %v5052_v32 = vrot.slane %v14849_v36, 5  ;;  %v11315_v16 = vcombine.low %v5029_v41, %v5032_v60  ;;  %v5056_v60 = vrot.slane %v14869_v50, 5 }
 0x15a   : > { %12564 = vmatmul.mubr.bf16.gmra.mxu0 %v13223_v62  ;;  %v5035_v62 = vrot.slane %v14820_v24, 5  ;;  %v15059_v37 = vadd.f32 %v1662_v25, %v1357_v11  ;;  %v13358_v24 = vld [vmem:[#allocation2 + $0x50] sm:$0x1]  ;;  %v4946_v11 = vld [vmem:[#allocation2 + $0x54] sm:$0xe] }
 0x15b   : > { %12631 = vmatprep.mubr.bf16.mxu0 %v11312_v6  ;;  %v12394_v28 = vpop.f32.mrf.mxu1  ;;  %v12278_v6 = vpop.f32.mrf.mxu0  ;;  %v5038_v25 = vrot.slane %v13358_v24, 5  ;;  %v11285_v51 = vrot.slane %v4946_v11, 9  ;;  %v13359_v24 = vld [vmem:[#allocation2 + $0x5c] sm:$0x1] }
 0x15c   : > { %18276 = vst [vmem:[#allocation27_spill] sm:$0xff] %v15059_v37  ;;  %v15061_v19 = vadd.f32 %v12326_v57, %v12278_v6  ;;  %v5037_v63 = vrot.slane %v5035_v62, 4  ;;  %v5036_v58 = vsel %vm13519_vm8, %v11284_v47, %v5035_v62  ;;  %v5045_v54 = vrot.slane %v13359_v24, 5 }
 0x15d   : > { %v15063_v10 = vpop.f32.mrf.mxu1  ;;  %v15065_v35 = vpop.f32.mrf.mxu0  ;;  %v1554_v62 = vadd.f32 %v14687_v5, %v14743_v30  ;;  %v5043_v5 = vsel %vm13519_vm8, %v11285_v51, %v5042_v27  ;;  %v5063_v30 = vrot.slane %v14891_v34, 5  ;;  %v5058_v51 = vrot.slane %v5056_v60, 4 }
 0x15e   : > { %18277 = vst [vmem:[#allocation28_spill] sm:$0xff] %v15063_v10  ;;  %18278 = vst [vmem:[#allocation29_spill] sm:$0xff] %v15065_v35  ;;  %v5044_v10 = vrot.slane %v5042_v27, 4  ;;  %v5051_v35 = vrot.slane %v5049_v53, 4 }
 0x15f   : > { %v12397_v3 = vpop.f32.mrf.mxu1  ;;  %v12345_v37 = vpop.f32.mrf.mxu0 }
 0x160   : > { %v2132_v57 = vadd.f32 %v12345_v37, %v14763_v14  ;;  %v5053_v50 = vsel %vm13519_vm8, %v5051_v35, %v5052_v32  ;;  %v5070_v32 = vrot.slane %v14906_v18, 5 }
 0x161   : > { %v2405_v33 = vpop.f32.mrf.mxu1  ;;  %v2003_v6 = vpop.f32.mrf.mxu0 }
 0x162   : > { %12632 = vmatmul.mubr.bf16.vlgmr.msra.gmra.mxu0 %v11313_v26  ;;  %v5039_v26 = vsel %vm13519_vm8, %v5037_v63, %v5038_v25  ;;  %v2130_v14 = vadd.f32 %v2003_v6, %v14780_v8  ;;  %v15079_v37 = vadd.f32 %v12393_v9, %v2132_v57  ;;  %v4948_v9 = vld [vmem:[#allocation2 + $0x6c] sm:$0xe]  ;;  %v4949_v57 = vld [vmem:[#allocation2 + $0x78] sm:$0xe] }
 0x163   : > { %12635 = vmatprep.mubr.bf16.mxu0 %v11314_v52  ;;  %v12398_v52 = vpop.f32.mrf.mxu1  ;;  %v12346_v31 = vpop.f32.mrf.mxu0  ;;  %v11316_v25 = vcombine.low %v5036_v58, %v5039_v26  ;;  %v4956_v6 = vld [vmem:[#allocation2 + $0xcc] sm:$0xe] }
 0x164   : > { %v2133_v47 = vadd.f32 %v12346_v31, %v14790_v29  ;;  %v15085_v63 = vadd.f32 %v2389_v48, %v2130_v14  ;;  %v5046_v48 = vsel %vm13519_vm8, %v5044_v10, %v5045_v54  ;;  %v11287_v14 = vrot.slane %v4948_v9, 9 }
 0x165   : > { %v15087_v11 = vpop.f32.mrf.mxu1  ;;  %v2006_v8 = vpop.f32.mrf.mxu0  ;;  %v5059_v31 = vrot.slane %v14875_v39, 5  ;;  %v11317_v10 = vcombine.low %v5043_v5, %v5046_v48  ;;  %v5066_v39 = vrot.slane %v14895_v44, 5 }
 0x166   : > { %v15089_v43 = vadd.f32 %v2006_v8, %v1554_v62  ;;  %v15091_v36 = vadd.f32 %v12394_v28, %v2133_v47  ;;  %v5050_v28 = vsel %vm13519_vm8, %v11286_v4, %v5049_v53  ;;  %v5065_v47 = vrot.slane %v5063_v30, 4 }
 0x167   : > { %v12401_v41 = vpop.f32.mrf.mxu1  ;;  %v11318_v54 = vcombine.low %v5050_v28, %v5053_v50  ;;  %v5115_v8 = vrot.slane %v15018_v45, 5  ;;  %v5060_v45 = vsel %vm13519_vm8, %v5058_v51, %v5059_v31  ;;  %v4951_v50 = vld [vmem:[#allocation2 + $0x90] sm:$0xe] }
 0x168   : > { %v12349_v24 = vpop.f32.mrf.mxu0 }
 0x169   : > { %v2136_v29 = vadd.f32 %v12349_v24, %v14797_v49  ;;  %v2421_v58 = vpop.f32.mrf.mxu1  ;;  %v5077_v24 = vrot.slane %v14933_v56, 5  ;;  %v5067_v56 = vsel %vm13519_vm8, %v5065_v47, %v5066_v39 }
 0x16a   : > { %12636 = vmatmul.mubr.bf16.gmra.mxu0 %v11315_v16  ;;  %v2019_v26 = vpop.f32.mrf.mxu0  ;;  %v11288_v16 = vrot.slane %v4949_v57, 9 }
 0x16b   : > { %12639 = vmatprep.mubr.bf16.mxu0 %v11316_v25  ;;  %v2134_v27 = vadd.f32 %v2019_v26, %v14809_v61  ;;  %v15106_v34 = vadd.f32 %v12397_v3, %v2136_v29  ;;  %v12402_v49 = vpop.f32.mrf.mxu1  ;;  %v11295_v25 = vrot.slane %v4956_v6, 9  ;;  %v5112_v61 = vrot.slane %v15010_v22, 5 }
 0x16c   : > { %v12350_v62 = vpop.f32.mrf.mxu0  ;;  %v5064_v29 = vsel %vm13519_vm8, %v11288_v16, %v5063_v30  ;;  %v5073_v30 = vrot.slane %v14918_v12, 5  ;;  %v5079_v47 = vrot.slane %v5077_v24, 4 }
 0x16d   : > { %v2137_v53 = vadd.f32 %v12350_v62, %v14815_v7  ;;  %v15109_v4 = vadd.f32 %v2405_v33, %v2134_v27  ;;  %v15111_v35 = vpop.f32.mrf.mxu1  ;;  %v4950_v7 = vld [vmem:[#allocation2 + $0x84] sm:$0xe]  ;;  %v15125_v44 = vsel %vm13519_vm8, %v11295_v25, %v5112_v61  ;;  %v5114_v22 = vrot.slane %v5112_v61, 4 }
 0x16e   : > { %v2022_v3 = vpop.f32.mrf.mxu0  ;;  %v11289_v27 = vrot.slane %v4950_v7, 9  ;;  %v11320_v62 = vcombine.low %v5064_v29, %v5067_v56  ;;  %v5080_v25 = vrot.slane %v14935_v0, 5  ;;  %v4952_v7 = vld [vmem:[#allocation2 + $0x9c] sm:$0xe]  ;;  %v5084_v0 = vrot.slane %v14953_v42, 5  ;;  %v18279_v56 = vld [vmem:[#allocation6_spill] sm:$0xff] }
 0x16f   : > { %v15118_v9 = vadd.f32 %v2022_v3, %v14818_v23  ;;  %v15120_v57 = vadd.f32 %v12398_v52, %v2137_v53  ;;  %v12405_v6 = vpop.f32.mrf.mxu1  ;;  %v5057_v23 = vsel %vm13519_vm8, %v11287_v14, %v5056_v60  ;;  %v15138_v48 = vsel %vm13519_vm8, %v5114_v22, %v5115_v8 }
 0x170   : > { %v12353_v33 = vpop.f32.mrf.mxu0  ;;  %v11327_v26 = vcombine.low %v15125_v44, %v15138_v48  ;;  %v11319_v31 = vcombine.low %v5057_v23, %v5060_v45  ;;  %v4953_v23 = vld [vmem:[#allocation2 + $0xa8] sm:$0xe]  ;;  %v11291_v29 = vrot.slane %v4952_v7, 9  ;;  %v5087_v42 = vrot.slane %v14958_v38, 5 }
 0x171   : > { %v2140_v18 = vadd.f32 %v12353_v33, %v14827_v20  ;;  %v2437_v52 = vpop.f32.mrf.mxu1  ;;  %v5081_v33 = vsel %vm13519_vm8, %v5079_v47, %v5080_v25 }
 0x172   : > { %12640 = vmatmul.mubr.bf16.gmra.mxu0 %v11317_v10  ;;  %v2035_v5 = vpop.f32.mrf.mxu0  ;;  %v5085_v47 = vsel %vm13519_vm8, %v11291_v29, %v5084_v0 }
 0x173   : > { %12643 = vmatprep.mubr.bf16.mxu0 %v11318_v54  ;;  %v2138_v20 = vadd.f32 %v2035_v5, %v14841_v1  ;;  %v15141_v28 = vadd.f32 %v12401_v41, %v2140_v18  ;;  %v12406_v60 = vpop.f32.mrf.mxu1  ;;  %v5072_v1 = vrot.slane %v5070_v32, 4  ;;  %v11290_v54 = vrot.slane %v4951_v50, 9 }
 0x174   : > { %v12354_v14 = vpop.f32.mrf.mxu0 }
 0x175   : > { %v2141_v51 = vadd.f32 %v12354_v14, %v14857_v21  ;;  %v15147_v16 = vadd.f32 %v2421_v58, %v2138_v20  ;;  %v15149_v10 = vpop.f32.mrf.mxu1  ;;  %v5071_v58 = vsel %vm13519_vm8, %v11289_v27, %v5070_v32  ;;  %v5074_v3 = vsel %vm13519_vm8, %v5072_v1, %v5073_v30 }
 0x176   : > { %v2038_v41 = vpop.f32.mrf.mxu0  ;;  %v11321_v5 = vcombine.low %v5071_v58, %v5074_v3  ;;  %v11292_v27 = vrot.slane %v4953_v23, 9  ;;  %v18283_v58 = vld [vmem:[#allocation18_spill] sm:$0xff] }
 0x177   : > { %v15153_v53 = vadd.f32 %v2038_v41, %v14862_v15  ;;  %v15155_v39 = vadd.f32 %v12402_v49, %v2141_v51  ;;  %v12409_v61 = vpop.f32.mrf.mxu1  ;;  %v5078_v49 = vsel %vm13519_vm8, %v11290_v54, %v5077_v24  ;;  %v18281_v51 = vld [vmem:[#allocation7_spill] sm:$0xff]  ;;  %v18282_v54 = vld [vmem:[#allocation9_spill] sm:$0xff]  ;;  %v5098_v3 = vrot.slane %v18283_v58, 5 }
 0x178   : > { %v12357_v12 = vpop.f32.mrf.mxu0  ;;  %v11322_v24 = vcombine.low %v5078_v49, %v5081_v33  ;;  %v18284_v49 = vld [vmem:[#allocation20_spill] sm:$0xff] }
 0x179   : > { %v2144_v21 = vadd.f32 %v12357_v12, %v14867_v2  ;;  %v2453_v8 = vpop.f32.mrf.mxu1  ;;  %v5091_v2 = vrot.slane %v14969_v40, 5  ;;  %v5105_v33 = vrot.slane %v18284_v49, 5 }
 0x17a   : > { %12644 = vmatmul.mubr.bf16.gmra.mxu0 %v11319_v31  ;;  %v2051_v15 = vpop.f32.mrf.mxu0  ;;  %v5086_v31 = vrot.slane %v5084_v0, 4 }
 0x17b   : > { %12647 = vmatprep.mubr.bf16.mxu0 %v11320_v62  ;;  %v2142_v22 = vadd.f32 %v2051_v15, %v14881_v46  ;;  %v15169_v18 = vadd.f32 %v12405_v6, %v2144_v21  ;;  %v12410_v32 = vpop.f32.mrf.mxu1  ;;  %v5093_v46 = vrot.slane %v5091_v2, 4  ;;  %v18280_v6 = vld [vmem:[#allocation15_spill] sm:$0xff]  ;;  %v4954_v21 = vld [vmem:[#allocation2 + $0xb4] sm:$0xe] }
 0x17c   : > { %v12358_v45 = vpop.f32.mrf.mxu0  ;;  %v5094_v30 = vrot.slane %v18280_v6, 5  ;;  %v5088_v25 = vsel %vm13519_vm8, %v5086_v31, %v5087_v42  ;;  %v18287_v31 = vld [vmem:[#allocation11_spill] sm:$0xff] }
 0x17d   : > { %v2145_v20 = vadd.f32 %v12358_v45, %v18279_v56  ;;  %v15173_v50 = vadd.f32 %v2437_v52, %v2142_v22  ;;  %v15175_v14 = vpop.f32.mrf.mxu1  ;;  %v18285_v22 = vld [vmem:[#allocation10_spill] sm:$0xff]  ;;  %v11323_v42 = vcombine.low %v5085_v47, %v5088_v25  ;;  %v11293_v56 = vrot.slane %v4954_v21, 9  ;;  %v18288_v25 = vld [vmem:[#allocation13_spill] sm:$0xff] }
 0x17e   : > { %v2054_v40 = vpop.f32.mrf.mxu0  ;;  %v5095_v15 = vsel %vm13519_vm8, %v5093_v46, %v5094_v30  ;;  %v5100_v46 = vrot.slane %v5098_v3, 4 }
 0x17f   : > { %v15179_v62 = vadd.f32 %v2054_v40, %v18281_v51  ;;  %v15181_v1 = vadd.f32 %v12406_v60, %v2145_v20  ;;  %v12413_v41 = vpop.f32.mrf.mxu1  ;;  %v5092_v60 = vsel %vm13519_vm8, %v11292_v27, %v5091_v2  ;;  %v18286_v20 = vld [vmem:[#allocation19_spill] sm:$0xff] }
 0x180   : > { %v12361_v38 = vpop.f32.mrf.mxu0  ;;  %v11324_v2 = vcombine.low %v5092_v60, %v5095_v15 }
 0x181   : > { %v2148_v52 = vadd.f32 %v12361_v38, %v18282_v54  ;;  %v2469_v12 = vpop.f32.mrf.mxu1  ;;  %v5108_v38 = vrot.slane %v15006_v55, 5 }
 0x182   : > { %12648 = vmatmul.mubr.bf16.gmra.mxu0 %v11321_v5  ;;  %v2067_v7 = vpop.f32.mrf.mxu0  ;;  %v4955_v5 = vld [vmem:[#allocation2 + $0xc0] sm:$0xe] }
 0x183   : > { %12651 = vmatprep.mubr.bf16.mxu0 %v11322_v24  ;;  %v2146_v23 = vadd.f32 %v2067_v7, %v18285_v22  ;;  %v15195_v45 = vadd.f32 %v12409_v61, %v2148_v52  ;;  %v12414_v0 = vpop.f32.mrf.mxu1  ;;  %v5101_v24 = vrot.slane %v18286_v20, 5  ;;  %v11294_v51 = vrot.slane %v4955_v5, 9 }
 0x184   : > { %v12362_v29 = vpop.f32.mrf.mxu0  ;;  %v5107_v61 = vrot.slane %v5105_v33, 4 }
 0x185   : > { %v2149_v40 = vadd.f32 %v12362_v29, %v18287_v31  ;;  %v15199_v6 = vadd.f32 %v2453_v8, %v2146_v23  ;;  %v15201_v27 = vpop.f32.mrf.mxu1  ;;  %v5099_v8 = vsel %vm13519_vm8, %v11293_v56, %v5098_v3  ;;  %v5102_v58 = vsel %vm13519_vm8, %v5100_v46, %v5101_v24  ;;  %v13224_v3 = vld [vmem:[%s18209_s1 + $0x2b8] sm:$0xff]  }
 0x186   : > { %v15203_v30 = vpop.f32.mrf.mxu0  ;;  %v5106_v15 = vsel %vm13519_vm8, %v11294_v51, %v5105_v33  ;;  %v5109_v55 = vsel %vm13519_vm8, %v5107_v61, %v5108_v38  ;;  %v11325_v29 = vcombine.low %v5099_v8, %v5102_v58  ;;  %12663 = vmatprep.subr.bf16.mxu1 %v13224_v3  ;;  %v18291_v38 = vld [vmem:[#allocation22_spill] sm:$0xff] }
 0x187   : > { %v15206_v54 = vadd.f32 %v12410_v32, %v2149_v40  ;;  %v12417_v52 = vpop.f32.mrf.mxu1  ;;  %v18289_v32 = vld [vmem:[#allocation14_spill] sm:$0xff]  ;;  %v11326_v24 = vcombine.low %v5106_v15, %v5109_v55  ;;  %12664 = vmatpush3.bf16.msra.mxu1 %v13224_v3 }
 0x189   : > { %v12365_v47 = vpop.f32.mrf.mxu0  ;;  %v2485_v7 = vpop.f32.mrf.mxu1 }
 0x18a   : > { %12652 = vmatmul.mubr.bf16.gmra.mxu0 %v11323_v42  ;;  %v2152_v21 = vadd.f32 %v12365_v47, %v18288_v25  ;;  %v18290_v42 = vld [vmem:[#allocation16_spill] sm:$0xff] }
 0x18b   : > { %12655 = vmatprep.mubr.bf16.mxu0 %v11324_v2  ;;  %v2083_v60 = vpop.f32.mrf.mxu0  ;;  %v12418_v23 = vpop.f32.mrf.mxu1 }
 0x18c   : > { %v2150_v49 = vadd.f32 %v2083_v60, %v18289_v32  ;;  %v15218_v22 = vadd.f32 %v12413_v41, %v2152_v21  ;;  %v13225_v21 = vld [vmem:[%s18209_s1 + $0x2b0] sm:$0xff]  }
 0x18d   : > { %v12366_v5 = vpop.f32.mrf.mxu0  ;;  %v15226_v33 = vpop.f32.mrf.mxu1  ;;  %12665 = vmatprep.subr.bf16.mxu1 %v13225_v21 }
 0x18e   : > { %v2153_v56 = vadd.f32 %v12366_v5, %v18290_v42  ;;  %v15224_v20 = vadd.f32 %v2469_v12, %v2150_v49  ;;  %12666 = vmatpush3.bf16.msra.mxu1 %v13225_v21 }
 0x18f   : > { %v15228_v31 = vpop.f32.mrf.mxu0  ;;  %v12421_v40 = vpop.f32.mrf.mxu1 }
 0x190   : > { %v15230_v41 = vadd.f32 %v12414_v0, %v2153_v56  ;;  %v18292_v0 = vld [vmem:[#allocation23_spill] sm:$0xff] }
 0x191   : > { %v12369_v2 = vpop.f32.mrf.mxu0  ;;  %v2501_v51 = vpop.f32.mrf.mxu1 }
 0x192   : > { %12656 = vmatmul.mubr.bf16.gmra.mxu0 %v11325_v29  ;;  %v2156_v46 = vadd.f32 %v12369_v2, %v15014_v59 }
 0x193   : > { %12659 = vmatprep.mubr.bf16.mxu0 %v11326_v24  ;;  %v2099_v61 = vpop.f32.mrf.mxu0  ;;  %v12422_v25 = vpop.f32.mrf.mxu1 }
 0x194   : > { %v2154_v12 = vadd.f32 %v2099_v61, %v18291_v38  ;;  %v15234_v47 = vadd.f32 %v12417_v52, %v2156_v46  ;;  %v13228_v61 = vld [vmem:[%s18209_s1 + $0x278] sm:$0xff]  }
 0x195   : > { %v12370_v8 = vpop.f32.mrf.mxu0  ;;  %v15242_v15 = vpop.f32.mrf.mxu1  ;;  %12711 = vmatprep.subr.bf16.mxu0 %v13228_v61 }
 0x196   : > { %v2157_v58 = vadd.f32 %v12370_v8, %v18292_v0  ;;  %v15240_v60 = vadd.f32 %v2485_v7, %v2154_v12  ;;  %v18293_v7 = vld [vmem:[#allocation27_spill] sm:$0xff]  ;;  %12712 = vmatpush3.bf16.msra.mxu0 %v13228_v61  ;;  %v13229_v0 = vld [vmem:[%s18209_s1 + $0x270] sm:$0xff]  }
 0x197   : > { %v15244_v59 = vpop.f32.mrf.mxu0  ;;  %v12489_v52 = vpop.f32.mrf.mxu1  ;;  %12713 = vmatprep.subr.bf16.mxu0 %v13229_v0 }
 0x198   : > { %v15246_v55 = vadd.f32 %v12418_v23, %v2157_v58  ;;  %v13226_v23 = vld [vmem:[%s18209_s1 + $0x2a8] sm:$0xff]  }
 0x199   : > { %v3641_v3 = vpop.f32.mrf.mxu1  ;;  %12667 = vmatprep.subr.bf16.mxu1 %v13226_v23 }
 0x19a   : > { %v12373_v32 = vpop.f32.mrf.mxu0  ;;  %12660 = vmatmul.mubr.bf16.gmra.mxu0 %v11327_v26  ;;  %12668 = vmatpush3.bf16.msra.mxu1 %v13226_v23 }
 0x19b   : > { %v2160_v49 = vadd.f32 %v12373_v32, %v15048_v17  ;;  %v15255_v56 = vpop.f32.mrf.mxu1  ;;  %12714 = vmatpush3.bf16.msra.mxu0 %v13229_v0 }
 0x19c   : > { %v2115_v5 = vpop.f32.mrf.mxu0  ;;  %18294 = vst [vmem:[#allocation6_spill] sm:$0xff] %v15255_v56 }
 0x19d   : > { %v2158_v29 = vadd.f32 %v2115_v5, %v18293_v7  ;;  %v15253_v42 = vadd.f32 %v12421_v40, %v2160_v49  ;;  %v15263_v44 = vpop.f32.mrf.mxu1 }
 0x19e   : > { %v12374_v24 = vpop.f32.mrf.mxu0  ;;  %18295 = vst [vmem:[#allocation15_spill] sm:$0xff] %v15263_v44 }
 0x19f   : > { %v2161_v2 = vadd.f32 %v12374_v24, %v15061_v19  ;;  %v15261_v46 = vadd.f32 %v2501_v51, %v2158_v29  ;;  %v12493_v26 = vpop.f32.mrf.mxu1 }
 0x1a0   : > { %v15265_v17 = vpop.f32.mrf.mxu0 }
 0x1a1   : > { %v15267_v48 = vadd.f32 %v12422_v25, %v2161_v2  ;;  %v3657_v12 = vpop.f32.mrf.mxu1 }
 0x1a2   : > { %v12441_v40 = vpop.f32.mrf.mxu0 }
 0x1a3   : > { %v3272_v38 = vadd.f32 %v12441_v40, %v15079_v37  ;;  %v15276_v8 = vpop.f32.mrf.mxu1 }
 0x1a4   : > { %v3143_v19 = vpop.f32.mrf.mxu0  ;;  %18296 = vst [vmem:[#allocation7_spill] sm:$0xff] %v15276_v8 }
 0x1a5   : > { %v3270_v51 = vadd.f32 %v3143_v19, %v15085_v63  ;;  %v15274_v21 = vadd.f32 %v12489_v52, %v3272_v38  ;;  %v15286_v37 = vpop.f32.mrf.mxu1  ;;  %v13227_v52 = vld [vmem:[%s18209_s1 + $0x2a0] sm:$0xff]  }
 0x1a6   : > { %v12442_v25 = vpop.f32.mrf.mxu0  ;;  %18298 = vst [vmem:[#allocation18_spill] sm:$0xff] %v15286_v37  ;;  %12669 = vmatprep.subr.bf16.mxu1 %v13227_v52  ;;  %v13232_v19 = vld [vmem:[%s18209_s1 + $0x260] sm:$0xff]  }
 0x1a7   : > { %v15282_v58 = vadd.f32 %v12442_v25, %v15091_v36  ;;  %v15284_v32 = vadd.f32 %v3641_v3, %v3270_v51  ;;  %v12497_v63 = vpop.f32.mrf.mxu1  ;;  %v13231_v36 = vld [vmem:[%s18209_s1 + $0x268] sm:$0xff]   ;;  %12670 = vmatpush3.bf16.msra.mxu1 %v13227_v52 }
 0x1a8   : > { %v15288_v49 = vpop.f32.mrf.mxu0  ;;  %12715 = vmatprep.subr.bf16.mxu0 %v13231_v36 }
 0x1a9   : > { %18297 = vst [vmem:[#allocation9_spill] sm:$0xff] %v15282_v58  ;;  %v3673_v29 = vpop.f32.mrf.mxu1  ;;  %12716 = vmatpush3.bf16.msra.mxu0 %v13231_v36 }
 0x1aa   : > { %v12445_v5 = vpop.f32.mrf.mxu0  ;;  %12717 = vmatprep.subr.bf16.mxu0 %v13232_v19 }
 0x1ab   : > { %v3276_v7 = vadd.f32 %v12445_v5, %v15106_v34  ;;  %v15300_v2 = vpop.f32.mrf.mxu1 }
 0x1ac   : > { %v3159_v3 = vpop.f32.mrf.mxu0  ;;  %18299 = vst [vmem:[#allocation20_spill] sm:$0xff] %v15300_v2 }
 0x1ad   : > { %v3274_v23 = vadd.f32 %v3159_v3, %v15109_v4  ;;  %v15298_v24 = vadd.f32 %v12493_v26, %v3276_v7  ;;  %v15307_v38 = vpop.f32.mrf.mxu1  ;;  %12718 = vmatpush3.bf16.msra.mxu0 %v13232_v19 }
 0x1ae   : > { %v12446_v40 = vpop.f32.mrf.mxu0  ;;  %18301 = vst [vmem:[#allocation19_spill] sm:$0xff] %v15307_v38 }
 0x1af   : > { %v15303_v61 = vadd.f32 %v12446_v40, %v15120_v57  ;;  %v15305_v34 = vadd.f32 %v3657_v12, %v3274_v23  ;;  %v12501_v4 = vpop.f32.mrf.mxu1  ;;  %v13234_v57 = vld [vmem:[%s18209_s1 + $0x258] sm:$0xff]  }
 0x1b0   : > { %v15312_v51 = vpop.f32.mrf.mxu0  ;;  %12719 = vmatprep.subr.bf16.mxu0 %v13234_v57 }
 0x1b1   : > { %18300 = vst [vmem:[#allocation10_spill] sm:$0xff] %v15303_v61  ;;  %v3689_v0 = vpop.f32.mrf.mxu1  ;;  %12720 = vmatpush3.bf16.msra.mxu0 %v13234_v57 }
 0x1b2   : > { %v12449_v26 = vpop.f32.mrf.mxu0 }
 0x1b3   : > { %v3280_v25 = vadd.f32 %v12449_v26, %v15141_v28  ;;  %v15321_v7 = vpop.f32.mrf.mxu1  ;;  %v13230_v26 = vld [vmem:[%s18209_s1 + $0x298] sm:$0xff]  }
 0x1b4   : > { %v3175_v52 = vpop.f32.mrf.mxu0  ;;  %18302 = vst [vmem:[#allocation11_spill] sm:$0xff] %v15321_v7  ;;  %12671 = vmatprep.subr.bf16.mxu1 %v13230_v26 }
 0x1b5   : > { %v3278_v12 = vadd.f32 %v3175_v52, %v15147_v16  ;;  %v15319_v5 = vadd.f32 %v12497_v63, %v3280_v25  ;;  %v15328_v28 = vpop.f32.mrf.mxu1  ;;  %v13235_v16 = vld [vmem:[%s18209_s1 + $0x250] sm:$0xff]   ;;  %12672 = vmatpush3.bf16.msra.mxu1 %v13230_v26  ;;  %v13238_v26 = vld [vmem:[%s18209_s1 + $0x240] sm:$0xff]  }
 0x1b6   : > { %v12450_v36 = vpop.f32.mrf.mxu0  ;;  %18304 = vst [vmem:[#allocation14_spill] sm:$0xff] %v15328_v28  ;;  %12721 = vmatprep.subr.bf16.mxu0 %v13235_v16 }
 0x1b7   : > { %v15324_v3 = vadd.f32 %v12450_v36, %v15155_v39  ;;  %v15326_v23 = vadd.f32 %v3673_v29, %v3278_v12  ;;  %v12505_v19 = vpop.f32.mrf.mxu1  ;;  %12722 = vmatpush3.bf16.msra.mxu0 %v13235_v16 }
 0x1b8   : > { %v15330_v40 = vpop.f32.mrf.mxu0  ;;  %12723 = vmatprep.subr.bf16.mxu0 %v13237_v13 }
 0x1b9   : > { %18303 = vst [vmem:[#allocation13_spill] sm:$0xff] %v15324_v3  ;;  %v3705_v25 = vpop.f32.mrf.mxu1 }
 0x1ba   : > { %v12453_v63 = vpop.f32.mrf.mxu0 }
 0x1bb   : > { %v3284_v39 = vadd.f32 %v12453_v63, %v15169_v18  ;;  %v12506_v12 = vpop.f32.mrf.mxu1  ;;  %12724 = vmatpush3.bf16.msra.mxu0 %v13237_v13 }
 0x1bc   : > { %v3191_v29 = vpop.f32.mrf.mxu0  ;;  %12725 = vmatprep.subr.bf16.mxu0 %v13238_v26 }
 0x1bd   : > { %v3282_v52 = vadd.f32 %v3191_v29, %v15173_v50  ;;  %v15340_v57 = vadd.f32 %v12501_v4, %v3284_v39  ;;  %v15350_v63 = vpop.f32.mrf.mxu1  ;;  %v13233_v4 = vld [vmem:[%s18209_s1 + $0x290] sm:$0xff]   ;;  %v5926_v29 = vld [vmem:[#allocation2] sm:$0xf] }
 0x1be   : > { %v12454_v36 = vpop.f32.mrf.mxu0  ;;  %18306 = vst [vmem:[#allocation22_spill] sm:$0xff] %v15350_v63  ;;  %12673 = vmatprep.subr.bf16.mxu1 %v13233_v4 }
 0x1bf   : > { %v15346_v28 = vadd.f32 %v12454_v36, %v15181_v1  ;;  %v15348_v18 = vadd.f32 %v3689_v0, %v3282_v52  ;;  %v12509_v50 = vpop.f32.mrf.mxu1  ;;  %12674 = vmatpush3.bf16.msra.mxu1 %v13233_v4  ;;  %v15361_v52 = vld [vmem:[#allocation2 + $0x4] sm:$0xf]  ;;  %12726 = vmatpush3.bf16.msra.mxu0 %v13238_v26  ;;  %v13236_v4 = vld [vmem:[%s18209_s1 + $0x288] sm:$0xff]  }
 0x1c0   : > { %v15352_v7 = vpop.f32.mrf.mxu0  ;;  %18307 = vst [vmem:[#allocation23_spill] sm:$0xff] %v15361_v52  ;;  %v11441_v38 = vcombine.low %v5926_v29, %v15361_v52  ;;  %12675 = vmatprep.subr.bf16.mxu1 %v13236_v4 }
 0x1c1   : > { %18305 = vst [vmem:[#allocation16_spill] sm:$0xff] %v15346_v28  ;;  %v3721_v0 = vpop.f32.mrf.mxu1 }
 0x1c2   : > { %v12457_v16 = vpop.f32.mrf.mxu0  ;;  %12727 = vmatprep.mubr.bf16.mxu0 %v11441_v38 }
 0x1c3   : > { %v3288_v1 = vadd.f32 %v12457_v16, %v15195_v45  ;;  %v12510_v13 = vpop.f32.mrf.mxu1  ;;  %12676 = vmatpush3.bf16.msra.mxu1 %v13236_v4 }
 0x1c4   : > { %v3207_v39 = vpop.f32.mrf.mxu0 }
 0x1c5   : > { %v3286_v36 = vadd.f32 %v3207_v39, %v15199_v6  ;;  %v15364_v63 = vadd.f32 %v12505_v19, %v3288_v1  ;;  %v15370_v16 = vpop.f32.mrf.mxu1  ;;  %v5992_v1 = vshrl.u32 %v5926_v29, 16  ;;  %v5995_v39 = vshll.u32 %v5926_v29, 16 }
 0x1c6   : > { %v12458_v28 = vpop.f32.mrf.mxu0  ;;  %18308 = vst [vmem:[#allocation27_spill] sm:$0xff] %v15370_v16  ;;  %v6005_v16 = vshrl.u32 %v15361_v52, 16 }
 0x1c7   : > { %v3289_v2 = vadd.f32 %v12458_v28, %v15206_v54  ;;  %v15368_v45 = vadd.f32 %v3705_v25, %v3286_v36  ;;  %v12513_v19 = vpop.f32.mrf.mxu1  ;;  %v13240_v25 = vld [vmem:[%s18209_s1 + $0x280] sm:$0xff]   ;;  %v5994_v4 = vrot.slane %v5992_v1, 4  ;;  %v5997_v8 = vrot.slane %v5995_v39, 5 }
 0x1c8   : > { %v15375_v3 = vpop.f32.mrf.mxu0  ;;  %12677 = vmatprep.subr.bf16.mxu1 %v13240_v25 }
 0x1c9   : > { %18309 = vst [vmem:[#allocation30_spill] sm:$0xff] %v15375_v3  ;;  %v15377_v6 = vadd.f32 %v12506_v12, %v3289_v2  ;;  %v3737_v28 = vpop.f32.mrf.mxu1  ;;  %12678 = vmatpush3.bf16.msra.mxu1 %v13240_v25  ;;  %v5998_v1 = vor.u32 %v5997_v8, %v5994_v4 }
 0x1ca   : > { %v12461_v26 = vpop.f32.mrf.mxu0 }
 0x1cb   : > { %v3292_v54 = vadd.f32 %v12461_v26, %v15218_v22  ;;  %v12514_v12 = vpop.f32.mrf.mxu1  ;;  %v6001_v22 = vshll.u32 %v15361_v52, 16 }
 0x1cc   : > { %v3223_v36 = vpop.f32.mrf.mxu0 }
 0x1cd   : > { %v3290_v38 = vadd.f32 %v3223_v36, %v15224_v20  ;;  %v15385_v2 = vadd.f32 %v12509_v50, %v3292_v54  ;;  %v15391_v61 = vpop.f32.mrf.mxu1  ;;  %v6003_v56 = vrot.slane %v6001_v22, 5  ;;  %v6007_v20 = vrot.slane %v6005_v16, 4  ;;  %v5975_v36 = vld [vmem:[#allocation2 + $0x8] sm:$0x1] }
 0x1ce   : > { %v12462_v37 = vpop.f32.mrf.mxu0  ;;  %18310 = vst [vmem:[#allocation31_spill] sm:$0xff] %v15391_v61  ;;  %v6011_v25 = vshll.u32 %v5975_v36, 16 }
 0x1cf   : > { %v3293_v29 = vadd.f32 %v12462_v37, %v15230_v41  ;;  %v15389_v26 = vadd.f32 %v3721_v0, %v3290_v38  ;;  %v12517_v54 = vpop.f32.mrf.mxu1  ;;  %v6008_v39 = vor.u32 %v6007_v20, %v6003_v56  ;;  %v5999_v37 = vrot.slane %v5998_v1, 4 }
 0x1d0   : > { %v15393_v44 = vpop.f32.mrf.mxu0  ;;  %v6013_v38 = vrot.slane %v6011_v25, 5 }
 0x1d1   : > { %18311 = vst [vmem:[#allocation32_spill] sm:$0xff] %v15393_v44  ;;  %v15395_v50 = vadd.f32 %v12510_v13, %v3293_v29  ;;  %v3753_v3 = vpop.f32.mrf.mxu1  ;;  %v6009_v0 = vrot.slane %v6008_v39, 4  ;;  %v6004_v29 = vsel %vm13478_vm5, %v5999_v37, %v6003_v56 }
 0x1d2   : > { %v12465_v58 = vpop.f32.mrf.mxu0 }
 0x1d3   : > { %v3296_v52 = vadd.f32 %v12465_v58, %v15234_v47  ;;  %v12518_v16 = vpop.f32.mrf.mxu1  ;;  %v6014_v8 = vsel %vm13478_vm5, %v6009_v0, %v6013_v38 }
 0x1d4   : > { %v3239_v41 = vpop.f32.mrf.mxu0  ;;  %v11417_v20 = vcombine.low %v6004_v29, %v6014_v8 }
 0x1d5   : > { %v3294_v61 = vadd.f32 %v3239_v41, %v15240_v60  ;;  %v15399_v44 = vadd.f32 %v12513_v19, %v3296_v52  ;;  %v15408_v58 = vpop.f32.mrf.mxu1 }
 0x1d6   : > { %v12466_v13 = vpop.f32.mrf.mxu0  ;;  %12679 = vmatprep.mubr.bf16.mxu1 %v11417_v20 }
 0x1d7   : > { %v3297_v4 = vadd.f32 %v12466_v13, %v15246_v55  ;;  %v15406_v47 = vadd.f32 %v3737_v28, %v3294_v61  ;;  %v15414_v52 = vpop.f32.mrf.mxu1 }
 0x1d8   : > { %v15410_v36 = vpop.f32.mrf.mxu0 }
 0x1d9   : > { %v15412_v60 = vadd.f32 %v12514_v12, %v3297_v4  ;;  %v15417_v1 = vpop.f32.mrf.mxu1 }
 0x1da   : > { %v12469_v19 = vpop.f32.mrf.mxu0 }
 0x1db   : > { %v3300_v56 = vadd.f32 %v12469_v19, %v15253_v42  ;;  %v15422_v28 = vpop.f32.mrf.mxu1 }
 0x1dc   : > { %v3255_v39 = vpop.f32.mrf.mxu0 }
 0x1dd   : > { %v3298_v55 = vadd.f32 %v3255_v39, %v15261_v46  ;;  %v15420_v61 = vadd.f32 %v12517_v54, %v3300_v56  ;;  %v15427_v37 = vpop.f32.mrf.mxu1  ;;  %v15438_v46 = vld [vmem:[%s18209_s1 + $0x2f8] sm:$0xff]  }
 0x1de   : > { %v12470_v25 = vpop.f32.mrf.mxu0  ;;  %18313 = vst [vmem:[#allocation33_spill] sm:$0xff] %v15438_v46  ;;  %12759 = vmatprep.subr.bf16.mxu1 %v15438_v46 }
 0x1df   : > { %v3301_v41 = vadd.f32 %v12470_v25, %v15267_v48  ;;  %v15425_v12 = vadd.f32 %v3753_v3, %v3298_v55  ;;  %v15433_v42 = vpop.f32.mrf.mxu1 }
 0x1e0   : > { %v15429_v0 = vpop.f32.mrf.mxu0 }
 0x1e1   : > { %v15431_v38 = vadd.f32 %v12518_v16, %v3301_v41  ;;  %v15443_v48 = vpop.f32.mrf.mxu1 }
 0x1e2   : > { %v12537_v54 = vpop.f32.mrf.mxu0 }
 0x1e3   : > { %v15441_v13 = vadd.f32 %v12537_v54, %v15274_v21  ;;  %v15449_v16 = vpop.f32.mrf.mxu1 }
 0x1e4   : > { %v4028_v3 = vpop.f32.mrf.mxu0 }
 0x1e5   : > { %v15447_v29 = vadd.f32 %v4028_v3, %v15284_v32  ;;  %v15453_v4 = vpop.f32.mrf.mxu1 }
 0x1e6   : > { %v15451_v8 = vpop.f32.mrf.mxu0  ;;  %18314 = vst [vmem:[#allocation34_spill] sm:$0xff] %v15453_v4 }
 0x1e7   : > { %v15457_v19 = vpop.f32.mrf.mxu1 }
 0x1e8   : > { %v15455_v20 = vpop.f32.mrf.mxu0  ;;  %18315 = vst [vmem:[#allocation35_spill] sm:$0xff] %v15457_v19 }
 0x1e9   : > { %v15462_v39 = vpop.f32.mrf.mxu1 }
 0x1ea   : > { %v12541_v21 = vpop.f32.mrf.mxu0  ;;  %18316 = vst [vmem:[#allocation36_spill] sm:$0xff] %v15462_v39 }
 0x1eb   : > { %v15460_v56 = vadd.f32 %v12541_v21, %v15298_v24  ;;  %v15467_v25 = vpop.f32.mrf.mxu1 }
 0x1ec   : > { %v4044_v55 = vpop.f32.mrf.mxu0  ;;  %18317 = vst [vmem:[#allocation37_spill] sm:$0xff] %v15467_v25 }
 0x1ed   : > { %v15465_v32 = vadd.f32 %v4044_v55, %v15305_v34  ;;  %v15471_v54 = vpop.f32.mrf.mxu1 }
 0x1ee   : > { %v15469_v41 = vpop.f32.mrf.mxu0  ;;  %18318 = vst [vmem:[#allocation38_spill] sm:$0xff] %v15471_v54 }
 0x1f0   : > { %v15473_v3 = vpop.f32.mrf.mxu0 }
 0x1f1   : > { %v15475_v22 = vpop.f32.mrf.mxu1 }
 0x1f2   : > { %v12545_v46 = vpop.f32.mrf.mxu0  ;;  %18319 = vst [vmem:[#allocation39_spill] sm:$0xff] %v15475_v22 }
 0x1f3   : > { %v15478_v24 = vadd.f32 %v12545_v46, %v15319_v5  ;;  %v15480_v39 = vpop.f32.mrf.mxu1 }
 0x1f4   : > { %v4060_v21 = vpop.f32.mrf.mxu0  ;;  %18321 = vst [vmem:[#allocation41_spill] sm:$0xff] %v15480_v39 }
 0x1f5   : > { %18320 = vst [vmem:[#allocation40_spill] sm:$0xff] %v15478_v24  ;;  %v15483_v34 = vadd.f32 %v4060_v21, %v15326_v23  ;;  %v15487_v25 = vpop.f32.mrf.mxu1 }
 0x1f6   : > { %v15485_v55 = vpop.f32.mrf.mxu0  ;;  %18323 = vst [vmem:[#allocation43_spill] sm:$0xff] %v15487_v25 }
 0x1f7   : > { %18322 = vst [vmem:[#allocation42_spill] sm:$0xff] %v15483_v34  ;;  %v15491_v54 = vpop.f32.mrf.mxu1 }
 0x1f8   : > { %v15489_v19 = vpop.f32.mrf.mxu0  ;;  %18324 = vst [vmem:[#allocation44_spill] sm:$0xff] %v15491_v54 }
 0x1fa   : > { %v12549_v4 = vpop.f32.mrf.mxu0 }
 0x1fb   : > { %v15494_v22 = vadd.f32 %v12549_v4, %v15340_v57 }
 0x1fc   : > { %v4076_v5 = vpop.f32.mrf.mxu0  ;;  %v15496_v46 = vpop.f32.mrf.mxu1 }
 0x1fd   : > { %18325 = vst [vmem:[#allocation45_spill] sm:$0xff] %v15494_v22  ;;  %18326 = vst [vmem:[#allocation46_spill] sm:$0xff] %v15496_v46  ;;  %v15499_v39 = vadd.f32 %v4076_v5, %v15348_v18 }
 0x1fe   : > { %v15501_v23 = vpop.f32.mrf.mxu0  ;;  %v15503_v21 = vpop.f32.mrf.mxu1 }
 0x1ff   : > { %18327 = vst [vmem:[#allocation47_spill] sm:$0xff] %v15499_v39  ;;  %18328 = vst [vmem:[#allocation48_spill] sm:$0xff] %v15503_v21 }
 0x200   : > { %v15505_v34 = vpop.f32.mrf.mxu0  ;;  %v15507_v25 = vpop.f32.mrf.mxu1 }
 0x201   : > { %18329 = vst [vmem:[#allocation49_spill] sm:$0xff] %v15507_v25 }
 0x202   : > { %v12553_v24 = vpop.f32.mrf.mxu0  ;;  %v15509_v54 = vpop.f32.mrf.mxu1 }
 0x203   : > { %18330 = vst [vmem:[#allocation50_spill] sm:$0xff] %v15509_v54  ;;  %v15512_v57 = vadd.f32 %v12553_v24, %v15364_v63 }
 0x204   : > { %v4092_v4 = vpop.f32.mrf.mxu0  ;;  %v15517_v5 = vpop.f32.mrf.mxu1 }
 0x205   : > { %18331 = vst [vmem:[#allocation51_spill] sm:$0xff] %v15512_v57  ;;  %v15515_v46 = vadd.f32 %v4092_v4, %v15368_v45  ;;  %18333 = vst [vmem:[#allocation53_spill] sm:$0xff] %v15517_v5 }
 0x206   : > { %v12554_v18 = vpop.f32.mrf.mxu0  ;;  %v15524_v22 = vpop.f32.mrf.mxu1 }
 0x207   : > { %18332 = vst [vmem:[#allocation52_spill] sm:$0xff] %v15515_v46  ;;  %v15520_v39 = vadd.f32 %v12554_v18, %v15377_v6  ;;  %18336 = vst [vmem:[#allocation56_spill] sm:$0xff] %v15524_v22 }
 0x208   : > { %v15522_v21 = vpop.f32.mrf.mxu0  ;;  %v15529_v63 = vpop.f32.mrf.mxu1 }
 0x209   : > { %18334 = vst [vmem:[#allocation54_spill] sm:$0xff] %v15520_v39  ;;  %18335 = vst [vmem:[#allocation55_spill] sm:$0xff] %v15522_v21 }
 0x20a   : > { %v12557_v25 = vpop.f32.mrf.mxu0  ;;  %18338 = vst [vmem:[#allocation58_spill] sm:$0xff] %v15529_v63  ;;  %v15537_v6 = vpop.f32.mrf.mxu1  ;;  %v18346_v63 = vld [vmem:[#allocation8_spill] sm:$0xff] }
 0x20b   : > { %v15527_v54 = vadd.f32 %v12557_v25, %v15385_v2  ;;  %18341 = vst [vmem:[#allocation61_spill] sm:$0xff] %v15537_v6  ;;  %v18345_v25 = vld [vmem:[#allocation12_spill] sm:$0xff]  ;;  %v18349_v6 = vld [vmem:[#allocation25_spill] sm:$0xff] }
 0x20c   : > { %v4108_v24 = vpop.f32.mrf.mxu0  ;;  %v15544_v2 = vpop.f32.mrf.mxu1 }
 0x20d   : > { %18337 = vst [vmem:[#allocation57_spill] sm:$0xff] %v15527_v54  ;;  %v15532_v45 = vadd.f32 %v4108_v24, %v15389_v26  ;;  %18344 = vst [vmem:[#allocation64_spill] sm:$0xff] %v15544_v2  ;;  %v1618_v54 = vadd.f32 %v18346_v63, %v18345_v25  ;;  %v15551_v26 = vld [vmem:[%s18209_s1 + $0x338] sm:$0xff]   ;;  %v18348_v24 = vld [vmem:[#allocation17_spill] sm:$0xff] }
 0x20e   : > { %v12558_v4 = vpop.f32.mrf.mxu0  ;;  %v18352_v2 = vld [vmem:[#allocation26_spill] sm:$0xff]  ;;  %12807 = vmatprep.subr.bf16.mxu0 %v15551_v26 }
 0x20f   : > { %18339 = vst [vmem:[#allocation59_spill] sm:$0xff] %v15532_v45  ;;  %v15535_v5 = vadd.f32 %v12558_v4, %v15395_v50  ;;  %v18347_v50 = vld [vmem:[#allocation21_spill] sm:$0xff]  ;;  %v2147_v63 = vadd.f32 %v15203_v30, %v1618_v54 }
 0x210   : > { %v15539_v18 = vpop.f32.mrf.mxu0  ;;  %v1634_v4 = vadd.f32 %v18348_v24, %v18347_v50 }
 0x211   : > { %18340 = vst [vmem:[#allocation60_spill] sm:$0xff] %v15535_v5  ;;  %18342 = vst [vmem:[#allocation62_spill] sm:$0xff] %v15539_v18  ;;  %v18350_v5 = vld [vmem:[#allocation24_spill] sm:$0xff] }
 0x212   : > { %v12561_v39 = vpop.f32.mrf.mxu0  ;;  %v1650_v45 = vadd.f32 %v18350_v5, %v18349_v6  ;;  %v18353_v18 = vld [vmem:[#allocation28_spill] sm:$0xff]  ;;  %v2151_v21 = vadd.f32 %v15228_v31, %v1634_v4  ;;  %v2529_v31 = vadd.f32 %v15149_v10, %v15179_v62  ;;  %v18360_v4 = vld [vmem:[#allocation7_spill] sm:$0xff] }
 0x213   : > { %v15542_v22 = vadd.f32 %v12561_v39, %v15399_v44  ;;  %v18351_v39 = vld [vmem:[#allocation29_spill] sm:$0xff]  ;;  %v2517_v57 = vadd.f32 %v18353_v18, %v15089_v43  ;;  %v2525_v43 = vadd.f32 %v15111_v35, %v15153_v53  ;;  %v18354_v53 = vld [vmem:[#allocation30_spill] sm:$0xff] }
 0x214   : > { %v4124_v46 = vpop.f32.mrf.mxu0  ;;  %v2155_v50 = vadd.f32 %v15244_v59, %v1650_v45  ;;  %v2533_v59 = vadd.f32 %v15175_v14, %v2147_v63  ;;  %v2537_v18 = vadd.f32 %v15201_v27, %v2151_v21  ;;  %v3283_v10 = vadd.f32 %v15352_v7, %v2529_v31  ;;  %v18357_v27 = vld [vmem:[#allocation15_spill] sm:$0xff] }
 0x215   : > { %18343 = vst [vmem:[#allocation63_spill] sm:$0xff] %v15542_v22  ;;  %v15558_v44 = vadd.f32 %v4124_v46, %v15406_v47  ;;  %v1666_v22 = vadd.f32 %v18352_v2, %v18351_v39  ;;  %v15571_v47 = vpop.f32.mrf.mxu1  ;;  %v2521_v46 = vadd.f32 %v15087_v11, %v15118_v9  ;;  %v3271_v6 = vadd.f32 %v15288_v49, %v2517_v57  ;;  %v18361_v39 = vld [vmem:[#allocation18_spill] sm:$0xff] }
 0x216   : > { %v12562_v25 = vpop.f32.mrf.mxu0  ;;  %v2541_v11 = vadd.f32 %v15226_v33, %v2155_v50  ;;  %v3279_v35 = vadd.f32 %v15330_v40, %v2525_v43  ;;  %v3287_v14 = vadd.f32 %v18354_v53, %v2533_v59  ;;  %v18358_v33 = vld [vmem:[#allocation32_spill] sm:$0xff]  ;;  %v18362_v50 = vld [vmem:[#allocation13_spill] sm:$0xff]  ;;  %v18364_v59 = vld [vmem:[#allocation19_spill] sm:$0xff] }
 0x217   : > { %v15569_v5 = vadd.f32 %v12562_v25, %v15412_v60  ;;  %v2159_v30 = vadd.f32 %v15265_v17, %v1666_v22  ;;  %v3275_v60 = vadd.f32 %v15312_v51, %v2521_v46  ;;  %v15587_v9 = vpop.f32.mrf.mxu1  ;;  %v18355_v51 = vld [vmem:[#allocation9_spill] sm:$0xff]  ;;  %v18356_v22 = vld [vmem:[#allocation6_spill] sm:$0xff]  ;;  %v3769_v21 = vadd.f32 %v18357_v27, %v3271_v6  ;;  %v18363_v46 = vld [vmem:[#allocation20_spill] sm:$0xff] }
 0x218   : > { %v15576_v54 = vpop.f32.mrf.mxu0  ;;  %v3771_v57 = vadd.f32 %v18356_v22, %v18355_v51  ;;  %v3291_v2 = vadd.f32 %v18358_v33, %v2537_v18  ;;  %v3295_v7 = vadd.f32 %v15410_v36, %v2541_v11  ;;  %v18366_v18 = vld [vmem:[#allocation11_spill] sm:$0xff]  ;;  %v18367_v11 = vld [vmem:[#allocation14_spill] sm:$0xff]  ;;  %v4909_v33 = vadd.f32 %v15417_v1, %v15447_v29  ;;  %v15646_v1 = vld [vmem:[%s18210_s2] ss:$0 sm:$0xff] }
 0x219   : > { %v2545_v49 = vadd.f32 %v15242_v15, %v2159_v30  ;;  %v3773_v40 = vadd.f32 %v18361_v39, %v3275_v60  ;;  %v3779_v30 = vadd.f32 %v18363_v46, %v18362_v50  ;;  %v4156_v43 = vadd.f32 %v15455_v20, %v3769_v21  ;;  %v15612_v31 = vpop.f32.mrf.mxu1  ;;  %v18365_v60 = vld [vmem:[#allocation16_spill] sm:$0xff]  ;;  %v18369_v51 = vld [vmem:[#allocation27_spill] sm:$0xff]  ;;  %v18371_v29 = vld [vmem:[#allocation34_spill] sm:$0xff] }
 0x21a   : > { %v12565_v45 = vpop.f32.mrf.mxu0  ;;  %v4158_v6 = vadd.f32 %v15451_v8, %v3771_v57  ;;  %v3783_v36 = vadd.f32 %v18366_v18, %v18365_v60  ;;  %v3789_v8 = vadd.f32 %v18369_v51, %v3291_v2  ;;  %v4911_v20 = vadd.f32 %v15414_v52, %v15441_v13  ;;  %v18370_v57 = vld [vmem:[#allocation31_spill] sm:$0xff]  ;;  %v18379_v50 = vld [vmem:[#allocation45_spill] sm:$0xff]  ;;  %v18386_v51 = vld [vmem:[#allocation46_spill] sm:$0xff] }
 0x21b   : > { %v15590_v17 = vadd.f32 %v12565_v45, %v15420_v61  ;;  %v18359_v61 = vld [vmem:[#allocation10_spill] sm:$0xff]  ;;  %v3299_v63 = vadd.f32 %v15429_v0, %v2545_v49  ;;  %v3777_v45 = vadd.f32 %v18364_v59, %v3279_v35  ;;  %v3781_v0 = vadd.f32 %v18367_v11, %v3283_v10  ;;  %v12613_v13 = vpop.f32.mrf.mxu1  ;;  %v18380_v46 = vld [vmem:[#allocation39_spill] sm:$0xff] }
 0x21c   : > { %v4140_v62 = vpop.f32.mrf.mxu0  ;;  %v3775_v15 = vadd.f32 %v18360_v4, %v18359_v61  ;;  %v18368_v49 = vld [vmem:[#allocation22_spill] sm:$0xff]  ;;  %v3793_v35 = vadd.f32 %v18370_v57, %v3295_v7  ;;  %v4166_v21 = vadd.f32 %v15485_v55, %v3779_v30  ;;  %v4912_v2 = vadd.f32 %v15422_v28, %v4158_v6  ;;  %v18372_v4 = vld [vmem:[#allocation40_spill] sm:$0xff]  ;;  %v18381_v6 = vld [vmem:[#allocation47_spill] sm:$0xff] }
 0x21d   : > { %v15601_v24 = vadd.f32 %v4140_v62, %v15425_v12  ;;  %v3785_v53 = vadd.f32 %v18368_v49, %v3287_v14  ;;  %v3797_v27 = vadd.f32 %v15408_v58, %v3299_v63  ;;  %v4164_v10 = vadd.f32 %v15489_v19, %v3777_v45  ;;  %v18378_v63 = vld [vmem:[#allocation55_spill] sm:$0xff]  ;;  %v4894_v45 = vpop.f32.mrf.mxu1 }
 0x21e   : > { %v12566_v25 = vpop.f32.mrf.mxu0  ;;  %v4162_v22 = vadd.f32 %v15469_v41, %v3775_v15  ;;  %v4910_v52 = vadd.f32 %v15427_v37, %v4156_v43  ;;  %v4913_v58 = vadd.f32 %v15443_v48, %v15465_v32  ;;  %v4170_v55 = vadd.f32 %v15501_v23, %v3783_v36  ;;  %v18373_v15 = vld [vmem:[#allocation35_spill] sm:$0xff]  ;;  %v18374_v48 = vld [vmem:[#allocation42_spill] sm:$0xff]  ;;  %v18375_v32 = vld [vmem:[#allocation36_spill] sm:$0xff] }
 0x21f   : > { %v15615_v12 = vadd.f32 %v12566_v25, %v15431_v38  ;;  %v4160_v38 = vadd.f32 %v15473_v3, %v3773_v40  ;;  %v4915_v3 = vadd.f32 %v15433_v42, %v15460_v56  ;;  %v4168_v19 = vadd.f32 %v15505_v34, %v3781_v0  ;;  %v18376_v34 = vld [vmem:[#allocation37_spill] sm:$0xff]  ;;  %v18377_v40 = vld [vmem:[#allocation38_spill] sm:$0xff]  ;;  %v18383_v36 = vld [vmem:[#allocation43_spill] sm:$0xff] }
 0x220   : > { %v15622_v62 = vpop.f32.mrf.mxu0  ;;  %v4916_v37 = vadd.f32 %v15449_v16, %v4162_v22  ;;  %v15652_v42 = vadd.f32 %v18373_v15, %v18372_v4  ;;  %v15656_v23 = vadd.f32 %v18375_v32, %v18374_v48  ;;  %v15659_v39 = vadd.f32 %v18376_v34, %v4166_v21  ;;  %v18382_v43 = vld [vmem:[#allocation41_spill] sm:$0xff]  ;;  %v18384_v0 = vld [vmem:[#allocation44_spill] sm:$0xff]  ;;  %v18387_v22 = vld [vmem:[#allocation62_spill] sm:$0xff] }
 0x221   : > { %v4914_v61 = vadd.f32 %v18371_v29, %v4160_v38  ;;  %v15662_v7 = vadd.f32 %v18377_v40, %v4164_v10  ;;  %v4172_v25 = vadd.f32 %v18378_v63, %v3785_v53  ;;  %v15667_v30 = vadd.f32 %v18380_v46, %v18379_v50  ;;  %v18385_v53 = vld [vmem:[#allocation51_spill] sm:$0xff]  ;;  %v18388_v21 = vld [vmem:[#allocation52_spill] sm:$0xff]  ;;  %v18392_v29 = vld [vmem:[#allocation50_spill] sm:$0xff]  ;;  %v12614_v40 = vpop.f32.mrf.mxu1 }
 0x222   : > { %v12633_v14 = vpop.f32.mrf.mxu0  ;;  %v15671_v59 = vadd.f32 %v18382_v43, %v18381_v6  ;;  %v15675_v11 = vadd.f32 %v18383_v36, %v4170_v55  ;;  %v15678_v49 = vadd.f32 %v18384_v0, %v4168_v19  ;;  %v4176_v38 = vadd.f32 %v18387_v22, %v3789_v8  ;;  %v18389_v10 = vld [vmem:[#allocation48_spill] sm:$0xff]  ;;  %v18390_v55 = vld [vmem:[#allocation54_spill] sm:$0xff]  ;;  %v18393_v15 = vld [vmem:[#allocation57_spill] sm:$0xff] }
 0x223   : > { %v5409_v41 = vadd.f32 %v12633_v14, %v4911_v20  ;;  %v15682_v20 = vadd.f32 %v18386_v51, %v18385_v53  ;;  %v15687_v14 = vadd.f32 %v18389_v10, %v18388_v21  ;;  %v15696_v4 = vadd.f32 %v18392_v29, %v4172_v25  ;;  %v18394_v48 = vld [vmem:[#allocation53_spill] sm:$0xff]  ;;  %v18395_v50 = vld [vmem:[#allocation59_spill] sm:$0xff]  ;;  %v18396_v46 = vld [vmem:[#allocation56_spill] sm:$0xff] }
 0x224   : > { %v5280_v28 = vpop.f32.mrf.mxu0  ;;  %v15700_v8 = vadd.f32 %v18394_v48, %v18393_v15  ;;  %v4180_v32 = vadd.f32 %v15576_v54, %v3793_v35  ;;  %v15706_v6 = vadd.f32 %v18396_v46, %v18395_v50  ;;  %v18397_v43 = vld [vmem:[#allocation60_spill] sm:$0xff]  ;;  %v18398_v25 = vld [vmem:[#allocation58_spill] sm:$0xff]  ;;  %v18399_v36 = vld [vmem:[#allocation61_spill] sm:$0xff]  ;;  %v15721_v21 = vadd.f32 %v15571_v47, %v15558_v44 }
 0x225   : > { %v5407_v56 = vadd.f32 %v5280_v28, %v4909_v33  ;;  %v5448_v60 = vadd.f32 %v15646_v1, %v5409_v41  ;;  %v18391_v28 = vld [vmem:[#allocation49_spill] sm:$0xff]  ;;  %v15713_v0 = vadd.f32 %v18399_v36, %v4176_v38  ;;  %v18400_v53 = vld [vmem:[#allocation63_spill] sm:$0xff]  ;;  %v18401_v54 = vld [vmem:[#allocation64_spill] sm:$0xff]  ;;  %v15725_v10 = vadd.f32 %v15587_v9, %v15569_v5 }
 0x226   : > { %v12634_v16 = vpop.f32.mrf.mxu0  ;;  %v15693_v19 = vadd.f32 %v18391_v28, %v18390_v55  ;;  %v15717_v35 = vadd.f32 %v18401_v54, %v18400_v53  ;;  %v4184_v38 = vadd.f32 %v15622_v62, %v3797_v27  ;;  %v15730_v55 = vadd.f32 %v15612_v31, %v4180_v32 }
 0x227   : > { %v5410_v18 = vadd.f32 %v12634_v16, %v4912_v2  ;;  %v5446_v33 = vadd.f32 %v15646_v1, %v5407_v56  ;;  %v5480_v63 = vmax.f32 %v5448_v60, 0.0  ;;  %v15736_v44 = vadd.f32 %v4894_v45, %v15601_v24 }
 0x228   : > { %v5283_v57 = vpop.f32.mrf.mxu0  ;;  %v15739_v5 = vadd.f32 %v12614_v40, %v15615_v12 }
 0x229   : > { %v5449_v2 = vadd.f32 %v15646_v1, %v5410_v18  ;;  %v5408_v41 = vadd.f32 %v5283_v57, %v4910_v52  ;;  %v15710_v18 = vadd.f32 %v18398_v25, %v18397_v43  ;;  %v5478_v51 = vmax.f32 %v5446_v33, 0.0 }
 0x22a   : > { %v12637_v34 = vpop.f32.mrf.mxu0  ;;  %v15733_v33 = vadd.f32 %v12613_v13, %v15590_v17 }
 0x22b   : > { %v5481_v56 = vmax.f32 %v5449_v2, 0.0  ;;  %v5447_v16 = vadd.f32 %v15646_v1, %v5408_v41  ;;  %v5413_v52 = vadd.f32 %v12637_v34, %v4915_v3 }
 0x22c   : > { %v5296_v60 = vpop.f32.mrf.mxu0 }
 0x22d   : > { %v5511_v22 = vpack.c.bf16 %v5481_v56, %v5480_v63  ;;  %v5479_v57 = vmax.f32 %v5447_v16, 0.0  ;;  %v5411_v3 = vadd.f32 %v5296_v60, %v4913_v58  ;;  %v5452_v2 = vadd.f32 %v15646_v1, %v5413_v52  ;;  %v4897_v58 = vpop.f32.mrf.mxu1 }
 0x22e   : > { %v12638_v41 = vpop.f32.mrf.mxu0  ;;  %v15742_v32 = vadd.f32 %v4897_v58, %v4184_v38 }
 0x22f   : > { %v5534_v28 = vshrl.u32 %v5511_v22, 16  ;;  %v5510_v29 = vpack.c.bf16 %v5479_v57, %v5478_v51  ;;  %v5450_v47 = vadd.f32 %v15646_v1, %v5411_v3  ;;  %v5414_v9 = vadd.f32 %v12638_v41, %v4916_v37 }
 0x230   : > { %v5299_v62 = vpop.f32.mrf.mxu0  ;;  %v5537_v15 = vshll.u32 %v5511_v22, 16  ;;  %v5484_v13 = vmax.f32 %v5452_v2, 0.0 }
 0x231   : > { %v5536_v27 = vrot.slane %v5534_v28, 7  ;;  %v5527_v31 = vshrl.u32 %v5510_v29, 16  ;;  %v5412_v48 = vadd.f32 %v5299_v62, %v4914_v61  ;;  %v5530_v17 = vshll.u32 %v5510_v29, 16 }
 0x232   : > { %v5453_v34 = vadd.f32 %v15646_v1, %v5414_v9  ;;  %v12641_v63 = vpop.f32.mrf.mxu0  ;;  %v5482_v16 = vmax.f32 %v5450_v47, 0.0 }
 0x233   : > { %v5539_v24 = vor.u32 %v5537_v15, %v5536_v27  ;;  %v5687_v12 = vsel %vm13500_vm7, %v5536_v27, 0  ;;  %v5529_v40 = vrot.slane %v5527_v31, 7  ;;  %v5451_v56 = vadd.f32 %v15646_v1, %v5412_v48 }
 0x234   : > { %v11342_v37 = vcombine.low %v5687_v12, %v5687_v12  ;;  %v5485_v52 = vmax.f32 %v5453_v34, 0.0  ;;  %v5417_v50 = vadd.f32 %v12641_v63, %v15652_v42  ;;  %v5312_v61 = vpop.f32.mrf.mxu0 }
 0x235   : > { %v5671_v46 = vsel %vm13500_vm7, 0, %v5539_v24  ;;  %v5532_v43 = vor.u32 %v5530_v17, %v5529_v40  ;;  %v5686_v25 = vsel %vm13500_vm7, %v5529_v40, 0  ;;  %v5483_v36 = vmax.f32 %v5451_v56, 0.0  ;;  %v15760_v17 = vld [vmem:[#allocation2] sm:$0xe] }
 0x236   : > { %v11340_v53 = vcombine.low %v5671_v46, %v5671_v46  ;;  %v11341_v54 = vcombine.high %v5671_v46, %v5671_v46  ;;  %5883 = vst [vmem:[#allocation2 + $0x20] sm:$0x1] %v11342_v37  ;;  %v11339_v60 = vcombine.low %v5686_v25, %v5686_v25  ;;  %v5513_v51 = vpack.c.bf16 %v5485_v52, %v5484_v13  ;;  %v12642_v22 = vpop.f32.mrf.mxu0  ;;  %v18403_v13 = vld [vmem:[#allocation23_spill] sm:$0xff] }
 0x237   : > { %v5670_v57 = vsel %vm13500_vm7, 0, %v5532_v43  ;;  %v5512_v3 = vpack.c.bf16 %v5483_v36, %v5482_v16  ;;  %v5456_v42 = vadd.f32 %v15646_v1, %v5417_v50  ;;  %v5415_v38 = vadd.f32 %v5312_v61, %v15656_v23 }
 0x238   : > { %5882 = vst [vmem:[#allocation2 + $0x1c] sm:$0xf] %v11341_v54  ;;  %5881 = vst [vmem:[#allocation2 + $0x18] sm:$0xf] %v11340_v53  ;;  %v11337_v2 = vcombine.low %v5670_v57, %v5670_v57  ;;  %v11338_v41 = vcombine.high %v5670_v57, %v5670_v57  ;;  %v5548_v58 = vshrl.u32 %v5513_v51, 16  ;;  %v5551_v28 = vshll.u32 %v5513_v51, 16  ;;  %v5315_v29 = vpop.f32.mrf.mxu0 }
 0x239   : > { %5880 = vst [vmem:[#allocation2 + $0x14] sm:$0x1] %v11339_v60  ;;  %v5541_v47 = vshrl.u32 %v5512_v3, 16  ;;  %v5544_v9 = vshll.u32 %v5512_v3, 16  ;;  %v5488_v62 = vmax.f32 %v5456_v42, 0.0  ;;  %v5454_v27 = vadd.f32 %v15646_v1, %v5415_v38 }
 0x23a   : > { %5878 = vst [vmem:[#allocation2 + $0xc] sm:$0xf] %v11337_v2  ;;  %5879 = vst [vmem:[#allocation2 + $0x10] sm:$0xf] %v11338_v41  ;;  %v5550_v15 = vrot.slane %v5548_v58, 7  ;;  %v5418_v31 = vadd.f32 %v12642_v22, %v15659_v39  ;;  %v5416_v23 = vadd.f32 %v5315_v29, %v15662_v7  ;;  %v12645_v48 = vpop.f32.mrf.mxu0  ;;  %v7020_v34 = vrot.slane %v18403_v13, 5 }
 0x23b   : > { %v5543_v63 = vrot.slane %v5541_v47, 7  ;;  %v5486_v24 = vmax.f32 %v5454_v27, 0.0  ;;  %v5421_v12 = vadd.f32 %v12645_v48, %v15667_v30  ;;  %v11465_v40 = vrot.slane %v15760_v17, 9 }
 0x23c   : > { %v5553_v56 = vor.u32 %v5551_v28, %v5550_v15  ;;  %v5689_v37 = vsel %vm13500_vm7, %v5550_v15, 0  ;;  %v5457_v16 = vadd.f32 %v15646_v1, %v5418_v31  ;;  %v5455_v39 = vadd.f32 %v15646_v1, %v5416_v23  ;;  %v5328_v7 = vpop.f32.mrf.mxu0 }
 0x23d   : > { %v11348_v52 = vcombine.low %v5689_v37, %v5689_v37  ;;  %v5546_v50 = vor.u32 %v5544_v9, %v5543_v63  ;;  %v5688_v61 = vsel %vm13500_vm7, %v5543_v63, 0  ;;  %v5460_v46 = vadd.f32 %v15646_v1, %v5421_v12 }
 0x23e   : > { %v5673_v30 = vsel %vm13500_vm7, 0, %v5553_v56  ;;  %v11345_v43 = vcombine.low %v5688_v61, %v5688_v61  ;;  %v5489_v25 = vmax.f32 %v5457_v16, 0.0  ;;  %v5487_v36 = vmax.f32 %v5455_v39, 0.0  ;;  %v12646_v53 = vpop.f32.mrf.mxu0 }
 0x23f   : > { %v11346_v54 = vcombine.low %v5673_v30, %v5673_v30  ;;  %v11347_v60 = vcombine.high %v5673_v30, %v5673_v30  ;;  %5889 = vst [vmem:[#allocation2 + $0x38] sm:$0x1] %v11348_v52  ;;  %v5672_v51 = vsel %vm13500_vm7, 0, %v5546_v50  ;;  %v5492_v22 = vmax.f32 %v5460_v46, 0.0  ;;  %v15776_v57 = vld [vmem:[#allocation2 + $0x18] sm:$0xf] }
 0x240   : > { %v11343_v3 = vcombine.low %v5672_v51, %v5672_v51  ;;  %v11344_v42 = vcombine.high %v5672_v51, %v5672_v51  ;;  %5886 = vst [vmem:[#allocation2 + $0x2c] sm:$0x1] %v11345_v43  ;;  %v5515_v38 = vpack.c.bf16 %v5489_v25, %v5488_v62  ;;  %v5514_v2 = vpack.c.bf16 %v5487_v36, %v5486_v24  ;;  %v5331_v41 = vpop.f32.mrf.mxu0 }
 0x241   : > { %5888 = vst [vmem:[#allocation2 + $0x34] sm:$0xf] %v11347_v60  ;;  %5887 = vst [vmem:[#allocation2 + $0x30] sm:$0xf] %v11346_v54  ;;  %v5419_v58 = vadd.f32 %v5328_v7, %v15671_v59  ;;  %v5422_v28 = vadd.f32 %v12646_v53, %v15675_v11  ;;  %v5420_v29 = vadd.f32 %v5331_v41, %v15678_v49  ;;  %v15781_v47 = vld [vmem:[#allocation2 + $0xc] sm:$0xf] }
 0x242   : > { %v6040_v9 = vshrl.u32 %v15776_v57, 16  ;;  %5885 = vst [vmem:[#allocation2 + $0x28] sm:$0xf] %v11344_v42  ;;  %5884 = vst [vmem:[#allocation2 + $0x24] sm:$0xf] %v11343_v3  ;;  %v5562_v27 = vshrl.u32 %v5515_v38, 16  ;;  %v12649_v23 = vpop.f32.mrf.mxu0 }
 0x243   : > { %v5565_v15 = vshll.u32 %v5515_v38, 16  ;;  %v5555_v31 = vshrl.u32 %v5514_v2, 16  ;;  %v5558_v62 = vshll.u32 %v5514_v2, 16  ;;  %v5458_v48 = vadd.f32 %v15646_v1, %v5419_v58  ;;  %v15803_v42 = vld [vmem:[#allocation2 + $0x10] sm:$0xf] }
 0x244   : > { %v5461_v63 = vadd.f32 %v15646_v1, %v5422_v28  ;;  %v5459_v59 = vadd.f32 %v15646_v1, %v5420_v29  ;;  %v5425_v11 = vadd.f32 %v12649_v23, %v15682_v20  ;;  %v5564_v49 = vrot.slane %v5562_v27, 7  ;;  %v5344_v12 = vpop.f32.mrf.mxu0 }
 0x245   : > { %v5557_v24 = vrot.slane %v5555_v31, 7  ;;  %v6016_v56 = vshrl.u32 %v15781_v47, 16  ;;  %v6019_v37 = vshll.u32 %v15781_v47, 16  ;;  %v5490_v16 = vmax.f32 %v5458_v48, 0.0 }
 0x246   : > { %v5493_v39 = vmax.f32 %v5461_v63, 0.0  ;;  %v5491_v7 = vmax.f32 %v5459_v59, 0.0  ;;  %v15791_v52 = vadd.f32 %v15646_v1, %v5425_v11  ;;  %v5567_v50 = vor.u32 %v5565_v15, %v5564_v49  ;;  %v12650_v30 = vpop.f32.mrf.mxu0 }
 0x247   : > { %v5691_v61 = vsel %vm13500_vm7, %v5564_v49, 0  ;;  %v5560_v46 = vor.u32 %v5558_v62, %v5557_v24  ;;  %v5690_v20 = vsel %vm13500_vm7, %v5557_v24, 0  ;;  %v5423_v3 = vadd.f32 %v5344_v12, %v15687_v14  ;;  %v13256_v12 = vld [vmem:[%s18209_s1 + $0x330] sm:$0xff]  }
 0x248   : > { %v11354_v43 = vcombine.low %v5691_v61, %v5691_v61  ;;  %v11351_v25 = vcombine.low %v5690_v20, %v5690_v20  ;;  %v5517_v36 = vpack.c.bf16 %v5493_v39, %v5492_v22  ;;  %v5516_v53 = vpack.c.bf16 %v5491_v7, %v5490_v16  ;;  %v5347_v38 = vpop.f32.mrf.mxu0  ;;  %v15805_v22 = vld [vmem:[#allocation2 + $0x1c] sm:$0xf] }
 0x249   : > { %v5675_v54 = vsel %vm13500_vm7, 0, %v5567_v50  ;;  %v5674_v60 = vsel %vm13500_vm7, 0, %v5560_v46  ;;  %v5496_v51 = vmax.f32 %v15791_v52, 0.0  ;;  %v15808_v14 = vadd.f32 %v15646_v1, %v5423_v3  ;;  %v5932_v3 = vld [vmem:[#allocation2 + $0x24] sm:$0xf] }
 0x24a   : > { %v11352_v2 = vcombine.low %v5675_v54, %v5675_v54  ;;  %v11353_v41 = vcombine.high %v5675_v54, %v5675_v54  ;;  %5895 = vst [vmem:[#allocation2 + $0x50] sm:$0x1] %v11354_v43  ;;  %v11349_v58 = vcombine.low %v5674_v60, %v5674_v60  ;;  %v11350_v28 = vcombine.high %v5674_v60, %v5674_v60  ;;  %v12653_v62 = vpop.f32.mrf.mxu0 }
 0x24b   : > { %5892 = vst [vmem:[#allocation2 + $0x44] sm:$0x1] %v11351_v25  ;;  %v5576_v29 = vshrl.u32 %v5517_v36, 16  ;;  %v5579_v27 = vshll.u32 %v5517_v36, 16  ;;  %v5569_v15 = vshrl.u32 %v5516_v53, 16  ;;  %v5572_v31 = vshll.u32 %v5516_v53, 16 }
 0x24c   : > { %5894 = vst [vmem:[#allocation2 + $0x4c] sm:$0xf] %v11353_v41  ;;  %5893 = vst [vmem:[#allocation2 + $0x48] sm:$0xf] %v11352_v2  ;;  %v15810_v23 = vrot.slane %v6016_v56, 4  ;;  %v15812_v48 = vrot.slane %v6019_v37, 5  ;;  %v11442_v49 = vcombine.low %v15781_v47, %v15803_v42  ;;  %v11443_v39 = vcombine.low %v15776_v57, %v15805_v22  ;;  %v5360_v61 = vpop.f32.mrf.mxu0 }
 0x24d   : > { %5891 = vst [vmem:[#allocation2 + $0x40] sm:$0xf] %v11350_v28  ;;  %5890 = vst [vmem:[#allocation2 + $0x3c] sm:$0xf] %v11349_v58  ;;  %v6029_v63 = vshrl.u32 %v15803_v42, 16  ;;  %v5578_v59 = vrot.slane %v5576_v29, 7  ;;  %v5426_v25 = vadd.f32 %v12650_v30, %v15693_v19  ;;  %v5424_v54 = vadd.f32 %v5347_v38, %v15696_v4 }
 0x24e   : > { %v5571_v11 = vrot.slane %v5569_v15, 7  ;;  %v15817_v24 = vrot.slane %v6040_v9, 4  ;;  %v5494_v16 = vmax.f32 %v15808_v14, 0.0  ;;  %v6043_v56 = vshll.u32 %v15776_v57, 16  ;;  %12728 = vmatmul.mubr.bf16.vlgmr.msra.gmra.mxu0 %v11442_v49  ;;  %v13259_v57 = vld [vmem:[%s18209_s1 + $0x328] sm:$0xff]   ;;  %v12654_v38 = vpop.f32.mrf.mxu0 }
 0x24f   : > { %v6053_v37 = vshrl.u32 %v15805_v22, 16  ;;  %v5581_v7 = vor.u32 %v5579_v27, %v5578_v59  ;;  %v5693_v50 = vsel %vm13500_vm7, %v5578_v59, 0  ;;  %12731 = vmatprep.mubr.bf16.mxu0 %v11443_v39  ;;  %12808 = vmatpush3.bf16.msra.mxu0 %v15551_v26  ;;  %v5429_v60 = vadd.f32 %v12653_v62, %v15700_v8  ;;  %v15844_v2 = vld [vmem:[#allocation2 + $0x28] sm:$0xf]  ;;  %v5976_v8 = vld [vmem:[#allocation2 + $0x14] sm:$0x1] }
 0x250   : > { %v5574_v47 = vor.u32 %v5572_v31, %v5571_v11  ;;  %v5692_v9 = vsel %vm13500_vm7, %v5571_v11, 0  ;;  %v11360_v46 = vcombine.low %v5693_v50, %v5693_v50  ;;  %v15831_v43 = vrot.slane %v6043_v56, 5  ;;  %12809 = vmatprep.subr.bf16.mxu0 %v13256_v12  ;;  %v5934_v14 = vld [vmem:[#allocation2 + $0x30] sm:$0xf]  ;;  %v13261_v56 = vld [vmem:[%s18209_s1 + $0x320] sm:$0xff]  }
 0x251   : > { %v11357_v20 = vcombine.low %v5692_v9, %v5692_v9  ;;  %v5677_v36 = vsel %vm13500_vm7, 0, %v5581_v7  ;;  %v5465_v58 = vadd.f32 %v15646_v1, %v5426_v25  ;;  %v5463_v28 = vadd.f32 %v15646_v1, %v5424_v54  ;;  %v15875_v54 = vld [vmem:[#allocation2 + $0x34] sm:$0xf] }
 0x252   : > { %v5676_v53 = vsel %vm13500_vm7, 0, %v5574_v47  ;;  %v11358_v19 = vcombine.low %v5677_v36, %v5677_v36  ;;  %v11359_v26 = vcombine.high %v5677_v36, %v5677_v36  ;;  %5901 = vst [vmem:[#allocation2 + $0x68] sm:$0x1] %v11360_v46  ;;  %v15849_v29 = vadd.f32 %v15646_v1, %v5429_v60 }
 0x253   : > { %v11355_v30 = vcombine.low %v5676_v53, %v5676_v53  ;;  %v11356_v41 = vcombine.high %v5676_v53, %v5676_v53  ;;  %5898 = vst [vmem:[#allocation2 + $0x5c] sm:$0x1] %v11357_v20  ;;  %v5427_v4 = vadd.f32 %v5360_v61, %v15706_v6  ;;  %v6064_v27 = vshrl.u32 %v5932_v3, 16  ;;  %12810 = vmatpush3.bf16.msra.mxu0 %v13256_v12  ;;  %v15873_v20 = vpop.f32.mrf.mxu0 }
 0x254   : > { %5900 = vst [vmem:[#allocation2 + $0x64] sm:$0xf] %v11359_v26  ;;  %5899 = vst [vmem:[#allocation2 + $0x60] sm:$0xf] %v11358_v19  ;;  %v6067_v15 = vshll.u32 %v5932_v3, 16  ;;  %v6077_v31 = vshrl.u32 %v15844_v2, 16  ;;  %v11444_v62 = vcombine.low %v5932_v3, %v15844_v2  ;;  %12811 = vmatprep.subr.bf16.mxu0 %v13259_v57  ;;  %v6022_v50 = vor.u32 %v15812_v48, %v15810_v23 }
 0x255   : > { %5897 = vst [vmem:[#allocation2 + $0x58] sm:$0xf] %v11356_v41  ;;  %5896 = vst [vmem:[#allocation2 + $0x54] sm:$0xf] %v11355_v30  ;;  %v5497_v59 = vmax.f32 %v5465_v58, 0.0  ;;  %v5495_v11 = vmax.f32 %v5463_v28, 0.0  ;;  %v15856_v6 = vadd.f32 %v15646_v1, %v5427_v4  ;;  %v12657_v28 = vpop.f32.mrf.mxu0 }
 0x256   : > { %v5500_v49 = vmax.f32 %v15849_v29, 0.0  ;;  %v15861_v39 = vrot.slane %v6064_v27, 4  ;;  %v15863_v7 = vrot.slane %v6067_v15, 5  ;;  %v6025_v12 = vshll.u32 %v15803_v42, 16  ;;  %12732 = vmatmul.mubr.bf16.gmra.mxu0 %v11444_v62  ;;  %v15938_v29 = vld [vmem:[#allocation2 + $0x40] sm:$0xf] }
 0x257   : > { %v5519_v47 = vpack.c.bf16 %v5497_v59, %v5496_v51  ;;  %v5518_v9 = vpack.c.bf16 %v5495_v11, %v5494_v16  ;;  %v5498_v61 = vmax.f32 %v15856_v6, 0.0  ;;  %v6031_v46 = vrot.slane %v6029_v63, 4  ;;  %12812 = vmatpush3.bf16.msra.mxu0 %v13259_v57  ;;  %v13264_v16 = vld [vmem:[%s18209_s1 + $0x318] sm:$0xff]  }
 0x258   : > { %v6023_v25 = vrot.slane %v6022_v50, 4  ;;  %v6027_v36 = vrot.slane %v6025_v12, 5  ;;  %v6035_v53 = vshll.u32 %v5976_v8, 16  ;;  %v6088_v23 = vshrl.u32 %v5934_v14, 16  ;;  %12813 = vmatprep.subr.bf16.mxu0 %v13261_v56  ;;  %v13266_v12 = vld [vmem:[%s18209_s1 + $0x310] sm:$0xff]  }
 0x259   : > { %v5590_v48 = vshrl.u32 %v5519_v47, 16  ;;  %v5593_v60 = vshll.u32 %v5519_v47, 16  ;;  %v5583_v52 = vshrl.u32 %v5518_v9, 16  ;;  %v5586_v51 = vshll.u32 %v5518_v9, 16 }
 0x25a   : > { %v6028_v63 = vsel %vm13478_vm5, %v6023_v25, %v6027_v36  ;;  %v6032_v3 = vor.u32 %v6031_v46, %v6027_v36  ;;  %v6037_v19 = vrot.slane %v6035_v53, 5  ;;  %v15882_v26 = vrot.slane %v6088_v23, 4  ;;  %v15908_v25 = vld [vmem:[#allocation2 + $0x20] sm:$0x1]  ;;  %v5376_v36 = vpop.f32.mrf.mxu0 }
 0x25b   : > { %v5592_v30 = vrot.slane %v5590_v48, 7  ;;  %v5585_v41 = vrot.slane %v5583_v52, 7  ;;  %v6091_v58 = vshll.u32 %v5934_v14, 16  ;;  %v6101_v57 = vshrl.u32 %v15875_v54, 16  ;;  %12814 = vmatpush3.bf16.msra.mxu0 %v13261_v56  ;;  %v15910_v52 = vld [vmem:[#allocation2 + $0x3c] sm:$0xf] }
 0x25c   : > { %v6033_v4 = vrot.slane %v6032_v3, 4  ;;  %v11445_v8 = vcombine.low %v5934_v14, %v15875_v54  ;;  %v5430_v27 = vadd.f32 %v12654_v38, %v15710_v18  ;;  %v6046_v15 = vor.u32 %v15831_v43, %v15817_v24  ;;  %12815 = vmatprep.subr.bf16.mxu0 %v13264_v16  ;;  %v13247_v43 = vld [vmem:[%s18209_s1 + $0x2f0] sm:$0xff]  }
 0x25d   : > { %v5595_v62 = vor.u32 %v5593_v60, %v5592_v30  ;;  %v5695_v59 = vsel %vm13500_vm7, %v5592_v30, 0  ;;  %v5588_v11 = vor.u32 %v5586_v51, %v5585_v41  ;;  %v5694_v50 = vsel %vm13500_vm7, %v5585_v41, 0  ;;  %v13269_v30 = vld [vmem:[%s18209_s1 + $0x308] sm:$0xff]  }
 0x25e   : > { %v11366_v14 = vcombine.low %v5695_v59, %v5695_v59  ;;  %v11363_v47 = vcombine.low %v5694_v50, %v5694_v50  ;;  %v6038_v18 = vsel %vm13478_vm5, %v6033_v4, %v6037_v19  ;;  %v15898_v24 = vrot.slane %v6091_v58, 5  ;;  %12735 = vmatprep.mubr.bf16.mxu0 %v11445_v8  ;;  %v18405_v41 = vld [vmem:[#allocation33_spill] sm:$0xff] }
 0x25f   : > { %v5679_v38 = vsel %vm13500_vm7, 0, %v5595_v62  ;;  %v5678_v56 = vsel %vm13500_vm7, 0, %v5588_v11  ;;  %v11418_v9 = vcombine.low %v6028_v63, %v6038_v18  ;;  %v5469_v46 = vadd.f32 %v15646_v1, %v5430_v27  ;;  %12816 = vmatpush3.bf16.msra.mxu0 %v13264_v16  ;;  %v13250_v62 = vld [vmem:[%s18209_s1 + $0x2e8] sm:$0xff]  }
 0x260   : > { %v11364_v53 = vcombine.low %v5679_v38, %v5679_v38  ;;  %v11365_v23 = vcombine.high %v5679_v38, %v5679_v38  ;;  %5907 = vst [vmem:[#allocation2 + $0x80] sm:$0x1] %v11366_v14  ;;  %v11361_v48 = vcombine.low %v5678_v56, %v5678_v56  ;;  %v11362_v60 = vcombine.high %v5678_v56, %v5678_v56  ;;  %v13271_v14 = vld [vmem:[%s18209_s1 + $0x300] sm:$0xff]  }
 0x261   : > { %5904 = vst [vmem:[#allocation2 + $0x74] sm:$0x1] %v11363_v47  ;;  %12680 = vmatmul.mubr.bf16.vlgmr.msra.gmra.mxu1 %v11418_v9  ;;  %v5501_v51 = vmax.f32 %v5469_v46, 0.0  ;;  %v6047_v3 = vrot.slane %v6046_v15, 4  ;;  %v6049_v19 = vshll.u32 %v15805_v22, 16  ;;  %v6055_v63 = vrot.slane %v6053_v37, 4  ;;  %12817 = vmatprep.subr.bf16.mxu0 %v13266_v12 }
 0x262   : > { %5906 = vst [vmem:[#allocation2 + $0x7c] sm:$0xf] %v11365_v23  ;;  %5905 = vst [vmem:[#allocation2 + $0x78] sm:$0xf] %v11364_v53  ;;  %12760 = vmatpush3.bf16.msra.mxu1 %v18405_v41  ;;  %v6059_v16 = vshll.u32 %v15908_v25, 16  ;;  %v5428_v58 = vadd.f32 %v15873_v20, %v15713_v0  ;;  %v5433_v4 = vadd.f32 %v12657_v28, %v15717_v35  ;;  %v6112_v27 = vshrl.u32 %v15910_v52, 16 }
 0x263   : > { %5903 = vst [vmem:[#allocation2 + $0x70] sm:$0xf] %v11362_v60  ;;  %5902 = vst [vmem:[#allocation2 + $0x6c] sm:$0xf] %v11361_v48  ;;  %v5431_v22 = vadd.f32 %v5376_v36, %v15721_v21  ;;  %v5521_v37 = vpack.c.bf16 %v5501_v51, %v5500_v49  ;;  %v6051_v8 = vrot.slane %v6049_v19, 5  ;;  %v6115_v15 = vshll.u32 %v15910_v52, 16  ;;  %12761 = vmatprep.subr.bf16.mxu1 %v13247_v43  ;;  %v15940_v49 = vpop.f32.mrf.mxu0 }
 0x264   : > { %v6061_v59 = vrot.slane %v6059_v16, 5  ;;  %v5467_v0 = vadd.f32 %v15646_v1, %v5428_v58  ;;  %v15933_v35 = vadd.f32 %v15646_v1, %v5433_v4  ;;  %12818 = vmatpush3.bf16.msra.mxu0 %v13266_v12  ;;  %v15949_v56 = vrot.slane %v6112_v27, 4  ;;  %v13253_v53 = vld [vmem:[%s18209_s1 + $0x2e0] sm:$0xff]   ;;  %v15961_v60 = vld [vmem:[#allocation2 + $0x2c] sm:$0x1] }
 0x265   : > { %v15936_v21 = vadd.f32 %v15646_v1, %v5431_v22  ;;  %v5604_v20 = vshrl.u32 %v5521_v37, 16  ;;  %v5607_v28 = vshll.u32 %v5521_v37, 16  ;;  %v6052_v11 = vsel %vm13478_vm5, %v6047_v3, %v6051_v8  ;;  %12819 = vmatprep.subr.bf16.mxu0 %v13269_v30  ;;  %v15966_v3 = vpop.f32.mrf.mxu0  ;;  %v15979_v58 = vld [vmem:[#allocation2 + $0x4c] sm:$0xf] }
 0x266   : > { %v6056_v50 = vor.u32 %v6055_v63, %v6051_v8  ;;  %v5499_v47 = vmax.f32 %v5467_v0, 0.0  ;;  %v5504_v18 = vmax.f32 %v15933_v35, 0.0  ;;  %12762 = vmatpush3.bf16.msra.mxu1 %v13247_v43  ;;  %v15951_v46 = vrot.slane %v6115_v15, 5 }
 0x267   : > { %v5502_v38 = vmax.f32 %v15936_v21, 0.0  ;;  %v5606_v12 = vrot.slane %v5604_v20, 7  ;;  %v6125_v36 = vshrl.u32 %v15938_v29, 16  ;;  %12763 = vmatprep.subr.bf16.mxu1 %v13250_v62  ;;  %v11446_v48 = vcombine.low %v15910_v52, %v15938_v29  ;;  %v5938_v52 = vld [vmem:[#allocation2 + $0x48] sm:$0xf]  ;;  %v12661_v0 = vpop.f32.mrf.mxu0 }
 0x268   : > { %v6057_v9 = vrot.slane %v6056_v50, 4  ;;  %v5520_v23 = vpack.c.bf16 %v5499_v47, %v5498_v61  ;;  %v6070_v43 = vor.u32 %v15863_v7, %v15861_v39  ;;  %v6073_v51 = vshll.u32 %v15844_v2, 16  ;;  %12820 = vmatpush3.bf16.msra.mxu0 %v13269_v30  ;;  %v15977_v39 = vld [vmem:[%s18209_s1 + $0x3b8] sm:$0xff]  }
 0x269   : > { %v5609_v19 = vor.u32 %v5607_v28, %v5606_v12  ;;  %v5697_v63 = vsel %vm13500_vm7, %v5606_v12, 0  ;;  %v6079_v61 = vrot.slane %v6077_v31, 4  ;;  %12821 = vmatprep.subr.bf16.mxu0 %v13271_v14  ;;  %12736 = vmatmul.mubr.bf16.gmra.mxu0 %v11446_v48  ;;  %v13258_v2 = vld [vmem:[%s18209_s1 + $0x2d8] sm:$0xff]   ;;  %v6083_v37 = vshll.u32 %v15961_v60, 16 }
 0x26a   : > { %v6062_v6 = vsel %vm13478_vm5, %v6057_v9, %v6061_v59  ;;  %v11372_v7 = vcombine.low %v5697_v63, %v5697_v63  ;;  %v5597_v30 = vshrl.u32 %v5520_v23, 16  ;;  %v5600_v16 = vshll.u32 %v5520_v23, 16  ;;  %12764 = vmatpush3.bf16.msra.mxu1 %v13250_v62 }
 0x26b   : > { %v11419_v41 = vcombine.low %v6052_v11, %v6062_v6  ;;  %v5681_v31 = vsel %vm13500_vm7, 0, %v5609_v19  ;;  %v6071_v4 = vrot.slane %v6070_v43, 4  ;;  %v6075_v22 = vrot.slane %v6073_v51, 5  ;;  %12765 = vmatprep.subr.bf16.mxu1 %v13253_v53  ;;  %v13263_v51 = vld [vmem:[%s18209_s1 + $0x2d0] sm:$0xff]   ;;  %v16005_v6 = vld [vmem:[#allocation2 + $0x38] sm:$0x1] }
 0x26c   : > { %v11370_v8 = vcombine.low %v5681_v31, %v5681_v31  ;;  %v11371_v27 = vcombine.high %v5681_v31, %v5681_v31  ;;  %5913 = vst [vmem:[#allocation2 + $0x98] sm:$0x1] %v11372_v7  ;;  %v5599_v15 = vrot.slane %v5597_v30, 7  ;;  %v6136_v59 = vshrl.u32 %v5938_v52, 16  ;;  %12822 = vmatpush3.bf16.msra.mxu0 %v13271_v14  ;;  %v5392_v7 = vpop.f32.mrf.mxu0  ;;  %v5940_v31 = vld [vmem:[#allocation2 + $0x54] sm:$0xf] }
 0x26d   : > { %12683 = vmatprep.mubr.bf16.mxu1 %v11419_v41  ;;  %v6076_v62 = vsel %vm13478_vm5, %v6071_v4, %v6075_v22  ;;  %v6080_v20 = vor.u32 %v6079_v61, %v6075_v22  ;;  %v6085_v28 = vrot.slane %v6083_v37, 5  ;;  %v6139_v11 = vshll.u32 %v5938_v52, 16  ;;  %12903 = vmatprep.subr.bf16.mxu0 %v15977_v39 }
 0x26e   : > { %5912 = vst [vmem:[#allocation2 + $0x94] sm:$0xf] %v11371_v27  ;;  %5911 = vst [vmem:[#allocation2 + $0x90] sm:$0xf] %v11370_v8  ;;  %v5602_v50 = vor.u32 %v5600_v16, %v5599_v15  ;;  %v5696_v47 = vsel %vm13500_vm7, %v5599_v15, 0  ;;  %v15992_v12 = vrot.slane %v6136_v59, 4  ;;  %12766 = vmatpush3.bf16.msra.mxu1 %v13253_v53  ;;  %v11447_v43 = vcombine.low %v5938_v52, %v15979_v58 }
 0x26f   : > { %v6149_v9 = vshrl.u32 %v15979_v58, 16  ;;  %v11369_v14 = vcombine.low %v5696_v47, %v5696_v47  ;;  %v6081_v23 = vrot.slane %v6080_v20, 4  ;;  %v15995_v48 = vrot.slane %v6139_v11, 5  ;;  %12767 = vmatprep.subr.bf16.mxu1 %v13258_v2  ;;  %v16025_v15 = vld [vmem:[#allocation2 + $0x58] sm:$0xf] }
 0x270   : > { %v5680_v19 = vsel %vm13500_vm7, 0, %v5602_v50  ;;  %v5434_v63 = vadd.f32 %v15940_v49, %v15725_v10  ;;  %v6094_v53 = vor.u32 %v15898_v24, %v15882_v26  ;;  %v6097_v61 = vshll.u32 %v15875_v54, 16  ;;  %12739 = vmatprep.mubr.bf16.mxu0 %v11447_v43  ;;  %v13268_v54 = vld [vmem:[%s18209_s1 + $0x2c8] sm:$0xff]  }
 0x271   : > { %v11367_v52 = vcombine.low %v5680_v19, %v5680_v19  ;;  %v11368_v41 = vcombine.high %v5680_v19, %v5680_v19  ;;  %5910 = vst [vmem:[#allocation2 + $0x8c] sm:$0x1] %v11369_v14  ;;  %v6086_v30 = vsel %vm13478_vm5, %v6081_v23, %v6085_v28  ;;  %v6103_v16 = vrot.slane %v6101_v57, 4 }
 0x272   : > { %v11420_v10 = vcombine.low %v6076_v62, %v6086_v30  ;;  %v5473_v49 = vadd.f32 %v15646_v1, %v5434_v63  ;;  %v6095_v4 = vrot.slane %v6094_v53, 4  ;;  %v6099_v22 = vrot.slane %v6097_v61, 5  ;;  %12768 = vmatpush3.bf16.msra.mxu1 %v13258_v2 }
 0x273   : > { %5909 = vst [vmem:[#allocation2 + $0x88] sm:$0xf] %v11368_v41  ;;  %5908 = vst [vmem:[#allocation2 + $0x84] sm:$0xf] %v11367_v52  ;;  %v6107_v26 = vshll.u32 %v16005_v6, 16  ;;  %v5432_v24 = vadd.f32 %v15966_v3, %v15730_v55  ;;  %v5437_v37 = vadd.f32 %v12661_v0, %v15733_v33  ;;  %v5435_v8 = vadd.f32 %v5392_v7, %v15736_v44 }
 0x274   : > { %12769 = vmatprep.subr.bf16.mxu1 %v13263_v51  ;;  %12684 = vmatmul.mubr.bf16.gmra.mxu1 %v11420_v10  ;;  %v5505_v57 = vmax.f32 %v5473_v49, 0.0  ;;  %v6100_v2 = vsel %vm13478_vm5, %v6095_v4, %v6099_v22  ;;  %v6104_v27 = vor.u32 %v6103_v16, %v6099_v22  ;;  %v6160_v59 = vshrl.u32 %v5940_v31, 16  ;;  %v16034_v3 = vld [vmem:[#allocation2 + $0x44] sm:$0x1]  ;;  %v16062_v10 = vld [vmem:[%s18209_s1 + $0x378] sm:$0xff]  }
 0x275   : > { %v6109_v62 = vrot.slane %v6107_v26, 5  ;;  %v5471_v55 = vadd.f32 %v15646_v1, %v5432_v24  ;;  %v16029_v33 = vadd.f32 %v15646_v1, %v5437_v37  ;;  %v16032_v44 = vadd.f32 %v15646_v1, %v5435_v8 }
 0x276   : > { %v5523_v0 = vpack.c.bf16 %v5505_v57, %v5504_v18  ;;  %v6105_v20 = vrot.slane %v6104_v27, 4  ;;  %v16038_v28 = vrot.slane %v6160_v59, 4  ;;  %v6163_v11 = vshll.u32 %v5940_v31, 16  ;;  %12770 = vmatpush3.bf16.msra.mxu1 %v13263_v51  ;;  %v5942_v18 = vld [vmem:[#allocation2 + $0x60] sm:$0xf] }
 0x277   : > { %v5503_v50 = vmax.f32 %v5471_v55, 0.0  ;;  %v5508_v47 = vmax.f32 %v16029_v33, 0.0  ;;  %v5506_v14 = vmax.f32 %v16032_v44, 0.0  ;;  %v6173_v23 = vshrl.u32 %v16025_v15, 16  ;;  %12771 = vmatprep.subr.bf16.mxu1 %v13268_v54  ;;  %v13272_v51 = vld [vmem:[%s18209_s1 + $0x2c0] sm:$0xff]  }
 0x278   : > { %v5618_v1 = vshrl.u32 %v5523_v0, 16  ;;  %v5621_v43 = vshll.u32 %v5523_v0, 16  ;;  %v6110_v19 = vsel %vm13478_vm5, %v6105_v20, %v6109_v62  ;;  %v16045_v35 = vrot.slane %v6163_v11, 5 }
 0x279   : > { %v11421_v63 = vcombine.low %v6100_v2, %v6110_v19  ;;  %v5522_v53 = vpack.c.bf16 %v5503_v50, %v5502_v38  ;;  %v11448_v61 = vcombine.low %v5940_v31, %v16025_v15  ;;  %v6118_v7 = vor.u32 %v15951_v46, %v15949_v56  ;;  %v16064_v56 = vld [vmem:[#allocation2 + $0x64] sm:$0xf] }
 0x27a   : > { %v5620_v52 = vrot.slane %v5618_v1, 7  ;;  %v6121_v41 = vshll.u32 %v15938_v29, 16  ;;  %v6127_v30 = vrot.slane %v6125_v36, 4  ;;  %v6131_v16 = vshll.u32 %v16034_v3, 16  ;;  %12772 = vmatpush3.bf16.msra.mxu1 %v13268_v54  ;;  %v12662_v54 = vpop.f32.mrf.mxu0 }
 0x27b   : > { %12687 = vmatprep.mubr.bf16.mxu1 %v11421_v63  ;;  %v5611_v21 = vshrl.u32 %v5522_v53, 16  ;;  %v5614_v38 = vshll.u32 %v5522_v53, 16  ;;  %12740 = vmatmul.mubr.bf16.gmra.mxu0 %v11448_v61  ;;  %v6119_v31 = vrot.slane %v6118_v7, 4  ;;  %v6184_v46 = vshrl.u32 %v5942_v18, 16  ;;  %v16084_v63 = vld [vmem:[#allocation2 + $0x50] sm:$0x1] }
 0x27c   : > { %v5623_v49 = vor.u32 %v5621_v43, %v5620_v52  ;;  %v5699_v36 = vsel %vm13500_vm7, %v5620_v52, 0  ;;  %v6123_v4 = vrot.slane %v6121_v41, 5  ;;  %v6133_v22 = vrot.slane %v6131_v16, 5  ;;  %12773 = vmatprep.subr.bf16.mxu1 %v13272_v51  ;;  %v5395_v7 = vpop.f32.mrf.mxu0  ;;  %v5944_v52 = vld [vmem:[#allocation2 + $0x6c] sm:$0xf] }
 0x27d   : > { %v11378_v26 = vcombine.low %v5699_v36, %v5699_v36  ;;  %v5613_v24 = vrot.slane %v5611_v21, 7  ;;  %v16068_v37 = vrot.slane %v6184_v46, 4  ;;  %v6187_v8 = vshll.u32 %v5942_v18, 16 }
 0x27e   : > { %v5683_v57 = vsel %vm13500_vm7, 0, %v5623_v49  ;;  %v6124_v2 = vsel %vm13478_vm5, %v6119_v31, %v6123_v4  ;;  %v6128_v27 = vor.u32 %v6127_v30, %v6123_v4  ;;  %v6197_v59 = vshrl.u32 %v16064_v56, 16  ;;  %12774 = vmatpush3.bf16.msra.mxu1 %v13272_v51 }
 0x27f   : > { %v11376_v62 = vcombine.low %v5683_v57, %v5683_v57  ;;  %v11377_v55 = vcombine.high %v5683_v57, %v5683_v57  ;;  %5919 = vst [vmem:[#allocation2 + $0xb0] sm:$0x1] %v11378_v26  ;;  %v5616_v0 = vor.u32 %v5614_v38, %v5613_v24  ;;  %v5698_v20 = vsel %vm13500_vm7, %v5613_v24, 0  ;;  %12855 = vmatprep.subr.bf16.mxu1 %v16062_v10 }
 0x280   : > { %v11375_v11 = vcombine.low %v5698_v20, %v5698_v20  ;;  %v6129_v50 = vrot.slane %v6128_v27, 4  ;;  %v16078_v1 = vrot.slane %v6187_v8, 5  ;;  %v11449_v43 = vcombine.low %v5942_v18, %v16064_v56  ;;  %v16103_v8 = vld [vmem:[#allocation2 + $0x5c] sm:$0x1]  ;;  %v5946_v20 = vld [vmem:[#allocation2 + $0x78] sm:$0xf] }
 0x281   : > { %5918 = vst [vmem:[#allocation2 + $0xac] sm:$0xf] %v11377_v55  ;;  %5917 = vst [vmem:[#allocation2 + $0xa8] sm:$0xf] %v11376_v62  ;;  %v5682_v19 = vsel %vm13500_vm7, 0, %v5616_v0  ;;  %v5438_v51 = vadd.f32 %v12662_v54, %v15739_v5  ;;  %v6142_v53 = vor.u32 %v15995_v48, %v15992_v12  ;;  %v6145_v61 = vshll.u32 %v15979_v58, 16 }
 0x282   : > { %v11373_v41 = vcombine.low %v5682_v19, %v5682_v19  ;;  %v11374_v30 = vcombine.high %v5682_v19, %v5682_v19  ;;  %5916 = vst [vmem:[#allocation2 + $0xa4] sm:$0x1] %v11375_v11  ;;  %v6134_v18 = vsel %vm13478_vm5, %v6129_v50, %v6133_v22  ;;  %12743 = vmatprep.mubr.bf16.mxu0 %v11449_v43  ;;  %v6151_v16 = vrot.slane %v6149_v9, 4  ;;  %v16093_v5 = vld [vmem:[#allocation2 + $0x70] sm:$0xf] }
 0x283   : > { %v11422_v21 = vcombine.low %v6124_v2, %v6134_v18  ;;  %v13360_v12 = vld [vmem:[%s18210_s2] ss:$0 sm:$0xff]  ;;  %v6143_v38 = vrot.slane %v6142_v53, 4  ;;  %v6147_v31 = vrot.slane %v6145_v61, 5  ;;  %v6155_v46 = vshll.u32 %v16084_v63, 16 }
 0x284   : > { %v5477_v48 = vadd.f32 %v13360_v12, %v5438_v51  ;;  %5915 = vst [vmem:[#allocation2 + $0xa0] sm:$0xf] %v11374_v30  ;;  %5914 = vst [vmem:[#allocation2 + $0x9c] sm:$0xf] %v11373_v41  ;;  %v5436_v49 = vadd.f32 %v5395_v7, %v15742_v32  ;;  %v6208_v36 = vshrl.u32 %v5944_v52, 16  ;;  %v6211_v4 = vshll.u32 %v5944_v52, 16 }
 0x285   : > { %12688 = vmatmul.mubr.bf16.gmra.mxu1 %v11422_v21  ;;  %v6148_v22 = vsel %vm13478_vm5, %v6143_v38, %v6147_v31  ;;  %v6152_v26 = vor.u32 %v6151_v16, %v6147_v31  ;;  %v6221_v24 = vshrl.u32 %v16093_v5, 16  ;;  %v6157_v54 = vrot.slane %v6155_v46, 5  ;;  %v16118_v51 = vld [vmem:[#allocation2 + $0x7c] sm:$0xf] }
 0x286   : > { %v5509_v9 = vmax.f32 %v5477_v48, 0.0  ;;  %v5475_v57 = vadd.f32 %v13360_v12, %v5436_v49  ;;  %v16105_v2 = vrot.slane %v6208_v36, 4  ;;  %v16107_v27 = vrot.slane %v6211_v4, 5 }
 0x287   : > { %v6153_v62 = vrot.slane %v6152_v26, 4  ;;  %v11450_v55 = vcombine.low %v5944_v52, %v16093_v5  ;;  %v6166_v0 = vor.u32 %v16045_v35, %v16038_v28  ;;  %v6169_v50 = vshll.u32 %v16025_v15, 16 }
 0x288   : > { %v5525_v32 = vpack.c.bf16 %v5509_v9, %v5508_v47  ;;  %v5507_v11 = vmax.f32 %v5475_v57, 0.0  ;;  %v6175_v43 = vrot.slane %v6173_v23, 4  ;;  %v6179_v19 = vshll.u32 %v16103_v8, 16  ;;  %v16134_v9 = vld [vmem:[#allocation2 + $0x68] sm:$0x1] }
 0x289   : > { %v6158_v47 = vsel %vm13478_vm5, %v6153_v62, %v6157_v54  ;;  %12744 = vmatmul.mubr.bf16.gmra.mxu0 %v11450_v55  ;;  %v6167_v61 = vrot.slane %v6166_v0, 4  ;;  %v6171_v35 = vrot.slane %v6169_v50, 5  ;;  %v6232_v30 = vshrl.u32 %v5946_v20, 16 }
 0x28a   : > { %v5632_v53 = vshrl.u32 %v5525_v32, 16  ;;  %v5635_v33 = vshll.u32 %v5525_v32, 16  ;;  %v11423_v7 = vcombine.low %v6148_v22, %v6158_v47  ;;  %v5524_v28 = vpack.c.bf16 %v5507_v11, %v5506_v14  ;;  %v5948_v32 = vld [vmem:[#allocation2 + $0x84] sm:$0xf] }
 0x28b   : > { %v6181_v52 = vrot.slane %v6179_v19, 5  ;;  %v6235_v23 = vshll.u32 %v5946_v20, 16  ;;  %v6245_v18 = vshrl.u32 %v16118_v51, 16  ;;  %v6172_v12 = vsel %vm13478_vm5, %v6167_v61, %v6171_v35 }
 0x28c   : > { %v5634_v41 = vrot.slane %v5632_v53, 7  ;;  %12691 = vmatprep.mubr.bf16.mxu1 %v11423_v7  ;;  %v5625_v16 = vshrl.u32 %v5524_v28, 16  ;;  %v5628_v21 = vshll.u32 %v5524_v28, 16  ;;  %v6176_v48 = vor.u32 %v6175_v43, %v6171_v35  ;;  %v16154_v35 = vld [vmem:[#allocation2 + $0x74] sm:$0x1] }
 0x28d   : > { %v16129_v44 = vrot.slane %v6232_v30, 4  ;;  %v16131_v14 = vrot.slane %v6235_v23, 5  ;;  %v11451_v4 = vcombine.low %v5946_v20, %v16118_v51  ;;  %v6190_v26 = vor.u32 %v16078_v1, %v16068_v37  ;;  %v16147_v1 = vld [vmem:[#allocation2 + $0x88] sm:$0xf] }
 0x28e   : > { %v5637_v38 = vor.u32 %v5635_v33, %v5634_v41  ;;  %v5701_v31 = vsel %vm13500_vm7, %v5634_v41, 0  ;;  %v5627_v49 = vrot.slane %v5625_v16, 7  ;;  %v6177_v36 = vrot.slane %v6176_v48, 4 }
 0x28f   : > { %v11384_v46 = vcombine.low %v5701_v31, %v5701_v31  ;;  %v6193_v54 = vshll.u32 %v16064_v56, 16  ;;  %v6199_v57 = vrot.slane %v6197_v59, 4  ;;  %12747 = vmatprep.mubr.bf16.mxu0 %v11451_v4  ;;  %v6191_v43 = vrot.slane %v6190_v26, 4  ;;  %v16163_v31 = vld [vmem:[#allocation2 + $0x80] sm:$0x1] }
 0x290   : > { %v5685_v22 = vsel %vm13500_vm7, 0, %v5637_v38  ;;  %v5630_v0 = vor.u32 %v5628_v21, %v5627_v49  ;;  %v5700_v20 = vsel %vm13500_vm7, %v5627_v49, 0  ;;  %v6182_v50 = vsel %vm13478_vm5, %v6177_v36, %v6181_v52  ;;  %v5950_v52 = vld [vmem:[#allocation2 + $0x90] sm:$0xf]  ;;  %v16161_v38 = vld [vmem:[#allocation2 + $0x94] sm:$0xf] }
 0x291   : > { %v11382_v62 = vcombine.low %v5685_v22, %v5685_v22  ;;  %v11383_v55 = vcombine.high %v5685_v22, %v5685_v22  ;;  %5925 = vst [vmem:[#allocation2 + $0xc8] sm:$0x1] %v11384_v46  ;;  %v11381_v11 = vcombine.low %v5700_v20, %v5700_v20  ;;  %v6195_v37 = vrot.slane %v6193_v54, 5  ;;  %v5952_v22 = vld [vmem:[#allocation2 + $0x9c] sm:$0xf] }
 0x292   : > { %v5684_v59 = vsel %vm13500_vm7, 0, %v5630_v0  ;;  %v11424_v19 = vcombine.low %v6172_v12, %v6182_v50  ;;  %v6203_v53 = vshll.u32 %v16134_v9, 16  ;;  %v6256_v33 = vshrl.u32 %v5948_v32, 16 }
 0x293   : > { %5924 = vst [vmem:[#allocation2 + $0xc4] sm:$0xf] %v11383_v55  ;;  %5923 = vst [vmem:[#allocation2 + $0xc0] sm:$0xf] %v11382_v62  ;;  %v11379_v47 = vcombine.low %v5684_v59, %v5684_v59  ;;  %v11380_v61 = vcombine.high %v5684_v59, %v5684_v59  ;;  %v6196_v7 = vsel %vm13478_vm5, %v6191_v43, %v6195_v37  ;;  %v6259_v23 = vshll.u32 %v5948_v32, 16 }
 0x294   : > { %5922 = vst [vmem:[#allocation2 + $0xbc] sm:$0x1] %v11381_v11  ;;  %v6200_v28 = vor.u32 %v6199_v57, %v6195_v37  ;;  %12692 = vmatmul.mubr.bf16.gmra.mxu1 %v11424_v19  ;;  %v6205_v41 = vrot.slane %v6203_v53, 5  ;;  %v6258_v30 = vrot.slane %v6256_v33, 4  ;;  %v6269_v45 = vshrl.u32 %v16147_v1, 16 }
 0x295   : > { %5921 = vst [vmem:[#allocation2 + $0xb8] sm:$0xf] %v11380_v61  ;;  %5920 = vst [vmem:[#allocation2 + $0xb4] sm:$0xf] %v11379_v47  ;;  %v11452_v21 = vcombine.low %v5948_v32, %v16147_v1  ;;  %v6214_v12 = vor.u32 %v16107_v27, %v16105_v2  ;;  %v6217_v48 = vshll.u32 %v16093_v5, 16  ;;  %v6261_v46 = vrot.slane %v6259_v23, 5 }
 0x296   : > { %v6201_v16 = vrot.slane %v6200_v28, 4  ;;  %v6223_v49 = vrot.slane %v6221_v24, 4  ;;  %v6227_v36 = vshll.u32 %v16154_v35, 16  ;;  %v6280_v4 = vshrl.u32 %v5950_v52, 16  ;;  %v16170_v57 = vld [vmem:[#allocation2 + $0xa0] sm:$0xf] }
 0x297   : > { %12748 = vmatmul.mubr.bf16.gmra.mxu0 %v11452_v21  ;;  %v6215_v54 = vrot.slane %v6214_v12, 4  ;;  %v6219_v2 = vrot.slane %v6217_v48, 5  ;;  %v6283_v27 = vshll.u32 %v5950_v52, 16  ;;  %v6293_v0 = vshrl.u32 %v16161_v38, 16  ;;  %v16188_v12 = vld [vmem:[#allocation2 + $0xac] sm:$0xf] }
 0x298   : > { %v6206_v26 = vsel %vm13478_vm5, %v6201_v16, %v6205_v41  ;;  %v6229_v62 = vrot.slane %v6227_v36, 5  ;;  %v6282_v55 = vrot.slane %v6280_v4, 4  ;;  %v11453_v50 = vcombine.low %v5950_v52, %v16161_v38 }
 0x299   : > { %v11425_v32 = vcombine.low %v6196_v7, %v6206_v26  ;;  %v6220_v24 = vsel %vm13478_vm5, %v6215_v54, %v6219_v2  ;;  %v6224_v20 = vor.u32 %v6223_v49, %v6219_v2  ;;  %v6285_v11 = vrot.slane %v6283_v27, 5  ;;  %v16183_v7 = vld [vmem:[#allocation2 + $0x8c] sm:$0x1] }
 0x29a   : > { %v6238_v43 = vor.u32 %v16131_v14, %v16129_v44  ;;  %v6241_v37 = vshll.u32 %v16118_v51, 16  ;;  %v6247_v59 = vrot.slane %v6245_v18, 4  ;;  %v6251_v19 = vshll.u32 %v16163_v31, 16  ;;  %12751 = vmatprep.mubr.bf16.mxu0 %v11453_v50  ;;  %v5954_v14 = vld [vmem:[#allocation2 + $0xa8] sm:$0xf] }
 0x29b   : > { %12695 = vmatprep.mubr.bf16.mxu1 %v11425_v32  ;;  %v6225_v53 = vrot.slane %v6224_v20, 4  ;;  %v6304_v33 = vshrl.u32 %v5952_v22, 16  ;;  %v6307_v47 = vshll.u32 %v5952_v22, 16  ;;  %v6317_v61 = vshrl.u32 %v16170_v57, 16  ;;  %v16196_v50 = vld [vmem:[#allocation2 + $0x98] sm:$0x1] }
 0x29c   : > { %v6239_v28 = vrot.slane %v6238_v43, 4  ;;  %v6243_v52 = vrot.slane %v6241_v37, 5  ;;  %v6253_v41 = vrot.slane %v6251_v19, 5  ;;  %v11454_v44 = vcombine.low %v5952_v22, %v16170_v57  ;;  %v5956_v37 = vld [vmem:[#allocation2 + $0xb4] sm:$0xf] }
 0x29d   : > { %v6230_v23 = vsel %vm13478_vm5, %v6225_v53, %v6229_v62  ;;  %v6306_v18 = vrot.slane %v6304_v33, 4  ;;  %v6309_v16 = vrot.slane %v6307_v47, 5  ;;  %v6262_v21 = vor.u32 %v6261_v46, %v6258_v30  ;;  %v16202_v33 = vld [vmem:[#allocation2 + $0xb8] sm:$0xf] }
 0x29e   : > { %v11426_v48 = vcombine.low %v6220_v24, %v6230_v23  ;;  %v6244_v49 = vsel %vm13478_vm5, %v6239_v28, %v6243_v52  ;;  %v6248_v36 = vor.u32 %v6247_v59, %v6243_v52  ;;  %v6265_v4 = vshll.u32 %v16147_v1, 16 }
 0x29f   : > { %12752 = vmatmul.mubr.bf16.gmra.mxu0 %v11454_v44  ;;  %v6263_v26 = vrot.slane %v6262_v21, 4  ;;  %v6271_v54 = vrot.slane %v6269_v45, 4  ;;  %v6275_v22 = vshll.u32 %v16183_v7, 16  ;;  %v6328_v2 = vshrl.u32 %v5954_v14, 16 }
 0x2a0   : > { %12696 = vmatmul.mubr.bf16.gmra.mxu1 %v11426_v48  ;;  %v6249_v27 = vrot.slane %v6248_v36, 4  ;;  %v6267_v32 = vrot.slane %v6265_v4, 5  ;;  %v6331_v62 = vshll.u32 %v5954_v14, 16  ;;  %v6341_v30 = vshrl.u32 %v16188_v12, 16  ;;  %v16208_v36 = vld [vmem:[#allocation2 + $0xa4] sm:$0x1] }
 0x2a1   : > { %v6277_v46 = vrot.slane %v6275_v22, 5  ;;  %v6330_v24 = vrot.slane %v6328_v2, 4  ;;  %v11455_v20 = vcombine.low %v5954_v14, %v16188_v12  ;;  %v6286_v43 = vor.u32 %v6285_v11, %v6282_v55  ;;  %v13270_v22 = vld [vmem:[#allocation2 + $0xc] sm:$0xff]  }
 0x2a2   : > { %v6254_v45 = vsel %vm13478_vm5, %v6249_v27, %v6253_v41  ;;  %v6268_v59 = vsel %vm13478_vm5, %v6263_v26, %v6267_v32  ;;  %v6272_v19 = vor.u32 %v6271_v54, %v6267_v32  ;;  %v6333_v53 = vrot.slane %v6331_v62, 5  ;;  %v16212_v2 = vld [vmem:[#allocation2 + $0xb0] sm:$0x1] }
 0x2a3   : > { %v11427_v47 = vcombine.low %v6244_v49, %v6254_v45  ;;  %12755 = vmatprep.mubr.bf16.mxu0 %v11455_v20  ;;  %v6287_v28 = vrot.slane %v6286_v43, 4  ;;  %v6289_v52 = vshll.u32 %v16161_v38, 16  ;;  %v6295_v44 = vrot.slane %v6293_v0, 4 }
 0x2a4   : > { %v6273_v14 = vrot.slane %v6272_v19, 4  ;;  %v6299_v55 = vshll.u32 %v16196_v50, 16  ;;  %v6352_v11 = vshrl.u32 %v5956_v37, 16  ;;  %v6355_v23 = vshll.u32 %v5956_v37, 16 }
 0x2a5   : > { %12699 = vmatprep.mubr.bf16.mxu1 %v11427_v47  ;;  %v6291_v41 = vrot.slane %v6289_v52, 5  ;;  %v6365_v21 = vshrl.u32 %v16202_v33, 16  ;;  %v11456_v48 = vcombine.low %v5956_v37, %v16202_v33  ;;  %v6310_v4 = vor.u32 %v6309_v16, %v6306_v18 }
 0x2a6   : > { %v6278_v49 = vsel %vm13478_vm5, %v6273_v14, %v6277_v46  ;;  %v6301_v26 = vrot.slane %v6299_v55, 5  ;;  %v6354_v54 = vrot.slane %v6352_v11, 4  ;;  %v6357_v0 = vrot.slane %v6355_v23, 5  ;;  %v16224_v11 = vld [vmem:[#allocation2 + $0xbc] sm:$0x1] }
 0x2a7   : > { %v11428_v27 = vcombine.low %v6268_v59, %v6278_v49  ;;  %v6292_v32 = vsel %vm13478_vm5, %v6287_v28, %v6291_v41  ;;  %v6296_v62 = vor.u32 %v6295_v44, %v6291_v41  ;;  %12756 = vmatmul.mubr.bf16.gmra.mxu0 %v11456_v48  ;;  %v6311_v20 = vrot.slane %v6310_v4, 4  ;;  %v13273_v49 = vld [vmem:[#allocation2 + $0x18] sm:$0xff]  }
 0x2a8   : > { %v6313_v43 = vshll.u32 %v16170_v57, 16  ;;  %v6319_v18 = vrot.slane %v6317_v61, 4  ;;  %v6323_v16 = vshll.u32 %v16208_v36, 16  ;;  %12823 = vmatprep.mubr.bf16.mxu0 %v13270_v22  ;;  %v6334_v46 = vor.u32 %v6333_v53, %v6330_v24  ;;  %v13288_v22 = vld [vmem:[%s18209_s1 + $0x3b0] sm:$0xff]  }
 0x2a9   : > { %12700 = vmatmul.mubr.bf16.gmra.mxu1 %v11428_v27  ;;  %v6297_v37 = vrot.slane %v6296_v62, 4  ;;  %v6337_v45 = vshll.u32 %v16188_v12, 16  ;;  %v6343_v59 = vrot.slane %v6341_v30, 4  ;;  %v6347_v19 = vshll.u32 %v16212_v2, 16  ;;  %v13274_v62 = vld [vmem:[#allocation2 + $0x24] sm:$0xff]  }
 0x2aa   : > { %v6315_v47 = vrot.slane %v6313_v43, 5  ;;  %v6325_v28 = vrot.slane %v6323_v16, 5  ;;  %v6335_v52 = vrot.slane %v6334_v46, 4  ;;  %v6358_v44 = vor.u32 %v6357_v0, %v6354_v54 }
 0x2ab   : > { %v6302_v14 = vsel %vm13478_vm5, %v6297_v37, %v6301_v26  ;;  %v6339_v55 = vrot.slane %v6337_v45, 5  ;;  %v6349_v61 = vrot.slane %v6347_v19, 5  ;;  %v6361_v24 = vshll.u32 %v16202_v33, 16  ;;  %v6971_v26 = vld [vmem:[#allocation2 + $0xc] sm:$0xe] }
 0x2ac   : > { %v11429_v53 = vcombine.low %v6292_v32, %v6302_v14  ;;  %v6316_v23 = vsel %vm13478_vm5, %v6311_v20, %v6315_v47  ;;  %v6320_v30 = vor.u32 %v6319_v18, %v6315_v47  ;;  %v6359_v41 = vrot.slane %v6358_v44, 4  ;;  %v13361_v37 = vld [vmem:[#allocation2 + $0x8] sm:$0x1]  ;;  %v6973_v19 = vld [vmem:[#allocation2 + $0x24] sm:$0xe] }
 0x2ad   : > { %v6340_v48 = vsel %vm13478_vm5, %v6335_v52, %v6339_v55  ;;  %v6344_v4 = vor.u32 %v6343_v59, %v6339_v55  ;;  %v6363_v54 = vrot.slane %v6361_v24, 5  ;;  %v6367_v0 = vrot.slane %v6365_v21, 4  ;;  %v6972_v59 = vld [vmem:[#allocation2 + $0x18] sm:$0xe]  ;;  %v13362_v52 = vld [vmem:[#allocation2 + $0x10] sm:$0xf] }
 0x2ae   : > { %12703 = vmatprep.mubr.bf16.mxu1 %v11429_v53  ;;  %v6321_v27 = vrot.slane %v6320_v30, 4  ;;  %v6371_v32 = vshll.u32 %v16224_v11, 16  ;;  %v16241_v43 = vsel %vm13519_vm8, %v11465_v40, %v7020_v34  ;;  %v7022_v21 = vrot.slane %v7020_v34, 4  ;;  %v6974_v24 = vld [vmem:[#allocation2 + $0x30] sm:$0xe] }
 0x2af   : > { %v6345_v18 = vrot.slane %v6344_v4, 4  ;;  %12824 = vmatmul.mubr.bf16.vlgmr.msra.gmra.mxu0 %v13273_v49  ;;  %v6364_v16 = vsel %vm13478_vm5, %v6359_v41, %v6363_v54  ;;  %v6368_v46 = vor.u32 %v6367_v0, %v6363_v54  ;;  %v7023_v45 = vrot.slane %v13361_v37, 5  ;;  %v13275_v41 = vld [vmem:[#allocation2 + $0x30] sm:$0xff]   ;;  %v13364_v0 = vld [vmem:[#allocation2 + $0x1c] sm:$0xf]  ;;  %v13293_v37 = vld [vmem:[%s18209_s1 + $0x3a0] sm:$0xff]  }
 0x2b0   : > { %v6326_v17 = vsel %vm13478_vm5, %v6321_v27, %v6325_v28  ;;  %v6373_v47 = vrot.slane %v6371_v32, 5  ;;  %12827 = vmatprep.mubr.bf16.mxu0 %v13274_v62  ;;  %v11466_v40 = vrot.slane %v6971_v26, 9  ;;  %v7027_v44 = vrot.slane %v13362_v52, 5  ;;  %12904 = vmatpush3.bf16.msra.mxu0 %v15977_v39  ;;  %v13291_v28 = vld [vmem:[%s18209_s1 + $0x3a8] sm:$0xff]   ;;  %v13363_v4 = vld [vmem:[#allocation2 + $0x14] sm:$0x1] }
 0x2b1   : > { %v11430_v13 = vcombine.low %v6316_v23, %v6326_v17  ;;  %v6350_v34 = vsel %vm13478_vm5, %v6345_v18, %v6349_v61  ;;  %v6369_v14 = vrot.slane %v6368_v46, 4  ;;  %v16254_v55 = vsel %vm13519_vm8, %v7022_v21, %v7023_v45  ;;  %12905 = vmatprep.subr.bf16.mxu0 %v13288_v22  ;;  %v6975_v27 = vld [vmem:[#allocation2 + $0x3c] sm:$0xe]  ;;  %v13365_v21 = vld [vmem:[#allocation2 + $0x28] sm:$0xf] }
 0x2b2   : > { %v11431_v53 = vcombine.low %v6340_v48, %v6350_v34  ;;  %v11497_v30 = vcombine.low %v16241_v43, %v16254_v55  ;;  %v16263_v39 = vsel %vm13519_vm8, %v11466_v40, %v7027_v44  ;;  %v7029_v61 = vrot.slane %v7027_v44, 4  ;;  %v13277_v32 = vld [vmem:[#allocation2 + $0x3c] sm:$0xff]   ;;  %v6976_v46 = vld [vmem:[#allocation2 + $0x48] sm:$0xe]  ;;  %v6977_v40 = vld [vmem:[#allocation2 + $0x54] sm:$0xe] }
 0x2b3   : > { %12704 = vmatmul.mubr.bf16.gmra.mxu1 %v11430_v13  ;;  %v6374_v23 = vsel %vm13478_vm5, %v6369_v14, %v6373_v47  ;;  %v7030_v49 = vrot.slane %v13363_v4, 5  ;;  %v11467_v54 = vrot.slane %v6972_v59, 9  ;;  %v7034_v26 = vrot.slane %v13364_v0, 5  ;;  %v13366_v44 = vld [vmem:[#allocation2 + $0x34] sm:$0xf] }
 0x2b4   : > { %12707 = vmatprep.mubr.bf16.mxu1 %v11431_v53  ;;  %v11432_v48 = vcombine.low %v6364_v16, %v6374_v23  ;;  %v7037_v62 = vrot.slane %v15908_v25, 5  ;;  %v11468_v43 = vrot.slane %v6973_v19, 9  ;;  %v7041_v18 = vrot.slane %v13365_v21, 5  ;;  %12906 = vmatpush3.bf16.msra.mxu0 %v13288_v22  ;;  %v13296_v23 = vld [vmem:[%s18209_s1 + $0x398] sm:$0xff]  }
 0x2b5   : > { %v16273_v45 = vsel %vm13519_vm8, %v7029_v61, %v7030_v49  ;;  %v16277_v59 = vsel %vm13519_vm8, %v11467_v54, %v7034_v26  ;;  %v7036_v16 = vrot.slane %v7034_v26, 4  ;;  %v7044_v25 = vrot.slane %v15961_v60, 5  ;;  %12907 = vmatprep.subr.bf16.mxu0 %v13291_v28  ;;  %v6978_v61 = vld [vmem:[#allocation2 + $0x60] sm:$0xe]  ;;  %v6979_v54 = vld [vmem:[#allocation2 + $0x6c] sm:$0xe] }
 0x2b6   : > { %v11498_v19 = vcombine.low %v16263_v39, %v16273_v45  ;;  %v16284_v22 = vsel %vm13519_vm8, %v11468_v43, %v7041_v18  ;;  %v7043_v17 = vrot.slane %v7041_v18, 4  ;;  %v11469_v47 = vrot.slane %v6974_v24, 9  ;;  %v13278_v26 = vld [vmem:[#allocation2 + $0x48] sm:$0xff]   ;;  %v6980_v18 = vld [vmem:[#allocation2 + $0x78] sm:$0xe] }
 0x2b7   : > { %12828 = vmatmul.mubr.bf16.gmra.mxu0 %v13275_v41  ;;  %v16288_v52 = vsel %vm13519_vm8, %v7036_v16, %v7037_v62  ;;  %v7048_v13 = vrot.slane %v13366_v44, 5  ;;  %v7051_v60 = vrot.slane %v16005_v6, 5  ;;  %v11470_v34 = vrot.slane %v6975_v27, 9  ;;  %v16395_v39 = vld [vmem:[#allocation2 + $0x14] sm:$0x1]  ;;  %v13283_v45 = vld [vmem:[#allocation2 + $0x6c] sm:$0xff]  }
 0x2b8   : > { %12831 = vmatprep.mubr.bf16.mxu0 %v13277_v32  ;;  %v11499_v14 = vcombine.low %v16277_v59, %v16288_v52  ;;  %v16295_v55 = vsel %vm13519_vm8, %v7043_v17, %v7044_v25  ;;  %v7055_v24 = vrot.slane %v15938_v29, 5  ;;  %v7058_v53 = vrot.slane %v16034_v3, 5  ;;  %12908 = vmatpush3.bf16.msra.mxu0 %v13291_v28  ;;  %v13280_v25 = vld [vmem:[#allocation2 + $0x54] sm:$0xff]  }
 0x2b9   : > { %v11500_v6 = vcombine.low %v16284_v22, %v16295_v55  ;;  %v16306_v41 = vsel %vm13519_vm8, %v11469_v47, %v7048_v13  ;;  %v7050_v4 = vrot.slane %v7048_v13, 4  ;;  %v11471_v49 = vrot.slane %v6976_v46, 9  ;;  %12909 = vmatprep.subr.bf16.mxu0 %v13293_v37 }
 0x2ba   : > { %v16310_v29 = vsel %vm13519_vm8, %v11470_v34, %v7055_v24  ;;  %v7057_v3 = vrot.slane %v7055_v24, 4  ;;  %v7062_v28 = vrot.slane %v15979_v58, 5  ;;  %v7065_v0 = vrot.slane %v16084_v63, 5  ;;  %v6981_v24 = vld [vmem:[#allocation2 + $0x84] sm:$0xe] }
 0x2bb   : > { %12708 = vmatmul.mubr.bf16.gmra.mxu1 %v11432_v48  ;;  %v16316_v27 = vsel %vm13519_vm8, %v7050_v4, %v7051_v60  ;;  %v11472_v32 = vrot.slane %v6977_v40, 9  ;;  %v7069_v62 = vrot.slane %v16025_v15, 5  ;;  %v7072_v43 = vrot.slane %v16103_v8, 5  ;;  %v13298_v15 = vld [vmem:[%s18209_s1 + $0x390] sm:$0xff]  }
 0x2bc   : > { %12775 = vmatprep.mubr.bf16.mxu1 %v11497_v30  ;;  %v11501_v21 = vcombine.low %v16306_v41, %v16316_v27  ;;  %v16324_v58 = vsel %vm13519_vm8, %v7057_v3, %v7058_v53  ;;  %v16328_v63 = vsel %vm13519_vm8, %v11471_v49, %v7062_v28  ;;  %v7064_v48 = vrot.slane %v7062_v28, 4  ;;  %12910 = vmatpush3.bf16.msra.mxu0 %v13293_v37  ;;  %v6982_v4 = vld [vmem:[#allocation2 + $0x90] sm:$0xe]  ;;  %v6983_v28 = vld [vmem:[#allocation2 + $0x9c] sm:$0xe] }
 0x2bd   : > { %v11502_v8 = vcombine.low %v16310_v29, %v16324_v58  ;;  %v16337_v30 = vsel %vm13519_vm8, %v11472_v32, %v7069_v62  ;;  %v7071_v46 = vrot.slane %v7069_v62, 4  ;;  %v11473_v16 = vrot.slane %v6978_v61, 9  ;;  %12911 = vmatprep.subr.bf16.mxu0 %v13296_v23  ;;  %v13279_v49 = vld [vmem:[%s18209_s1 + $0x370] sm:$0xff]   ;;  %v13301_v62 = vld [vmem:[%s18209_s1 + $0x388] sm:$0xff]  }
 0x2be   : > { %v16341_v17 = vsel %vm13519_vm8, %v7064_v48, %v7065_v0  ;;  %v7076_v37 = vrot.slane %v16064_v56, 5  ;;  %v7079_v47 = vrot.slane %v16134_v9, 5  ;;  %v11474_v40 = vrot.slane %v6979_v54, 9 }
 0x2bf   : > { %12832 = vmatmul.mubr.bf16.gmra.mxu0 %v13278_v26  ;;  %v11503_v44 = vcombine.low %v16328_v63, %v16341_v17  ;;  %v16349_v13 = vsel %vm13519_vm8, %v7071_v46, %v7072_v43  ;;  %v7083_v60 = vrot.slane %v16093_v5, 5  ;;  %v7086_v34 = vrot.slane %v16154_v35, 5  ;;  %v8592_v43 = vld [vmem:[#allocation2 + $0xc] sm:$0xe]  ;;  %v16393_v46 = vld [vmem:[#allocation2 + $0x10] sm:$0xf] }
 0x2c0   : > { %12835 = vmatprep.mubr.bf16.mxu0 %v13280_v25  ;;  %v11504_v56 = vcombine.low %v16337_v30, %v16349_v13  ;;  %v16357_v9 = vsel %vm13519_vm8, %v11473_v16, %v7076_v37  ;;  %v7078_v53 = vrot.slane %v7076_v37, 4  ;;  %v11475_v61 = vrot.slane %v6980_v18, 9  ;;  %12912 = vmatpush3.bf16.msra.mxu0 %v13296_v23  ;;  %v16553_v17 = vld [vmem:[#allocation2 + $0x40] sm:$0xf]  ;;  %v16591_v13 = vld [vmem:[#allocation2 + $0x4c] sm:$0xf] }
 0x2c1   : > { %v16364_v5 = vsel %vm13519_vm8, %v11474_v40, %v7083_v60  ;;  %v7085_v35 = vrot.slane %v7083_v60, 4  ;;  %v7090_v54 = vrot.slane %v16118_v51, 5  ;;  %v7093_v3 = vrot.slane %v16163_v31, 5  ;;  %12913 = vmatprep.subr.bf16.mxu0 %v13298_v15  ;;  %v13281_v51 = vld [vmem:[#allocation2 + $0x60] sm:$0xff]   ;;  %v13282_v31 = vld [vmem:[%s18209_s1 + $0x368] sm:$0xff]  }
 0x2c2   : > { %v16370_v0 = vsel %vm13519_vm8, %v7078_v53, %v7079_v47  ;;  %v11476_v23 = vrot.slane %v6981_v24, 9  ;;  %v7097_v26 = vrot.slane %v16147_v1, 5  ;;  %v7100_v32 = vrot.slane %v16183_v7, 5  ;;  %v13302_v40 = vld [vmem:[%s18209_s1 + $0x380] sm:$0xff]  }
 0x2c3   : > { %12776 = vmatmul.mubr.bf16.vlgmr.msra.gmra.mxu1 %v11498_v19  ;;  %v11505_v48 = vcombine.low %v16357_v9, %v16370_v0  ;;  %v16387_v1 = vsel %vm13519_vm8, %v7085_v35, %v7086_v34  ;;  %v16391_v7 = vsel %vm13519_vm8, %v11475_v61, %v7090_v54  ;;  %v7092_v18 = vrot.slane %v7090_v54, 4  ;;  %v16432_v35 = vld [vmem:[#allocation2 + $0x20] sm:$0x1]  ;;  %v16598_v9 = vld [vmem:[%s18209_s1 + $0x3f8] sm:$0xff]  }
 0x2c4   : > { %12856 = vmatpush3.bf16.msra.mxu1 %v16062_v10  ;;  %12779 = vmatprep.mubr.bf16.mxu1 %v11499_v14  ;;  %v11506_v19 = vcombine.low %v16364_v5, %v16387_v1  ;;  %v16405_v16 = vsel %vm13519_vm8, %v11476_v23, %v7097_v26  ;;  %v7099_v25 = vrot.slane %v7097_v26, 4  ;;  %v11477_v37 = vrot.slane %v6982_v4, 9  ;;  %v6984_v14 = vld [vmem:[#allocation2 + $0xa8] sm:$0xe]  ;;  %v16430_v4 = vld [vmem:[#allocation2 + $0x1c] sm:$0xf] }
 0x2c5   : > { %12857 = vmatprep.subr.bf16.mxu1 %v13279_v49  ;;  %v16409_v47 = vsel %vm13519_vm8, %v7092_v18, %v7093_v3  ;;  %v7104_v10 = vrot.slane %v16161_v38, 5  ;;  %v7107_v59 = vrot.slane %v16196_v50, 5  ;;  %12914 = vmatpush3.bf16.msra.mxu0 %v13298_v15  ;;  %v11478_v52 = vrot.slane %v6983_v28, 9  ;;  %v8593_v28 = vld [vmem:[#allocation2 + $0x18] sm:$0xe]  ;;  %v13285_v23 = vld [vmem:[%s18209_s1 + $0x360] sm:$0xff]  }
 0x2c6   : > { %v11507_v60 = vcombine.low %v16391_v7, %v16409_v47  ;;  %v16420_v34 = vsel %vm13519_vm8, %v7099_v25, %v7100_v32  ;;  %12915 = vmatprep.subr.bf16.mxu0 %v13301_v62  ;;  %v7111_v24 = vrot.slane %v16170_v57, 5  ;;  %v7114_v38 = vrot.slane %v16208_v36, 5  ;;  %v7844_v50 = vld [vmem:[#allocation2 + $0x24] sm:$0xf]  ;;  %v16634_v1 = vld [vmem:[#allocation2 + $0x5c] sm:$0x1] }
 0x2c7   : > { %12836 = vmatmul.mubr.bf16.gmra.mxu0 %v13281_v51  ;;  %v16428_v15 = vsel %vm13519_vm8, %v11477_v37, %v7104_v10  ;;  %v7106_v53 = vrot.slane %v7104_v10, 4  ;;  %v11601_v61 = vrot.slane %v8592_v43, 9  ;;  %v8658_v54 = vrot.slane %v16393_v46, 5  ;;  %v6985_v51 = vld [vmem:[#allocation2 + $0xb4] sm:$0xe] }
 0x2c8   : > { %12858 = vmatpush3.bf16.msra.mxu1 %v13279_v49  ;;  %12839 = vmatprep.mubr.bf16.mxu0 %v13283_v45  ;;  %v16436_v57 = vsel %vm13519_vm8, %v11478_v52, %v7111_v24  ;;  %v7113_v36 = vrot.slane %v7111_v24, 4  ;;  %v8661_v3 = vrot.slane %v16395_v39, 5  ;;  %v11479_v49 = vrot.slane %v6984_v14, 9  ;;  %v8594_v14 = vld [vmem:[#allocation2 + $0x24] sm:$0xe] }
 0x2c9   : > { %12859 = vmatprep.subr.bf16.mxu1 %v13282_v31  ;;  %v16445_v26 = vsel %vm13519_vm8, %v7106_v53, %v7107_v59  ;;  %12916 = vmatpush3.bf16.msra.mxu0 %v13301_v62  ;;  %v7118_v32 = vrot.slane %v16188_v12, 5  ;;  %v7121_v43 = vrot.slane %v16212_v2, 5  ;;  %v16457_v25 = vsel %vm13519_vm8, %v11601_v61, %v8658_v54  ;;  %v16459_v62 = vld [vmem:[#allocation2 + $0x28] sm:$0xf]  ;;  %v16464_v12 = vld [vmem:[%s18209_s1 + $0x438] sm:$0xff]  }
 0x2ca   : > { %v16453_v45 = vsel %vm13519_vm8, %v7113_v36, %v7114_v38  ;;  %v8660_v37 = vrot.slane %v8658_v54, 4  ;;  %12917 = vmatprep.subr.bf16.mxu0 %v13302_v40  ;;  %v11602_v52 = vrot.slane %v8593_v28, 9  ;;  %v8665_v22 = vrot.slane %v16430_v4, 5  ;;  %v16484_v38 = vld [vmem:[#allocation2 + $0x2c] sm:$0x1]  ;;  %v13284_v53 = vld [vmem:[#allocation2 + $0x78] sm:$0xff]  }
 0x2cb   : > { %12780 = vmatmul.mubr.bf16.gmra.mxu1 %v11500_v6  ;;  %v16473_v10 = vsel %vm13519_vm8, %v11479_v49, %v7118_v32  ;;  %v7120_v59 = vrot.slane %v7118_v32, 4  ;;  %v8668_v55 = vrot.slane %v16432_v35, 5  ;;  %v11480_v6 = vrot.slane %v6985_v51, 9  ;;  %v13290_v61 = vld [vmem:[%s18209_s1 + $0x358] sm:$0xff]   ;;  %v7838_v36 = vld [vmem:[#allocation2 + $0xc] sm:$0xf] }
 0x2cc   : > { %12783 = vmatprep.mubr.bf16.mxu1 %v11501_v21  ;;  %12860 = vmatpush3.bf16.msra.mxu1 %v13282_v31  ;;  %v16480_v24 = vsel %vm13519_vm8, %v8660_v37, %v8661_v3  ;;  %v7125_v21 = vrot.slane %v16202_v33, 5  ;;  %v7128_v31 = vrot.slane %v16224_v11, 5  ;;  %v13287_v54 = vld [vmem:[#allocation2 + $0x84] sm:$0xff]   ;;  %v16501_v28 = vsel %vm13519_vm8, %v11602_v52, %v8665_v22 }
 0x2cd   : > { %12861 = vmatprep.subr.bf16.mxu1 %v13285_v23  ;;  %v11633_v41 = vcombine.low %v16457_v25, %v16480_v24  ;;  %v16493_v27 = vsel %vm13519_vm8, %v7120_v59, %v7121_v43  ;;  %12918 = vmatpush3.bf16.msra.mxu0 %v13302_v40  ;;  %v8667_v49 = vrot.slane %v8665_v22, 4  ;;  %v11603_v32 = vrot.slane %v8594_v14, 9  ;;  %v8595_v14 = vld [vmem:[#allocation2 + $0x30] sm:$0xe] }
 0x2ce   : > { %12999 = vmatprep.subr.bf16.mxu0 %v16464_v12  ;;  %v16506_v40 = vsel %vm13519_vm8, %v11480_v6, %v7125_v21  ;;  %v7127_v33 = vrot.slane %v7125_v21, 4  ;;  %v8672_v11 = vrot.slane %v16459_v62, 5  ;;  %v8675_v43 = vrot.slane %v16484_v38, 5  ;;  %v13295_v22 = vld [vmem:[%s18209_s1 + $0x350] sm:$0xff]   ;;  %v7841_v6 = vld [vmem:[#allocation2 + $0x18] sm:$0xf] }
 0x2cf   : > { %12840 = vmatmul.mubr.bf16.gmra.mxu0 %v13284_v53  ;;  %v16512_v51 = vsel %vm13519_vm8, %v8667_v49, %v8668_v55  ;;  %v7887_v37 = vshrl.u32 %v7838_v36, 16  ;;  %v7890_v59 = vshll.u32 %v7838_v36, 16  ;;  %v7896_v52 = vshll.u32 %v16393_v46, 16  ;;  %v16528_v21 = vld [vmem:[#allocation2 + $0x34] sm:$0xf] }
 0x2d0   : > { %12843 = vmatprep.mubr.bf16.mxu0 %v13287_v54  ;;  %12862 = vmatpush3.bf16.msra.mxu1 %v13285_v23  ;;  %v16522_v23 = vsel %vm13519_vm8, %v7127_v33, %v7128_v31  ;;  %v16526_v55 = vsel %vm13519_vm8, %v11603_v32, %v8672_v11  ;;  %v8674_v53 = vrot.slane %v8672_v11, 4  ;;  %v16530_v36 = vld [vmem:[#allocation2 + $0x38] sm:$0x1]  ;;  %v7900_v32 = vshrl.u32 %v16393_v46, 16  ;;  %v13300_v46 = vld [vmem:[%s18209_s1 + $0x348] sm:$0xff]  }
 0x2d1   : > { %12863 = vmatprep.subr.bf16.mxu1 %v13290_v61  ;;  %v7889_v49 = vrot.slane %v7887_v37, 4  ;;  %v7892_v3 = vrot.slane %v7890_v59, 5  ;;  %v7898_v2 = vrot.slane %v7896_v52, 5  ;;  %v7906_v33 = vshll.u32 %v16395_v39, 16 }
 0x2d2   : > { %v16539_v31 = vsel %vm13519_vm8, %v8674_v53, %v8675_v43  ;;  %v11604_v11 = vrot.slane %v8595_v14, 9  ;;  %v8679_v29 = vrot.slane %v16528_v21, 5  ;;  %v8682_v58 = vrot.slane %v16530_v36, 5 }
 0x2d3   : > { %12784 = vmatmul.mubr.bf16.gmra.mxu1 %v11502_v8  ;;  %v7893_v59 = vor.u32 %v7892_v3, %v7889_v49  ;;  %v13289_v8 = vld [vmem:[#allocation2 + $0x90] sm:$0xff]   ;;  %v7902_v39 = vrot.slane %v7900_v32, 4  ;;  %v7908_v43 = vrot.slane %v7906_v33, 5  ;;  %v7911_v52 = vshrl.u32 %v7841_v6, 16  ;;  %v16560_v49 = vld [vmem:[#allocation2 + $0x44] sm:$0x1] }
 0x2d4   : > { %12787 = vmatprep.mubr.bf16.mxu1 %v11503_v44  ;;  %12864 = vmatpush3.bf16.msra.mxu1 %v13290_v61  ;;  %v7914_v63 = vshll.u32 %v7841_v6, 16  ;;  %v13292_v44 = vld [vmem:[#allocation2 + $0x9c] sm:$0xff]   ;;  %v16557_v3 = vsel %vm13519_vm8, %v11604_v11, %v8679_v29  ;;  %v8681_v14 = vrot.slane %v8679_v29, 4  ;;  %v7920_v53 = vshll.u32 %v16430_v4, 16 }
 0x2d5   : > { %12865 = vmatprep.subr.bf16.mxu1 %v13295_v22  ;;  %v7894_v61 = vrot.slane %v7893_v59, 4  ;;  %v7903_v54 = vor.u32 %v7902_v39, %v7898_v2  ;;  %v7913_v37 = vrot.slane %v7911_v52, 4  ;;  %v7924_v33 = vshrl.u32 %v16430_v4, 16  ;;  %v8596_v6 = vld [vmem:[#allocation2 + $0x3c] sm:$0xe] }
 0x2d6   : > { %v7916_v32 = vrot.slane %v7914_v63, 5  ;;  %v16567_v11 = vsel %vm13519_vm8, %v8681_v14, %v8682_v58  ;;  %v7922_v29 = vrot.slane %v7920_v53, 5  ;;  %v7930_v18 = vshll.u32 %v16432_v35, 16 }
 0x2d7   : > { %12844 = vmatmul.mubr.bf16.gmra.mxu0 %v13289_v8  ;;  %v7899_v59 = vsel %vm13478_vm5, %v7894_v61, %v7898_v2  ;;  %v13303_v8 = vld [vmem:[%s18209_s1 + $0x340] sm:$0xff]   ;;  %v7904_v4 = vrot.slane %v7903_v54, 4  ;;  %v7926_v52 = vrot.slane %v7924_v33, 4  ;;  %v11605_v63 = vrot.slane %v8596_v6, 9 }
 0x2d8   : > { %12847 = vmatprep.mubr.bf16.mxu0 %v13292_v44  ;;  %12866 = vmatpush3.bf16.msra.mxu1 %v13295_v22  ;;  %v11636_v22 = vcombine.low %v16557_v3, %v16567_v11  ;;  %v7917_v39 = vor.u32 %v7916_v32, %v7913_v37  ;;  %v7932_v2 = vrot.slane %v7930_v18, 5  ;;  %v8686_v58 = vrot.slane %v16553_v17, 5  ;;  %v13294_v32 = vld [vmem:[#allocation2 + $0xa8] sm:$0xff]  }
 0x2d9   : > { %12867 = vmatprep.subr.bf16.mxu1 %v13300_v46  ;;  %v8689_v44 = vrot.slane %v16560_v49, 5  ;;  %v7909_v35 = vsel %vm13478_vm5, %v7904_v4, %v7908_v43  ;;  %v7927_v54 = vor.u32 %v7926_v52, %v7922_v29  ;;  %v7935_v14 = vshrl.u32 %v7844_v50, 16  ;;  %v8597_v43 = vld [vmem:[#allocation2 + $0x48] sm:$0xe]  ;;  %v7847_v52 = vld [vmem:[#allocation2 + $0x30] sm:$0xf] }
 0x2da   : > { %v7918_v61 = vrot.slane %v7917_v39, 4  ;;  %v16585_v18 = vcombine.low %v7899_v59, %v7909_v35  ;;  %v16589_v37 = vsel %vm13519_vm8, %v11605_v63, %v8686_v58  ;;  %v8688_v53 = vrot.slane %v8686_v58, 4 }
 0x2db   : > { %12788 = vmatmul.mubr.bf16.gmra.mxu1 %v11504_v56  ;;  %v7938_v30 = vshll.u32 %v7844_v50, 16  ;;  %v16593_v56 = vld [vmem:[#allocation2 + $0x50] sm:$0x1]  ;;  %v7944_v33 = vshll.u32 %v16459_v62, 16  ;;  %v13297_v50 = vld [vmem:[#allocation2 + $0xb4] sm:$0xff]   ;;  %v7948_v4 = vshrl.u32 %v16459_v62, 16 }
 0x2dc   : > { %12791 = vmatprep.mubr.bf16.mxu1 %v11505_v48  ;;  %12868 = vmatpush3.bf16.msra.mxu1 %v13300_v46  ;;  %v7923_v0 = vsel %vm13478_vm5, %v7918_v61, %v7922_v29  ;;  %v7928_v48 = vrot.slane %v7927_v54, 4  ;;  %v7937_v46 = vrot.slane %v7935_v14, 4  ;;  %v16605_v6 = vsel %vm13519_vm8, %v8688_v53, %v8689_v44 }
 0x2dd   : > { %12869 = vmatprep.subr.bf16.mxu1 %v13303_v8  ;;  %v7940_v59 = vrot.slane %v7938_v30, 5  ;;  %v7954_v39 = vshll.u32 %v16484_v38, 16  ;;  %v11637_v29 = vcombine.low %v16589_v37, %v16605_v6  ;;  %v7946_v58 = vrot.slane %v7944_v33, 5 }
 0x2de   : > { %v7933_v63 = vsel %vm13478_vm5, %v7928_v48, %v7932_v2  ;;  %v11606_v35 = vrot.slane %v8597_v43, 9  ;;  %v7950_v54 = vrot.slane %v7948_v4, 4  ;;  %v8693_v62 = vrot.slane %v16591_v13, 5 }
 0x2df   : > { %12848 = vmatmul.mubr.bf16.gmra.mxu0 %v13294_v32  ;;  %v16613_v61 = vcombine.low %v7923_v0, %v7933_v63  ;;  %v7941_v44 = vor.u32 %v7940_v59, %v7937_v46  ;;  %v7956_v14 = vrot.slane %v7954_v39, 5  ;;  %v8696_v38 = vrot.slane %v16593_v56, 5  ;;  %v16627_v59 = vld [vmem:[#allocation2 + $0x58] sm:$0xf] }
 0x2e0   : > { %12851 = vmatprep.mubr.bf16.mxu0 %v13297_v50  ;;  %12870 = vmatpush3.bf16.msra.mxu1 %v13303_v8  ;;  %v7959_v53 = vshrl.u32 %v7847_v52, 16  ;;  %v7962_v2 = vshll.u32 %v7847_v52, 16  ;;  %v7951_v32 = vor.u32 %v7950_v54, %v7946_v58  ;;  %v7968_v48 = vshll.u32 %v16528_v21, 16  ;;  %v8598_v8 = vld [vmem:[#allocation2 + $0x54] sm:$0xe] }
 0x2e1   : > { %12951 = vmatprep.subr.bf16.mxu1 %v16598_v9  ;;  %v7942_v30 = vrot.slane %v7941_v44, 4  ;;  %v7972_v43 = vshrl.u32 %v16528_v21, 16  ;;  %v16625_v0 = vsel %vm13519_vm8, %v11606_v35, %v8693_v62  ;;  %v8695_v46 = vrot.slane %v8693_v62, 4  ;;  %v7850_v54 = vld [vmem:[#allocation2 + $0x3c] sm:$0xf] }
 0x2e2   : > { %v7961_v33 = vrot.slane %v7959_v53, 4  ;;  %v7964_v50 = vrot.slane %v7962_v2, 5  ;;  %v7952_v4 = vrot.slane %v7951_v32, 4  ;;  %v7970_v39 = vrot.slane %v7968_v48, 5  ;;  %v16656_v48 = vld [vmem:[#allocation2 + $0x64] sm:$0xf] }
 0x2e3   : > { %12792 = vmatmul.mubr.bf16.gmra.mxu1 %v11506_v19  ;;  %v7947_v21 = vsel %vm13478_vm5, %v7942_v30, %v7946_v58  ;;  %v7974_v5 = vrot.slane %v7972_v43, 4  ;;  %v13299_v19 = vld [vmem:[#allocation2 + $0xc0] sm:$0xff]   ;;  %v16638_v52 = vsel %vm13519_vm8, %v8695_v46, %v8696_v38  ;;  %v7978_v35 = vshll.u32 %v16530_v36, 16 }
 0x2e4   : > { %12795 = vmatprep.mubr.bf16.mxu1 %v11507_v60  ;;  %v7965_v63 = vor.u32 %v7964_v50, %v7961_v33  ;;  %v11607_v44 = vrot.slane %v8598_v8, 9  ;;  %v7957_v7 = vsel %vm13478_vm5, %v7952_v4, %v7956_v14  ;;  %v11638_v47 = vcombine.low %v16625_v0, %v16638_v52  ;;  %v8599_v50 = vld [vmem:[#allocation2 + $0x60] sm:$0xe]  ;;  %v16669_v4 = vld [vmem:[#allocation2 + $0x68] sm:$0x1]  ;;  %v13305_v0 = vld [vmem:[%s18209_s1 + $0x3f0] sm:$0xff]  }
 0x2e5   : > { %v7975_v60 = vor.u32 %v7974_v5, %v7970_v39  ;;  %v8700_v58 = vrot.slane %v16627_v59, 5  ;;  %v16646_v62 = vcombine.low %v7947_v21, %v7957_v7  ;;  %v7980_v38 = vrot.slane %v7978_v35, 5  ;;  %v7853_v5 = vld [vmem:[#allocation2 + $0x48] sm:$0xf] }
 0x2e6   : > { %v7966_v53 = vrot.slane %v7965_v63, 4  ;;  %v8703_v2 = vrot.slane %v16634_v1, 5  ;;  %v7983_v32 = vshrl.u32 %v7850_v54, 16  ;;  %v7986_v8 = vshll.u32 %v7850_v54, 16 }
 0x2e7   : > { %12852 = vmatmul.mubr.bf16.gmra.mxu0 %v13299_v19  ;;  %v7976_v36 = vrot.slane %v7975_v60, 4  ;;  %v16654_v14 = vsel %vm13519_vm8, %v11607_v44, %v8700_v58  ;;  %v8702_v30 = vrot.slane %v8700_v58, 4  ;;  %v7992_v46 = vshll.u32 %v16553_v17, 16 }
 0x2e8   : > { %12919 = vmatprep.mubr.bf16.mxu0 %v11633_v41  ;;  %v7971_v43 = vsel %vm13478_vm5, %v7966_v53, %v7970_v39  ;;  %v7996_v33 = vshrl.u32 %v16553_v17, 16  ;;  %v7985_v41 = vrot.slane %v7983_v32, 4  ;;  %v8002_v21 = vshll.u32 %v16560_v49, 16 }
 0x2e9   : > { %v7981_v25 = vsel %vm13478_vm5, %v7976_v36, %v7980_v38  ;;  %v16666_v24 = vsel %vm13519_vm8, %v8702_v30, %v8703_v2  ;;  %v18407_v39 = vcombine.low %v16405_v16, %v16420_v34  ;;  %v7988_v63 = vrot.slane %v7986_v8, 5  ;;  %v13309_v38 = vld [vmem:[%s18209_s1 + $0x430] sm:$0xff]  }
 0x2ea   : > { %v16674_v19 = vcombine.low %v7971_v43, %v7981_v25  ;;  %v11639_v17 = vcombine.low %v16654_v14, %v16666_v24  ;;  %v7994_v35 = vrot.slane %v7992_v46, 5  ;;  %v18408_v44 = vcombine.low %v16428_v15, %v16445_v26  ;;  %v16691_v30 = vld [vmem:[#allocation2 + $0x70] sm:$0xf] }
 0x2eb   : > { %12796 = vmatmul.mubr.bf16.gmra.mxu1 %v18407_v39  ;;  %v7998_v54 = vrot.slane %v7996_v33, 4  ;;  %v8004_v49 = vrot.slane %v8002_v21, 5  ;;  %v11608_v7 = vrot.slane %v8599_v50, 9  ;;  %v8707_v60 = vrot.slane %v16656_v48, 5  ;;  %v8600_v50 = vld [vmem:[#allocation2 + $0x6c] sm:$0xe] }
 0x2ec   : > { %12799 = vmatprep.mubr.bf16.mxu1 %v18408_v44  ;;  %v7989_v58 = vor.u32 %v7988_v63, %v7985_v41  ;;  %v8710_v16 = vrot.slane %v16669_v4, 5  ;;  %v8007_v34 = vshrl.u32 %v7853_v5, 16  ;;  %v8010_v53 = vshll.u32 %v7853_v5, 16  ;;  %v7856_v63 = vld [vmem:[#allocation2 + $0x54] sm:$0xf]  ;;  %v13311_v44 = vld [vmem:[%s18209_s1 + $0x428] sm:$0xff]  }
 0x2ed   : > { %v7999_v2 = vor.u32 %v7998_v54, %v7994_v35  ;;  %v16688_v36 = vsel %vm13519_vm8, %v11608_v7, %v8707_v60  ;;  %v8709_v15 = vrot.slane %v8707_v60, 4  ;;  %v8016_v26 = vshll.u32 %v16591_v13, 16 }
 0x2ee   : > { %v18409_v32 = vcombine.low %v16501_v28, %v16512_v51  ;;  %v7990_v43 = vrot.slane %v7989_v58, 4  ;;  %v8009_v8 = vrot.slane %v8007_v34, 4  ;;  %v8012_v46 = vrot.slane %v8010_v53, 5  ;;  %v16705_v28 = vld [vmem:[#allocation2 + $0x74] sm:$0x1] }
 0x2ef   : > { %v8020_v33 = vshrl.u32 %v16591_v13, 16  ;;  %v18410_v25 = vcombine.low %v16526_v55, %v16539_v31  ;;  %v8000_v41 = vrot.slane %v7999_v2, 4  ;;  %v16702_v21 = vsel %vm13519_vm8, %v8709_v15, %v8710_v16 }
 0x2f0   : > { %12920 = vmatmul.mubr.bf16.vlgmr.msra.gmra.mxu0 %v18409_v32  ;;  %v8018_v5 = vrot.slane %v8016_v26, 5  ;;  %v8026_v39 = vshll.u32 %v16593_v56, 16  ;;  %v7995_v51 = vsel %vm13478_vm5, %v7990_v43, %v7994_v35  ;;  %v11640_v13 = vcombine.low %v16688_v36, %v16702_v21  ;;  %v16731_v32 = vld [vmem:[#allocation2 + $0x7c] sm:$0xf] }
 0x2f1   : > { %12923 = vmatprep.mubr.bf16.mxu0 %v18410_v25  ;;  %13000 = vmatpush3.bf16.msra.mxu0 %v16464_v12  ;;  %v8013_v55 = vor.u32 %v8012_v46, %v8009_v8  ;;  %v8022_v31 = vrot.slane %v8020_v33, 4  ;;  %v8005_v56 = vsel %vm13478_vm5, %v8000_v41, %v8004_v49  ;;  %v11609_v7 = vrot.slane %v8600_v50, 9  ;;  %v13312_v46 = vld [vmem:[%s18209_s1 + $0x420] sm:$0xff]  }
 0x2f2   : > { %13001 = vmatprep.subr.bf16.mxu0 %v13309_v38  ;;  %v8028_v54 = vrot.slane %v8026_v39, 5  ;;  %v8714_v12 = vrot.slane %v16691_v30, 5  ;;  %v18411_v35 = vcombine.low %v16436_v57, %v16453_v45  ;;  %v16721_v60 = vcombine.low %v7995_v51, %v8005_v56  ;;  %v16733_v57 = vld [vmem:[#allocation2 + $0x80] sm:$0x1] }
 0x2f3   : > { %v8014_v58 = vrot.slane %v8013_v55, 4  ;;  %v8023_v16 = vor.u32 %v8022_v31, %v8018_v5  ;;  %v8717_v34 = vrot.slane %v16705_v28, 5  ;;  %v18412_v53 = vcombine.low %v16473_v10, %v16493_v27  ;;  %v8601_v27 = vld [vmem:[#allocation2 + $0x78] sm:$0xe]  ;;  %v7859_v41 = vld [vmem:[#allocation2 + $0x60] sm:$0xf] }
 0x2f4   : > { %12800 = vmatmul.mubr.bf16.gmra.mxu1 %v18411_v35  ;;  %v16729_v49 = vsel %vm13519_vm8, %v11609_v7, %v8714_v12  ;;  %v8716_v2 = vrot.slane %v8714_v12, 4  ;;  %v8031_v15 = vshrl.u32 %v7856_v63, 16  ;;  %v8034_v26 = vshll.u32 %v7856_v63, 16  ;;  %v16766_v12 = vld [vmem:[#allocation2 + $0x88] sm:$0xf] }
 0x2f5   : > { %12803 = vmatprep.mubr.bf16.mxu1 %v18412_v53  ;;  %13002 = vmatpush3.bf16.msra.mxu0 %v13309_v38  ;;  %v8019_v45 = vsel %vm13478_vm5, %v8014_v58, %v8018_v5  ;;  %v8024_v43 = vrot.slane %v8023_v16, 4  ;;  %v8040_v8 = vshll.u32 %v16627_v59, 16  ;;  %v8044_v10 = vshrl.u32 %v16627_v59, 16 }
 0x2f6   : > { %13003 = vmatprep.subr.bf16.mxu0 %v13311_v44  ;;  %v16744_v33 = vsel %vm13519_vm8, %v8716_v2, %v8717_v34  ;;  %v8033_v50 = vrot.slane %v8031_v15, 4  ;;  %v8036_v38 = vrot.slane %v8034_v26, 5  ;;  %v8050_v25 = vshll.u32 %v16634_v1, 16  ;;  %v16775_v2 = vld [vmem:[#allocation2 + $0x8c] sm:$0x1] }
 0x2f7   : > { %v8029_v59 = vsel %vm13478_vm5, %v8024_v43, %v8028_v54  ;;  %v11641_v5 = vcombine.low %v16729_v49, %v16744_v33  ;;  %v8042_v39 = vrot.slane %v8040_v8, 5  ;;  %v8046_v51 = vrot.slane %v8044_v10, 4  ;;  %v13314_v54 = vld [vmem:[%s18209_s1 + $0x418] sm:$0xff]   ;;  %v7862_v43 = vld [vmem:[#allocation2 + $0x6c] sm:$0xf]  ;;  %v13307_v49 = vld [vmem:[%s18209_s1 + $0x3e0] sm:$0xff]  }
 0x2f8   : > { %12924 = vmatmul.mubr.bf16.gmra.mxu0 %v11636_v22  ;;  %v16757_v55 = vcombine.low %v8019_v45, %v8029_v59  ;;  %v8037_v1 = vor.u32 %v8036_v38, %v8033_v50  ;;  %v8052_v31 = vrot.slane %v8050_v25, 5  ;;  %v11610_v63 = vrot.slane %v8601_v27, 9 }
 0x2f9   : > { %12927 = vmatprep.mubr.bf16.mxu0 %v11637_v29  ;;  %13004 = vmatpush3.bf16.msra.mxu0 %v13311_v44  ;;  %v8047_v3 = vor.u32 %v8046_v51, %v8042_v39  ;;  %v8721_v11 = vrot.slane %v16731_v32, 5  ;;  %v8724_v22 = vrot.slane %v16733_v57, 5  ;;  %v8055_v56 = vshrl.u32 %v7859_v41, 16  ;;  %v8602_v44 = vld [vmem:[#allocation2 + $0x84] sm:$0xe] }
 0x2fa   : > { %13005 = vmatprep.subr.bf16.mxu0 %v13312_v46  ;;  %v8038_v7 = vrot.slane %v8037_v1, 4  ;;  %v8058_v37 = vshll.u32 %v7859_v41, 16  ;;  %v8064_v6 = vshll.u32 %v16656_v48, 16  ;;  %v8068_v29 = vshrl.u32 %v16656_v48, 16 }
 0x2fb   : > { %v18413_v35 = vcombine.low %v16506_v40, %v16522_v23  ;;  %v8048_v58 = vrot.slane %v8047_v3, 4  ;;  %v16773_v16 = vsel %vm13519_vm8, %v11610_v63, %v8721_v11  ;;  %v8723_v34 = vrot.slane %v8721_v11, 4  ;;  %v16803_v63 = vld [vmem:[#allocation2 + $0x94] sm:$0xf]  ;;  %v7865_v3 = vld [vmem:[#allocation2 + $0x78] sm:$0xf] }
 0x2fc   : > { %v8057_v53 = vrot.slane %v8055_v56, 4  ;;  %v8043_v48 = vsel %vm13478_vm5, %v8038_v7, %v8042_v39  ;;  %v8060_v15 = vrot.slane %v8058_v37, 5  ;;  %v8066_v26 = vrot.slane %v8064_v6, 5  ;;  %v16817_v7 = vld [vmem:[#allocation2 + $0x98] sm:$0x1]  ;;  %v13317_v37 = vld [vmem:[%s18209_s1 + $0x408] sm:$0xff]  }
 0x2fd   : > { %12804 = vmatmul.mubr.bf16.gmra.mxu1 %v18413_v35  ;;  %v8070_v45 = vrot.slane %v8068_v29, 4  ;;  %13006 = vmatpush3.bf16.msra.mxu0 %v13312_v46  ;;  %v8053_v40 = vsel %vm13478_vm5, %v8048_v58, %v8052_v31  ;;  %v16784_v23 = vsel %vm13519_vm8, %v8723_v34, %v8724_v22  ;;  %v8074_v8 = vshll.u32 %v16669_v4, 16 }
 0x2fe   : > { %12871 = vmatprep.mubr.bf16.mxu1 %v16585_v18  ;;  %v11611_v10 = vrot.slane %v8602_v44, 9  ;;  %13007 = vmatprep.subr.bf16.mxu0 %v13314_v54  ;;  %v13315_v18 = vld [vmem:[%s18209_s1 + $0x410] sm:$0xff]   ;;  %v16790_v27 = vcombine.low %v8043_v48, %v8053_v40  ;;  %v11642_v46 = vcombine.low %v16773_v16, %v16784_v23  ;;  %v8061_v50 = vor.u32 %v8060_v15, %v8057_v53  ;;  %v13306_v53 = vld [vmem:[%s18209_s1 + $0x3e8] sm:$0xff]   ;;  %v7868_v40 = vld [vmem:[#allocation2 + $0x84] sm:$0xf] }
 0x2ff   : > { %v8071_v38 = vor.u32 %v8070_v45, %v8066_v26  ;;  %v8076_v25 = vrot.slane %v8074_v8, 5  ;;  %v8728_v4 = vrot.slane %v16766_v12, 5  ;;  %v8731_v41 = vrot.slane %v16775_v2, 5  ;;  %v13318_v8 = vld [vmem:[%s18209_s1 + $0x400] sm:$0xff]  }
 0x300   : > { %12928 = vmatmul.mubr.bf16.gmra.mxu0 %v11638_v47  ;;  %v8079_v59 = vshrl.u32 %v7862_v43, 16  ;;  %v8062_v39 = vrot.slane %v8061_v50, 4  ;;  %v8082_v1 = vshll.u32 %v7862_v43, 16  ;;  %v8088_v31 = vshll.u32 %v16691_v30, 16 }
 0x301   : > { %12931 = vmatprep.mubr.bf16.mxu0 %v11639_v17  ;;  %v8072_v51 = vrot.slane %v8071_v38, 4  ;;  %13008 = vmatpush3.bf16.msra.mxu0 %v13314_v54  ;;  %v16810_v52 = vsel %vm13519_vm8, %v11611_v10, %v8728_v4  ;;  %v8730_v47 = vrot.slane %v8728_v4, 4  ;;  %v8092_v24 = vshrl.u32 %v16691_v30, 16  ;;  %v8603_v17 = vld [vmem:[#allocation2 + $0x90] sm:$0xe] }
 0x302   : > { %v8081_v14 = vrot.slane %v8079_v59, 4  ;;  %13009 = vmatprep.subr.bf16.mxu0 %v13315_v18  ;;  %v8067_v11 = vsel %vm13478_vm5, %v8062_v39, %v8066_v26  ;;  %v8084_v56 = vrot.slane %v8082_v1, 5  ;;  %v8090_v54 = vrot.slane %v8088_v31, 5  ;;  %v16863_v59 = vld [vmem:[#allocation2 + $0xa4] sm:$0x1] }
 0x303   : > { %v8077_v22 = vsel %vm13478_vm5, %v8072_v51, %v8076_v25  ;;  %v16827_v30 = vsel %vm13519_vm8, %v8730_v47, %v8731_v41  ;;  %v8094_v29 = vrot.slane %v8092_v24, 4  ;;  %v8098_v44 = vshll.u32 %v16705_v28, 16  ;;  %v8604_v25 = vld [vmem:[#allocation2 + $0x9c] sm:$0xe] }
 0x304   : > { %v16823_v6 = vcombine.low %v8067_v11, %v8077_v22  ;;  %v11643_v35 = vcombine.low %v16810_v52, %v16827_v30  ;;  %v8085_v58 = vor.u32 %v8084_v56, %v8081_v14  ;;  %v11612_v34 = vrot.slane %v8603_v17, 9  ;;  %v8605_v56 = vld [vmem:[#allocation2 + $0xa8] sm:$0xe] }
 0x305   : > { %12872 = vmatmul.mubr.bf16.vlgmr.msra.gmra.mxu1 %v16613_v61  ;;  %v8735_v61 = vrot.slane %v16803_v63, 5  ;;  %v8095_v48 = vor.u32 %v8094_v29, %v8090_v54  ;;  %v8100_v15 = vrot.slane %v8098_v44, 5  ;;  %v8738_v28 = vrot.slane %v16817_v7, 5  ;;  %13010 = vmatpush3.bf16.msra.mxu0 %v13315_v18 }
 0x306   : > { %12952 = vmatpush3.bf16.msra.mxu1 %v16598_v9  ;;  %12875 = vmatprep.mubr.bf16.mxu1 %v16646_v62  ;;  %v8103_v26 = vshrl.u32 %v7865_v3, 16  ;;  %v8086_v9 = vrot.slane %v8085_v58, 4  ;;  %v8106_v43 = vshll.u32 %v7865_v3, 16  ;;  %v8112_v18 = vshll.u32 %v16731_v32, 16  ;;  %v16887_v58 = vld [vmem:[#allocation2 + $0xac] sm:$0xf] }
 0x307   : > { %12953 = vmatprep.subr.bf16.mxu1 %v13305_v0  ;;  %v16841_v62 = vsel %vm13519_vm8, %v11612_v34, %v8735_v61  ;;  %v8737_v45 = vrot.slane %v8735_v61, 4  ;;  %13011 = vmatprep.subr.bf16.mxu0 %v13317_v37  ;;  %v8096_v10 = vrot.slane %v8095_v48, 4  ;;  %v8116_v38 = vshrl.u32 %v16731_v32, 16  ;;  %v16891_v48 = vld [vmem:[#allocation2 + $0xb0] sm:$0x1] }
 0x308   : > { %12932 = vmatmul.mubr.bf16.gmra.mxu0 %v11640_v13  ;;  %v8105_v50 = vrot.slane %v8103_v26, 4  ;;  %v8091_v4 = vsel %vm13478_vm5, %v8086_v9, %v8090_v54  ;;  %v8108_v36 = vrot.slane %v8106_v43, 5  ;;  %v8122_v21 = vshll.u32 %v16733_v57, 16  ;;  %v16861_v13 = vld [vmem:[#allocation2 + $0xa0] sm:$0xf] }
 0x309   : > { %12935 = vmatprep.mubr.bf16.mxu0 %v11641_v5  ;;  %v16858_v41 = vsel %vm13519_vm8, %v8737_v45, %v8738_v28  ;;  %v8101_v32 = vsel %vm13478_vm5, %v8096_v10, %v8100_v15  ;;  %v8114_v5 = vrot.slane %v8112_v18, 5  ;;  %v8118_v39 = vrot.slane %v8116_v38, 4  ;;  %13012 = vmatpush3.bf16.msra.mxu0 %v13317_v37  ;;  %v7871_v54 = vld [vmem:[#allocation2 + $0x90] sm:$0xf] }
 0x30a   : > { %12954 = vmatpush3.bf16.msra.mxu1 %v13305_v0  ;;  %v11644_v33 = vcombine.low %v16841_v62, %v16858_v41  ;;  %v16872_v51 = vcombine.low %v8091_v4, %v8101_v32  ;;  %v8109_v57 = vor.u32 %v8108_v36, %v8105_v50  ;;  %v8124_v1 = vrot.slane %v8122_v21, 5  ;;  %13013 = vmatprep.subr.bf16.mxu0 %v13318_v8  ;;  %v13313_v10 = vld [vmem:[%s18209_s1 + $0x3d0] sm:$0xff]   ;;  %v8607_v62 = vld [vmem:[#allocation2 + $0xc0] sm:$0xe] }
 0x30b   : > { %12955 = vmatprep.subr.bf16.mxu1 %v13306_v53  ;;  %v11613_v31 = vrot.slane %v8604_v25, 9  ;;  %v8119_v3 = vor.u32 %v8118_v39, %v8114_v5  ;;  %v8742_v0 = vrot.slane %v16861_v13, 5  ;;  %v8745_v47 = vrot.slane %v16863_v59, 5  ;;  %v7874_v25 = vld [vmem:[#allocation2 + $0x9c] sm:$0xf] }
 0x30c   : > { %v8127_v14 = vshrl.u32 %v7868_v40, 16  ;;  %v8110_v24 = vrot.slane %v8109_v57, 4  ;;  %v8130_v17 = vshll.u32 %v7868_v40, 16  ;;  %v8136_v11 = vshll.u32 %v16766_v12, 16  ;;  %v8606_v32 = vld [vmem:[#allocation2 + $0xb4] sm:$0xe] }
 0x30d   : > { %12876 = vmatmul.mubr.bf16.gmra.mxu1 %v16674_v19  ;;  %v8140_v22 = vshrl.u32 %v16766_v12, 16  ;;  %v13310_v19 = vld [vmem:[%s18209_s1 + $0x3d8] sm:$0xff]   ;;  %v8120_v37 = vrot.slane %v8119_v3, 4  ;;  %v16885_v29 = vsel %vm13519_vm8, %v11613_v31, %v8742_v0  ;;  %13014 = vmatpush3.bf16.msra.mxu0 %v13318_v8  ;;  %v8146_v26 = vshll.u32 %v16775_v2, 16 }
 0x30e   : > { %12879 = vmatprep.mubr.bf16.mxu1 %v16721_v60  ;;  %12956 = vmatpush3.bf16.msra.mxu1 %v13306_v53  ;;  %v8744_v60 = vrot.slane %v8742_v0, 4  ;;  %v8129_v44 = vrot.slane %v8127_v14, 4  ;;  %v8115_v12 = vsel %vm13478_vm5, %v8110_v24, %v8114_v5  ;;  %v8132_v34 = vrot.slane %v8130_v17, 5  ;;  %v16901_v45 = vpop.f32.mrf.mxu0  ;;  %v16933_v31 = vld [vmem:[#allocation2 + $0xb8] sm:$0xf]  ;;  %v13316_v14 = vld [vmem:[%s18209_s1 + $0x3c8] sm:$0xff]  }
 0x30f   : > { %12957 = vmatprep.subr.bf16.mxu1 %v13307_v49  ;;  %v8138_v61 = vrot.slane %v8136_v11, 5  ;;  %v8142_v53 = vrot.slane %v8140_v22, 4  ;;  %v8125_v15 = vsel %vm13478_vm5, %v8120_v37, %v8124_v1  ;;  %v11614_v9 = vrot.slane %v8605_v56, 9  ;;  %v16935_v3 = vld [vmem:[#allocation2 + $0xbc] sm:$0x1] }
 0x310   : > { %12936 = vmatmul.mubr.bf16.gmra.mxu0 %v11642_v46  ;;  %v8746_v28 = vsel %vm13519_vm8, %v8744_v60, %v8745_v47  ;;  %v16906_v43 = vcombine.low %v8115_v12, %v8125_v15  ;;  %v8133_v23 = vor.u32 %v8132_v34, %v8129_v44  ;;  %v8749_v46 = vrot.slane %v16887_v58, 5  ;;  %v16914_v52 = vpop.f32.mrf.mxu0  ;;  %v16955_v34 = vld [vmem:[#allocation2 + $0xc8] sm:$0x1]  ;;  %v16959_v15 = vld [vmem:[#allocation2 + $0xc4] sm:$0xf] }
 0x311   : > { %12939 = vmatprep.mubr.bf16.mxu0 %v11643_v35  ;;  %v11645_v16 = vcombine.low %v16885_v29, %v8746_v28  ;;  %v8143_v40 = vor.u32 %v8142_v53, %v8138_v61  ;;  %v8148_v8 = vrot.slane %v8146_v26, 5  ;;  %v8752_v2 = vrot.slane %v16891_v48, 5 }
 0x312   : > { %12958 = vmatpush3.bf16.msra.mxu1 %v13307_v49  ;;  %v8151_v50 = vshrl.u32 %v7871_v54, 16  ;;  %v8134_v30 = vrot.slane %v8133_v23, 4  ;;  %v16918_v35 = vsel %vm13519_vm8, %v11614_v9, %v8749_v46  ;;  %v8751_v18 = vrot.slane %v8749_v46, 4  ;;  %v16923_v5 = vpop.f32.mrf.mxu0  ;;  %v7877_v23 = vld [vmem:[#allocation2 + $0xa8] sm:$0xf] }
 0x313   : > { %12959 = vmatprep.subr.bf16.mxu1 %v13310_v19  ;;  %v8154_v38 = vshll.u32 %v7871_v54, 16  ;;  %v8144_v4 = vrot.slane %v8143_v40, 4  ;;  %v8160_v21 = vshll.u32 %v16803_v63, 16  ;;  %v8164_v49 = vshrl.u32 %v16803_v63, 16 }
 0x314   : > { %v8153_v36 = vrot.slane %v8151_v50, 4  ;;  %v8139_v39 = vsel %vm13478_vm5, %v8134_v30, %v8138_v61  ;;  %v16930_v57 = vsel %vm13519_vm8, %v8751_v18, %v8752_v2  ;;  %v8170_v1 = vshll.u32 %v16817_v7, 16  ;;  %v16951_v37 = vpop.f32.mrf.mxu0 }
 0x315   : > { %12880 = vmatmul.mubr.bf16.gmra.mxu1 %v16757_v55  ;;  %v8156_v55 = vrot.slane %v8154_v38, 5  ;;  %v8149_v63 = vsel %vm13478_vm5, %v8144_v4, %v8148_v8  ;;  %v8162_v0 = vrot.slane %v8160_v21, 5  ;;  %v8166_v47 = vrot.slane %v8164_v49, 4 }
 0x316   : > { %12883 = vmatprep.mubr.bf16.mxu1 %v16790_v27  ;;  %12960 = vmatpush3.bf16.msra.mxu1 %v13310_v19  ;;  %v11646_v27 = vcombine.low %v16918_v35, %v16930_v57  ;;  %v16944_v24 = vcombine.low %v8139_v39, %v8149_v63  ;;  %v8172_v17 = vrot.slane %v8170_v1, 5  ;;  %v11615_v11 = vrot.slane %v8606_v32, 9  ;;  %v9476_v1 = vld [vmem:[#allocation2 + $0x18] sm:$0xf] }
 0x317   : > { %12961 = vmatprep.subr.bf16.mxu1 %v13313_v10  ;;  %v8157_v7 = vor.u32 %v8156_v55, %v8153_v36  ;;  %v8167_v22 = vor.u32 %v8166_v47, %v8162_v0  ;;  %v8756_v56 = vrot.slane %v16933_v31, 5  ;;  %v8759_v54 = vrot.slane %v16935_v3, 5 }
 0x318   : > { %12940 = vmatmul.mubr.bf16.gmra.mxu0 %v11644_v33  ;;  %v8175_v19 = vshrl.u32 %v7874_v25, 16  ;;  %v8178_v60 = vshll.u32 %v7874_v25, 16  ;;  %v8184_v44 = vshll.u32 %v16861_v13, 16  ;;  %v8188_v12 = vshrl.u32 %v16861_v13, 16  ;;  %v13319_v13 = vld [vmem:[%s18209_s1 + $0x3c0] sm:$0xff]  }
 0x319   : > { %12943 = vmatprep.mubr.bf16.mxu0 %v11645_v16  ;;  %v8158_v29 = vrot.slane %v8157_v7, 4  ;;  %v8168_v41 = vrot.slane %v8167_v22, 4  ;;  %v8757_v33 = vsel %vm13519_vm8, %v11615_v11, %v8756_v56  ;;  %v8758_v61 = vrot.slane %v8756_v56, 4  ;;  %v16999_v56 = vld [vmem:[#allocation2 + $0x20] sm:$0x1] }
 0x31a   : > { %12962 = vmatpush3.bf16.msra.mxu1 %v13313_v10  ;;  %v8177_v53 = vrot.slane %v8175_v19, 4  ;;  %v8180_v26 = vrot.slane %v8178_v60, 5  ;;  %v8186_v9 = vrot.slane %v8184_v44, 5  ;;  %v8190_v16 = vrot.slane %v8188_v12, 4  ;;  %v16972_v10 = vpop.f32.mrf.mxu0  ;;  %v7880_v44 = vld [vmem:[#allocation2 + $0xb4] sm:$0xf] }
 0x31b   : > { %12963 = vmatprep.subr.bf16.mxu1 %v13316_v14  ;;  %v8163_v28 = vsel %vm13478_vm5, %v8158_v29, %v8162_v0  ;;  %v8173_v46 = vsel %vm13478_vm5, %v8168_v41, %v8172_v17  ;;  %v8760_v40 = vsel %vm13519_vm8, %v8758_v61, %v8759_v54  ;;  %v8194_v8 = vshll.u32 %v16863_v59, 16 }
 0x31c   : > { %v11616_v2 = vrot.slane %v8607_v62, 9  ;;  %v16975_v50 = vcombine.low %v8163_v28, %v8173_v46  ;;  %v11647_v30 = vcombine.low %v8757_v33, %v8760_v40  ;;  %v8181_v35 = vor.u32 %v8180_v26, %v8177_v53  ;;  %v16988_v63 = vpop.f32.mrf.mxu0 }
 0x31d   : > { %12884 = vmatmul.mubr.bf16.gmra.mxu1 %v16823_v6  ;;  %v8191_v18 = vor.u32 %v8190_v16, %v8186_v9  ;;  %v8196_v38 = vrot.slane %v8194_v8, 5  ;;  %v8763_v6 = vrot.slane %v16959_v15, 5  ;;  %v8766_v25 = vrot.slane %v16955_v34, 5 }
 0x31e   : > { %12887 = vmatprep.mubr.bf16.mxu1 %v16872_v51  ;;  %v8199_v4 = vshrl.u32 %v7877_v23, 16  ;;  %12964 = vmatpush3.bf16.msra.mxu1 %v13316_v14  ;;  %v8182_v36 = vrot.slane %v8181_v35, 4  ;;  %v8202_v59 = vshll.u32 %v7877_v23, 16  ;;  %v8208_v49 = vshll.u32 %v16887_v58, 16  ;;  %v16983_v51 = vld [vmem:[%s18209_s1 + $0x478] sm:$0xff]   ;;  %v17005_v61 = vpop.f32.mrf.mxu0 }
 0x31f   : > { %v8192_v21 = vrot.slane %v8191_v18, 4  ;;  %12965 = vmatprep.subr.bf16.mxu1 %v13319_v13  ;;  %v8764_v32 = vsel %vm13519_vm8, %v11616_v2, %v8763_v6  ;;  %v8765_v39 = vrot.slane %v8763_v6, 4  ;;  %v8212_v55 = vshrl.u32 %v16887_v58, 16 }
 0x320   : > { %12944 = vmatmul.mubr.bf16.gmra.mxu0 %v11646_v27  ;;  %v8201_v57 = vrot.slane %v8199_v4, 4  ;;  %v8187_v0 = vsel %vm13478_vm5, %v8182_v36, %v8186_v9  ;;  %v8204_v14 = vrot.slane %v8202_v59, 5  ;;  %v8210_v7 = vrot.slane %v8208_v49, 5  ;;  %v16994_v27 = vld [vmem:[#allocation2 + $0x1c] sm:$0xf]  ;;  %v17016_v6 = vpop.f32.mrf.mxu0 }
 0x321   : > { %12947 = vmatprep.mubr.bf16.mxu0 %v11647_v30  ;;  %v8197_v47 = vsel %vm13478_vm5, %v8192_v21, %v8196_v38  ;;  %v8767_v11 = vsel %vm13519_vm8, %v8765_v39, %v8766_v25  ;;  %v8214_v22 = vrot.slane %v8212_v55, 4  ;;  %v8218_v58 = vshll.u32 %v16891_v48, 16  ;;  %v9479_v30 = vld [vmem:[#allocation2 + $0x24] sm:$0xf]  ;;  %v17019_v59 = vld [vmem:[#allocation2 + $0x28] sm:$0xf] }
 0x322   : > { %v11589_v17 = vcombine.low %v8187_v0, %v8197_v47  ;;  %12966 = vmatpush3.bf16.msra.mxu1 %v13319_v13  ;;  %v11648_v54 = vcombine.low %v8764_v32, %v8767_v11  ;;  %v8205_v19 = vor.u32 %v8204_v14, %v8201_v57  ;;  %v9525_v29 = vshrl.u32 %v9476_v1, 16  ;;  %v17026_v14 = vld [vmem:[#allocation2 + $0x2c] sm:$0x1]  ;;  %v7883_v11 = vld [vmem:[#allocation2 + $0xc0] sm:$0xf] }
 0x323   : > { %v9528_v60 = vshll.u32 %v9476_v1, 16  ;;  %13047 = vmatprep.subr.bf16.mxu1 %v16983_v51  ;;  %v8215_v12 = vor.u32 %v8214_v22, %v8210_v7  ;;  %v8220_v62 = vrot.slane %v8218_v58, 5  ;;  %v9534_v41 = vshll.u32 %v16994_v27, 16 }
 0x324   : > { %v9538_v33 = vshrl.u32 %v16994_v27, 16  ;;  %v8206_v48 = vrot.slane %v8205_v19, 4  ;;  %v9527_v53 = vrot.slane %v9525_v29, 4  ;;  %v9544_v26 = vshll.u32 %v16999_v56, 16 }
 0x325   : > { %12888 = vmatmul.mubr.bf16.gmra.mxu1 %v16906_v43  ;;  %v9530_v28 = vrot.slane %v9528_v60, 5  ;;  %v8216_v9 = vrot.slane %v8215_v12, 4  ;;  %v9536_v16 = vrot.slane %v9534_v41, 5  ;;  %v8223_v13 = vshrl.u32 %v7880_v44, 16  ;;  %v17009_v43 = vpop.f32.mrf.mxu1 }
 0x326   : > { %12891 = vmatprep.mubr.bf16.mxu1 %v16944_v24  ;;  %v9540_v23 = vrot.slane %v9538_v33, 4  ;;  %v8211_v46 = vsel %vm13478_vm5, %v8206_v48, %v8210_v7  ;;  %v9546_v8 = vrot.slane %v9544_v26, 5  ;;  %v8226_v2 = vshll.u32 %v7880_v44, 16 }
 0x327   : > { %v9531_v40 = vor.u32 %v9530_v28, %v9527_v53  ;;  %v8221_v24 = vsel %vm13478_vm5, %v8216_v9, %v8220_v62  ;;  %v8225_v18 = vrot.slane %v8223_v13, 4  ;;  %v8232_v38 = vshll.u32 %v16933_v31, 16  ;;  %v17022_v55 = vpop.f32.mrf.mxu1  ;;  %v9482_v13 = vld [vmem:[#allocation2 + $0x30] sm:$0xf] }
 0x328   : > { %12948 = vmatmul.mubr.bf16.gmra.mxu0 %v11648_v54  ;;  %v9541_v35 = vor.u32 %v9540_v23, %v9536_v16  ;;  %v11590_v25 = vcombine.low %v8211_v46, %v8221_v24  ;;  %v8228_v36 = vrot.slane %v8226_v2, 5  ;;  %v8236_v21 = vshrl.u32 %v16933_v31, 16  ;;  %v17046_v24 = vld [vmem:[#allocation2 + $0x34] sm:$0xf] }
 0x329   : > { %v9532_v4 = vrot.slane %v9531_v40, 4  ;;  %v8234_v32 = vrot.slane %v8232_v38, 5  ;;  %v8242_v39 = vshll.u32 %v16935_v3, 16  ;;  %v9549_v57 = vshrl.u32 %v9479_v30, 16  ;;  %v17032_v54 = vpop.f32.mrf.mxu0  ;;  %v17036_v33 = vpop.f32.mrf.mxu1 }
 0x32a   : > { %v9542_v49 = vrot.slane %v9541_v35, 4  ;;  %v8229_v0 = vor.u32 %v8228_v36, %v8225_v18  ;;  %v8238_v47 = vrot.slane %v8236_v21, 4  ;;  %v9552_v7 = vshll.u32 %v9479_v30, 16 }
 0x32b   : > { %v9537_v1 = vsel %vm13478_vm5, %v9532_v4, %v9536_v16  ;;  %v8244_v22 = vrot.slane %v8242_v39, 5  ;;  %v9551_v58 = vrot.slane %v9549_v57, 4  ;;  %v9558_v3 = vshll.u32 %v17019_v59, 16  ;;  %v17041_v46 = vpop.f32.mrf.mxu0  ;;  %v17049_v36 = vpop.f32.mrf.mxu1  ;;  %v17053_v39 = vld [vmem:[#allocation2 + $0x38] sm:$0x1] }
 0x32c   : > { %v9547_v31 = vsel %vm13478_vm5, %v9542_v49, %v9546_v8  ;;  %v8230_v29 = vrot.slane %v8229_v0, 4  ;;  %v8239_v60 = vor.u32 %v8238_v47, %v8234_v32  ;;  %v9554_v44 = vrot.slane %v9552_v7, 5 }
 0x32d   : > { %12892 = vmatmul.mubr.bf16.gmra.mxu1 %v16975_v50  ;;  %v11713_v19 = vcombine.low %v9537_v1, %v9547_v31  ;;  %v9560_v12 = vrot.slane %v9558_v3, 5  ;;  %v9562_v62 = vshrl.u32 %v17019_v59, 16  ;;  %v9568_v41 = vshll.u32 %v17026_v14, 16  ;;  %v17056_v7 = vpop.f32.mrf.mxu0 }
 0x32e   : > { %12895 = vmatprep.mubr.bf16.mxu1 %v11589_v17  ;;  %v8247_v50 = vshrl.u32 %v7883_v11, 16  ;;  %v8235_v48 = vsel %vm13478_vm5, %v8230_v29, %v8234_v32  ;;  %v8240_v53 = vrot.slane %v8239_v60, 4  ;;  %v9555_v28 = vor.u32 %v9554_v44, %v9551_v58  ;;  %v9485_v58 = vld [vmem:[#allocation2 + $0x3c] sm:$0xf]  ;;  %v17062_v60 = vld [vmem:[#allocation2 + $0x40] sm:$0xf] }
 0x32f   : > { %13015 = vmatprep.mubr.bf16.mxu0 %v11713_v19  ;;  %v8250_v26 = vshll.u32 %v7883_v11, 16  ;;  %v9564_v17 = vrot.slane %v9562_v62, 4  ;;  %v9570_v9 = vrot.slane %v9568_v41, 5  ;;  %v8256_v23 = vshll.u32 %v16959_v15, 16 }
 0x330   : > { %v8249_v16 = vrot.slane %v8247_v50, 4  ;;  %v8245_v40 = vsel %vm13478_vm5, %v8240_v53, %v8244_v22  ;;  %v9556_v8 = vrot.slane %v9555_v28, 4  ;;  %v8260_v30 = vshrl.u32 %v16959_v15, 16  ;;  %v17068_v28 = vld [vmem:[#allocation2 + $0x44] sm:$0x1] }
 0x331   : > { %v8252_v2 = vrot.slane %v8250_v26, 5  ;;  %v11591_v35 = vcombine.low %v8235_v48, %v8245_v40  ;;  %v9565_v18 = vor.u32 %v9564_v17, %v9560_v12  ;;  %v8258_v38 = vrot.slane %v8256_v23, 5 }
 0x332   : > { %v8266_v4 = vshll.u32 %v16955_v34, 16  ;;  %v9561_v21 = vsel %vm13478_vm5, %v9556_v8, %v9560_v12  ;;  %v8262_v32 = vrot.slane %v8260_v30, 4  ;;  %v9573_v57 = vshrl.u32 %v9482_v13, 16  ;;  %v9488_v8 = vld [vmem:[#allocation2 + $0x48] sm:$0xf] }
 0x333   : > { %v8253_v49 = vor.u32 %v8252_v2, %v8249_v16  ;;  %v9566_v1 = vrot.slane %v9565_v18, 4  ;;  %v9576_v0 = vshll.u32 %v9482_v13, 16  ;;  %v9582_v47 = vshll.u32 %v17046_v24, 16 }
 0x334   : > { %v8268_v15 = vrot.slane %v8266_v4, 5  ;;  %v8263_v11 = vor.u32 %v8262_v32, %v8258_v38  ;;  %v9575_v31 = vrot.slane %v9573_v57, 4  ;;  %v9586_v22 = vshrl.u32 %v17046_v24, 16  ;;  %v17064_v44 = vpop.f32.mrf.mxu1 }
 0x335   : > { %12896 = vmatmul.mubr.bf16.gmra.mxu1 %v11590_v25  ;;  %v8254_v34 = vrot.slane %v8253_v49, 4  ;;  %v9571_v3 = vsel %vm13478_vm5, %v9566_v1, %v9570_v9  ;;  %v9578_v19 = vrot.slane %v9576_v0, 5  ;;  %v9584_v29 = vrot.slane %v9582_v47, 5  ;;  %v17070_v9 = vpop.f32.mrf.mxu0  ;;  %v17079_v1 = vld [vmem:[#allocation2 + $0x4c] sm:$0xf] }
 0x336   : > { %12899 = vmatprep.mubr.bf16.mxu1 %v11591_v35  ;;  %v9592_v25 = vshll.u32 %v17053_v39, 16  ;;  %v11714_v12 = vcombine.low %v9561_v21, %v9571_v3  ;;  %v8264_v41 = vrot.slane %v8263_v11, 4  ;;  %v9588_v50 = vrot.slane %v9586_v22, 4  ;;  %v13320_v35 = vld [vmem:[#allocation2 + $0x18] sm:$0xff]   ;;  %v17076_v4 = vpop.f32.mrf.mxu1 }
 0x337   : > { %v8259_v62 = vsel %vm13478_vm5, %v8254_v34, %v8258_v38  ;;  %v9579_v48 = vor.u32 %v9578_v19, %v9575_v31  ;;  %v9597_v26 = vshrl.u32 %v9485_v58, 16  ;;  %v9600_v17 = vshll.u32 %v9485_v58, 16  ;;  %v17087_v34 = vld [vmem:[#allocation2 + $0x50] sm:$0x1] }
 0x338   : > { %v9594_v53 = vrot.slane %v9592_v25, 5  ;;  %13016 = vmatmul.mubr.bf16.vlgmr.msra.gmra.mxu0 %v11714_v12  ;;  %v8269_v16 = vsel %vm13478_vm5, %v8264_v41, %v8268_v15  ;;  %v9589_v23 = vor.u32 %v9588_v50, %v9584_v29  ;;  %v9606_v13 = vshll.u32 %v17062_v60, 16  ;;  %v17094_v41 = vpop.f32.mrf.mxu1 }
 0x339   : > { %v9610_v40 = vshrl.u32 %v17062_v60, 16  ;;  %v11592_v2 = vcombine.low %v8259_v62, %v8269_v16  ;;  %v9580_v30 = vrot.slane %v9579_v48, 4  ;;  %v9599_v18 = vrot.slane %v9597_v26, 4 }
 0x33a   : > { %v9602_v38 = vrot.slane %v9600_v17, 5  ;;  %v9590_v21 = vrot.slane %v9589_v23, 4  ;;  %v9608_v49 = vrot.slane %v9606_v13, 5  ;;  %v9616_v57 = vshll.u32 %v17068_v28, 16 }
 0x33b   : > { %v9612_v32 = vrot.slane %v9610_v40, 4  ;;  %v9585_v15 = vsel %vm13478_vm5, %v9580_v30, %v9584_v29  ;;  %v17085_v47 = vadd.f32 %v16901_v45, %v17009_v43  ;;  %v9621_v11 = vshrl.u32 %v9488_v8, 16  ;;  %v17089_v31 = vpop.f32.mrf.mxu0  ;;  %v17110_v40 = vld [vmem:[#allocation2 + $0x58] sm:$0xf] }
 0x33c   : > { %v9603_v0 = vor.u32 %v9602_v38, %v9599_v18  ;;  %v9595_v22 = vsel %vm13478_vm5, %v9590_v21, %v9594_v53  ;;  %v9618_v3 = vrot.slane %v9616_v57, 5  ;;  %v9624_v19 = vshll.u32 %v9488_v8, 16  ;;  %v9491_v53 = vld [vmem:[#allocation2 + $0x54] sm:$0xf]  ;;  %v13322_v38 = vld [vmem:[#allocation2 + $0x24] sm:$0xff]  }
 0x33d   : > { %12900 = vmatmul.mubr.bf16.gmra.mxu1 %v11592_v2  ;;  %v9613_v58 = vor.u32 %v9612_v32, %v9608_v49  ;;  %v11715_v25 = vcombine.low %v9585_v15, %v9595_v22  ;;  %v9623_v29 = vrot.slane %v9621_v11, 4  ;;  %v9630_v62 = vshll.u32 %v17079_v1, 16  ;;  %v17096_v45 = vpop.f32.mrf.mxu0  ;;  %v13323_v15 = vld [vmem:[#allocation2 + $0x30] sm:$0xff]   ;;  %v9494_v22 = vld [vmem:[#allocation2 + $0x60] sm:$0xf] }
 0x33e   : > { %12967 = vmatprep.mubr.bf16.mxu1 %v13320_v35  ;;  %v9604_v12 = vrot.slane %v9603_v0, 4  ;;  %v9626_v50 = vrot.slane %v9624_v19, 5  ;;  %v9634_v48 = vshrl.u32 %v17079_v1, 16  ;;  %v9640_v26 = vshll.u32 %v17087_v34, 16  ;;  %v17114_v35 = vld [vmem:[#allocation2 + $0x5c] sm:$0x1] }
 0x33f   : > { %v9614_v43 = vrot.slane %v9613_v58, 4  ;;  %13019 = vmatprep.mubr.bf16.mxu0 %v11715_v25  ;;  %v9632_v16 = vrot.slane %v9630_v62, 5  ;;  %v17104_v23 = vadd.f32 %v16914_v52, %v17022_v55  ;;  %v17108_v13 = vadd.f32 %v16923_v5, %v17036_v33  ;;  %v13324_v52 = vld [vmem:[%s18209_s1 + $0x470] sm:$0xff]   ;;  %v6557_v5 = vpop.f32.mrf.mxu1  ;;  %v17119_v55 = vpop.f32.mrf.mxu0 }
 0x340   : > { %v9609_v17 = vsel %vm13478_vm5, %v9604_v12, %v9608_v49  ;;  %v9627_v2 = vor.u32 %v9626_v50, %v9623_v29  ;;  %v9636_v30 = vrot.slane %v9634_v48, 4  ;;  %v9642_v21 = vrot.slane %v9640_v26, 5  ;;  %v17128_v12 = vld [vmem:[#allocation2 + $0x64] sm:$0xf] }
 0x341   : > { %v9619_v8 = vsel %vm13478_vm5, %v9614_v43, %v9618_v3  ;;  %v9645_v49 = vshrl.u32 %v9491_v53, 16  ;;  %v9648_v32 = vshll.u32 %v9491_v53, 16  ;;  %v9654_v0 = vshll.u32 %v17110_v40, 16  ;;  %v17133_v53 = vld [vmem:[#allocation2 + $0x68] sm:$0x1] }
 0x342   : > { %v11716_v18 = vcombine.low %v9609_v17, %v9619_v8  ;;  %v9628_v33 = vrot.slane %v9627_v2, 4  ;;  %v9637_v57 = vor.u32 %v9636_v30, %v9632_v16  ;;  %v9658_v11 = vshrl.u32 %v17110_v40, 16 }
 0x343   : > { %v9647_v58 = vrot.slane %v9645_v49, 4  ;;  %v9650_v3 = vrot.slane %v9648_v32, 5  ;;  %v9664_v19 = vshll.u32 %v17114_v35, 16  ;;  %v17126_v25 = vadd.f32 %v16972_v10, %v17064_v44  ;;  %v17135_v44 = vpop.f32.mrf.mxu0  ;;  %v13325_v32 = vld [vmem:[#allocation2 + $0x3c] sm:$0xff]  }
 0x344   : > { %13020 = vmatmul.mubr.bf16.gmra.mxu0 %v11716_v18  ;;  %v9633_v29 = vsel %vm13478_vm5, %v9628_v33, %v9632_v16  ;;  %v9638_v62 = vrot.slane %v9637_v57, 4  ;;  %v9656_v43 = vrot.slane %v9654_v0, 5  ;;  %v9660_v50 = vrot.slane %v9658_v11, 4  ;;  %v13327_v18 = vld [vmem:[%s18209_s1 + $0x468] sm:$0xff]  }
 0x345   : > { %12968 = vmatmul.mubr.bf16.vlgmr.msra.gmra.mxu1 %v13322_v38  ;;  %18414 = vst [vmem:[#allocation12_spill] sm:$0xff] %v17126_v25  ;;  %v9651_v48 = vor.u32 %v9650_v3, %v9647_v58  ;;  %v9666_v26 = vrot.slane %v9664_v19, 5  ;;  %v9669_v17 = vshrl.u32 %v9494_v22, 16  ;;  %v9672_v8 = vshll.u32 %v9494_v22, 16  ;;  %v12689_v10 = vpop.f32.mrf.mxu1 }
 0x346   : > { %13048 = vmatpush3.bf16.msra.mxu1 %v16983_v51  ;;  %12971 = vmatprep.mubr.bf16.mxu1 %v13323_v15  ;;  %v9643_v2 = vsel %vm13478_vm5, %v9638_v62, %v9642_v21  ;;  %v9661_v16 = vor.u32 %v9660_v50, %v9656_v43  ;;  %v9678_v30 = vshll.u32 %v17128_v12, 16  ;;  %v9682_v51 = vshrl.u32 %v17128_v12, 16  ;;  %v9497_v21 = vld [vmem:[#allocation2 + $0x6c] sm:$0xf]  ;;  %v17155_v50 = vld [vmem:[#allocation2 + $0x70] sm:$0xf] }
 0x347   : > { %13049 = vmatprep.subr.bf16.mxu1 %v13324_v52  ;;  %v11717_v38 = vcombine.low %v9633_v29, %v9643_v2  ;;  %v9652_v49 = vrot.slane %v9651_v48, 4  ;;  %v9671_v33 = vrot.slane %v9669_v17, 4  ;;  %v9674_v57 = vrot.slane %v9672_v8, 5  ;;  %v6570_v58 = vpop.f32.mrf.mxu1  ;;  %v17157_v48 = vld [vmem:[#allocation2 + $0x74] sm:$0x1]  ;;  %v13330_v17 = vld [vmem:[%s18209_s1 + $0x460] sm:$0xff]  }
 0x348   : > { %v9662_v15 = vrot.slane %v9661_v16, 4  ;;  %v9680_v0 = vrot.slane %v9678_v30, 5  ;;  %v9684_v11 = vrot.slane %v9682_v51, 4  ;;  %v9688_v22 = vshll.u32 %v17133_v53, 16  ;;  %v17169_v51 = vld [vmem:[#allocation2 + $0x80] sm:$0x1] }
 0x349   : > { %13023 = vmatprep.mubr.bf16.mxu0 %v11717_v38  ;;  %v9657_v3 = vsel %vm13478_vm5, %v9652_v49, %v9656_v43  ;;  %v9675_v19 = vor.u32 %v9674_v57, %v9671_v33  ;;  %v17149_v29 = vadd.f32 %v16988_v63, %v17076_v4  ;;  %v17153_v62 = vadd.f32 %v17005_v61, %v17094_v41  ;;  %v13326_v4 = vld [vmem:[#allocation2 + $0x48] sm:$0xff]  }
 0x34a   : > { %13050 = vmatpush3.bf16.msra.mxu1 %v13324_v52  ;;  %v17159_v52 = vpop.f32.mrf.mxu0  ;;  %v9667_v43 = vsel %vm13478_vm5, %v9662_v15, %v9666_v26  ;;  %v9685_v8 = vor.u32 %v9684_v11, %v9680_v0  ;;  %v9690_v63 = vrot.slane %v9688_v22, 5  ;;  %v17167_v2 = vadd.f32 %v17016_v6, %v6557_v5  ;;  %v9500_v6 = vld [vmem:[#allocation2 + $0x78] sm:$0xf]  ;;  %v12690_v5 = vpop.f32.mrf.mxu1 }
 0x34b   : > { %18415 = vst [vmem:[#allocation8_spill] sm:$0xff] %v17149_v29  ;;  %18416 = vst [vmem:[#allocation21_spill] sm:$0xff] %v17153_v62  ;;  %13051 = vmatprep.subr.bf16.mxu1 %v13327_v18  ;;  %v11718_v61 = vcombine.low %v9657_v3, %v9667_v43  ;;  %v9676_v41 = vrot.slane %v9675_v19, 4  ;;  %v9693_v16 = vshrl.u32 %v9497_v21, 16  ;;  %v9696_v30 = vshll.u32 %v9497_v21, 16  ;;  %v13333_v3 = vld [vmem:[%s18209_s1 + $0x458] sm:$0xff]  }
 0x34c   : > { %18417 = vst [vmem:[#allocation17_spill] sm:$0xff] %v17167_v2  ;;  %v17171_v38 = vpop.f32.mrf.mxu0  ;;  %v9686_v49 = vrot.slane %v9685_v8, 4  ;;  %v9702_v26 = vshll.u32 %v17155_v50, 16  ;;  %v9706_v33 = vshrl.u32 %v17155_v50, 16  ;;  %v9712_v57 = vshll.u32 %v17157_v48, 16  ;;  %v13329_v62 = vld [vmem:[#allocation2 + $0x60] sm:$0xff]   ;;  %v6573_v29 = vpop.f32.mrf.mxu1 }
 0x34d   : > { %12972 = vmatmul.mubr.bf16.gmra.mxu1 %v13325_v32  ;;  %13024 = vmatmul.mubr.bf16.gmra.mxu0 %v11718_v61  ;;  %v9681_v32 = vsel %vm13478_vm5, %v9676_v41, %v9680_v0  ;;  %v9695_v15 = vrot.slane %v9693_v16, 4  ;;  %v9698_v11 = vrot.slane %v9696_v30, 5  ;;  %v17179_v22 = vadd.f32 %v17032_v54, %v12689_v10  ;;  %v17181_v21 = vld [vmem:[#allocation2 + $0x7c] sm:$0xf]  ;;  %v13328_v10 = vld [vmem:[#allocation2 + $0x54] sm:$0xff]  }
 0x34e   : > { %12975 = vmatprep.mubr.bf16.mxu1 %v13326_v4  ;;  %13052 = vmatpush3.bf16.msra.mxu1 %v13327_v18  ;;  %v9691_v18 = vsel %vm13478_vm5, %v9686_v49, %v9690_v63  ;;  %v9704_v19 = vrot.slane %v9702_v26, 5  ;;  %v9708_v43 = vrot.slane %v9706_v33, 4  ;;  %v9714_v8 = vrot.slane %v9712_v57, 5  ;;  %v17188_v16 = vpop.f32.mrf.mxu0  ;;  %v9503_v57 = vld [vmem:[#allocation2 + $0x84] sm:$0xf] }
 0x34f   : > { %18418 = vst [vmem:[#allocation25_spill] sm:$0xff] %v17179_v22  ;;  %13053 = vmatprep.subr.bf16.mxu1 %v13330_v17  ;;  %v11719_v4 = vcombine.low %v9681_v32, %v9691_v18  ;;  %v9699_v0 = vor.u32 %v9698_v11, %v9695_v15  ;;  %v9717_v61 = vshrl.u32 %v9500_v6, 16  ;;  %v9720_v41 = vshll.u32 %v9500_v6, 16  ;;  %v13336_v6 = vld [vmem:[%s18209_s1 + $0x450] sm:$0xff]  }
 0x350   : > { %v9709_v54 = vor.u32 %v9708_v43, %v9704_v19  ;;  %v9726_v30 = vshll.u32 %v17181_v21, 16  ;;  %v9730_v22 = vshrl.u32 %v17181_v21, 16  ;;  %v9736_v2 = vshll.u32 %v17169_v51, 16  ;;  %v17199_v43 = vld [vmem:[#allocation2 + $0x88] sm:$0xf] }
 0x351   : > { %13027 = vmatprep.mubr.bf16.mxu0 %v11719_v4  ;;  %v9700_v63 = vrot.slane %v9699_v0, 4  ;;  %v9719_v49 = vrot.slane %v9717_v61, 4  ;;  %v9722_v26 = vrot.slane %v9720_v41, 5  ;;  %v17194_v33 = vadd.f32 %v17041_v46, %v6570_v58  ;;  %v17209_v0 = vld [vmem:[#allocation2 + $0x8c] sm:$0x1]  ;;  %v17211_v61 = vpop.f32.mrf.mxu0 }
 0x352   : > { %13054 = vmatpush3.bf16.msra.mxu1 %v13330_v17  ;;  %v9710_v32 = vrot.slane %v9709_v54, 4  ;;  %v9728_v15 = vrot.slane %v9726_v30, 5  ;;  %v9732_v11 = vrot.slane %v9730_v22, 4  ;;  %v9738_v18 = vrot.slane %v9736_v2, 5 }
 0x353   : > { %18419 = vst [vmem:[#allocation24_spill] sm:$0xff] %v17194_v33  ;;  %13055 = vmatprep.subr.bf16.mxu1 %v13333_v3  ;;  %v9705_v17 = vsel %vm13478_vm5, %v9700_v63, %v9704_v19  ;;  %v9723_v4 = vor.u32 %v9722_v26, %v9719_v49  ;;  %v17204_v46 = vadd.f32 %v17056_v7, %v12690_v5  ;;  %v9741_v41 = vshrl.u32 %v9503_v57, 16  ;;  %v13339_v5 = vld [vmem:[%s18209_s1 + $0x448] sm:$0xff]   ;;  %v17221_v26 = vld [vmem:[#allocation2 + $0x94] sm:$0xf] }
 0x354   : > { %v17207_v58 = vadd.f32 %v17070_v9, %v6573_v29  ;;  %v9715_v2 = vsel %vm13478_vm5, %v9710_v32, %v9714_v8  ;;  %v9733_v22 = vor.u32 %v9732_v11, %v9728_v15  ;;  %v9744_v54 = vshll.u32 %v9503_v57, 16  ;;  %v12693_v19 = vpop.f32.mrf.mxu1  ;;  %v9506_v29 = vld [vmem:[#allocation2 + $0x90] sm:$0xf]  ;;  %18422 = vst [vmem:[#allocation28_spill] sm:$0xff] %v17221_v26 }
 0x355   : > { %12976 = vmatmul.mubr.bf16.gmra.mxu1 %v13328_v10  ;;  %18420 = vst [vmem:[#allocation29_spill] sm:$0xff] %v17204_v46  ;;  %v11720_v10 = vcombine.low %v9705_v17, %v9715_v2  ;;  %v9724_v30 = vrot.slane %v9723_v4, 4  ;;  %v9750_v7 = vshll.u32 %v17199_v43, 16  ;;  %v9754_v9 = vshrl.u32 %v17199_v43, 16  ;;  %v17228_v4 = vld [vmem:[#allocation2 + $0x98] sm:$0x1] }
 0x356   : > { %18421 = vst [vmem:[#allocation26_spill] sm:$0xff] %v17207_v58  ;;  %12979 = vmatprep.mubr.bf16.mxu1 %v13329_v62  ;;  %13056 = vmatpush3.bf16.msra.mxu1 %v13333_v3  ;;  %v9734_v63 = vrot.slane %v9733_v22, 4  ;;  %v9743_v8 = vrot.slane %v9741_v41, 4  ;;  %v9746_v49 = vrot.slane %v9744_v54, 5  ;;  %v9760_v62 = vshll.u32 %v17209_v0, 16  ;;  %v6586_v3 = vpop.f32.mrf.mxu1  ;;  %18424 = vst [vmem:[#allocation9_spill] sm:$0xff] %v17228_v4 }
 0x357   : > { %13057 = vmatprep.subr.bf16.mxu1 %v13336_v6  ;;  %13028 = vmatmul.mubr.bf16.gmra.mxu0 %v11720_v10  ;;  %v9729_v57 = vsel %vm13478_vm5, %v9724_v30, %v9728_v15  ;;  %v9752_v32 = vrot.slane %v9750_v7, 5  ;;  %v9756_v11 = vrot.slane %v9754_v9, 4  ;;  %v17226_v17 = vadd.f32 %v17089_v31, %v12693_v19  ;;  %v17230_v2 = vpop.f32.mrf.mxu0  ;;  %v13331_v15 = vld [vmem:[#allocation2 + $0x6c] sm:$0xff]   ;;  %v13332_v31 = vld [vmem:[#allocation2 + $0x78] sm:$0xff]   ;;  %v13342_v9 = vld [vmem:[%s18209_s1 + $0x440] sm:$0xff]  }
 0x358   : > { %v9739_v22 = vsel %vm13478_vm5, %v9734_v63, %v9738_v18  ;;  %v9747_v41 = vor.u32 %v9746_v49, %v9743_v8  ;;  %v9762_v54 = vrot.slane %v9760_v62, 5  ;;  %v9765_v58 = vshrl.u32 %v9506_v29, 16  ;;  %v12694_v46 = vpop.f32.mrf.mxu1  ;;  %v9509_v62 = vld [vmem:[#allocation2 + $0x9c] sm:$0xf] }
 0x359   : > { %18423 = vst [vmem:[#allocation30_spill] sm:$0xff] %v17226_v17  ;;  %v11721_v10 = vcombine.low %v9729_v57, %v9739_v22  ;;  %v9757_v33 = vor.u32 %v9756_v11, %v9752_v32  ;;  %v9768_v30 = vshll.u32 %v9506_v29, 16  ;;  %v9774_v7 = vshll.u32 %v17221_v26, 16  ;;  %v17235_v19 = vpop.f32.mrf.mxu0  ;;  %v17245_v17 = vld [vmem:[#allocation2 + $0xa0] sm:$0xf] }
 0x35a   : > { %13058 = vmatpush3.bf16.msra.mxu1 %v13336_v6  ;;  %v9748_v18 = vrot.slane %v9747_v41, 4  ;;  %v9767_v63 = vrot.slane %v9765_v58, 4  ;;  %v9778_v8 = vshrl.u32 %v17221_v26, 16  ;;  %v9784_v6 = vshll.u32 %v17228_v4, 16  ;;  %v6589_v49 = vpop.f32.mrf.mxu1  ;;  %18426 = vst [vmem:[#allocation15_spill] sm:$0xff] %v17245_v17 }
 0x35b   : > { %13059 = vmatprep.subr.bf16.mxu1 %v13339_v5  ;;  %13031 = vmatprep.mubr.bf16.mxu0 %v11721_v10  ;;  %v9758_v29 = vrot.slane %v9757_v33, 4  ;;  %v9770_v57 = vrot.slane %v9768_v30, 5  ;;  %v9776_v11 = vrot.slane %v9774_v7, 5  ;;  %v17243_v22 = vadd.f32 %v17096_v45, %v6586_v3  ;;  %v17247_v25 = vpop.f32.mrf.mxu0  ;;  %v17254_v33 = vld [vmem:[#allocation2 + $0xa4] sm:$0x1] }
 0x35c   : > { %v9753_v58 = vsel %vm13478_vm5, %v9748_v18, %v9752_v32  ;;  %v9780_v41 = vrot.slane %v9778_v8, 4  ;;  %v9786_v26 = vrot.slane %v9784_v6, 5  ;;  %v17252_v4 = vadd.f32 %v17119_v55, %v12694_v46  ;;  %18428 = vst [vmem:[#allocation10_spill] sm:$0xff] %v17254_v33  ;;  %v9512_v30 = vld [vmem:[#allocation2 + $0xa8] sm:$0xf] }
 0x35d   : > { %12980 = vmatmul.mubr.bf16.gmra.mxu1 %v13331_v15  ;;  %18425 = vst [vmem:[#allocation6_spill] sm:$0xff] %v17243_v22  ;;  %v9763_v45 = vsel %vm13478_vm5, %v9758_v29, %v9762_v54  ;;  %v9771_v3 = vor.u32 %v9770_v57, %v9767_v63  ;;  %v17259_v10 = vadd.f32 %v17135_v44, %v6589_v49  ;;  %v9789_v15 = vshrl.u32 %v9509_v62, 16  ;;  %v17261_v7 = vpop.f32.mrf.mxu0  ;;  %v17268_v57 = vld [vmem:[#allocation2 + $0xac] sm:$0xf] }
 0x35e   : > { %12983 = vmatprep.mubr.bf16.mxu1 %v13332_v31  ;;  %18427 = vst [vmem:[#allocation32_spill] sm:$0xff] %v17252_v4  ;;  %13060 = vmatpush3.bf16.msra.mxu1 %v13339_v5  ;;  %v11722_v32 = vcombine.low %v9753_v58, %v9763_v45  ;;  %v9781_v31 = vor.u32 %v9780_v41, %v9776_v11  ;;  %v9792_v18 = vshll.u32 %v9509_v62, 16  ;;  %v9798_v55 = vshll.u32 %v17245_v17, 16 }
 0x35f   : > { %18429 = vst [vmem:[#allocation7_spill] sm:$0xff] %v17259_v10  ;;  %13061 = vmatprep.subr.bf16.mxu1 %v13342_v9  ;;  %v9772_v46 = vrot.slane %v9771_v3, 4  ;;  %v9791_v8 = vrot.slane %v9789_v15, 4  ;;  %v9802_v5 = vshrl.u32 %v17245_v17, 16  ;;  %v9808_v54 = vshll.u32 %v17254_v33, 16  ;;  %v17266_v63 = vpop.f32.mrf.mxu0  ;;  %v13334_v15 = vld [vmem:[#allocation2 + $0x84] sm:$0xff]  }
 0x360   : > { %13032 = vmatmul.mubr.bf16.gmra.mxu0 %v11722_v32  ;;  %v9782_v44 = vrot.slane %v9781_v31, 4  ;;  %v9794_v6 = vrot.slane %v9792_v18, 5  ;;  %v9800_v49 = vrot.slane %v9798_v55, 5  ;;  %v12697_v29 = vpop.f32.mrf.mxu1  ;;  %v9813_v58 = vshrl.u32 %v9512_v30, 16  ;;  %v17275_v10 = vld [vmem:[#allocation2 + $0xb0] sm:$0x1] }
 0x361   : > { %v9777_v62 = vsel %vm13478_vm5, %v9772_v46, %v9776_v11  ;;  %v9804_v41 = vrot.slane %v9802_v5, 4  ;;  %v9810_v45 = vrot.slane %v9808_v54, 5  ;;  %v17273_v3 = vadd.f32 %v17159_v52, %v12697_v29  ;;  %18431 = vst [vmem:[#allocation13_spill] sm:$0xff] %v17275_v10  ;;  %v17277_v32 = vpop.f32.mrf.mxu0  ;;  %v9515_v5 = vld [vmem:[#allocation2 + $0xb4] sm:$0xf] }
 0x362   : > { %13062 = vmatpush3.bf16.msra.mxu1 %v13342_v9  ;;  %v9787_v31 = vsel %vm13478_vm5, %v9782_v44, %v9786_v26  ;;  %v9795_v18 = vor.u32 %v9794_v6, %v9791_v8  ;;  %v9815_v55 = vrot.slane %v9813_v58, 4  ;;  %v9816_v4 = vshll.u32 %v9512_v30, 16  ;;  %v13335_v9 = vld [vmem:[#allocation2 + $0x90] sm:$0xff]   ;;  %v6602_v22 = vpop.f32.mrf.mxu1 }
 0x363   : > { %18430 = vst [vmem:[#allocation18_spill] sm:$0xff] %v17273_v3  ;;  %v11723_v33 = vcombine.low %v9777_v62, %v9787_v31  ;;  %v9805_v11 = vor.u32 %v9804_v41, %v9800_v49  ;;  %v9822_v46 = vshll.u32 %v17268_v57, 16  ;;  %v9826_v52 = vshrl.u32 %v17268_v57, 16  ;;  %v17283_v54 = vpop.f32.mrf.mxu0  ;;  %v17292_v62 = vld [vmem:[#allocation2 + $0xb8] sm:$0xf] }
 0x364   : > { %v9796_v29 = vrot.slane %v9795_v18, 4  ;;  %v9818_v3 = vrot.slane %v9816_v4, 5  ;;  %v9832_v17 = vshll.u32 %v17275_v10, 16  ;;  %v17287_v26 = vadd.f32 %v17171_v38, %v6602_v22  ;;  %v12698_v30 = vpop.f32.mrf.mxu1 }
 0x365   : > { %12984 = vmatmul.mubr.bf16.gmra.mxu1 %v13334_v15  ;;  %13035 = vmatprep.mubr.bf16.mxu0 %v11723_v33  ;;  %v9806_v8 = vrot.slane %v9805_v11, 4  ;;  %v9824_v44 = vrot.slane %v9822_v46, 5  ;;  %v9828_v6 = vrot.slane %v9826_v52, 4  ;;  %v17290_v58 = vadd.f32 %v17188_v16, %v12698_v30  ;;  %v17294_v41 = vpop.f32.mrf.mxu0  ;;  %v9518_v11 = vld [vmem:[#allocation2 + $0xc0] sm:$0xf] }
 0x366   : > { %12987 = vmatprep.mubr.bf16.mxu1 %v13335_v9  ;;  %18432 = vst [vmem:[#allocation20_spill] sm:$0xff] %v17287_v26  ;;  %v17298_v4 = vadd.f32 %v16951_v37, %v17049_v36  ;;  %v9801_v38 = vsel %vm13478_vm5, %v9796_v29, %v9800_v49  ;;  %v9819_v22 = vor.u32 %v9818_v3, %v9815_v55  ;;  %v6605_v15 = vpop.f32.mrf.mxu1  ;;  %v9837_v33 = vshrl.u32 %v9515_v5, 16  ;;  %v17309_v36 = vld [vmem:[#allocation2 + $0xbc] sm:$0x1] }
 0x367   : > { %18433 = vst [vmem:[#allocation19_spill] sm:$0xff] %v17290_v58  ;;  %v9811_v31 = vsel %vm13478_vm5, %v9806_v8, %v9810_v45  ;;  %v9829_v18 = vor.u32 %v9828_v6, %v9824_v44  ;;  %v17305_v16 = vadd.f32 %v17211_v61, %v6605_v15  ;;  %v9840_v9 = vshll.u32 %v9515_v5, 16  ;;  %v17307_v46 = vpop.f32.mrf.mxu0  ;;  %v13337_v3 = vld [vmem:[#allocation2 + $0x9c] sm:$0xff]   ;;  %v17313_v61 = vld [vmem:[#allocation2 + $0xc4] sm:$0xf] }
 0x368   : > { %v11724_v52 = vcombine.low %v9801_v38, %v9811_v31  ;;  %v9820_v37 = vrot.slane %v9819_v22, 4  ;;  %v9839_v30 = vrot.slane %v9837_v33, 4  ;;  %v9846_v49 = vshll.u32 %v17292_v62, 16  ;;  %18435 = vst [vmem:[#allocation11_spill] sm:$0xff] %v17313_v61  ;;  %v17322_v15 = vld [vmem:[#allocation2 + $0xc8] sm:$0x1] }
 0x369   : > { %18434 = vst [vmem:[#allocation16_spill] sm:$0xff] %v17305_v16  ;;  %v9830_v55 = vrot.slane %v9829_v18, 4  ;;  %v9834_v29 = vrot.slane %v9832_v17, 5  ;;  %v9842_v58 = vrot.slane %v9840_v9, 5  ;;  %v9850_v45 = vshrl.u32 %v17292_v62, 16  ;;  %v12701_v8 = vpop.f32.mrf.mxu1  ;;  %v17315_v5 = vpop.f32.mrf.mxu0  ;;  %18437 = vst [vmem:[#allocation22_spill] sm:$0xff] %v17322_v15 }
 0x36a   : > { %13036 = vmatmul.mubr.bf16.gmra.mxu0 %v11724_v52  ;;  %v9825_v6 = vsel %vm13478_vm5, %v9820_v37, %v9824_v44  ;;  %v9848_v38 = vrot.slane %v9846_v49, 5  ;;  %v17320_v22 = vadd.f32 %v17230_v2, %v12701_v8  ;;  %v9861_v33 = vshrl.u32 %v9518_v11, 16  ;;  %v13338_v17 = vld [vmem:[#allocation2 + $0xa8] sm:$0xff]  }
 0x36b   : > { %v9835_v31 = vsel %vm13478_vm5, %v9830_v55, %v9834_v29  ;;  %v9843_v18 = vor.u32 %v9842_v58, %v9839_v30  ;;  %v9852_v9 = vrot.slane %v9850_v45, 4  ;;  %v9856_v16 = vshll.u32 %v17309_v36, 16  ;;  %v6618_v52 = vpop.f32.mrf.mxu1  ;;  %v17327_v26 = vpop.f32.mrf.mxu0 }
 0x36c   : > { %18436 = vst [vmem:[#allocation14_spill] sm:$0xff] %v17320_v22  ;;  %v11725_v44 = vcombine.low %v9825_v6, %v9835_v31  ;;  %v9863_v37 = vrot.slane %v9861_v33, 4  ;;  %v9864_v49 = vshll.u32 %v9518_v11, 16  ;;  %v9870_v2 = vshll.u32 %v17313_v61, 16  ;;  %v10230_v6 = vld [vmem:[#allocation2 + $0x18] sm:$0xe] }
 0x36d   : > { %12988 = vmatmul.mubr.bf16.gmra.mxu1 %v13337_v3  ;;  %v9844_v8 = vrot.slane %v9843_v18, 4  ;;  %v9853_v22 = vor.u32 %v9852_v9, %v9848_v38  ;;  %v9874_v10 = vshrl.u32 %v17313_v61, 16  ;;  %v9880_v55 = vshll.u32 %v17322_v15, 16  ;;  %v12702_v58 = vpop.f32.mrf.mxu1  ;;  %v17332_v30 = vpop.f32.mrf.mxu0  ;;  %v9521_v33 = vld [vmem:[#allocation2 + $0xcc] sm:$0xf] }
 0x36e   : > { %12991 = vmatprep.mubr.bf16.mxu1 %v13338_v17  ;;  %13039 = vmatprep.mubr.bf16.mxu0 %v11725_v44  ;;  %v9866_v3 = vrot.slane %v9864_v49, 5  ;;  %v9872_v29 = vrot.slane %v9870_v2, 5  ;;  %v17335_v45 = vadd.f32 %v17235_v19, %v6618_v52  ;;  %v17338_v11 = vadd.f32 %v17247_v25, %v12702_v58  ;;  %v17348_v25 = vld [vmem:[#allocation2 + $0xd0] sm:$0xf] }
 0x36f   : > { %v9849_v17 = vsel %vm13478_vm5, %v9844_v8, %v9848_v38  ;;  %v9854_v31 = vrot.slane %v9853_v22, 4  ;;  %v9858_v18 = vrot.slane %v9856_v16, 5  ;;  %v9876_v9 = vrot.slane %v9874_v10, 4  ;;  %v6621_v15 = vpop.f32.mrf.mxu1  ;;  %v17342_v61 = vpop.f32.mrf.mxu0  ;;  %18441 = vst [vmem:[#allocation40_spill] sm:$0xff] %v17348_v25  ;;  %v13340_v38 = vld [vmem:[#allocation2 + $0xb4] sm:$0xff]  }
 0x370   : > { %18438 = vst [vmem:[#allocation27_spill] sm:$0xff] %v17335_v45  ;;  %18439 = vst [vmem:[#allocation31_spill] sm:$0xff] %v17338_v11  ;;  %v9867_v44 = vor.u32 %v9866_v3, %v9863_v37  ;;  %v9882_v49 = vrot.slane %v9880_v55, 5  ;;  %v17345_v2 = vadd.f32 %v17261_v7, %v6621_v15  ;;  %v10296_v19 = vrot.slane %v16994_v27, 5  ;;  %v13341_v37 = vld [vmem:[#allocation2 + $0xc0] sm:$0xff]  }
 0x371   : > { %v9859_v52 = vsel %vm13478_vm5, %v9854_v31, %v9858_v18  ;;  %v9877_v58 = vor.u32 %v9876_v9, %v9872_v29  ;;  %v17352_v22 = vpop.f32.mrf.mxu0  ;;  %v11737_v10 = vrot.slane %v10230_v6, 9  ;;  %v9885_v16 = vshrl.u32 %v9521_v33, 16  ;;  %v17355_v27 = vld [vmem:[#allocation2 + $0xd4] sm:$0x1] }
 0x372   : > { %18440 = vst [vmem:[#allocation34_spill] sm:$0xff] %v17345_v2  ;;  %v11726_v8 = vcombine.low %v9849_v17, %v9859_v52  ;;  %v9868_v11 = vrot.slane %v9867_v44, 4  ;;  %v10298_v55 = vrot.slane %v10296_v19, 4  ;;  %v10299_v7 = vrot.slane %v16999_v56, 5  ;;  %v10231_v44 = vld [vmem:[#allocation2 + $0x24] sm:$0xe] }
 0x373   : > { %v9878_v15 = vrot.slane %v9877_v58, 4  ;;  %v12705_v3 = vpop.f32.mrf.mxu1  ;;  %v9887_v2 = vrot.slane %v9885_v16, 4  ;;  %v9888_v45 = vshll.u32 %v9521_v33, 16  ;;  %v9894_v31 = vshll.u32 %v17348_v25, 16  ;;  %v17358_v18 = vpop.f32.mrf.mxu0 }
 0x374   : > { %13040 = vmatmul.mubr.bf16.gmra.mxu0 %v11726_v8  ;;  %v9873_v6 = vsel %vm13478_vm5, %v9868_v11, %v9872_v29  ;;  %v17363_v17 = vadd.f32 %v17266_v63, %v12705_v3  ;;  %v10300_v56 = vsel %vm13519_vm8, %v10298_v55, %v10299_v7  ;;  %v9898_v9 = vshrl.u32 %v17348_v25, 16  ;;  %v10232_v63 = vld [vmem:[#allocation2 + $0x30] sm:$0xe] }
 0x375   : > { %12992 = vmatmul.mubr.bf16.gmra.mxu1 %v13340_v38  ;;  %v9883_v33 = vsel %vm13478_vm5, %v9878_v15, %v9882_v49  ;;  %v6634_v52 = vpop.f32.mrf.mxu1  ;;  %v10297_v58 = vsel %vm13519_vm8, %v11737_v10, %v10296_v19  ;;  %v9890_v38 = vrot.slane %v9888_v45, 5  ;;  %v9896_v16 = vrot.slane %v9894_v31, 5  ;;  %v17372_v29 = vpop.f32.mrf.mxu0  ;;  %v13343_v3 = vld [vmem:[#allocation2 + $0xcc] sm:$0xff]  }
 0x376   : > { %18442 = vst [vmem:[#allocation35_spill] sm:$0xff] %v17363_v17  ;;  %12995 = vmatprep.mubr.bf16.mxu1 %v13341_v37  ;;  %v11727_v11 = vcombine.low %v9873_v6, %v9883_v33  ;;  %v17375_v8 = vadd.f32 %v17277_v32, %v6634_v52  ;;  %v9900_v37 = vrot.slane %v9898_v9, 4  ;;  %v9904_v55 = vshll.u32 %v17355_v27, 16  ;;  %v10233_v6 = vld [vmem:[#allocation2 + $0x3c] sm:$0xe] }
 0x377   : > { %v12706_v7 = vpop.f32.mrf.mxu1  ;;  %v11769_v17 = vcombine.low %v10297_v58, %v10300_v56  ;;  %v9891_v49 = vor.u32 %v9890_v38, %v9887_v2  ;;  %v17378_v15 = vpop.f32.mrf.mxu0  ;;  %v11738_v25 = vrot.slane %v10231_v44, 9  ;;  %v10303_v45 = vrot.slane %v17019_v59, 5  ;;  %v10234_v38 = vld [vmem:[#allocation2 + $0x48] sm:$0xe] }
 0x378   : > { %18443 = vst [vmem:[#allocation42_spill] sm:$0xff] %v17375_v8  ;;  %13043 = vmatprep.mubr.bf16.mxu0 %v11727_v11  ;;  %v17382_v19 = vadd.f32 %v17283_v54, %v12706_v7  ;;  %v9901_v10 = vor.u32 %v9900_v37, %v9896_v16  ;;  %v9906_v31 = vrot.slane %v9904_v55, 5  ;;  %v11739_v32 = vrot.slane %v10232_v63, 9 }
 0x379   : > { %v6637_v9 = vpop.f32.mrf.mxu1  ;;  %v9892_v33 = vrot.slane %v9891_v49, 4  ;;  %v10305_v52 = vrot.slane %v10303_v45, 4  ;;  %v10306_v8 = vrot.slane %v17026_v14, 5  ;;  %v17385_v56 = vpop.f32.mrf.mxu0  ;;  %v10310_v2 = vrot.slane %v17046_v24, 5 }
 0x37a   : > { %v17389_v44 = vadd.f32 %v17294_v41, %v6637_v9  ;;  %v9902_v59 = vrot.slane %v9901_v10, 4  ;;  %v10304_v54 = vsel %vm13519_vm8, %v11738_v25, %v10303_v45  ;;  %v10313_v58 = vrot.slane %v17053_v39, 5 }
 0x37b   : > { %v12709_v63 = vpop.f32.mrf.mxu1  ;;  %v9897_v11 = vsel %vm13478_vm5, %v9892_v33, %v9896_v16  ;;  %v10307_v14 = vsel %vm13519_vm8, %v10305_v52, %v10306_v8  ;;  %v10312_v37 = vrot.slane %v10310_v2, 4  ;;  %v17398_v24 = vpop.f32.mrf.mxu0  ;;  %v11740_v41 = vrot.slane %v10233_v6, 9  ;;  %v10235_v16 = vld [vmem:[#allocation2 + $0x54] sm:$0xe] }
 0x37c   : > { %v17401_v55 = vadd.f32 %v17307_v46, %v12709_v63  ;;  %v9907_v39 = vsel %vm13478_vm5, %v9902_v59, %v9906_v31  ;;  %v10311_v25 = vsel %vm13519_vm8, %v11739_v32, %v10310_v2  ;;  %v10317_v7 = vrot.slane %v17062_v60, 5  ;;  %v10236_v32 = vld [vmem:[#allocation2 + $0x60] sm:$0xe] }
 0x37d   : > { %12996 = vmatmul.mubr.bf16.gmra.mxu1 %v13343_v3  ;;  %v6650_v3 = vpop.f32.mrf.mxu1  ;;  %v11728_v49 = vcombine.low %v9897_v11, %v9907_v39  ;;  %v11770_v8 = vcombine.low %v10304_v54, %v10307_v14  ;;  %v10314_v45 = vsel %vm13519_vm8, %v10312_v37, %v10313_v58  ;;  %v17410_v10 = vpop.f32.mrf.mxu0  ;;  %v11741_v46 = vrot.slane %v10234_v38, 9  ;;  %v10237_v38 = vld [vmem:[#allocation2 + $0x6c] sm:$0xe] }
 0x37e   : > { %13063 = vmatprep.mubr.bf16.mxu1 %v11769_v17  ;;  %v17413_v17 = vadd.f32 %v17315_v5, %v6650_v3  ;;  %v11771_v42 = vcombine.low %v10311_v25, %v10314_v45  ;;  %v10319_v31 = vrot.slane %v10317_v7, 4  ;;  %v10320_v6 = vrot.slane %v17068_v28, 5 }
 0x37f   : > { %13044 = vmatmul.mubr.bf16.gmra.mxu0 %v11728_v49  ;;  %v12710_v60 = vpop.f32.mrf.mxu1  ;;  %v17416_v9 = vpop.f32.mrf.mxu0  ;;  %v17420_v33 = vsel %vm13519_vm8, %v11740_v41, %v10317_v7  ;;  %v10324_v52 = vrot.slane %v17079_v1, 5  ;;  %v11742_v2 = vrot.slane %v10235_v16, 9  ;;  %v10331_v59 = vrot.slane %v17110_v40, 5  ;;  %v10238_v49 = vld [vmem:[#allocation2 + $0x78] sm:$0xe] }
 0x380   : > { %v17425_v5 = vadd.f32 %v17327_v26, %v12710_v60  ;;  %v10321_v28 = vsel %vm13519_vm8, %v10319_v31, %v10320_v6  ;;  %v10327_v54 = vrot.slane %v17087_v34, 5  ;;  %v10334_v58 = vrot.slane %v17114_v35, 5  ;;  %v10239_v31 = vld [vmem:[#allocation2 + $0x84] sm:$0xe] }
 0x381   : > { %v6653_v63 = vpop.f32.mrf.mxu1  ;;  %v11772_v11 = vcombine.low %v17420_v33, %v10321_v28  ;;  %v17432_v14 = vpop.f32.mrf.mxu0  ;;  %v10325_v1 = vsel %vm13519_vm8, %v11741_v46, %v10324_v52  ;;  %v10326_v40 = vrot.slane %v10324_v52, 4  ;;  %v11743_v37 = vrot.slane %v10236_v32, 9 }
 0x382   : > { %v17437_v26 = vadd.f32 %v17332_v30, %v6653_v63  ;;  %v17441_v41 = vsel %vm13519_vm8, %v11742_v2, %v10331_v59  ;;  %v10333_v34 = vrot.slane %v10331_v59, 4  ;;  %v10338_v35 = vrot.slane %v17128_v12, 5 }
 0x383   : > { %v12777_v39 = vpop.f32.mrf.mxu1  ;;  %v10328_v25 = vsel %vm13519_vm8, %v10326_v40, %v10327_v54  ;;  %v17446_v7 = vpop.f32.mrf.mxu0  ;;  %v10341_v16 = vrot.slane %v17133_v53, 5  ;;  %v11744_v3 = vrot.slane %v10237_v38, 9  ;;  %v10345_v30 = vrot.slane %v17155_v50, 5  ;;  %v10240_v38 = vld [vmem:[#allocation2 + $0x90] sm:$0xe] }
 0x384   : > { %v17451_v45 = vadd.f32 %v12777_v39, %v17085_v47  ;;  %v11773_v46 = vcombine.low %v10325_v1, %v10328_v25  ;;  %v17455_v12 = vsel %vm13519_vm8, %v10333_v34, %v10334_v58  ;;  %v17464_v50 = vsel %vm13519_vm8, %v11743_v37, %v10338_v35  ;;  %v10241_v37 = vld [vmem:[#allocation2 + $0x9c] sm:$0xe] }
 0x385   : > { %13064 = vmatmul.mubr.bf16.vlgmr.msra.gmra.mxu1 %v11770_v8  ;;  %v10348_v8 = vrot.slane %v17157_v48, 5  ;;  %v7293_v6 = vpop.f32.mrf.mxu1  ;;  %v17458_v32 = vpop.f32.mrf.mxu0  ;;  %v10340_v47 = vrot.slane %v10338_v35, 4  ;;  %v17471_v33 = vsel %vm13519_vm8, %v11744_v3, %v10345_v30  ;;  %v11745_v48 = vrot.slane %v10238_v49, 9 }
 0x386   : > { %13067 = vmatprep.mubr.bf16.mxu1 %v11771_v42  ;;  %v10347_v42 = vrot.slane %v10345_v30, 4  ;;  %v17467_v60 = vadd.f32 %v7293_v6, %v17104_v23  ;;  %v10352_v52 = vrot.slane %v17181_v21, 5  ;;  %v11746_v23 = vrot.slane %v10239_v31, 9  ;;  %v18444_v30 = vld [vmem:[#allocation28_spill] sm:$0xff] }
 0x387   : > { %v12778_v2 = vpop.f32.mrf.mxu1  ;;  %v17474_v59 = vpop.f32.mrf.mxu0  ;;  %v17478_v28 = vsel %vm13519_vm8, %v10340_v47, %v10341_v16  ;;  %v10359_v58 = vrot.slane %v17199_v43, 5  ;;  %v10355_v40 = vrot.slane %v17169_v51, 5  ;;  %v11747_v51 = vrot.slane %v10240_v38, 9 }
 0x388   : > { %v17482_v54 = vsel %vm13519_vm8, %v10347_v42, %v10348_v8  ;;  %v17486_v63 = vadd.f32 %v12778_v2, %v17108_v13  ;;  %v11775_v21 = vcombine.low %v17464_v50, %v17478_v28  ;;  %v17497_v39 = vsel %vm13519_vm8, %v11745_v48, %v10352_v52  ;;  %v18445_v50 = vld [vmem:[#allocation15_spill] sm:$0xff]  ;;  %v10242_v42 = vld [vmem:[#allocation2 + $0xa8] sm:$0xe]  ;;  %v18446_v48 = vld [vmem:[#allocation12_spill] sm:$0xff] }
 0x389   : > { %v7296_v34 = vpop.f32.mrf.mxu1  ;;  %v17493_v35 = vpop.f32.mrf.mxu0  ;;  %v10354_v43 = vrot.slane %v10352_v52, 4  ;;  %v10361_v25 = vrot.slane %v10359_v58, 4  ;;  %v10362_v13 = vrot.slane %v17209_v0, 5  ;;  %v17505_v3 = vsel %vm13519_vm8, %v11746_v23, %v10359_v58  ;;  %v18447_v28 = vld [vmem:[#allocation9_spill] sm:$0xff]  ;;  %v10243_v58 = vld [vmem:[#allocation2 + $0xb4] sm:$0xe] }
 0x38a   : > { %v17501_v16 = vadd.f32 %v7296_v34, %v17298_v4  ;;  %v10366_v49 = vrot.slane %v18444_v30, 5  ;;  %v11748_v4 = vrot.slane %v10241_v37, 9  ;;  %v10373_v47 = vrot.slane %v18445_v50, 5 }
 0x38b   : > { %v12781_v8 = vpop.f32.mrf.mxu1  ;;  %v17508_v31 = vpop.f32.mrf.mxu0  ;;  %v17512_v6 = vsel %vm13519_vm8, %v10354_v43, %v10355_v40  ;;  %v17516_v0 = vsel %vm13519_vm8, %v10361_v25, %v10362_v13  ;;  %v10369_v23 = vrot.slane %v18447_v28, 5  ;;  %v18448_v25 = vld [vmem:[#allocation10_spill] sm:$0xff]  ;;  %v18449_v13 = vld [vmem:[#allocation8_spill] sm:$0xff]  ;;  %v11749_v50 = vrot.slane %v10242_v42, 9 }
 0x38c   : > { %v7426_v52 = vadd.f32 %v12781_v8, %v18446_v48  ;;  %v17529_v37 = vsel %vm13519_vm8, %v11747_v51, %v10366_v49  ;;  %v10368_v34 = vrot.slane %v10366_v49, 4  ;;  %v10375_v43 = vrot.slane %v10373_v47, 4 }
 0x38d   : > { %13068 = vmatmul.mubr.bf16.gmra.mxu1 %v11772_v11  ;;  %v7309_v38 = vpop.f32.mrf.mxu1  ;;  %v17525_v40 = vpop.f32.mrf.mxu0  ;;  %v17535_v8 = vsel %vm13519_vm8, %v11748_v4, %v10373_v47  ;;  %v10380_v48 = vrot.slane %v17268_v57, 5 }
 0x38e   : > { %13071 = vmatprep.mubr.bf16.mxu1 %v11773_v46  ;;  %v10376_v46 = vrot.slane %v18448_v25, 5  ;;  %v7424_v30 = vadd.f32 %v7309_v38, %v18449_v13  ;;  %v17542_v51 = vsel %vm13519_vm8, %v10368_v34, %v10369_v23  ;;  %v11750_v25 = vrot.slane %v10243_v58, 9  ;;  %v18450_v13 = vld [vmem:[#allocation21_spill] sm:$0xff] }
 0x38f   : > { %v12782_v28 = vpop.f32.mrf.mxu1  ;;  %v17538_v2 = vpop.f32.mrf.mxu0  ;;  %v10387_v38 = vrot.slane %v17292_v62, 5  ;;  %v11779_v47 = vcombine.low %v17529_v37, %v17542_v51  ;;  %v10382_v23 = vrot.slane %v10380_v48, 4  ;;  %v18451_v34 = vld [vmem:[#allocation13_spill] sm:$0xff]  ;;  %v17566_v51 = vsel %vm13519_vm8, %v11749_v50, %v10380_v48 }
 0x390   : > { %v17546_v49 = vsel %vm13519_vm8, %v10375_v43, %v10376_v46  ;;  %v7427_v4 = vadd.f32 %v12782_v28, %v18450_v13  ;;  %v10383_v1 = vrot.slane %v18451_v34, 5  ;;  %v10390_v43 = vrot.slane %v17309_v36, 5  ;;  %v18452_v58 = vld [vmem:[#allocation17_spill] sm:$0xff] }
 0x391   : > { %v11780_v57 = vcombine.low %v17535_v8, %v17546_v49  ;;  %v7312_v42 = vpop.f32.mrf.mxu1  ;;  %v17554_v11 = vpop.f32.mrf.mxu0  ;;  %v10389_v53 = vrot.slane %v10387_v38, 4  ;;  %v18453_v28 = vcombine.low %v17441_v41, %v17455_v12  ;;  %v17574_v36 = vsel %vm13519_vm8, %v11750_v25, %v10387_v38  ;;  %v18454_v41 = vld [vmem:[#allocation25_spill] sm:$0xff] }
 0x392   : > { %v7425_v46 = vadd.f32 %v7312_v42, %v18452_v58  ;;  %v17570_v13 = vsel %vm13519_vm8, %v10382_v23, %v10383_v1  ;;  %v18455_v23 = vld [vmem:[#allocation24_spill] sm:$0xff]  ;;  %v17590_v25 = vadd.f32 %v17342_v61, %v17451_v45  ;;  %v18456_v61 = vld [vmem:[#allocation29_spill] sm:$0xff] }
 0x393   : > { %v12785_v62 = vpop.f32.mrf.mxu1  ;;  %v17562_v37 = vpop.f32.mrf.mxu0  ;;  %v17578_v42 = vsel %vm13519_vm8, %v10389_v53, %v10390_v43  ;;  %v11781_v34 = vcombine.low %v17566_v51, %v17570_v13  ;;  %v17594_v53 = vadd.f32 %v17352_v22, %v17467_v60 }
 0x394   : > { %v7430_v12 = vadd.f32 %v12785_v62, %v18454_v41  ;;  %v11782_v50 = vcombine.low %v17574_v36, %v17578_v42  ;;  %v17604_v62 = vadd.f32 %v17372_v29, %v17501_v16  ;;  %v17611_v41 = vadd.f32 %v17385_v56, %v7424_v30  ;;  %v18457_v16 = vld [vmem:[#allocation26_spill] sm:$0xff] }
 0x395   : > { %13072 = vmatmul.mubr.bf16.gmra.mxu1 %v18453_v28  ;;  %v7325_v48 = vpop.f32.mrf.mxu1  ;;  %v17585_v1 = vpop.f32.mrf.mxu0  ;;  %v17607_v28 = vadd.f32 %v17378_v15, %v7426_v52 }
 0x396   : > { %13075 = vmatprep.mubr.bf16.mxu1 %v11775_v21  ;;  %v7428_v58 = vadd.f32 %v7325_v48, %v18455_v23  ;;  %v17598_v21 = vadd.f32 %v17358_v18, %v17486_v63  ;;  %v17616_v18 = vadd.f32 %v17398_v24, %v7427_v4  ;;  %v17619_v63 = vadd.f32 %v17410_v10, %v7425_v46  ;;  %v18459_v10 = vld [vmem:[#allocation30_spill] sm:$0xff] }
 0x397   : > { %v12786_v38 = vpop.f32.mrf.mxu1  ;;  %v17600_v43 = vpop.f32.mrf.mxu0  ;;  %v17622_v29 = vadd.f32 %v17416_v9, %v7430_v12  ;;  %v18458_v48 = vcombine.low %v17471_v33, %v17482_v54  ;;  %v18460_v9 = vcombine.low %v17497_v39, %v17512_v6 }
 0x398   : > { %v7431_v45 = vadd.f32 %v12786_v38, %v18456_v61  ;;  %v17625_v15 = vadd.f32 %v17432_v14, %v7428_v58  ;;  %v18462_v38 = vld [vmem:[#allocation32_spill] sm:$0xff] }
 0x399   : > { %v7328_v22 = vpop.f32.mrf.mxu1  ;;  %v17613_v60 = vpop.f32.mrf.mxu0 }
 0x39a   : > { %v7429_v52 = vadd.f32 %v7328_v22, %v18457_v16  ;;  %v17629_v56 = vadd.f32 %v17446_v7, %v7431_v45  ;;  %v18461_v7 = vld [vmem:[#allocation6_spill] sm:$0xff] }
 0x39b   : > { %v12789_v30 = vpop.f32.mrf.mxu1  ;;  %v17634_v24 = vpop.f32.mrf.mxu0 }
 0x39c   : > { %v7434_v4 = vadd.f32 %v12789_v30, %v18459_v10  ;;  %v17641_v14 = vadd.f32 %v17458_v32, %v7429_v52  ;;  %v18463_v32 = vld [vmem:[#allocation7_spill] sm:$0xff] }
 0x39d   : > { %13076 = vmatmul.mubr.bf16.gmra.mxu1 %v18458_v48  ;;  %v7341_v46 = vpop.f32.mrf.mxu1  ;;  %v17643_v12 = vpop.f32.mrf.mxu0  ;;  %v18465_v48 = vld [vmem:[#allocation18_spill] sm:$0xff] }
 0x39e   : > { %13079 = vmatprep.mubr.bf16.mxu1 %v18460_v9  ;;  %v7432_v23 = vadd.f32 %v7341_v46, %v18461_v7  ;;  %v17647_v58 = vadd.f32 %v17474_v59, %v7434_v4  ;;  %v18464_v59 = vcombine.low %v17505_v3, %v17516_v0  ;;  %v18466_v46 = vld [vmem:[#allocation20_spill] sm:$0xff]  ;;  %v18467_v3 = vld [vmem:[#allocation11_spill] sm:$0xff] }
 0x39f   : > { %v12790_v33 = vpop.f32.mrf.mxu1  ;;  %v17649_v54 = vpop.f32.mrf.mxu0  ;;  %v10394_v0 = vrot.slane %v18467_v3, 5 }
 0x3a0   : > { %v7435_v61 = vadd.f32 %v12790_v33, %v18462_v38  ;;  %v17653_v45 = vadd.f32 %v17493_v35, %v7432_v23  ;;  %v18468_v38 = vld [vmem:[#allocation19_spill] sm:$0xff] }
 0x3a1   : > { %v7344_v39 = vpop.f32.mrf.mxu1  ;;  %v17655_v6 = vpop.f32.mrf.mxu0 }
 0x3a2   : > { %v7433_v22 = vadd.f32 %v7344_v39, %v18463_v32  ;;  %v17659_v16 = vadd.f32 %v17508_v31, %v7435_v61  ;;  %v18469_v32 = vld [vmem:[#allocation16_spill] sm:$0xff] }
 0x3a3   : > { %v12793_v52 = vpop.f32.mrf.mxu1  ;;  %v17664_v30 = vpop.f32.mrf.mxu0 }
 0x3a4   : > { %v7438_v10 = vadd.f32 %v12793_v52, %v18465_v48  ;;  %v17668_v35 = vadd.f32 %v17525_v40, %v7433_v22  ;;  %v10244_v52 = vld [vmem:[#allocation2 + $0xc0] sm:$0xe]  ;;  %v10396_v48 = vrot.slane %v10394_v0, 4 }
 0x3a5   : > { %13080 = vmatmul.mubr.bf16.gmra.mxu1 %v18464_v59  ;;  %v7357_v4 = vpop.f32.mrf.mxu1  ;;  %v17670_v9 = vpop.f32.mrf.mxu0 }
 0x3a6   : > { %13083 = vmatprep.mubr.bf16.mxu1 %v11779_v47  ;;  %v7436_v7 = vadd.f32 %v7357_v4, %v18466_v46  ;;  %v17674_v31 = vadd.f32 %v17538_v2, %v7438_v10  ;;  %v18470_v4 = vld [vmem:[#allocation14_spill] sm:$0xff]  ;;  %v10245_v46 = vld [vmem:[#allocation2 + $0xcc] sm:$0xe] }
 0x3a7   : > { %v12794_v23 = vpop.f32.mrf.mxu1  ;;  %v17676_v33 = vpop.f32.mrf.mxu0 }
 0x3a8   : > { %v7439_v61 = vadd.f32 %v12794_v23, %v18468_v38  ;;  %v17681_v47 = vadd.f32 %v17554_v11, %v7436_v7  ;;  %v18471_v7 = vld [vmem:[#allocation40_spill] sm:$0xff]  ;;  %v11751_v38 = vrot.slane %v10244_v52, 9  ;;  %v10404_v52 = vrot.slane %v17355_v27, 5 }
 0x3a9   : > { %v7360_v40 = vpop.f32.mrf.mxu1  ;;  %v17683_v39 = vpop.f32.mrf.mxu0  ;;  %v10401_v23 = vrot.slane %v18471_v7, 5 }
 0x3aa   : > { %v7437_v22 = vadd.f32 %v7360_v40, %v18469_v32  ;;  %v17687_v59 = vadd.f32 %v17562_v37, %v7439_v61  ;;  %v18472_v61 = vld [vmem:[#allocation22_spill] sm:$0xff] }
 0x3ab   : > { %v12797_v2 = vpop.f32.mrf.mxu1  ;;  %v17692_v10 = vpop.f32.mrf.mxu0  ;;  %v10397_v8 = vrot.slane %v18472_v61, 5 }
 0x3ac   : > { %v7442_v11 = vadd.f32 %v12797_v2, %v18470_v4  ;;  %v17700_v37 = vadd.f32 %v17585_v1, %v7437_v22  ;;  %v18474_v4 = vld [vmem:[#allocation31_spill] sm:$0xff]  ;;  %v10403_v22 = vrot.slane %v10401_v23, 4 }
 0x3ad   : > { %13084 = vmatmul.mubr.bf16.gmra.mxu1 %v11780_v57  ;;  %v7373_v3 = vpop.f32.mrf.mxu1  ;;  %v7794_v49 = vpop.f32.mrf.mxu0  ;;  %v18473_v57 = vld [vmem:[#allocation27_spill] sm:$0xff]  ;;  %v10398_v51 = vsel %vm13519_vm8, %v10396_v48, %v10397_v8 }
 0x3ae   : > { %13087 = vmatprep.mubr.bf16.mxu1 %v11781_v34  ;;  %v7440_v40 = vadd.f32 %v7373_v3, %v18473_v57  ;;  %v17705_v32 = vadd.f32 %v17600_v43, %v7442_v11  ;;  %v11752_v34 = vrot.slane %v10245_v46, 9  ;;  %v10395_v43 = vsel %vm13519_vm8, %v11751_v38, %v10394_v0  ;;  %v18475_v3 = vld [vmem:[#allocation34_spill] sm:$0xff] }
 0x3af   : > { %v12798_v2 = vpop.f32.mrf.mxu1  ;;  %v11783_v48 = vcombine.low %v10395_v43, %v10398_v51  ;;  %v10405_v38 = vsel %vm13519_vm8, %v10403_v22, %v10404_v52 }
 0x3b0   : > { %v17709_v13 = vpop.f32.mrf.mxu0  ;;  %v7443_v1 = vadd.f32 %v12798_v2, %v18474_v4  ;;  %v17714_v7 = vadd.f32 %v17613_v60, %v7440_v40  ;;  %v18476_v60 = vld [vmem:[#allocation35_spill] sm:$0xff]  ;;  %v10402_v0 = vsel %vm13519_vm8, %v11752_v34, %v10401_v23  ;;  %v18477_v4 = vld [vmem:[#allocation42_spill] sm:$0xff] }
 0x3b1   : > { %v7376_v61 = vpop.f32.mrf.mxu1 }
 0x3b2   : > { %v17718_v11 = vpop.f32.mrf.mxu0  ;;  %v7441_v57 = vadd.f32 %v7376_v61, %v18475_v3  ;;  %v17722_v8 = vadd.f32 %v17634_v24, %v7443_v1  ;;  %v11784_v1 = vcombine.low %v10402_v0, %v10405_v38 }
 0x3b4   : > { %v12801_v46 = vpop.f32.mrf.mxu1  ;;  %v17727_v27 = vpop.f32.mrf.mxu0  ;;  %v17735_v2 = vadd.f32 %v17643_v12, %v7441_v57 }
 0x3b5   : > { %13088 = vmatmul.mubr.bf16.gmra.mxu1 %v11782_v50  ;;  %v7446_v40 = vadd.f32 %v12801_v46, %v18476_v60 }
 0x3b6   : > { %13091 = vmatprep.mubr.bf16.mxu1 %v11783_v48  ;;  %v7389_v24 = vpop.f32.mrf.mxu1  ;;  %v17737_v51 = vpop.f32.mrf.mxu0 }
 0x3b7   : > { %v7444_v36 = vadd.f32 %v7389_v24, %v18477_v4  ;;  %v17741_v42 = vadd.f32 %v17649_v54, %v7446_v40 }
 0x3b8   : > { %v12802_v50 = vpop.f32.mrf.mxu1  ;;  %v17743_v61 = vpop.f32.mrf.mxu0 }
 0x3b9   : > { %v7447_v23 = vadd.f32 %v12802_v50, %v17382_v19  ;;  %v17747_v20 = vadd.f32 %v17655_v6, %v7444_v36 }
 0x3ba   : > { %v7392_v34 = vpop.f32.mrf.mxu1  ;;  %v17749_v12 = vpop.f32.mrf.mxu0 }
 0x3bb   : > { %v7445_v22 = vadd.f32 %v7392_v34, %v17389_v44  ;;  %v17753_v52 = vadd.f32 %v17664_v30, %v7447_v23 }
 0x3bc   : > { %v17755_v54 = vpop.f32.mrf.mxu0 }
 0x3bd   : > { %v12805_v43 = vpop.f32.mrf.mxu1  ;;  %13092 = vmatmul.mubr.bf16.gmra.mxu1 %v11784_v1  ;;  %v17759_v57 = vadd.f32 %v17670_v9, %v7445_v22 }
 0x3be   : > { %v7450_v3 = vadd.f32 %v12805_v43, %v17401_v55  ;;  %v17761_v6 = vpop.f32.mrf.mxu0 }
 0x3bf   : > { %v7405_v19 = vpop.f32.mrf.mxu1 }
 0x3c0   : > { %v7448_v48 = vadd.f32 %v7405_v19, %v17413_v17  ;;  %v17765_v46 = vadd.f32 %v17676_v33, %v7450_v3  ;;  %v17767_v30 = vpop.f32.mrf.mxu0 }
 0x3c1   : > { %v12806_v44 = vpop.f32.mrf.mxu1 }
 0x3c2   : > { %v7451_v60 = vadd.f32 %v12806_v44, %v17425_v5  ;;  %v17771_v40 = vadd.f32 %v17683_v39, %v7448_v48  ;;  %v17773_v0 = vpop.f32.mrf.mxu0 }
 0x3c3   : > { %v7408_v55 = vpop.f32.mrf.mxu1 }
 0x3c4   : > { %v7449_v9 = vadd.f32 %v7408_v55, %v17437_v26  ;;  %v17777_v38 = vadd.f32 %v17692_v10, %v7451_v60  ;;  %v17779_v24 = vpop.f32.mrf.mxu0 }
 0x3c5   : > { %v12873_v17 = vpop.f32.mrf.mxu1 }
 0x3c6   : > { %v17782_v33 = vadd.f32 %v12873_v17, %v17590_v25  ;;  %v17784_v4 = vadd.f32 %v7794_v49, %v7449_v9  ;;  %v17786_v36 = vpop.f32.mrf.mxu0 }
 0x3c7   : > { %v8433_v5 = vpop.f32.mrf.mxu1 }
 0x3c8   : > { %v17789_v39 = vadd.f32 %v8433_v5, %v17594_v53  ;;  %v17791_v1 = vpop.f32.mrf.mxu0 }
 0x3c9   : > { %v12874_v50 = vpop.f32.mrf.mxu1 }
 0x3ca   : > { %v17794_v26 = vadd.f32 %v12874_v50, %v17598_v21  ;;  %v17796_v23 = vpop.f32.mrf.mxu0 }
 0x3cb   : > { %v8436_v10 = vpop.f32.mrf.mxu1 }
 0x3cc   : > { %v17799_v25 = vadd.f32 %v8436_v10, %v17604_v62  ;;  %v17801_v34 = vpop.f32.mrf.mxu0 }
 0x3cd   : > { %v12877_v49 = vpop.f32.mrf.mxu1  ;;  %18478 = vst [vmem:[#allocation36_spill] sm:$0xff] %v17801_v34 }
 0x3ce   : > { %v17804_v22 = vadd.f32 %v12877_v49, %v17607_v28  ;;  %v17806_v43 = vpop.f32.mrf.mxu0 }
 0x3cf   : > { %v8449_v53 = vpop.f32.mrf.mxu1  ;;  %18479 = vst [vmem:[#allocation37_spill] sm:$0xff] %v17806_v43 }
 0x3d0   : > { %v17809_v3 = vadd.f32 %v8449_v53, %v17611_v41  ;;  %v17811_v19 = vpop.f32.mrf.mxu0 }
 0x3d1   : > { %v12878_v21 = vpop.f32.mrf.mxu1  ;;  %18480 = vst [vmem:[#allocation38_spill] sm:$0xff] %v17811_v19 }
 0x3d2   : > { %v17814_v48 = vadd.f32 %v12878_v21, %v17616_v18  ;;  %v17816_v44 = vpop.f32.mrf.mxu0 }
 0x3d3   : > { %v8452_v62 = vpop.f32.mrf.mxu1  ;;  %18481 = vst [vmem:[#allocation55_spill] sm:$0xff] %v17816_v44 }
 0x3d4   : > { %v17819_v60 = vadd.f32 %v8452_v62, %v17619_v63  ;;  %v17821_v55 = vpop.f32.mrf.mxu0 }
 0x3d5   : > { %v12881_v28 = vpop.f32.mrf.mxu1  ;;  %18482 = vst [vmem:[#allocation45_spill] sm:$0xff] %v17821_v55 }
 0x3d6   : > { %v17824_v9 = vadd.f32 %v12881_v28, %v17622_v29  ;;  %v17826_v17 = vpop.f32.mrf.mxu0 }
 0x3d7   : > { %v8465_v41 = vpop.f32.mrf.mxu1  ;;  %18483 = vst [vmem:[#allocation39_spill] sm:$0xff] %v17826_v17 }
 0x3d8   : > { %v17829_v5 = vadd.f32 %v8465_v41, %v17625_v15  ;;  %v17831_v50 = vpop.f32.mrf.mxu0 }
 0x3d9   : > { %v12882_v18 = vpop.f32.mrf.mxu1  ;;  %18484 = vst [vmem:[#allocation47_spill] sm:$0xff] %v17831_v50 }
 0x3da   : > { %v17834_v10 = vadd.f32 %v12882_v18, %v17629_v56  ;;  %v17836_v49 = vpop.f32.mrf.mxu0 }
 0x3db   : > { %v8468_v63 = vpop.f32.mrf.mxu1  ;;  %18485 = vst [vmem:[#allocation41_spill] sm:$0xff] %v17836_v49 }
 0x3dc   : > { %v17839_v53 = vadd.f32 %v8468_v63, %v17641_v14  ;;  %v17841_v21 = vpop.f32.mrf.mxu0 }
 0x3dd   : > { %v12885_v29 = vpop.f32.mrf.mxu1  ;;  %18486 = vst [vmem:[#allocation43_spill] sm:$0xff] %v17841_v21 }
 0x3de   : > { %v17844_v62 = vadd.f32 %v12885_v29, %v17647_v58  ;;  %v17849_v50 = vpop.f32.mrf.mxu0 }
 0x3df   : > { %v8481_v15 = vpop.f32.mrf.mxu1  ;;  %18487 = vst [vmem:[#allocation44_spill] sm:$0xff] %v17849_v50 }
 0x3e0   : > { %v17847_v28 = vadd.f32 %v8481_v15, %v17653_v45  ;;  %v17857_v49 = vpop.f32.mrf.mxu0 }
 0x3e1   : > { %v12886_v41 = vpop.f32.mrf.mxu1  ;;  %18490 = vst [vmem:[#allocation62_spill] sm:$0xff] %v17857_v49 }
 0x3e2   : > { %v17852_v56 = vadd.f32 %v12886_v41, %v17659_v16  ;;  %v17865_v21 = vpop.f32.mrf.mxu0 }
 0x3e3   : > { %v8484_v18 = vpop.f32.mrf.mxu1  ;;  %18493 = vst [vmem:[#allocation54_spill] sm:$0xff] %v17865_v21 }
 0x3e4   : > { %18488 = vst [vmem:[#allocation51_spill] sm:$0xff] %v17852_v56  ;;  %v17855_v14 = vadd.f32 %v8484_v18, %v17668_v35  ;;  %v17873_v50 = vpop.f32.mrf.mxu0 }
 0x3e5   : > { %v12889_v63 = vpop.f32.mrf.mxu1  ;;  %18496 = vst [vmem:[#allocation57_spill] sm:$0xff] %v17873_v50 }
 0x3e6   : > { %18489 = vst [vmem:[#allocation46_spill] sm:$0xff] %v17855_v14  ;;  %v17860_v58 = vadd.f32 %v12889_v63, %v17674_v31  ;;  %v17881_v49 = vpop.f32.mrf.mxu0 }
 0x3e7   : > { %v8497_v29 = vpop.f32.mrf.mxu1  ;;  %18499 = vst [vmem:[#allocation56_spill] sm:$0xff] %v17881_v49 }
 0x3e8   : > { %18491 = vst [vmem:[#allocation52_spill] sm:$0xff] %v17860_v58  ;;  %v17863_v45 = vadd.f32 %v8497_v29, %v17681_v47 }
 0x3e9   : > { %v12890_v15 = vpop.f32.mrf.mxu1 }
 0x3ea   : > { %18492 = vst [vmem:[#allocation48_spill] sm:$0xff] %v17863_v45  ;;  %v17868_v16 = vadd.f32 %v12890_v15, %v17687_v59 }
 0x3eb   : > { %v8500_v41 = vpop.f32.mrf.mxu1 }
 0x3ec   : > { %18494 = vst [vmem:[#allocation49_spill] sm:$0xff] %v17868_v16  ;;  %v17871_v35 = vadd.f32 %v8500_v41, %v17700_v37  ;;  %v17889_v41 = vpop.f32.mrf.mxu0 }
 0x3ed   : > { %v12893_v18 = vpop.f32.mrf.mxu1  ;;  %18502 = vst [vmem:[#allocation61_spill] sm:$0xff] %v17889_v41 }
 0x3ee   : > { %18495 = vst [vmem:[#allocation50_spill] sm:$0xff] %v17871_v35  ;;  %v17876_v31 = vadd.f32 %v12893_v18, %v17705_v32 }
 0x3ef   : > { %v8513_v63 = vpop.f32.mrf.mxu1 }
 0x3f0   : > { %18497 = vst [vmem:[#allocation53_spill] sm:$0xff] %v17876_v31  ;;  %v17879_v47 = vadd.f32 %v8513_v63, %v17714_v7  ;;  %v17897_v63 = vpop.f32.mrf.mxu0 }
 0x3f1   : > { %v12894_v29 = vpop.f32.mrf.mxu1  ;;  %18505 = vst [vmem:[#allocation4_spill] sm:$0xff] %v17897_v63 }
 0x3f2   : > { %18498 = vst [vmem:[#allocation59_spill] sm:$0xff] %v17879_v47  ;;  %v17884_v59 = vadd.f32 %v12894_v29, %v17722_v8 }
 0x3f3   : > { %v8516_v15 = vpop.f32.mrf.mxu1 }
 0x3f4   : > { %18500 = vst [vmem:[#allocation60_spill] sm:$0xff] %v17884_v59  ;;  %v17887_v37 = vadd.f32 %v8516_v15, %v17735_v2  ;;  %v17905_v15 = vpop.f32.mrf.mxu0 }
 0x3f5   : > { %v12897_v50 = vpop.f32.mrf.mxu1  ;;  %18508 = vst [vmem:[#allocation33_spill] sm:$0xff] %v17905_v15 }
 0x3f6   : > { %18501 = vst [vmem:[#allocation58_spill] sm:$0xff] %v17887_v37  ;;  %v17892_v32 = vadd.f32 %v12897_v50, %v17741_v42 }
 0x3f7   : > { %v8529_v18 = vpop.f32.mrf.mxu1 }
 0x3f8   : > { %18503 = vst [vmem:[#allocation63_spill] sm:$0xff] %v17892_v32  ;;  %v17895_v7 = vadd.f32 %v8529_v18, %v17747_v20  ;;  %v17913_v18 = vpop.f32.mrf.mxu0 }
 0x3f9   : > { %v12898_v49 = vpop.f32.mrf.mxu1  ;;  %18511 = vst [vmem:[#allocation15_spill] sm:$0xff] %v17913_v18 }
 0x3fa   : > { %18504 = vst [vmem:[#allocation64_spill] sm:$0xff] %v17895_v7  ;;  %v17900_v8 = vadd.f32 %v12898_v49, %v17753_v52 }
 0x3fb   : > { %v8532_v29 = vpop.f32.mrf.mxu1 }
 0x3fc   : > { %18506 = vst [vmem:[#allocation23_spill] sm:$0xff] %v17900_v8  ;;  %v17903_v2 = vadd.f32 %v8532_v29, %v17759_v57  ;;  %v13017_v29 = vpop.f32.mrf.mxu0 }
 0x3fd   : > { %v12901_v41 = vpop.f32.mrf.mxu1 }
 0x3fe   : > { %18507 = vst [vmem:[#allocation3_spill] sm:$0xff] %v17903_v2  ;;  %v17908_v42 = vadd.f32 %v12901_v41, %v17765_v46  ;;  %v10071_v8 = vpop.f32.mrf.mxu0 }
 0x3ff   : > { %v8545_v50 = vpop.f32.mrf.mxu1 }
 0x400   : > { %18509 = vst [vmem:[#allocation5_spill] sm:$0xff] %v17908_v42  ;;  %v17911_v20 = vadd.f32 %v8545_v50, %v17771_v40  ;;  %v13018_v42 = vpop.f32.mrf.mxu0 }
 0x401   : > { %v12902_v63 = vpop.f32.mrf.mxu1 }
 0x402   : > { %18510 = vst [vmem:[#allocation28_spill] sm:$0xff] %v17911_v20  ;;  %v17916_v52 = vadd.f32 %v12902_v63, %v17777_v38  ;;  %v17921_v50 = vpop.f32.mrf.mxu0 }
 0x403   : > { %v8548_v49 = vpop.f32.mrf.mxu1 }
 0x404   : > { %18512 = vst [vmem:[#allocation12_spill] sm:$0xff] %v17916_v52  ;;  %v17919_v57 = vadd.f32 %v8548_v49, %v17784_v4  ;;  %v17927_v38 = vpop.f32.mrf.mxu0 }
 0x405   : > { %v12969_v15 = vpop.f32.mrf.mxu1 }
 0x406   : > { %18513 = vst [vmem:[#allocation9_spill] sm:$0xff] %v17919_v57  ;;  %v17933_v49 = vpop.f32.mrf.mxu0 }
 0x407   : > { %v9317_v2 = vpop.f32.mrf.mxu1 }
 0x408   : > { %v17939_v7 = vpop.f32.mrf.mxu0 }
 0x409   : > { %v12970_v46 = vpop.f32.mrf.mxu1 }
 0x40a   : > { %v17945_v59 = vpop.f32.mrf.mxu0 }
 0x40b   : > { %v9320_v41 = vpop.f32.mrf.mxu1 }
 0x40d   : > { %v12973_v21 = vpop.f32.mrf.mxu1  ;;  %v17951_v17 = vpop.f32.mrf.mxu0 }
 0x40f   : > { %v9333_v40 = vpop.f32.mrf.mxu1  ;;  %v17957_v16 = vpop.f32.mrf.mxu0 }
 0x411   : > { %v17923_v18 = vpop.f32.mrf.mxu1  ;;  %v17963_v19 = vpop.f32.mrf.mxu0 }
 0x413   : > { %v17925_v20 = vpop.f32.mrf.mxu1 }
 0x415   : > { %v17929_v63 = vpop.f32.mrf.mxu1 }
 0x417   : > { %v17931_v4 = vpop.f32.mrf.mxu1 }
 0x419   : > { %v17935_v57 = vpop.f32.mrf.mxu1 }
 0x41b   : > { %v17937_v52 = vpop.f32.mrf.mxu1 }
 0x41d   : > { %v17941_v32 = vpop.f32.mrf.mxu1 }
 0x41f   : > { %v17943_v37 = vpop.f32.mrf.mxu1 }
 0x421   : > { %v17947_v47 = vpop.f32.mrf.mxu1 }
 0x422   : > { %18514 = vst [vmem:[#allocation10_spill] sm:$0xff] %v17947_v47  ;;  %v17969_v47 = vpop.f32.mrf.mxu0 }
 0x423   : > { %v17949_v31 = vpop.f32.mrf.mxu1 }
 0x424   : > { %18515 = vst [vmem:[#allocation8_spill] sm:$0xff] %v17949_v31 }
 0x425   : > { %v17953_v35 = vpop.f32.mrf.mxu1 }
 0x426   : > { %18516 = vst [vmem:[#allocation21_spill] sm:$0xff] %v17953_v35  ;;  %v17975_v35 = vpop.f32.mrf.mxu0 }
 0x427   : > { %v17955_v55 = vpop.f32.mrf.mxu1  ;;  %18524 = vst [vmem:[#allocation6_spill] sm:$0xff] %v17975_v35 }
 0x428   : > { %18517 = vst [vmem:[#allocation13_spill] sm:$0xff] %v17955_v55 }
 0x429   : > { %v17959_v44 = vpop.f32.mrf.mxu1 }
 0x42a   : > { %18518 = vst [vmem:[#allocation17_spill] sm:$0xff] %v17959_v44  ;;  %v17981_v44 = vpop.f32.mrf.mxu0 }
 0x42b   : > { %v17961_v45 = vpop.f32.mrf.mxu1  ;;  %18527 = vst [vmem:[#allocation18_spill] sm:$0xff] %v17981_v44 }
 0x42c   : > { %18519 = vst [vmem:[#allocation25_spill] sm:$0xff] %v17961_v45 }
 0x42d   : > { %v17965_v58 = vpop.f32.mrf.mxu1 }
 0x42e   : > { %18520 = vst [vmem:[#allocation24_spill] sm:$0xff] %v17965_v58  ;;  %v17987_v58 = vpop.f32.mrf.mxu0 }
 0x42f   : > { %v17967_v43 = vpop.f32.mrf.mxu1  ;;  %18530 = vst [vmem:[#allocation19_spill] sm:$0xff] %v17987_v58 }
 0x430   : > { %18521 = vst [vmem:[#allocation29_spill] sm:$0xff] %v17967_v43 }
 0x431   : > { %v17971_v31 = vpop.f32.mrf.mxu1 }
 0x432   : > { %18522 = vst [vmem:[#allocation26_spill] sm:$0xff] %v17971_v31  ;;  %v9060_v31 = vadd.f32 %v17709_v13, %v17782_v33  ;;  %v9059_v13 = vadd.f32 %v17737_v51, %v17799_v25  ;;  %v9062_v51 = vadd.f32 %v17749_v12, %v17809_v3 }
 0x433   : > { %v17973_v14 = vpop.f32.mrf.mxu1 }
 0x434   : > { %18523 = vst [vmem:[#allocation30_spill] sm:$0xff] %v17973_v14  ;;  %v9446_v35 = vadd.f32 %v12969_v15, %v9060_v31  ;;  %v9064_v31 = vadd.f32 %v17743_v61, %v17804_v22  ;;  %v9448_v15 = vadd.f32 %v9333_v40, %v9062_v51  ;;  %v9069_v51 = vadd.f32 %v17779_v24, %v17834_v10 }
 0x435   : > { %v17977_v55 = vpop.f32.mrf.mxu1 }
 0x436   : > { %18525 = vst [vmem:[#allocation32_spill] sm:$0xff] %v17977_v55  ;;  %v9058_v55 = vadd.f32 %v17718_v11, %v17789_v39  ;;  %v10200_v33 = vadd.f32 %v13017_v29, %v9446_v35  ;;  %v9065_v29 = vadd.f32 %v17755_v54, %v17814_v48  ;;  %v9063_v54 = vadd.f32 %v17761_v6, %v17819_v60 }
 0x437   : > { %v17979_v34 = vpop.f32.mrf.mxu1 }
 0x438   : > { %18526 = vst [vmem:[#allocation7_spill] sm:$0xff] %v17979_v34  ;;  %v17997_v34 = vpop.f32.mrf.mxu0  ;;  %v9449_v6 = vadd.f32 %v17925_v20, %v9063_v54 }
 0x439   : > { %v17983_v45 = vpop.f32.mrf.mxu1 }
 0x43a   : > { %18528 = vst [vmem:[#allocation20_spill] sm:$0xff] %v17983_v45  ;;  %v9444_v45 = vadd.f32 %v9317_v2, %v9058_v55  ;;  %v18009_v11 = vpop.f32.mrf.mxu0  ;;  %v18014_v55 = vld [vmem:[%s18210_s2 + $0x1] ss:$0 sm:$0xff] }
 0x43b   : > { %v17985_v56 = vpop.f32.mrf.mxu1 }
 0x43c   : > { %18529 = vst [vmem:[#allocation11_spill] sm:$0xff] %v17985_v56  ;;  %v9061_v56 = vadd.f32 %v17727_v27, %v17794_v26  ;;  %v9445_v27 = vadd.f32 %v9320_v41, %v9059_v13  ;;  %v10198_v2 = vadd.f32 %v10071_v8, %v9444_v45 }
 0x43d   : > { %v17989_v43 = vpop.f32.mrf.mxu1 }
 0x43e   : > { %18531 = vst [vmem:[#allocation16_spill] sm:$0xff] %v17989_v43  ;;  %v9447_v43 = vadd.f32 %v12970_v46, %v9061_v56  ;;  %v9450_v56 = vadd.f32 %v12973_v21, %v9064_v31  ;;  %v18021_v46 = vpop.f32.mrf.mxu0 }
 0x43f   : > { %v17993_v14 = vpop.f32.mrf.mxu1 }
 0x440   : > { %v10201_v22 = vadd.f32 %v13018_v42, %v9447_v43  ;;  %v10199_v43 = vadd.f32 %v17921_v50, %v9445_v27  ;;  %v10204_v8 = vadd.f32 %v17927_v38, %v9450_v56  ;;  %v9451_v42 = vadd.f32 %v17923_v18, %v9065_v29  ;;  %v18040_v31 = vpop.f32.mrf.mxu0 }
 0x441   : > { %v17999_v44 = vpop.f32.mrf.mxu1 }
 0x442   : > { %v10205_v20 = vadd.f32 %v17939_v7, %v9451_v42  ;;  %v18533_v42 = vld [vmem:[#allocation36_spill] sm:$0xff] }
 0x443   : > { %v18003_v58 = vpop.f32.mrf.mxu1 }
 0x445   : > { %v13065_v39 = vpop.f32.mrf.mxu1 }
 0x446   : > { %v10698_v26 = vadd.f32 %v13065_v39, %v10200_v33  ;;  %v9068_v33 = vadd.f32 %v17767_v30, %v17824_v9  ;;  %v10202_v39 = vadd.f32 %v17933_v49, %v9448_v15  ;;  %v9455_v15 = vadd.f32 %v17935_v57, %v9069_v51 }
 0x447   : > { %v10569_v25 = vpop.f32.mrf.mxu1 }
 0x448   : > { %v10738_v35 = vadd.f32 %v18014_v55, %v10698_v26  ;;  %v10696_v61 = vadd.f32 %v10569_v25, %v10198_v2  ;;  %v9454_v27 = vadd.f32 %v17929_v63, %v9068_v33  ;;  %v9066_v26 = vadd.f32 %v17773_v0, %v17829_v5  ;;  %v18055_v25 = vpop.f32.mrf.mxu0 }
 0x449   : > { %v13066_v21 = vpop.f32.mrf.mxu1 }
 0x44a   : > { %v10770_v12 = vmax.f32 %v10738_v35, 0.0  ;;  %v10736_v3 = vadd.f32 %v18014_v55, %v10696_v61  ;;  %v10699_v45 = vadd.f32 %v13066_v21, %v10201_v22  ;;  %v9452_v56 = vadd.f32 %v17931_v4, %v9066_v26 }
 0x44b   : > { %v10572_v48 = vpop.f32.mrf.mxu1  ;;  %v10203_v61 = vadd.f32 %v17945_v59, %v9449_v6  ;;  %v9067_v22 = vadd.f32 %v17786_v36, %v17839_v53  ;;  %v10208_v4 = vadd.f32 %v17951_v17, %v9454_v27  ;;  %v9072_v21 = vadd.f32 %v17791_v1, %v17844_v62 }
 0x44c   : > { %10802 = vst [vmem:[%s18028_s26 + $0x10] sm:$0xff] %v10770_v12  ;;  %v10768_v41 = vmax.f32 %v10736_v3, 0.0  ;;  %v10739_v40 = vadd.f32 %v18014_v55, %v10699_v45  ;;  %v10697_v13 = vadd.f32 %v10572_v48, %v10199_v43  ;;  %v18068_v12 = vpop.f32.mrf.mxu0  ;;  %v10206_v3 = vadd.f32 %v17957_v16, %v9452_v56  ;;  %v18540_v56 = vld [vmem:[#allocation18_spill] sm:$0xff] }
 0x44d   : > { %v13069_v50 = vpop.f32.mrf.mxu1  ;;  %v9453_v36 = vadd.f32 %v17937_v52, %v9067_v22  ;;  %v9458_v45 = vadd.f32 %v17941_v32, %v9072_v21  ;;  %v9070_v43 = vadd.f32 %v17796_v23, %v17847_v28  ;;  %v10209_v52 = vadd.f32 %v17963_v19, %v9455_v15  ;;  %v18542_v22 = vld [vmem:[#allocation21_spill] sm:$0xff]  ;;  %v18544_v15 = vld [vmem:[#allocation55_spill] sm:$0xff] }
 0x44e   : > { %10800 = vst [vmem:[%s18028_s26] sm:$0xff] %v10768_v41  ;;  %v10771_v60 = vmax.f32 %v10739_v40, 0.0  ;;  %v10737_v18 = vadd.f32 %v18014_v55, %v10697_v13  ;;  %v10702_v38 = vadd.f32 %v13069_v50, %v10204_v8  ;;  %v18532_v8 = vld [vmem:[#allocation51_spill] sm:$0xff]  ;;  %v18083_v40 = vpop.f32.mrf.mxu0  ;;  %v18534_v50 = vld [vmem:[#allocation46_spill] sm:$0xff] }
 0x44f   : > { %v10585_v2 = vpop.f32.mrf.mxu1  ;;  %v9456_v48 = vadd.f32 %v17943_v37, %v9070_v43  ;;  %v9073_v41 = vadd.f32 %v18533_v42, %v18532_v8  ;;  %v10207_v33 = vadd.f32 %v17969_v47, %v9453_v36  ;;  %v18549_v8 = vld [vmem:[#allocation50_spill] sm:$0xff]  ;;  %v18550_v42 = vld [vmem:[#allocation39_spill] sm:$0xff] }
 0x450   : > { %10803 = vst [vmem:[%s18028_s26 + $0x18] sm:$0xff] %v10771_v60  ;;  %v10769_v30 = vmax.f32 %v10737_v18, 0.0  ;;  %v10742_v9 = vadd.f32 %v18014_v55, %v10702_v38  ;;  %v10700_v49 = vadd.f32 %v10585_v2, %v10202_v39  ;;  %v18535_v39 = vld [vmem:[#allocation37_spill] sm:$0xff]  ;;  %v18536_v60 = vld [vmem:[#allocation6_spill] sm:$0xff] }
 0x451   : > { %v13070_v63 = vpop.f32.mrf.mxu1  ;;  %v9071_v6 = vadd.f32 %v18535_v39, %v18534_v50  ;;  %v10212_v37 = vadd.f32 %v18536_v60, %v9458_v45  ;;  %v18537_v18 = vld [vmem:[#allocation10_spill] sm:$0xff]  ;;  %v10210_v51 = vadd.f32 %v18540_v56, %v9456_v48  ;;  %v18548_v45 = vld [vmem:[#allocation45_spill] sm:$0xff]  ;;  %v18553_v60 = vld [vmem:[#allocation47_spill] sm:$0xff] }
 0x452   : > { %10801 = vst [vmem:[%s18028_s26 + $0x8] sm:$0xff] %v10769_v30  ;;  %v10774_v35 = vmax.f32 %v10742_v9, 0.0  ;;  %v10740_v0 = vadd.f32 %v18014_v55, %v10700_v49  ;;  %v10703_v5 = vadd.f32 %v13070_v63, %v10205_v20  ;;  %v9459_v38 = vadd.f32 %v18537_v18, %v9073_v41  ;;  %v18538_v30 = vld [vmem:[#allocation52_spill] sm:$0xff]  ;;  %v18539_v9 = vld [vmem:[#allocation38_spill] sm:$0xff]  ;;  %v18096_v20 = vpop.f32.mrf.mxu0 }
 0x453   : > { %v10588_v7 = vpop.f32.mrf.mxu1  ;;  %v9076_v49 = vadd.f32 %v18539_v9, %v18538_v30  ;;  %v18541_v63 = vld [vmem:[#allocation8_spill] sm:$0xff]  ;;  %v9075_v41 = vadd.f32 %v18550_v42, %v18549_v8 }
 0x454   : > { %10806 = vst [vmem:[%s18028_s26 + $0x30] sm:$0xff] %v10774_v35  ;;  %v10772_v24 = vmax.f32 %v10740_v0, 0.0  ;;  %v10743_v10 = vadd.f32 %v18014_v55, %v10703_v5  ;;  %v10701_v29 = vadd.f32 %v10588_v7, %v10203_v61  ;;  %v9457_v35 = vadd.f32 %v18541_v63, %v9071_v6  ;;  %v18555_v30 = vld [vmem:[#allocation24_spill] sm:$0xff] }
 0x455   : > { %v13073_v59 = vpop.f32.mrf.mxu1  ;;  %v9462_v7 = vadd.f32 %v18542_v22, %v9076_v49  ;;  %v18556_v49 = vld [vmem:[#allocation59_spill] sm:$0xff] }
 0x456   : > { %10804 = vst [vmem:[%s18028_s26 + $0x20] sm:$0xff] %v10772_v24  ;;  %v10775_v17 = vmax.f32 %v10743_v10, 0.0  ;;  %v10741_v53 = vadd.f32 %v18014_v55, %v10701_v29  ;;  %v10706_v57 = vadd.f32 %v13073_v59, %v10208_v4  ;;  %v18543_v4 = vld [vmem:[#allocation48_spill] sm:$0xff]  ;;  %v10211_v48 = vadd.f32 %v17997_v34, %v9457_v35 }
 0x457   : > { %v10601_v54 = vpop.f32.mrf.mxu1  ;;  %v9074_v24 = vadd.f32 %v18544_v15, %v18543_v4  ;;  %v18560_v4 = vld [vmem:[#allocation43_spill] sm:$0xff] }
 0x458   : > { %10807 = vst [vmem:[%s18028_s26 + $0x38] sm:$0xff] %v10775_v17  ;;  %v10773_v1 = vmax.f32 %v10741_v53, 0.0  ;;  %v10746_v62 = vadd.f32 %v18014_v55, %v10706_v57  ;;  %v10704_v16 = vadd.f32 %v10601_v54, %v10206_v3  ;;  %v18545_v3 = vld [vmem:[#allocation19_spill] sm:$0xff]  ;;  %v18546_v17 = vld [vmem:[#allocation13_spill] sm:$0xff]  ;;  %v18111_v54 = vpop.f32.mrf.mxu0 }
 0x459   : > { %v13074_v32 = vpop.f32.mrf.mxu1  ;;  %v10213_v36 = vadd.f32 %v18545_v3, %v9459_v38  ;;  %v9460_v53 = vadd.f32 %v18546_v17, %v9074_v24  ;;  %v18547_v57 = vld [vmem:[#allocation49_spill] sm:$0xff]  ;;  %v18561_v3 = vld [vmem:[#allocation58_spill] sm:$0xff] }
 0x45a   : > { %10805 = vst [vmem:[%s18028_s26 + $0x28] sm:$0xff] %v10773_v1  ;;  %v10778_v13 = vmax.f32 %v10746_v62, 0.0  ;;  %v10744_v23 = vadd.f32 %v18014_v55, %v10704_v16  ;;  %v10707_v28 = vadd.f32 %v13074_v32, %v10209_v52  ;;  %v9077_v43 = vadd.f32 %v18548_v45, %v18547_v57  ;;  %v18122_v6 = vpop.f32.mrf.mxu0  ;;  %v18554_v38 = vld [vmem:[#allocation25_spill] sm:$0xff]  ;;  %v18563_v57 = vld [vmem:[#allocation26_spill] sm:$0xff] }
 0x45b   : > { %v10604_v19 = vpop.f32.mrf.mxu1  ;;  %v10214_v18 = vadd.f32 %v18021_v46, %v9460_v53 }
 0x45c   : > { %10810 = vst [vmem:[%s18028_s26 + $0x50] sm:$0xff] %v10778_v13  ;;  %v10776_v27 = vmax.f32 %v10744_v23, 0.0  ;;  %v10747_v26 = vadd.f32 %v18014_v55, %v10707_v28  ;;  %v10705_v2 = vadd.f32 %v10604_v19, %v10207_v33  ;;  %v10216_v13 = vadd.f32 %v18009_v11, %v9462_v7  ;;  %v18551_v23 = vld [vmem:[#allocation17_spill] sm:$0xff]  ;;  %v18559_v7 = vld [vmem:[#allocation60_spill] sm:$0xff] }
 0x45d   : > { %v13077_v47 = vpop.f32.mrf.mxu1  ;;  %v9463_v28 = vadd.f32 %v18551_v23, %v9077_v43  ;;  %v18552_v19 = vld [vmem:[#allocation53_spill] sm:$0xff]  ;;  %v9081_v15 = vadd.f32 %v18560_v4, %v18559_v7 }
 0x45e   : > { %10808 = vst [vmem:[%s18028_s26 + $0x40] sm:$0xff] %v10776_v27  ;;  %v10779_v0 = vmax.f32 %v10747_v26, 0.0  ;;  %v10745_v5 = vadd.f32 %v18014_v55, %v10705_v2  ;;  %v10710_v61 = vadd.f32 %v13077_v47, %v10212_v37  ;;  %v9080_v37 = vadd.f32 %v18553_v60, %v18552_v19  ;;  %v18557_v47 = vld [vmem:[#allocation41_spill] sm:$0xff] }
 0x45f   : > { %v10617_v10 = vpop.f32.mrf.mxu1  ;;  %v9461_v27 = vadd.f32 %v18554_v38, %v9075_v41  ;;  %v9078_v56 = vadd.f32 %v18557_v47, %v18556_v49  ;;  %v9467_v45 = vadd.f32 %v18563_v57, %v9081_v15  ;;  %v18566_v41 = vld [vmem:[#allocation30_spill] sm:$0xff] }
 0x460   : > { %10811 = vst [vmem:[%s18028_s26 + $0x58] sm:$0xff] %v10779_v0  ;;  %v10777_v29 = vmax.f32 %v10745_v5, 0.0  ;;  %v10750_v21 = vadd.f32 %v18014_v55, %v10710_v61  ;;  %v10708_v59 = vadd.f32 %v10617_v10, %v10210_v51  ;;  %v9466_v9 = vadd.f32 %v18555_v30, %v9080_v37  ;;  %v10167_v5 = vpop.f32.mrf.mxu0  ;;  %v18558_v61 = vld [vmem:[#allocation29_spill] sm:$0xff] }
 0x461   : > { %v13078_v1 = vpop.f32.mrf.mxu1  ;;  %v10217_v0 = vadd.f32 %v18040_v31, %v9463_v28  ;;  %v9464_v22 = vadd.f32 %v18558_v61, %v9078_v56  ;;  %v18567_v28 = vld [vmem:[#allocation32_spill] sm:$0xff] }
 0x462   : > { %10809 = vst [vmem:[%s18028_s26 + $0x48] sm:$0xff] %v10777_v29  ;;  %v10782_v62 = vmax.f32 %v10750_v21, 0.0  ;;  %v10748_v16 = vadd.f32 %v18014_v55, %v10708_v59  ;;  %v10711_v52 = vadd.f32 %v13078_v1, %v10213_v36  ;;  %v10215_v59 = vadd.f32 %v18055_v25, %v9461_v27  ;;  %v18562_v36 = vld [vmem:[#allocation44_spill] sm:$0xff]  ;;  %v18570_v27 = vld [vmem:[#allocation7_spill] sm:$0xff] }
 0x463   : > { %v10620_v32 = vpop.f32.mrf.mxu1  ;;  %v9079_v17 = vadd.f32 %v18562_v36, %v18561_v3  ;;  %v10220_v31 = vadd.f32 %v18068_v12, %v9466_v9  ;;  %v10218_v25 = vadd.f32 %v18083_v40, %v9464_v22  ;;  %v10221_v40 = vadd.f32 %v18096_v20, %v9467_v45  ;;  %v18575_v22 = vld [vmem:[#allocation20_spill] sm:$0xff]  ;;  %v18578_v3 = vld [vmem:[#allocation11_spill] sm:$0xff] }
 0x464   : > { %10814 = vst [vmem:[%s18028_s26 + $0x70] sm:$0xff] %v10782_v62  ;;  %v10780_v33 = vmax.f32 %v10748_v16, 0.0  ;;  %v10751_v50 = vadd.f32 %v18014_v55, %v10711_v52  ;;  %v10709_v39 = vadd.f32 %v10620_v32, %v10211_v48  ;;  %v13042_v16 = vpop.f32.mrf.mxu0  ;;  %v18564_v52 = vld [vmem:[#allocation63_spill] sm:$0xff]  ;;  %v18565_v48 = vld [vmem:[#allocation62_spill] sm:$0xff]  ;;  %v18580_v45 = vld [vmem:[#allocation28_spill] sm:$0xff] }
 0x465   : > { %v13081_v34 = vpop.f32.mrf.mxu1  ;;  %v9084_v8 = vadd.f32 %v18565_v48, %v18564_v52  ;;  %v9465_v32 = vadd.f32 %v18566_v41, %v9079_v17  ;;  %v18582_v41 = vld [vmem:[#allocation12_spill] sm:$0xff] }
 0x466   : > { %10812 = vst [vmem:[%s18028_s26 + $0x60] sm:$0xff] %v10780_v33  ;;  %v10783_v11 = vmax.f32 %v10751_v50, 0.0  ;;  %v10749_v26 = vadd.f32 %v18014_v55, %v10709_v39  ;;  %v10714_v2 = vadd.f32 %v13081_v34, %v10216_v13  ;;  %v18568_v50 = vld [vmem:[#allocation64_spill] sm:$0xff]  ;;  %v18569_v39 = vld [vmem:[#allocation54_spill] sm:$0xff]  ;;  %v10170_v38 = vpop.f32.mrf.mxu0 }
 0x467   : > { %v10633_v51 = vpop.f32.mrf.mxu1  ;;  %v9470_v33 = vadd.f32 %v18567_v28, %v9084_v8  ;;  %v9082_v19 = vadd.f32 %v18569_v39, %v18568_v50 }
 0x468   : > { %10815 = vst [vmem:[%s18028_s26 + $0x78] sm:$0xff] %v10783_v11  ;;  %v10781_v63 = vmax.f32 %v10749_v26, 0.0  ;;  %v10754_v35 = vadd.f32 %v18014_v55, %v10714_v2  ;;  %v10712_v46 = vadd.f32 %v10633_v51, %v10214_v18  ;;  %v18571_v26 = vld [vmem:[#allocation23_spill] sm:$0xff]  ;;  %v18572_v2 = vld [vmem:[#allocation57_spill] sm:$0xff]  ;;  %v10219_v51 = vadd.f32 %v18111_v54, %v9465_v32 }
 0x469   : > { %v13082_v24 = vpop.f32.mrf.mxu1  ;;  %v9468_v11 = vadd.f32 %v18570_v27, %v9082_v19  ;;  %v9085_v30 = vadd.f32 %v18572_v2, %v18571_v26  ;;  %v10224_v61 = vadd.f32 %v18122_v6, %v9470_v33  ;;  %v18583_v32 = vld [vmem:[#allocation33_spill] sm:$0xff] }
 0x46a   : > { %10813 = vst [vmem:[%s18028_s26 + $0x68] sm:$0xff] %v10781_v63  ;;  %v10786_v10 = vmax.f32 %v10754_v35, 0.0  ;;  %v10752_v29 = vadd.f32 %v18014_v55, %v10712_v46  ;;  %v10715_v21 = vadd.f32 %v13082_v24, %v10217_v0  ;;  %v18573_v63 = vld [vmem:[#allocation3_spill] sm:$0xff]  ;;  %v18574_v35 = vld [vmem:[#allocation56_spill] sm:$0xff]  ;;  %v13045_v0 = vpop.f32.mrf.mxu0  ;;  %v18584_v19 = vld [vmem:[#allocation9_spill] sm:$0xff] }
 0x46b   : > { %v10636_v53 = vpop.f32.mrf.mxu1  ;;  %v9083_v46 = vadd.f32 %v18574_v35, %v18573_v63  ;;  %v9471_v7 = vadd.f32 %v18575_v22, %v9085_v30  ;;  %v10222_v54 = vadd.f32 %v10167_v5, %v9468_v11 }
 0x46c   : > { %10818 = vst [vmem:[%s18028_s26 + $0x90] sm:$0xff] %v10786_v10  ;;  %v10784_v43 = vmax.f32 %v10752_v29, 0.0  ;;  %v10755_v1 = vadd.f32 %v18014_v55, %v10715_v21  ;;  %v10713_v62 = vadd.f32 %v10636_v53, %v10215_v59  ;;  %v18576_v10 = vld [vmem:[#allocation5_spill] sm:$0xff] }
 0x46d   : > { %v13085_v42 = vpop.f32.mrf.mxu1  ;;  %v18577_v29 = vld [vmem:[#allocation61_spill] sm:$0xff]  ;;  %v9469_v36 = vadd.f32 %v18578_v3, %v9083_v46 }
 0x46e   : > { %10816 = vst [vmem:[%s18028_s26 + $0x80] sm:$0xff] %v10784_v43  ;;  %v10787_v12 = vmax.f32 %v10755_v1, 0.0  ;;  %v10753_v13 = vadd.f32 %v18014_v55, %v10713_v62  ;;  %v10718_v23 = vadd.f32 %v13085_v42, %v10220_v31  ;;  %v9088_v21 = vadd.f32 %v18577_v29, %v18576_v10  ;;  %v18579_v31 = vld [vmem:[#allocation16_spill] sm:$0xff]  ;;  %v10183_v62 = vpop.f32.mrf.mxu0 }
 0x46f   : > { %v10649_v60 = vpop.f32.mrf.mxu1  ;;  %v18581_v43 = vld [vmem:[#allocation4_spill] sm:$0xff]  ;;  %v10225_v42 = vadd.f32 %v13042_v16, %v9471_v7  ;;  %v10223_v50 = vadd.f32 %v10170_v38, %v9469_v36 }
 0x470   : > { %10819 = vst [vmem:[%s18028_s26 + $0x98] sm:$0xff] %v10787_v12  ;;  %v10785_v37 = vmax.f32 %v10753_v13, 0.0  ;;  %v10758_v34 = vadd.f32 %v18014_v55, %v10718_v23  ;;  %v10716_v18 = vadd.f32 %v10649_v60, %v10218_v25  ;;  %v9474_v57 = vadd.f32 %v18579_v31, %v9088_v21  ;;  %v18585_v60 = vld [vmem:[#allocation15_spill] sm:$0xff] }
 0x471   : > { %v13086_v9 = vpop.f32.mrf.mxu1  ;;  %v9086_v1 = vadd.f32 %v18581_v43, %v18580_v45  ;;  %v9089_v12 = vadd.f32 %v18583_v32, %v18582_v41 }
 0x472   : > { %10817 = vst [vmem:[%s18028_s26 + $0x88] sm:$0xff] %v10785_v37  ;;  %v10790_v49 = vmax.f32 %v10758_v34, 0.0  ;;  %v10756_v47 = vadd.f32 %v18014_v55, %v10716_v18  ;;  %v10719_v56 = vadd.f32 %v13086_v9, %v10221_v40  ;;  %v10228_v39 = vadd.f32 %v13045_v0, %v9474_v57  ;;  %v13046_v34 = vpop.f32.mrf.mxu0 }
 0x473   : > { %v10652_v20 = vpop.f32.mrf.mxu1  ;;  %v9472_v25 = vadd.f32 %v17993_v14, %v9086_v1  ;;  %v9087_v37 = vadd.f32 %v18585_v60, %v18584_v19  ;;  %v9475_v14 = vadd.f32 %v17999_v44, %v9089_v12 }
 0x474   : > { %10822 = vst [vmem:[%s18028_s26 + $0xb0] sm:$0xff] %v10790_v49  ;;  %v10788_v4 = vmax.f32 %v10756_v47, 0.0  ;;  %v10759_v15 = vadd.f32 %v18014_v55, %v10719_v56  ;;  %v10717_v24 = vadd.f32 %v10652_v20, %v10219_v51  ;;  %v10186_v49 = vpop.f32.mrf.mxu0 }
 0x475   : > { %v13089_v59 = vpop.f32.mrf.mxu1  ;;  %v10226_v11 = vadd.f32 %v10183_v62, %v9472_v25  ;;  %v9473_v2 = vadd.f32 %v18003_v58, %v9087_v37  ;;  %v10229_v56 = vadd.f32 %v13046_v34, %v9475_v14 }
 0x476   : > { %10820 = vst [vmem:[%s18028_s26 + $0xa0] sm:$0xff] %v10788_v4  ;;  %v10791_v17 = vmax.f32 %v10759_v15, 0.0  ;;  %v10757_v6 = vadd.f32 %v18014_v55, %v10717_v24  ;;  %v10722_v53 = vadd.f32 %v13089_v59, %v10224_v61 }
 0x477   : > { %v10665_v52 = vpop.f32.mrf.mxu1  ;;  %v10227_v46 = vadd.f32 %v10186_v49, %v9473_v2 }
 0x478   : > { %10823 = vst [vmem:[%s18028_s26 + $0xb8] sm:$0xff] %v10791_v17  ;;  %v10789_v48 = vmax.f32 %v10757_v6, 0.0  ;;  %v10762_v8 = vadd.f32 %v18014_v55, %v10722_v53  ;;  %v10720_v5 = vadd.f32 %v10665_v52, %v10222_v54 }
 0x479   : > { %v13090_v13 = vpop.f32.mrf.mxu1 }
 0x47a   : > { %10821 = vst [vmem:[%s18028_s26 + $0xa8] sm:$0xff] %v10789_v48  ;;  %v10794_v23 = vmax.f32 %v10762_v8, 0.0  ;;  %v10760_v28 = vadd.f32 %v18014_v55, %v10720_v5  ;;  %v10723_v33 = vadd.f32 %v13090_v13, %v10225_v42 }
 0x47b   : > { %v10668_v18 = vpop.f32.mrf.mxu1 }
 0x47c   : > { %10826 = vst [vmem:[%s18028_s26 + $0xd0] sm:$0xff] %v10794_v23  ;;  %v10792_v16 = vmax.f32 %v10760_v28, 0.0  ;;  %v10763_v40 = vadd.f32 %v18014_v55, %v10723_v33  ;;  %v10721_v27 = vadd.f32 %v10668_v18, %v10223_v50 }
 0x47d   : > { %v13093_v26 = vpop.f32.mrf.mxu1 }
 0x47e   : > { %10824 = vst [vmem:[%s18028_s26 + $0xc0] sm:$0xff] %v10792_v16  ;;  %v10795_v38 = vmax.f32 %v10763_v40, 0.0  ;;  %v10761_v30 = vadd.f32 %v18014_v55, %v10721_v27  ;;  %v10726_v9 = vadd.f32 %v13093_v26, %v10228_v39 }
 0x47f   : > { %v10681_v47 = vpop.f32.mrf.mxu1 }
 0x480   : > { %10827 = vst [vmem:[%s18028_s26 + $0xd8] sm:$0xff] %v10795_v38  ;;  %v10793_v44 = vmax.f32 %v10761_v30, 0.0  ;;  %v10766_v51 = vadd.f32 %v18014_v55, %v10726_v9  ;;  %v10724_v63 = vadd.f32 %v10681_v47, %v10226_v11 }
 0x481   : > { %v13094_v35 = vpop.f32.mrf.mxu1 }
 0x482   : > { %10825 = vst [vmem:[%s18028_s26 + $0xc8] sm:$0xff] %v10793_v44  ;;  %v10798_v58 = vmax.f32 %v10766_v51, 0.0  ;;  %v10764_v0 = vadd.f32 %v18014_v55, %v10724_v63  ;;  %v10727_v20 = vadd.f32 %v13094_v35, %v10229_v56 }
 0x483   : > { %v10684_v61 = vpop.f32.mrf.mxu1 }
 0x484   : > { %10830 = vst [vmem:[%s18028_s26 + $0xf0] sm:$0xff] %v10798_v58  ;;  %v10796_v22 = vmax.f32 %v10764_v0, 0.0  ;;  %v10767_v7 = vadd.f32 %v18014_v55, %v10727_v20  ;;  %v10725_v4 = vadd.f32 %v10684_v61, %v10227_v46 }
 0x486   : > { %10828 = vst [vmem:[%s18028_s26 + $0xe0] sm:$0xff] %v10796_v22  ;;  %v10799_v15 = vmax.f32 %v10767_v7, 0.0  ;;  %v10765_v24 = vadd.f32 %v18014_v55, %v10725_v4 }
 0x488   : > { %10831 = vst [vmem:[%s18028_s26 + $0xf8] sm:$0xff] %v10799_v15  ;;  %v10797_v10 = vmax.f32 %v10765_v24, 0.0 }
 0x48a   : > { %10829 = vst [vmem:[%s18028_s26 + $0xe8] sm:$0xff] %v10797_v10 }
 0x48b PF: > { %s13_s12 = sadd.s32 1, %s13373_s12  }
 0x48c   : > { %p10_p4 = scmp.ge.s32.totalorder %s13_s12, 4  }
 0x48e   :  { %12 = sbr.rel (!%p10_p4) target bundleno = 1 (0x1), region = 83 }

</bundles_post_ra>
